<compile_context>
chip_gen: v7x
topology: tpu7x:2x2x1
jax: 0.10.0
libtpu: 0.0.40
codegen_flags: <defaults>
</compile_context>

<pallas_src>
import functools
import math

import jax
import jax.numpy as jnp
from jax.experimental import pallas as pl
from jax.experimental.pallas import tpu as pltpu

# ----------------------------- configuration (small synthetic CLIP) ------------------
B = 2              # batch
T = 2              # segments per sample (cfg.DATALOADER.SEGMENTS -> True)
C = 3              # image channels
IMG_SIZE = 16
PATCH = 8          # -> 2x2 = 4 patches, +1 class token => visual seq len 5
D_IMG = 32         # visual transformer width
D_TEXT = 32        # text transformer width
EMBED_DIM = 32     # shared CLIP embedding dim
N_HEADS = 4
N_LAYERS = 2
CTX_LEN = 8        # tokenized prompt length
VOCAB = 64
N_CLASSES = 3
SEGMENTS = True

# TODO(synk): original clip_model.dtype is fp16 on GPU; here the residual stream is fp32 with
# bf16 MXU operands + fp32 accumulation, which is the TPU-native equivalent.


# ----------------------------- in-kernel helpers --------------------------------------


def _bf16(x):
    return x.astype(jnp.bfloat16)


def _ln(x, g, b, eps=1e-5):
    # LayerNorm over the last axis, fp32 math (VPU + EUP rsqrt).
    x = x.astype(jnp.float32)
    mu = jnp.mean(x, axis=-1, keepdims=True)
    var = jnp.mean((x - mu) ** 2, axis=-1, keepdims=True)
    return (x - mu) * jax.lax.rsqrt(var + eps) * g + b


def _residual_block(x, ln1g, ln1b, inw, inb, outw, outb,
                    ln2g, ln2b, fcw, fcb, pjw, pjb, *, n, s, n_heads, causal):
    """One CLIP ResidualAttentionBlock on a (n*s, d) fp32 residual stream (all in VMEM/vregs)."""
    d = x.shape[-1]
    dh = d // n_heads
    scale = 1.0 / math.sqrt(dh)

    # --- attention branch: LN1 -> QKV -> per-head SDPA -> out-proj (+bias), residual folded ---
    h = _ln(x, ln1g, ln1b)
    qkv = jnp.dot(_bf16(h), inw, preferred_element_type=jnp.float32) + inb     # (n*s, 3d)

    if causal:
        row = jax.lax.broadcasted_iota(jnp.int32, (n, s, s), 1)
        col = jax.lax.broadcasted_iota(jnp.int32, (n, s, s), 2)
        keep = col <= row                                    # hoisted out of the head loop

    attn = jnp.zeros((n * s, d), jnp.float32)
    for hd in range(n_heads):                                # static unroll; all in VMEM
        q = qkv[:, hd * dh:(hd + 1) * dh].reshape(n, s, dh)
        k = qkv[:, d + hd * dh: d + (hd + 1) * dh].reshape(n, s, dh)
        v = qkv[:, 2 * d + hd * dh: 2 * d + (hd + 1) * dh].reshape(n, s, dh)
        # contracting-dim einsum -> no explicit transpose of K
        sc = jnp.einsum('nqd,nkd->nqk', _bf16(q), _bf16(k),
                        preferred_element_type=jnp.float32) * scale
        if causal:
            sc = jnp.where(keep, sc, -1e30)
        sc = sc - jnp.max(sc, axis=-1, keepdims=True)        # softmax in fp32
        p = jnp.exp(sc)
        p = p * pl.reciprocal(jnp.sum(p, axis=-1, keepdims=True), approx=True)
        o = jnp.einsum('nqk,nkd->nqd', _bf16(p), _bf16(v),
                       preferred_element_type=jnp.float32)   # (n, s, dh)
        # concat-over-heads @ W_out  ==  sum_h (o_h @ W_out[h*dh:(h+1)*dh, :])
        attn = attn + jnp.dot(_bf16(o.reshape(n * s, dh)),
                              outw[hd * dh:(hd + 1) * dh, :],
                              preferred_element_type=jnp.float32)
    x = x + attn + outb                                      # residual add folded in

    # --- MLP branch: LN2 -> fc + QuickGELU -> proj (+bias), residual folded ---
    h = _ln(x, ln2g, ln2b)
    m = jnp.dot(_bf16(h), fcw, preferred_element_type=jnp.float32) + fcb
    m = m * jax.nn.sigmoid(1.702 * m)                        # QuickGELU, fp32 VPU/EUP
    m = jnp.dot(_bf16(m), pjw, preferred_element_type=jnp.float32) + pjb
    return x + m


# ----------------------------- Pallas kernels ------------------------------------------


def _image_tower_kernel(p_ref, convw_ref, cls_ref, pos_ref, preg_ref, preb_ref,
                        ln1g_ref, ln1b_ref, inw_ref, inb_ref, outw_ref, outb_ref,
                        ln2g_ref, ln2b_ref, fcw_ref, fcb_ref, pjw_ref, pjb_ref,
                        o_ref, *, n_heads):
    """Full visual tower: patch-embed + cls + pos + ln_pre at layer 0, then one block per
    grid step. o_ref has a constant block index, so it doubles as the VMEM-resident residual
    stream across layers."""
    n, s, d = o_ref.shape
    layer = pl.program_id(0)

    @pl.when(layer == 0)
    def _():
        npatch, cpp = p_ref.shape[1], p_ref.shape[2]
        patches = p_ref[...].astype(jnp.float32).reshape(n * npatch, cpp)
        xp = jnp.dot(_bf16(patches), convw_ref[...], preferred_element_type=jnp.float32)
        pos = pos_ref[...].astype(jnp.float32)               # (1 + npatch, d)
        xp = xp.reshape(n, npatch, d) + pos[1:][None]        # patch rows
        xc = cls_ref[...].astype(jnp.float32) + pos[0:1]     # (1, d) class row
        xc = jnp.broadcast_to(xc[None], (n, 1, d))
        g = preg_ref[...]
        b = preb_ref[...]
        # LayerNorm is row-wise: apply to class row and patch rows separately and write them
        # into the output block (avoids an in-kernel concatenate).
        o_ref[:, 0:1, :] = _ln(xc, g, b).astype(o_ref.dtype)
        o_ref[:, 1:, :] = _ln(xp, g, b).astype(o_ref.dtype)

    x = o_ref[...].astype(jnp.float32).reshape(n * s, d)
    y = _residual_block(
        x, ln1g_ref[0], ln1b_ref[0], inw_ref[0], inb_ref[0],
        outw_ref[0], outb_ref[0], ln2g_ref[0], ln2b_ref[0],
        fcw_ref[0], fcb_ref[0], pjw_ref[0], pjb_ref[0],
        n=n, s=s, n_heads=n_heads, causal=False)
    o_ref[...] = y.reshape(n, s, d).astype(o_ref.dtype)


def _text_tower_kernel(x_ref, pos_ref,
                       ln1g_ref, ln1b_ref, inw_ref, inb_ref, outw_ref, outb_ref,
                       ln2g_ref, ln2b_ref, fcw_ref, fcb_ref, pjw_ref, pjb_ref,
                       o_ref, *, n_heads):
    """Full text tower: pos-emb add at layer 0, then one causal block per grid step.
    (PyTorch's permute(1,0,2) is only for seq-first nn.MultiheadAttention; math identical.)"""
    n, s, d = o_ref.shape
    layer = pl.program_id(0)

    @pl.when(layer == 0)
    def _():
        o_ref[...] = (x_ref[...].astype(jnp.float32)
                      + pos_ref[...].astype(jnp.float32)[None]).astype(o_ref.dtype)

    x = o_ref[...].astype(jnp.float32).reshape(n * s, d)
    y = _residual_block(
        x, ln1g_ref[0], ln1b_ref[0], inw_ref[0], inb_ref[0],
        outw_ref[0], outb_ref[0], ln2g_ref[0], ln2b_ref[0],
        fcw_ref[0], fcb_ref[0], pjw_ref[0], pjb_ref[0],
        n=n, s=s, n_heads=n_heads, causal=True)
    o_ref[...] = y.reshape(n, s, d).astype(o_ref.dtype)


def _head_logits_kernel(icls_ref, vg_ref, vb_ref, vproj_ref,
                        teot_ref, tg_ref, tb_ref, tproj_ref, scale_ref, o_ref,
                        *, seg_b, seg_t):
    """ln_post+proj (image), ln_final+proj (text), segment mean, L2-normalize, logits."""
    # image features: ln_post(class token) @ visual_proj, then segment mean
    img = jnp.dot(_bf16(_ln(icls_ref[...], vg_ref[...], vb_ref[...])), vproj_ref[...],
                  preferred_element_type=jnp.float32)           # (b*t, E)
    if seg_t > 1:
        img = jnp.mean(img.reshape(seg_b, seg_t, img.shape[-1]), axis=1)   # (b, E)
    # text features: ln_final(EOT token) @ text_projection
    txt = jnp.dot(_bf16(_ln(teot_ref[...], tg_ref[...], tb_ref[...])), tproj_ref[...],
                  preferred_element_type=jnp.float32)           # (n_cls, E)
    # L2 normalize (EUP rsqrt), cosine-similarity logits scaled by exp(logit_scale)
    img = img * jax.lax.rsqrt(jnp.sum(img * img, axis=-1, keepdims=True))
    txt = txt * jax.lax.rsqrt(jnp.sum(txt * txt, axis=-1, keepdims=True))
    logits = jax.lax.dot_general(img, txt, (((1,), (1,)), ((), ())),
                                 preferred_element_type=jnp.float32)
    o_ref[...] = (jnp.exp(scale_ref[...]) * logits).astype(o_ref.dtype)


# ----------------------------- pallas_call wrappers ------------------------------------

_ARBITRARY = pltpu.CompilerParams(dimension_semantics=("arbitrary",))

_BLOCK_KEYS = ("ln1_g", "ln1_b", "in_w", "in_b", "out_w", "out_b",
               "ln2_g", "ln2_b", "fc_w", "fc_b", "proj_w", "proj_b")


def _stack_blocks(blocks):
    # Stack per-layer params along a leading layer axis -> (L, r, c); selected via index_map.
    return [jnp.stack([blk[k] for blk in blocks]) for k in _BLOCK_KEYS]


def _const_spec(a):
    # Full-array block with a constant index -> DMA'd once across the layer grid.
    nd = a.ndim
    return pl.BlockSpec(tuple(a.shape), lambda l, _nd=nd: (0,) * _nd)


def _layer_spec(a):
    # Leading layer axis selected by the grid index; last two dims are full -> always legal.
    nd = a.ndim
    return pl.BlockSpec((1,) + tuple(a.shape[1:]),
                        lambda l, _nd=nd: (l,) + (0,) * (_nd - 1))


def pallas_image_tower(patches, vp, *, n_heads):
    n, npatch, _ = patches.shape
    d = vp["conv_w"].shape[1]
    s = npatch + 1
    const_args = [patches, vp["conv_w"], vp["class_emb"], vp["pos_emb"],
                  vp["ln_pre_g"], vp["ln_pre_b"]]
    stacked = _stack_blocks(vp["blocks"])
    return pl.pallas_call(
        functools.partial(_image_tower_kernel, n_heads=n_heads),
        out_shape=jax.ShapeDtypeStruct((n, s, d), jnp.float32),
        grid=(len(vp["blocks"]),),
        in_specs=[_const_spec(a) for a in const_args] + [_layer_spec(a) for a in stacked],
        out_specs=pl.BlockSpec((n, s, d), lambda l: (0, 0, 0)),
        compiler_params=_ARBITRARY,
    )(*const_args, *stacked)


def pallas_text_tower(x, tp, *, n_heads):
    n, s, d = x.shape
    const_args = [x, tp["pos_emb"]]
    stacked = _stack_blocks(tp["blocks"])
    return pl.pallas_call(
        functools.partial(_text_tower_kernel, n_heads=n_heads),
        out_shape=jax.ShapeDtypeStruct((n, s, d), jnp.float32),
        grid=(len(tp["blocks"]),),
        in_specs=[_const_spec(a) for a in const_args] + [_layer_spec(a) for a in stacked],
        out_specs=pl.BlockSpec((n, s, d), lambda l: (0, 0, 0)),
        compiler_params=_ARBITRARY,
    )(*const_args, *stacked)


def pallas_head_logits(img_cls, txt_eot, params, *, seg_b, seg_t):
    vp, tp = params["visual"], params["text"]
    n_cls = txt_eot.shape[0]
    args = [img_cls, vp["ln_post_g"], vp["ln_post_b"], vp["proj"],
            txt_eot, tp["ln_f_g"], tp["ln_f_b"], tp["text_proj"],
            params["logit_scale"].reshape(1, 1)]
    return pl.pallas_call(
        functools.partial(_head_logits_kernel, seg_b=seg_b, seg_t=seg_t),
        out_shape=jax.ShapeDtypeStruct((seg_b, n_cls), jnp.float32),
        grid=(1,),
        in_specs=[_const_spec(a) for a in args],
        out_specs=pl.BlockSpec((seg_b, n_cls), lambda l: (0, 0)),
        compiler_params=_ARBITRARY,
    )(*args)


# ----------------------------- encoders -------------------------------------------------


def encode_image(image, vp):
    # image: (N, C, H, W) NCHW. Patchify == conv1 with stride=kernel=PATCH (im2col, JAX glue).
    n, c, h, w = image.shape
    gh, gw = h // PATCH, w // PATCH
    p = image.reshape(n, c, gh, PATCH, gw, PATCH)
    p = p.transpose(0, 2, 4, 1, 3, 5).reshape(n, gh * gw, c * PATCH * PATCH)
    x = pallas_image_tower(p, vp, n_heads=N_HEADS)    # conv + cls + pos + ln_pre + all blocks
    return x[:, 0, :]                                 # class token; ln_post/proj in head kernel


def encode_text(tokens, tp):
    x = tp["token_emb"][tokens]                       # embedding gather (JAX glue)
    x = pallas_text_tower(x, tp, n_heads=N_HEADS)     # pos add + all causal blocks
    eot = jnp.argmax(tokens, axis=-1)                 # EOT has the highest token id
    return x[jnp.arange(x.shape[0]), eot]             # (N_cls, D); ln_final/proj in head kernel


def custom_clip_forward(image, tokens, params):
    if SEGMENTS:
        assert image.ndim == 5
        b, t, c, h, w = image.shape
        image = image.reshape(b * t, c, h, w)
    else:
        b, t = image.shape[0], 1
    img_cls = encode_image(image, params["visual"])             # (b*t, D_IMG)
    txt_eot = encode_text(tokens, params["text"])               # (N_CLASSES, D_TEXT)
    return pallas_head_logits(img_cls, txt_eot, params, seg_b=b, seg_t=t)


# ----------------------------- deterministic parameter init -----------------------------


def init_params(key):
    keys = iter(jax.random.split(key, 256))

    def nrm(shape, scale=0.02, dtype=jnp.float32):
        return (scale * jax.random.normal(next(keys), shape)).astype(dtype)

    def wnrm(shape):
        # MXU-facing weights pre-cast to bf16 once (fp32 accumulation inside the kernels).
        return nrm(shape, dtype=jnp.bfloat16)

    def block_params(d):
        return {
            "ln1_g": jnp.ones((1, d), jnp.float32),
            "ln1_b": jnp.zeros((1, d), jnp.float32),
            "in_w": wnrm((d, 3 * d)),
            "in_b": jnp.zeros((1, 3 * d), jnp.float32),
            "out_w": wnrm((d, d)),
            "out_b": jnp.zeros((1, d), jnp.float32),
            "ln2_g": jnp.ones((1, d), jnp.float32),
            "ln2_b": jnp.zeros((1, d), jnp.float32),
            "fc_w": wnrm((d, 4 * d)),
            "fc_b": jnp.zeros((1, 4 * d), jnp.float32),
            "proj_w": wnrm((4 * d, d)),
            "proj_b": jnp.zeros((1, d), jnp.float32),
        }

    n_patches = (IMG_SIZE // PATCH) ** 2
    visual = {
        # conv1 weight stored pre-reshaped as (C*P*P, D) == torch (D, C, P, P).reshape(D,-1).T
        "conv_w": wnrm((C * PATCH * PATCH, D_IMG)),
        "class_emb": nrm((1, D_IMG)),
        "pos_emb": nrm((n_patches + 1, D_IMG)),
        "ln_pre_g": jnp.ones((1, D_IMG), jnp.float32),
        "ln_pre_b": jnp.zeros((1, D_IMG), jnp.float32),
        "blocks": [block_params(D_IMG) for _ in range(N_LAYERS)],
        "ln_post_g": jnp.ones((1, D_IMG), jnp.float32),
        "ln_post_b": jnp.zeros((1, D_IMG), jnp.float32),
        "proj": wnrm((D_IMG, EMBED_DIM)),
    }
    text = {
        "token_emb": nrm((VOCAB, D_TEXT)),
        "pos_emb": nrm((CTX_LEN, D_TEXT)),
        "blocks": [block_params(D_TEXT) for _ in range(N_LAYERS)],
        "ln_f_g": jnp.ones((1, D_TEXT), jnp.float32),
        "ln_f_b": jnp.zeros((1, D_TEXT), jnp.float32),
        "text_proj": wnrm((D_TEXT, EMBED_DIM)),
    }
    return {
        "visual": visual,
        "text": text,
        "logit_scale": jnp.asarray(math.log(1.0 / 0.07), jnp.float32),
    }


def make_tokenized_prompts():
    # Synthetic stand-in for clip.tokenize("The photo of a <class>"):
    # SOT=1, some class tokens, EOT=VOCAB-1 (highest id, so argmax finds it), zero pad.
    rows = []
    for i in range(N_CLASSES):
        length = 4 + i
        body = [((2 + i + j) % (VOCAB - 3)) + 1 for j in range(length - 2)]
        row = [1] + body + [VOCAB - 1]
        row = row + [0] * (CTX_LEN - len(row))
        rows.append(row)
    return jnp.asarray(rows, dtype=jnp.int32)


# ----------------------------- main -----------------------------------------------------

if __name__ == "__main__":
    key = jax.random.PRNGKey(0)
    k_img, k_params = jax.random.split(key)

    image = jax.random.normal(
        k_img, (B, T, C, IMG_SIZE, IMG_SIZE), dtype=jnp.float32
    )  # (b, t, c, h, w) NCHW, SEGMENTS path
    tokens = make_tokenized_prompts()  # (N_CLASSES, CTX_LEN)
    params = init_params(k_params)

    fwd = jax.jit(custom_clip_forward)
    logits = fwd(image, tokens, params)
    logits = jax.block_until_ready(logits)

    assert logits.shape == (B, N_CLASSES), logits.shape
    assert bool(jnp.all(jnp.isfinite(logits)))
    print("KERNEL_OK")
</pallas_src>

<mosaic_0001>
module attributes {stable_mosaic.version = 11 : i64} {
  func.func @_text_tower_kernel(%arg0: i32, %arg1: memref<3x8x32xf32, #tpu.memory_space<vmem>>, %arg2: memref<8x32xf32, #tpu.memory_space<vmem>>, %arg3: memref<1x1x32xf32, #tpu.memory_space<vmem>>, %arg4: memref<1x1x32xf32, #tpu.memory_space<vmem>>, %arg5: memref<1x32x96xbf16, #tpu.memory_space<vmem>>, %arg6: memref<1x1x96xf32, #tpu.memory_space<vmem>>, %arg7: memref<1x32x32xbf16, #tpu.memory_space<vmem>>, %arg8: memref<1x1x32xf32, #tpu.memory_space<vmem>>, %arg9: memref<1x1x32xf32, #tpu.memory_space<vmem>>, %arg10: memref<1x1x32xf32, #tpu.memory_space<vmem>>, %arg11: memref<1x32x128xbf16, #tpu.memory_space<vmem>>, %arg12: memref<1x1x128xf32, #tpu.memory_space<vmem>>, %arg13: memref<1x128x32xbf16, #tpu.memory_space<vmem>>, %arg14: memref<1x1x32xf32, #tpu.memory_space<vmem>>, %arg15: memref<3x8x32xf32, #tpu.memory_space<vmem>>) attributes {dimension_semantics = [#tpu.dimension_semantics<arbitrary>], iteration_bounds = array<i64: 2>, scalar_prefetch = 0 : i64, scratch_operands = 0 : i64, tpu.core_type = #tpu.core_type<tc>, window_params = [{pipeline_mode = #tpu.pipeline_mode<synchronous>, transform_indices = @transform_0, window_bounds = array<i64: 3, 8, 32>}, {pipeline_mode = #tpu.pipeline_mode<synchronous>, transform_indices = @transform_1, window_bounds = array<i64: 8, 32>}, {transform_indices = @transform_2, window_bounds = array<i64: 1, 1, 32>}, {transform_indices = @transform_3, window_bounds = array<i64: 1, 1, 32>}, {transform_indices = @transform_4, window_bounds = array<i64: 1, 32, 96>}, {transform_indices = @transform_5, window_bounds = array<i64: 1, 1, 96>}, {transform_indices = @transform_6, window_bounds = array<i64: 1, 32, 32>}, {transform_indices = @transform_7, window_bounds = array<i64: 1, 1, 32>}, {transform_indices = @transform_8, window_bounds = array<i64: 1, 1, 32>}, {transform_indices = @transform_9, window_bounds = array<i64: 1, 1, 32>}, {transform_indices = @transform_10, window_bounds = array<i64: 1, 32, 128>}, {transform_indices = @transform_11, window_bounds = array<i64: 1, 1, 128>}, {transform_indices = @transform_12, window_bounds = array<i64: 1, 128, 32>}, {transform_indices = @transform_13, window_bounds = array<i64: 1, 1, 32>}, {pipeline_mode = #tpu.pipeline_mode<synchronous>, transform_indices = @transform_14, window_bounds = array<i64: 3, 8, 32>}]} {
    %c0_i32 = arith.constant 0 : i32
    %0 = arith.cmpi eq, %arg0, %c0_i32 : i32
    %1 = arith.extui %0 : i1 to i32
    %c0_i32_0 = arith.constant 0 : i32
    %2 = arith.cmpi ne, %1, %c0_i32_0 : i32
    scf.if %2 {
      %c0_85 = arith.constant 0 : index
      %c0_86 = arith.constant 0 : index
      %c0_87 = arith.constant 0 : index
      %227 = vector.load %arg1[%c0_85, %c0_86, %c0_87] : memref<3x8x32xf32, #tpu.memory_space<vmem>>, vector<3x8x32xf32>
      %c0_88 = arith.constant 0 : index
      %c0_89 = arith.constant 0 : index
      %228 = vector.load %arg2[%c0_88, %c0_89] : memref<8x32xf32, #tpu.memory_space<vmem>>, vector<8x32xf32>
      %229 = vector.shape_cast %228 : vector<8x32xf32> to vector<1x8x32xf32>
      %230 = vector.broadcast %229 : vector<1x8x32xf32> to vector<3x8x32xf32>
      %231 = arith.addf %227, %230 : vector<3x8x32xf32>
      %c0_90 = arith.constant 0 : index
      %c0_91 = arith.constant 0 : index
      %c0_92 = arith.constant 0 : index
      %232 = vector.load %arg15[%c0_90, %c0_91, %c0_92] : memref<3x8x32xf32, #tpu.memory_space<vmem>>, vector<3x8x32xf32>
      tpu.vector_store %arg15[%c0_90, %c0_91, %c0_92], %231 {strides = array<i32>} : memref<3x8x32xf32, #tpu.memory_space<vmem>>, vector<3x8x32xf32>,
    } else {
    }
    %c0 = arith.constant 0 : index
    %c0_1 = arith.constant 0 : index
    %c0_2 = arith.constant 0 : index
    %3 = vector.load %arg15[%c0, %c0_1, %c0_2] : memref<3x8x32xf32, #tpu.memory_space<vmem>>, vector<3x8x32xf32>
    %4 = vector.shape_cast %3 : vector<3x8x32xf32> to vector<24x32xf32>
    %c0_3 = arith.constant 0 : index
    %c0_4 = arith.constant 0 : index
    %c0_5 = arith.constant 0 : index
    %5 = vector.load %arg3[%c0_3, %c0_4, %c0_5] : memref<1x1x32xf32, #tpu.memory_space<vmem>>, vector<1x1x32xf32>
    %6 = vector.shape_cast %5 : vector<1x1x32xf32> to vector<1x32xf32>
    %c0_6 = arith.constant 0 : index
    %c0_7 = arith.constant 0 : index
    %c0_8 = arith.constant 0 : index
    %7 = vector.load %arg4[%c0_6, %c0_7, %c0_8] : memref<1x1x32xf32, #tpu.memory_space<vmem>>, vector<1x1x32xf32>
    %8 = vector.shape_cast %7 : vector<1x1x32xf32> to vector<1x32xf32>
    %c0_9 = arith.constant 0 : index
    %c0_10 = arith.constant 0 : index
    %c0_11 = arith.constant 0 : index
    %9 = vector.load %arg5[%c0_9, %c0_10, %c0_11] : memref<1x32x96xbf16, #tpu.memory_space<vmem>>, vector<1x32x96xbf16>
    %10 = vector.shape_cast %9 : vector<1x32x96xbf16> to vector<32x96xbf16>
    %c0_12 = arith.constant 0 : index
    %c0_13 = arith.constant 0 : index
    %c0_14 = arith.constant 0 : index
    %11 = vector.load %arg6[%c0_12, %c0_13, %c0_14] : memref<1x1x96xf32, #tpu.memory_space<vmem>>, vector<1x1x96xf32>
    %12 = vector.shape_cast %11 : vector<1x1x96xf32> to vector<1x96xf32>
    %c0_15 = arith.constant 0 : index
    %c0_16 = arith.constant 0 : index
    %c0_17 = arith.constant 0 : index
    %13 = vector.load %arg7[%c0_15, %c0_16, %c0_17] : memref<1x32x32xbf16, #tpu.memory_space<vmem>>, vector<1x32x32xbf16>
    %14 = vector.shape_cast %13 : vector<1x32x32xbf16> to vector<32x32xbf16>
    %c0_18 = arith.constant 0 : index
    %c0_19 = arith.constant 0 : index
    %c0_20 = arith.constant 0 : index
    %15 = vector.load %arg8[%c0_18, %c0_19, %c0_20] : memref<1x1x32xf32, #tpu.memory_space<vmem>>, vector<1x1x32xf32>
    %16 = vector.shape_cast %15 : vector<1x1x32xf32> to vector<1x32xf32>
    %c0_21 = arith.constant 0 : index
    %c0_22 = arith.constant 0 : index
    %c0_23 = arith.constant 0 : index
    %17 = vector.load %arg9[%c0_21, %c0_22, %c0_23] : memref<1x1x32xf32, #tpu.memory_space<vmem>>, vector<1x1x32xf32>
    %18 = vector.shape_cast %17 : vector<1x1x32xf32> to vector<1x32xf32>
    %c0_24 = arith.constant 0 : index
    %c0_25 = arith.constant 0 : index
    %c0_26 = arith.constant 0 : index
    %19 = vector.load %arg10[%c0_24, %c0_25, %c0_26] : memref<1x1x32xf32, #tpu.memory_space<vmem>>, vector<1x1x32xf32>
    %20 = vector.shape_cast %19 : vector<1x1x32xf32> to vector<1x32xf32>
    %c0_27 = arith.constant 0 : index
    %c0_28 = arith.constant 0 : index
    %c0_29 = arith.constant 0 : index
    %21 = vector.load %arg11[%c0_27, %c0_28, %c0_29] : memref<1x32x128xbf16, #tpu.memory_space<vmem>>, vector<1x32x128xbf16>
    %22 = vector.shape_cast %21 : vector<1x32x128xbf16> to vector<32x128xbf16>
    %c0_30 = arith.constant 0 : index
    %c0_31 = arith.constant 0 : index
    %c0_32 = arith.constant 0 : index
    %23 = vector.load %arg12[%c0_30, %c0_31, %c0_32] : memref<1x1x128xf32, #tpu.memory_space<vmem>>, vector<1x1x128xf32>
    %24 = vector.shape_cast %23 : vector<1x1x128xf32> to vector<1x128xf32>
    %c0_33 = arith.constant 0 : index
    %c0_34 = arith.constant 0 : index
    %c0_35 = arith.constant 0 : index
    %25 = vector.load %arg13[%c0_33, %c0_34, %c0_35] : memref<1x128x32xbf16, #tpu.memory_space<vmem>>, vector<1x128x32xbf16>
    %26 = vector.shape_cast %25 : vector<1x128x32xbf16> to vector<128x32xbf16>
    %c0_36 = arith.constant 0 : index
    %c0_37 = arith.constant 0 : index
    %c0_38 = arith.constant 0 : index
    %27 = vector.load %arg14[%c0_36, %c0_37, %c0_38] : memref<1x1x32xf32, #tpu.memory_space<vmem>>, vector<1x1x32xf32>
    %28 = vector.shape_cast %27 : vector<1x1x32xf32> to vector<1x32xf32>
    %cst = arith.constant dense<0.000000e+00> : vector<24xf32>
    %29 = vector.multi_reduction <add>, %4, %cst [1] : vector<24x32xf32> to vector<24xf32>
    %30 = vector.shape_cast %29 : vector<24xf32> to vector<24x1xf32>
    %cst_39 = arith.constant 3.200000e+01 : f32
    %31 = vector.broadcast %cst_39 : f32 to vector<24x1xf32>
    %32 = arith.divf %30, %31 : vector<24x1xf32>
    %33 = vector.broadcast %32 : vector<24x1xf32> to vector<24x32xf32>
    %34 = arith.subf %4, %33 : vector<24x32xf32>
    %35 = arith.mulf %34, %34 : vector<24x32xf32>
    %cst_40 = arith.constant dense<0.000000e+00> : vector<24xf32>
    %36 = vector.multi_reduction <add>, %35, %cst_40 [1] : vector<24x32xf32> to vector<24xf32>
    %37 = vector.shape_cast %36 : vector<24xf32> to vector<24x1xf32>
    %cst_41 = arith.constant 3.200000e+01 : f32
    %38 = vector.broadcast %cst_41 : f32 to vector<24x1xf32>
    %39 = arith.divf %37, %38 : vector<24x1xf32>
    %40 = vector.broadcast %32 : vector<24x1xf32> to vector<24x32xf32>
    %41 = arith.subf %4, %40 : vector<24x32xf32>
    %cst_42 = arith.constant 9.99999974E-6 : f32
    %42 = vector.broadcast %cst_42 : f32 to vector<24x1xf32>
    %43 = arith.addf %39, %42 : vector<24x1xf32>
    %44 = math.rsqrt %43 : vector<24x1xf32>
    %45 = vector.broadcast %44 : vector<24x1xf32> to vector<24x32xf32>
    %46 = arith.mulf %41, %45 : vector<24x32xf32>
    %47 = vector.broadcast %6 : vector<1x32xf32> to vector<24x32xf32>
    %48 = arith.mulf %46, %47 : vector<24x32xf32>
    %49 = vector.broadcast %8 : vector<1x32xf32> to vector<24x32xf32>
    %50 = arith.addf %48, %49 : vector<24x32xf32>
    %51 = arith.truncf %50 : vector<24x32xf32> to vector<24x32xbf16>
    %cst_43 = arith.constant dense<0.000000e+00> : vector<24x96xf32>
    %52 = tpu.matmul %51, %10, %cst_43 {dimension_numbers = #tpu.dot_dimension_numbers<[1], [0], [0], [1], [0, 0, 1, 1], [], []>} : vector<24x32xbf16>, vector<32x96xbf16>, vector<24x96xf32> -> vector<24x96xf32>
    %53 = vector.broadcast %12 : vector<1x96xf32> to vector<24x96xf32>
    %54 = arith.addf %52, %53 : vector<24x96xf32>
    %55 = tpu.iota {dimensions = array<i32: 1>} : vector<3x8x8xi32>
    %56 = tpu.iota {dimensions = array<i32: 2>} : vector<3x8x8xi32>
    %57 = arith.cmpi sle, %56, %55 : vector<3x8x8xi32>
    %cst_44 = arith.constant 0.000000e+00 : f32
    %58 = vector.broadcast %cst_44 : f32 to vector<24x32xf32>
    %59 = vector.extract_strided_slice %54 {offsets = [0, 0], sizes = [24, 8], strides = [1, 1]} : vector<24x96xf32> to vector<24x8xf32>
    %60 = vector.shape_cast %59 : vector<24x8xf32> to vector<3x8x8xf32>
    %61 = vector.extract_strided_slice %54 {offsets = [0, 32], sizes = [24, 8], strides = [1, 1]} : vector<24x96xf32> to vector<24x8xf32>
    %62 = vector.shape_cast %61 : vector<24x8xf32> to vector<3x8x8xf32>
    %63 = vector.extract_strided_slice %54 {offsets = [0, 64], sizes = [24, 8], strides = [1, 1]} : vector<24x96xf32> to vector<24x8xf32>
    %64 = vector.shape_cast %63 : vector<24x8xf32> to vector<3x8x8xf32>
    %65 = arith.truncf %60 : vector<3x8x8xf32> to vector<3x8x8xbf16>
    %66 = arith.truncf %62 : vector<3x8x8xf32> to vector<3x8x8xbf16>
    "tpu.trace_start"() <{level = 10 : i32, message = "nqd,nkd->nqk"}> : () -> ()
    %cst_45 = arith.constant dense<0.000000e+00> : vector<3x8x8xf32>
    %67 = tpu.matmul %65, %66, %cst_45 {dimension_numbers = #tpu.dot_dimension_numbers<[2], [2], [1], [1], [0, 0, 0, 1, 1, 1], [0], [0]>} : vector<3x8x8xbf16>, vector<3x8x8xbf16>, vector<3x8x8xf32> -> vector<3x8x8xf32>
    "tpu.trace_stop"() : () -> ()
    %cst_46 = arith.constant 0.353553385 : f32
    %68 = vector.broadcast %cst_46 : f32 to vector<3x8x8xf32>
    %69 = arith.mulf %67, %68 : vector<3x8x8xf32>
    %cst_47 = arith.constant -1.000000e+30 : f32
    %70 = vector.broadcast %cst_47 : f32 to vector<3x8x8xf32>
    %71 = arith.select %57, %69, %70 : vector<3x8x8xi1>, vector<3x8x8xf32>
    %cst_48 = arith.constant dense<0xFF800000> : vector<3x8xf32>
    %72 = vector.multi_reduction <maximumf>, %71, %cst_48 [2] : vector<3x8x8xf32> to vector<3x8xf32>
    %73 = vector.shape_cast %72 : vector<3x8xf32> to vector<3x8x1xf32>
    %74 = vector.broadcast %73 : vector<3x8x1xf32> to vector<3x8x8xf32>
    %75 = arith.subf %71, %74 : vector<3x8x8xf32>
    %76 = math.exp %75 : vector<3x8x8xf32>
    %cst_49 = arith.constant dense<0.000000e+00> : vector<3x8xf32>
    %77 = vector.multi_reduction <add>, %76, %cst_49 [2] : vector<3x8x8xf32> to vector<3x8xf32>
    %78 = vector.shape_cast %77 : vector<3x8xf32> to vector<3x8x1xf32>
    %79 = tpu.reciprocal %78 {approx = true} : vector<3x8x1xf32> -> vector<3x8x1xf32>
    %80 = vector.broadcast %79 : vector<3x8x1xf32> to vector<3x8x8xf32>
    %81 = arith.mulf %76, %80 : vector<3x8x8xf32>
    %82 = arith.truncf %81 : vector<3x8x8xf32> to vector<3x8x8xbf16>
    %83 = arith.truncf %64 : vector<3x8x8xf32> to vector<3x8x8xbf16>
    "tpu.trace_start"() <{level = 10 : i32, message = "nqk,nkd->nqd"}> : () -> ()
    %cst_50 = arith.constant dense<0.000000e+00> : vector<3x8x8xf32>
    %84 = tpu.matmul %82, %83, %cst_50 {dimension_numbers = #tpu.dot_dimension_numbers<[2], [1], [1], [2], [0, 0, 0, 1, 1, 2], [0], [0]>} : vector<3x8x8xbf16>, vector<3x8x8xbf16>, vector<3x8x8xf32> -> vector<3x8x8xf32>
    "tpu.trace_stop"() : () -> ()
    %85 = vector.shape_cast %84 : vector<3x8x8xf32> to vector<24x8xf32>
    %86 = arith.truncf %85 : vector<24x8xf32> to vector<24x8xbf16>
    %87 = vector.extract_strided_slice %14 {offsets = [0, 0], sizes = [8, 32], strides = [1, 1]} : vector<32x32xbf16> to vector<8x32xbf16>
    %cst_51 = arith.constant dense<0.000000e+00> : vector<24x32xf32>
    %88 = tpu.matmul %86, %87, %cst_51 {dimension_numbers = #tpu.dot_dimension_numbers<[1], [0], [0], [1], [0, 0, 1, 1], [], []>} : vector<24x8xbf16>, vector<8x32xbf16>, vector<24x32xf32> -> vector<24x32xf32>
    %89 = arith.addf %58, %88 : vector<24x32xf32>
    %90 = vector.extract_strided_slice %54 {offsets = [0, 8], sizes = [24, 8], strides = [1, 1]} : vector<24x96xf32> to vector<24x8xf32>
    %91 = vector.shape_cast %90 : vector<24x8xf32> to vector<3x8x8xf32>
    %92 = vector.extract_strided_slice %54 {offsets = [0, 40], sizes = [24, 8], strides = [1, 1]} : vector<24x96xf32> to vector<24x8xf32>
    %93 = vector.shape_cast %92 : vector<24x8xf32> to vector<3x8x8xf32>
    %94 = vector.extract_strided_slice %54 {offsets = [0, 72], sizes = [24, 8], strides = [1, 1]} : vector<24x96xf32> to vector<24x8xf32>
    %95 = vector.shape_cast %94 : vector<24x8xf32> to vector<3x8x8xf32>
    %96 = arith.truncf %91 : vector<3x8x8xf32> to vector<3x8x8xbf16>
    %97 = arith.truncf %93 : vector<3x8x8xf32> to vector<3x8x8xbf16>
    "tpu.trace_start"() <{level = 10 : i32, message = "nqd,nkd->nqk"}> : () -> ()
    %cst_52 = arith.constant dense<0.000000e+00> : vector<3x8x8xf32>
    %98 = tpu.matmul %96, %97, %cst_52 {dimension_numbers = #tpu.dot_dimension_numbers<[2], [2], [1], [1], [0, 0, 0, 1, 1, 1], [0], [0]>} : vector<3x8x8xbf16>, vector<3x8x8xbf16>, vector<3x8x8xf32> -> vector<3x8x8xf32>
    "tpu.trace_stop"() : () -> ()
    %cst_53 = arith.constant 0.353553385 : f32
    %99 = vector.broadcast %cst_53 : f32 to vector<3x8x8xf32>
    %100 = arith.mulf %98, %99 : vector<3x8x8xf32>
    %cst_54 = arith.constant -1.000000e+30 : f32
    %101 = vector.broadcast %cst_54 : f32 to vector<3x8x8xf32>
    %102 = arith.select %57, %100, %101 : vector<3x8x8xi1>, vector<3x8x8xf32>
    %cst_55 = arith.constant dense<0xFF800000> : vector<3x8xf32>
    %103 = vector.multi_reduction <maximumf>, %102, %cst_55 [2] : vector<3x8x8xf32> to vector<3x8xf32>
    %104 = vector.shape_cast %103 : vector<3x8xf32> to vector<3x8x1xf32>
    %105 = vector.broadcast %104 : vector<3x8x1xf32> to vector<3x8x8xf32>
    %106 = arith.subf %102, %105 : vector<3x8x8xf32>
    %107 = math.exp %106 : vector<3x8x8xf32>
    %cst_56 = arith.constant dense<0.000000e+00> : vector<3x8xf32>
    %108 = vector.multi_reduction <add>, %107, %cst_56 [2] : vector<3x8x8xf32> to vector<3x8xf32>
    %109 = vector.shape_cast %108 : vector<3x8xf32> to vector<3x8x1xf32>
    %110 = tpu.reciprocal %109 {approx = true} : vector<3x8x1xf32> -> vector<3x8x1xf32>
    %111 = vector.broadcast %110 : vector<3x8x1xf32> to vector<3x8x8xf32>
    %112 = arith.mulf %107, %111 : vector<3x8x8xf32>
    %113 = arith.truncf %112 : vector<3x8x8xf32> to vector<3x8x8xbf16>
    %114 = arith.truncf %95 : vector<3x8x8xf32> to vector<3x8x8xbf16>
    "tpu.trace_start"() <{level = 10 : i32, message = "nqk,nkd->nqd"}> : () -> ()
    %cst_57 = arith.constant dense<0.000000e+00> : vector<3x8x8xf32>
    %115 = tpu.matmul %113, %114, %cst_57 {dimension_numbers = #tpu.dot_dimension_numbers<[2], [1], [1], [2], [0, 0, 0, 1, 1, 2], [0], [0]>} : vector<3x8x8xbf16>, vector<3x8x8xbf16>, vector<3x8x8xf32> -> vector<3x8x8xf32>
    "tpu.trace_stop"() : () -> ()
    %116 = vector.shape_cast %115 : vector<3x8x8xf32> to vector<24x8xf32>
    %117 = arith.truncf %116 : vector<24x8xf32> to vector<24x8xbf16>
    %118 = vector.extract_strided_slice %14 {offsets = [8, 0], sizes = [8, 32], strides = [1, 1]} : vector<32x32xbf16> to vector<8x32xbf16>
    %cst_58 = arith.constant dense<0.000000e+00> : vector<24x32xf32>
    %119 = tpu.matmul %117, %118, %cst_58 {dimension_numbers = #tpu.dot_dimension_numbers<[1], [0], [0], [1], [0, 0, 1, 1], [], []>} : vector<24x8xbf16>, vector<8x32xbf16>, vector<24x32xf32> -> vector<24x32xf32>
    %120 = arith.addf %89, %119 : vector<24x32xf32>
    %121 = vector.extract_strided_slice %54 {offsets = [0, 16], sizes = [24, 8], strides = [1, 1]} : vector<24x96xf32> to vector<24x8xf32>
    %122 = vector.shape_cast %121 : vector<24x8xf32> to vector<3x8x8xf32>
    %123 = vector.extract_strided_slice %54 {offsets = [0, 48], sizes = [24, 8], strides = [1, 1]} : vector<24x96xf32> to vector<24x8xf32>
    %124 = vector.shape_cast %123 : vector<24x8xf32> to vector<3x8x8xf32>
    %125 = vector.extract_strided_slice %54 {offsets = [0, 80], sizes = [24, 8], strides = [1, 1]} : vector<24x96xf32> to vector<24x8xf32>
    %126 = vector.shape_cast %125 : vector<24x8xf32> to vector<3x8x8xf32>
    %127 = arith.truncf %122 : vector<3x8x8xf32> to vector<3x8x8xbf16>
    %128 = arith.truncf %124 : vector<3x8x8xf32> to vector<3x8x8xbf16>
    "tpu.trace_start"() <{level = 10 : i32, message = "nqd,nkd->nqk"}> : () -> ()
    %cst_59 = arith.constant dense<0.000000e+00> : vector<3x8x8xf32>
    %129 = tpu.matmul %127, %128, %cst_59 {dimension_numbers = #tpu.dot_dimension_numbers<[2], [2], [1], [1], [0, 0, 0, 1, 1, 1], [0], [0]>} : vector<3x8x8xbf16>, vector<3x8x8xbf16>, vector<3x8x8xf32> -> vector<3x8x8xf32>
    "tpu.trace_stop"() : () -> ()
    %cst_60 = arith.constant 0.353553385 : f32
    %130 = vector.broadcast %cst_60 : f32 to vector<3x8x8xf32>
    %131 = arith.mulf %129, %130 : vector<3x8x8xf32>
    %cst_61 = arith.constant -1.000000e+30 : f32
    %132 = vector.broadcast %cst_61 : f32 to vector<3x8x8xf32>
    %133 = arith.select %57, %131, %132 : vector<3x8x8xi1>, vector<3x8x8xf32>
    %cst_62 = arith.constant dense<0xFF800000> : vector<3x8xf32>
    %134 = vector.multi_reduction <maximumf>, %133, %cst_62 [2] : vector<3x8x8xf32> to vector<3x8xf32>
    %135 = vector.shape_cast %134 : vector<3x8xf32> to vector<3x8x1xf32>
    %136 = vector.broadcast %135 : vector<3x8x1xf32> to vector<3x8x8xf32>
    %137 = arith.subf %133, %136 : vector<3x8x8xf32>
    %138 = math.exp %137 : vector<3x8x8xf32>
    %cst_63 = arith.constant dense<0.000000e+00> : vector<3x8xf32>
    %139 = vector.multi_reduction <add>, %138, %cst_63 [2] : vector<3x8x8xf32> to vector<3x8xf32>
    %140 = vector.shape_cast %139 : vector<3x8xf32> to vector<3x8x1xf32>
    %141 = tpu.reciprocal %140 {approx = true} : vector<3x8x1xf32> -> vector<3x8x1xf32>
    %142 = vector.broadcast %141 : vector<3x8x1xf32> to vector<3x8x8xf32>
    %143 = arith.mulf %138, %142 : vector<3x8x8xf32>
    %144 = arith.truncf %143 : vector<3x8x8xf32> to vector<3x8x8xbf16>
    %145 = arith.truncf %126 : vector<3x8x8xf32> to vector<3x8x8xbf16>
    "tpu.trace_start"() <{level = 10 : i32, message = "nqk,nkd->nqd"}> : () -> ()
    %cst_64 = arith.constant dense<0.000000e+00> : vector<3x8x8xf32>
    %146 = tpu.matmul %144, %145, %cst_64 {dimension_numbers = #tpu.dot_dimension_numbers<[2], [1], [1], [2], [0, 0, 0, 1, 1, 2], [0], [0]>} : vector<3x8x8xbf16>, vector<3x8x8xbf16>, vector<3x8x8xf32> -> vector<3x8x8xf32>
    "tpu.trace_stop"() : () -> ()
    %147 = vector.shape_cast %146 : vector<3x8x8xf32> to vector<24x8xf32>
    %148 = arith.truncf %147 : vector<24x8xf32> to vector<24x8xbf16>
    %149 = vector.extract_strided_slice %14 {offsets = [16, 0], sizes = [8, 32], strides = [1, 1]} : vector<32x32xbf16> to vector<8x32xbf16>
    %cst_65 = arith.constant dense<0.000000e+00> : vector<24x32xf32>
    %150 = tpu.matmul %148, %149, %cst_65 {dimension_numbers = #tpu.dot_dimension_numbers<[1], [0], [0], [1], [0, 0, 1, 1], [], []>} : vector<24x8xbf16>, vector<8x32xbf16>, vector<24x32xf32> -> vector<24x32xf32>
    %151 = arith.addf %120, %150 : vector<24x32xf32>
    %152 = vector.extract_strided_slice %54 {offsets = [0, 24], sizes = [24, 8], strides = [1, 1]} : vector<24x96xf32> to vector<24x8xf32>
    %153 = vector.shape_cast %152 : vector<24x8xf32> to vector<3x8x8xf32>
    %154 = vector.extract_strided_slice %54 {offsets = [0, 56], sizes = [24, 8], strides = [1, 1]} : vector<24x96xf32> to vector<24x8xf32>
    %155 = vector.shape_cast %154 : vector<24x8xf32> to vector<3x8x8xf32>
    %156 = vector.extract_strided_slice %54 {offsets = [0, 88], sizes = [24, 8], strides = [1, 1]} : vector<24x96xf32> to vector<24x8xf32>
    %157 = vector.shape_cast %156 : vector<24x8xf32> to vector<3x8x8xf32>
    %158 = arith.truncf %153 : vector<3x8x8xf32> to vector<3x8x8xbf16>
    %159 = arith.truncf %155 : vector<3x8x8xf32> to vector<3x8x8xbf16>
    "tpu.trace_start"() <{level = 10 : i32, message = "nqd,nkd->nqk"}> : () -> ()
    %cst_66 = arith.constant dense<0.000000e+00> : vector<3x8x8xf32>
    %160 = tpu.matmul %158, %159, %cst_66 {dimension_numbers = #tpu.dot_dimension_numbers<[2], [2], [1], [1], [0, 0, 0, 1, 1, 1], [0], [0]>} : vector<3x8x8xbf16>, vector<3x8x8xbf16>, vector<3x8x8xf32> -> vector<3x8x8xf32>
    "tpu.trace_stop"() : () -> ()
    %cst_67 = arith.constant 0.353553385 : f32
    %161 = vector.broadcast %cst_67 : f32 to vector<3x8x8xf32>
    %162 = arith.mulf %160, %161 : vector<3x8x8xf32>
    %cst_68 = arith.constant -1.000000e+30 : f32
    %163 = vector.broadcast %cst_68 : f32 to vector<3x8x8xf32>
    %164 = arith.select %57, %162, %163 : vector<3x8x8xi1>, vector<3x8x8xf32>
    %cst_69 = arith.constant dense<0xFF800000> : vector<3x8xf32>
    %165 = vector.multi_reduction <maximumf>, %164, %cst_69 [2] : vector<3x8x8xf32> to vector<3x8xf32>
    %166 = vector.shape_cast %165 : vector<3x8xf32> to vector<3x8x1xf32>
    %167 = vector.broadcast %166 : vector<3x8x1xf32> to vector<3x8x8xf32>
    %168 = arith.subf %164, %167 : vector<3x8x8xf32>
    %169 = math.exp %168 : vector<3x8x8xf32>
    %cst_70 = arith.constant dense<0.000000e+00> : vector<3x8xf32>
    %170 = vector.multi_reduction <add>, %169, %cst_70 [2] : vector<3x8x8xf32> to vector<3x8xf32>
    %171 = vector.shape_cast %170 : vector<3x8xf32> to vector<3x8x1xf32>
    %172 = tpu.reciprocal %171 {approx = true} : vector<3x8x1xf32> -> vector<3x8x1xf32>
    %173 = vector.broadcast %172 : vector<3x8x1xf32> to vector<3x8x8xf32>
    %174 = arith.mulf %169, %173 : vector<3x8x8xf32>
    %175 = arith.truncf %174 : vector<3x8x8xf32> to vector<3x8x8xbf16>
    %176 = arith.truncf %157 : vector<3x8x8xf32> to vector<3x8x8xbf16>
    "tpu.trace_start"() <{level = 10 : i32, message = "nqk,nkd->nqd"}> : () -> ()
    %cst_71 = arith.constant dense<0.000000e+00> : vector<3x8x8xf32>
    %177 = tpu.matmul %175, %176, %cst_71 {dimension_numbers = #tpu.dot_dimension_numbers<[2], [1], [1], [2], [0, 0, 0, 1, 1, 2], [0], [0]>} : vector<3x8x8xbf16>, vector<3x8x8xbf16>, vector<3x8x8xf32> -> vector<3x8x8xf32>
    "tpu.trace_stop"() : () -> ()
    %178 = vector.shape_cast %177 : vector<3x8x8xf32> to vector<24x8xf32>
    %179 = arith.truncf %178 : vector<24x8xf32> to vector<24x8xbf16>
    %180 = vector.extract_strided_slice %14 {offsets = [24, 0], sizes = [8, 32], strides = [1, 1]} : vector<32x32xbf16> to vector<8x32xbf16>
    %cst_72 = arith.constant dense<0.000000e+00> : vector<24x32xf32>
    %181 = tpu.matmul %179, %180, %cst_72 {dimension_numbers = #tpu.dot_dimension_numbers<[1], [0], [0], [1], [0, 0, 1, 1], [], []>} : vector<24x8xbf16>, vector<8x32xbf16>, vector<24x32xf32> -> vector<24x32xf32>
    %182 = arith.addf %151, %181 : vector<24x32xf32>
    %183 = arith.addf %4, %182 : vector<24x32xf32>
    %184 = vector.broadcast %16 : vector<1x32xf32> to vector<24x32xf32>
    %185 = arith.addf %183, %184 : vector<24x32xf32>
    %cst_73 = arith.constant dense<0.000000e+00> : vector<24xf32>
    %186 = vector.multi_reduction <add>, %185, %cst_73 [1] : vector<24x32xf32> to vector<24xf32>
    %187 = vector.shape_cast %186 : vector<24xf32> to vector<24x1xf32>
    %cst_74 = arith.constant 3.200000e+01 : f32
    %188 = vector.broadcast %cst_74 : f32 to vector<24x1xf32>
    %189 = arith.divf %187, %188 : vector<24x1xf32>
    %190 = vector.broadcast %189 : vector<24x1xf32> to vector<24x32xf32>
    %191 = arith.subf %185, %190 : vector<24x32xf32>
    %192 = arith.mulf %191, %191 : vector<24x32xf32>
    %cst_75 = arith.constant dense<0.000000e+00> : vector<24xf32>
    %193 = vector.multi_reduction <add>, %192, %cst_75 [1] : vector<24x32xf32> to vector<24xf32>
    %194 = vector.shape_cast %193 : vector<24xf32> to vector<24x1xf32>
    %cst_76 = arith.constant 3.200000e+01 : f32
    %195 = vector.broadcast %cst_76 : f32 to vector<24x1xf32>
    %196 = arith.divf %194, %195 : vector<24x1xf32>
    %197 = vector.broadcast %189 : vector<24x1xf32> to vector<24x32xf32>
    %198 = arith.subf %185, %197 : vector<24x32xf32>
    %cst_77 = arith.constant 9.99999974E-6 : f32
    %199 = vector.broadcast %cst_77 : f32 to vector<24x1xf32>
    %200 = arith.addf %196, %199 : vector<24x1xf32>
    %201 = math.rsqrt %200 : vector<24x1xf32>
    %202 = vector.broadcast %201 : vector<24x1xf32> to vector<24x32xf32>
    %203 = arith.mulf %198, %202 : vector<24x32xf32>
    %204 = vector.broadcast %18 : vector<1x32xf32> to vector<24x32xf32>
    %205 = arith.mulf %203, %204 : vector<24x32xf32>
    %206 = vector.broadcast %20 : vector<1x32xf32> to vector<24x32xf32>
    %207 = arith.addf %205, %206 : vector<24x32xf32>
    %208 = arith.truncf %207 : vector<24x32xf32> to vector<24x32xbf16>
    %cst_78 = arith.constant dense<0.000000e+00> : vector<24x128xf32>
    %209 = tpu.matmul %208, %22, %cst_78 {dimension_numbers = #tpu.dot_dimension_numbers<[1], [0], [0], [1], [0, 0, 1, 1], [], []>} : vector<24x32xbf16>, vector<32x128xbf16>, vector<24x128xf32> -> vector<24x128xf32>
    %210 = vector.broadcast %24 : vector<1x128xf32> to vector<24x128xf32>
    %211 = arith.addf %209, %210 : vector<24x128xf32>
    %cst_79 = arith.constant 1.702000e+00 : f32
    %212 = vector.broadcast %cst_79 : f32 to vector<24x128xf32>
    %213 = arith.mulf %212, %211 : vector<24x128xf32>
    %214 = arith.negf %213 : vector<24x128xf32>
    %215 = math.exp %214 : vector<24x128xf32>
    %cst_80 = arith.constant 1.000000e+00 : f32
    %216 = vector.broadcast %cst_80 : f32 to vector<24x128xf32>
    %217 = arith.addf %216, %215 : vector<24x128xf32>
    %218 = arith.divf %216, %217 : vector<24x128xf32>
    %219 = arith.mulf %211, %218 : vector<24x128xf32>
    %220 = arith.truncf %219 : vector<24x128xf32> to vector<24x128xbf16>
    %cst_81 = arith.constant dense<0.000000e+00> : vector<24x32xf32>
    %221 = tpu.matmul %220, %26, %cst_81 {dimension_numbers = #tpu.dot_dimension_numbers<[1], [0], [0], [1], [0, 0, 1, 1], [], []>} : vector<24x128xbf16>, vector<128x32xbf16>, vector<24x32xf32> -> vector<24x32xf32>
    %222 = vector.broadcast %28 : vector<1x32xf32> to vector<24x32xf32>
    %223 = arith.addf %221, %222 : vector<24x32xf32>
    %224 = arith.addf %185, %223 : vector<24x32xf32>
    %225 = vector.shape_cast %224 : vector<24x32xf32> to vector<3x8x32xf32>
    %c0_82 = arith.constant 0 : index
    %c0_83 = arith.constant 0 : index
    %c0_84 = arith.constant 0 : index
    %226 = vector.load %arg15[%c0_82, %c0_83, %c0_84] : memref<3x8x32xf32, #tpu.memory_space<vmem>>, vector<3x8x32xf32>
    tpu.vector_store %arg15[%c0_82, %c0_83, %c0_84], %225 {strides = array<i32>} : memref<3x8x32xf32, #tpu.memory_space<vmem>>, vector<3x8x32xf32>,
    return
  }
  func.func @transform_0(%arg0: i32) -> (i32, i32, i32) {
    %c0_i32 = arith.constant 0 : i32
    %c0_i32_0 = arith.constant 0 : i32
    %c0_i32_1 = arith.constant 0 : i32
    %c0_i32_2 = arith.constant 0 : i32
    return %c0_i32, %c0_i32_0, %c0_i32_1 : i32, i32, i32
  }
  func.func @transform_1(%arg0: i32) -> (i32, i32) {
    %c0_i32 = arith.constant 0 : i32
    %c0_i32_0 = arith.constant 0 : i32
    %c0_i32_1 = arith.constant 0 : i32
    return %c0_i32, %c0_i32_0 : i32, i32
  }
  func.func @transform_2(%arg0: i32) -> (i32, i32, i32) {
    %c0_i32 = arith.constant 0 : i32
    %c0_i32_0 = arith.constant 0 : i32
    %c0_i32_1 = arith.constant 0 : i32
    return %arg0, %c0_i32, %c0_i32_0 : i32, i32, i32
  }
  func.func @transform_3(%arg0: i32) -> (i32, i32, i32) {
    %c0_i32 = arith.constant 0 : i32
    %c0_i32_0 = arith.constant 0 : i32
    %c0_i32_1 = arith.constant 0 : i32
    return %arg0, %c0_i32, %c0_i32_0 : i32, i32, i32
  }
  func.func @transform_4(%arg0: i32) -> (i32, i32, i32) {
    %c0_i32 = arith.constant 0 : i32
    %c0_i32_0 = arith.constant 0 : i32
    %c0_i32_1 = arith.constant 0 : i32
    return %arg0, %c0_i32, %c0_i32_0 : i32, i32, i32
  }
  func.func @transform_5(%arg0: i32) -> (i32, i32, i32) {
    %c0_i32 = arith.constant 0 : i32
    %c0_i32_0 = arith.constant 0 : i32
    %c0_i32_1 = arith.constant 0 : i32
    return %arg0, %c0_i32, %c0_i32_0 : i32, i32, i32
  }
  func.func @transform_6(%arg0: i32) -> (i32, i32, i32) {
    %c0_i32 = arith.constant 0 : i32
    %c0_i32_0 = arith.constant 0 : i32
    %c0_i32_1 = arith.constant 0 : i32
    return %arg0, %c0_i32, %c0_i32_0 : i32, i32, i32
  }
  func.func @transform_7(%arg0: i32) -> (i32, i32, i32) {
    %c0_i32 = arith.constant 0 : i32
    %c0_i32_0 = arith.constant 0 : i32
    %c0_i32_1 = arith.constant 0 : i32
    return %arg0, %c0_i32, %c0_i32_0 : i32, i32, i32
  }
  func.func @transform_8(%arg0: i32) -> (i32, i32, i32) {
    %c0_i32 = arith.constant 0 : i32
    %c0_i32_0 = arith.constant 0 : i32
    %c0_i32_1 = arith.constant 0 : i32
    return %arg0, %c0_i32, %c0_i32_0 : i32, i32, i32
  }
  func.func @transform_9(%arg0: i32) -> (i32, i32, i32) {
    %c0_i32 = arith.constant 0 : i32
    %c0_i32_0 = arith.constant 0 : i32
    %c0_i32_1 = arith.constant 0 : i32
    return %arg0, %c0_i32, %c0_i32_0 : i32, i32, i32
  }
  func.func @transform_10(%arg0: i32) -> (i32, i32, i32) {
    %c0_i32 = arith.constant 0 : i32
    %c0_i32_0 = arith.constant 0 : i32
    %c0_i32_1 = arith.constant 0 : i32
    return %arg0, %c0_i32, %c0_i32_0 : i32, i32, i32
  }
  func.func @transform_11(%arg0: i32) -> (i32, i32, i32) {
    %c0_i32 = arith.constant 0 : i32
    %c0_i32_0 = arith.constant 0 : i32
    %c0_i32_1 = arith.constant 0 : i32
    return %arg0, %c0_i32, %c0_i32_0 : i32, i32, i32
  }
  func.func @transform_12(%arg0: i32) -> (i32, i32, i32) {
    %c0_i32 = arith.constant 0 : i32
    %c0_i32_0 = arith.constant 0 : i32
    %c0_i32_1 = arith.constant 0 : i32
    return %arg0, %c0_i32, %c0_i32_0 : i32, i32, i32
  }
  func.func @transform_13(%arg0: i32) -> (i32, i32, i32) {
    %c0_i32 = arith.constant 0 : i32
    %c0_i32_0 = arith.constant 0 : i32
    %c0_i32_1 = arith.constant 0 : i32
    return %arg0, %c0_i32, %c0_i32_0 : i32, i32, i32
  }
  func.func @transform_14(%arg0: i32) -> (i32, i32, i32) {
    %c0_i32 = arith.constant 0 : i32
    %c0_i32_0 = arith.constant 0 : i32
    %c0_i32_1 = arith.constant 0 : i32
    %c0_i32_2 = arith.constant 0 : i32
    return %c0_i32, %c0_i32_0, %c0_i32_1 : i32, i32, i32
  }
}

module attributes {stable_mosaic.version = 11 : i64} {
  func.func @_image_tower_kernel(%arg0: i32, %arg1: memref<4x4x192xf32, #tpu.memory_space<vmem>>, %arg2: memref<192x32xbf16, #tpu.memory_space<vmem>>, %arg3: memref<1x32xf32, #tpu.memory_space<vmem>>, %arg4: memref<5x32xf32, #tpu.memory_space<vmem>>, %arg5: memref<1x32xf32, #tpu.memory_space<vmem>>, %arg6: memref<1x32xf32, #tpu.memory_space<vmem>>, %arg7: memref<1x1x32xf32, #tpu.memory_space<vmem>>, %arg8: memref<1x1x32xf32, #tpu.memory_space<vmem>>, %arg9: memref<1x32x96xbf16, #tpu.memory_space<vmem>>, %arg10: memref<1x1x96xf32, #tpu.memory_space<vmem>>, %arg11: memref<1x32x32xbf16, #tpu.memory_space<vmem>>, %arg12: memref<1x1x32xf32, #tpu.memory_space<vmem>>, %arg13: memref<1x1x32xf32, #tpu.memory_space<vmem>>, %arg14: memref<1x1x32xf32, #tpu.memory_space<vmem>>, %arg15: memref<1x32x128xbf16, #tpu.memory_space<vmem>>, %arg16: memref<1x1x128xf32, #tpu.memory_space<vmem>>, %arg17: memref<1x128x32xbf16, #tpu.memory_space<vmem>>, %arg18: memref<1x1x32xf32, #tpu.memory_space<vmem>>, %arg19: memref<4x5x32xf32, #tpu.memory_space<vmem>>) attributes {dimension_semantics = [#tpu.dimension_semantics<arbitrary>], iteration_bounds = array<i64: 2>, scalar_prefetch = 0 : i64, scratch_operands = 0 : i64, tpu.core_type = #tpu.core_type<tc>, window_params = [{pipeline_mode = #tpu.pipeline_mode<synchronous>, transform_indices = @transform_0, window_bounds = array<i64: 4, 4, 192>}, {pipeline_mode = #tpu.pipeline_mode<synchronous>, transform_indices = @transform_1, window_bounds = array<i64: 192, 32>}, {pipeline_mode = #tpu.pipeline_mode<synchronous>, transform_indices = @transform_2, window_bounds = array<i64: 1, 32>}, {pipeline_mode = #tpu.pipeline_mode<synchronous>, transform_indices = @transform_3, window_bounds = array<i64: 5, 32>}, {pipeline_mode = #tpu.pipeline_mode<synchronous>, transform_indices = @transform_4, window_bounds = array<i64: 1, 32>}, {pipeline_mode = #tpu.pipeline_mode<synchronous>, transform_indices = @transform_5, window_bounds = array<i64: 1, 32>}, {transform_indices = @transform_6, window_bounds = array<i64: 1, 1, 32>}, {transform_indices = @transform_7, window_bounds = array<i64: 1, 1, 32>}, {transform_indices = @transform_8, window_bounds = array<i64: 1, 32, 96>}, {transform_indices = @transform_9, window_bounds = array<i64: 1, 1, 96>}, {transform_indices = @transform_10, window_bounds = array<i64: 1, 32, 32>}, {transform_indices = @transform_11, window_bounds = array<i64: 1, 1, 32>}, {transform_indices = @transform_12, window_bounds = array<i64: 1, 1, 32>}, {transform_indices = @transform_13, window_bounds = array<i64: 1, 1, 32>}, {transform_indices = @transform_14, window_bounds = array<i64: 1, 32, 128>}, {transform_indices = @transform_15, window_bounds = array<i64: 1, 1, 128>}, {transform_indices = @transform_16, window_bounds = array<i64: 1, 128, 32>}, {transform_indices = @transform_17, window_bounds = array<i64: 1, 1, 32>}, {pipeline_mode = #tpu.pipeline_mode<synchronous>, transform_indices = @transform_18, window_bounds = array<i64: 4, 5, 32>}]} {
    %c0_i32 = arith.constant 0 : i32
    %0 = arith.cmpi eq, %arg0, %c0_i32 : i32
    %1 = arith.extui %0 : i1 to i32
    %c0_i32_0 = arith.constant 0 : i32
    %2 = arith.cmpi ne, %1, %c0_i32_0 : i32
    scf.if %2 {
      %c0_81 = arith.constant 0 : index
      %c0_82 = arith.constant 0 : index
      %c0_83 = arith.constant 0 : index
      %216 = vector.load %arg1[%c0_81, %c0_82, %c0_83] : memref<4x4x192xf32, #tpu.memory_space<vmem>>, vector<4x4x192xf32>
      %217 = vector.shape_cast %216 : vector<4x4x192xf32> to vector<16x192xf32>
      %218 = arith.truncf %217 : vector<16x192xf32> to vector<16x192xbf16>
      %c0_84 = arith.constant 0 : index
      %c0_85 = arith.constant 0 : index
      %219 = vector.load %arg2[%c0_84, %c0_85] : memref<192x32xbf16, #tpu.memory_space<vmem>>, vector<192x32xbf16>
      %cst_86 = arith.constant dense<0.000000e+00> : vector<16x32xf32>
      %220 = tpu.matmul %218, %219, %cst_86 {dimension_numbers = #tpu.dot_dimension_numbers<[1], [0], [0], [1], [0, 0, 1, 1], [], []>} : vector<16x192xbf16>, vector<192x32xbf16>, vector<16x32xf32> -> vector<16x32xf32>
      %c0_87 = arith.constant 0 : index
      %c0_88 = arith.constant 0 : index
      %221 = vector.load %arg4[%c0_87, %c0_88] : memref<5x32xf32, #tpu.memory_space<vmem>>, vector<5x32xf32>
      %222 = vector.shape_cast %220 : vector<16x32xf32> to vector<4x4x32xf32>
      %223 = vector.extract_strided_slice %221 {offsets = [1, 0], sizes = [4, 32], strides = [1, 1]} : vector<5x32xf32> to vector<4x32xf32>
      %224 = vector.shape_cast %223 : vector<4x32xf32> to vector<1x4x32xf32>
      %225 = vector.broadcast %224 : vector<1x4x32xf32> to vector<4x4x32xf32>
      %226 = arith.addf %222, %225 : vector<4x4x32xf32>
      %c0_89 = arith.constant 0 : index
      %c0_90 = arith.constant 0 : index
      %227 = vector.load %arg3[%c0_89, %c0_90] : memref<1x32xf32, #tpu.memory_space<vmem>>, vector<1x32xf32>
      %228 = vector.extract_strided_slice %221 {offsets = [0, 0], sizes = [1, 32], strides = [1, 1]} : vector<5x32xf32> to vector<1x32xf32>
      %229 = arith.addf %227, %228 : vector<1x32xf32>
      %230 = vector.shape_cast %229 : vector<1x32xf32> to vector<1x1x32xf32>
      %231 = vector.shape_cast %230 : vector<1x1x32xf32> to vector<1x1x32xf32>
      %232 = vector.broadcast %231 : vector<1x1x32xf32> to vector<4x1x32xf32>
      %c0_91 = arith.constant 0 : index
      %c0_92 = arith.constant 0 : index
      %233 = vector.load %arg5[%c0_91, %c0_92] : memref<1x32xf32, #tpu.memory_space<vmem>>, vector<1x32xf32>
      %c0_93 = arith.constant 0 : index
      %c0_94 = arith.constant 0 : index
      %234 = vector.load %arg6[%c0_93, %c0_94] : memref<1x32xf32, #tpu.memory_space<vmem>>, vector<1x32xf32>
      %cst_95 = arith.constant dense<0.000000e+00> : vector<4x1xf32>
      %235 = vector.multi_reduction <add>, %232, %cst_95 [2] : vector<4x1x32xf32> to vector<4x1xf32>
      %236 = vector.shape_cast %235 : vector<4x1xf32> to vector<4x1x1xf32>
      %cst_96 = arith.constant 3.200000e+01 : f32
      %237 = vector.broadcast %cst_96 : f32 to vector<4x1x1xf32>
      %238 = arith.divf %236, %237 : vector<4x1x1xf32>
      %239 = vector.broadcast %238 : vector<4x1x1xf32> to vector<4x1x32xf32>
      %240 = arith.subf %232, %239 : vector<4x1x32xf32>
      %241 = arith.mulf %240, %240 : vector<4x1x32xf32>
      %cst_97 = arith.constant dense<0.000000e+00> : vector<4x1xf32>
      %242 = vector.multi_reduction <add>, %241, %cst_97 [2] : vector<4x1x32xf32> to vector<4x1xf32>
      %243 = vector.shape_cast %242 : vector<4x1xf32> to vector<4x1x1xf32>
      %cst_98 = arith.constant 3.200000e+01 : f32
      %244 = vector.broadcast %cst_98 : f32 to vector<4x1x1xf32>
      %245 = arith.divf %243, %244 : vector<4x1x1xf32>
      %246 = vector.broadcast %238 : vector<4x1x1xf32> to vector<4x1x32xf32>
      %247 = arith.subf %232, %246 : vector<4x1x32xf32>
      %cst_99 = arith.constant 9.99999974E-6 : f32
      %248 = vector.broadcast %cst_99 : f32 to vector<4x1x1xf32>
      %249 = arith.addf %245, %248 : vector<4x1x1xf32>
      %250 = math.rsqrt %249 : vector<4x1x1xf32>
      %251 = vector.broadcast %250 : vector<4x1x1xf32> to vector<4x1x32xf32>
      %252 = arith.mulf %247, %251 : vector<4x1x32xf32>
      %253 = vector.shape_cast %233 : vector<1x32xf32> to vector<1x1x32xf32>
      %254 = vector.broadcast %253 : vector<1x1x32xf32> to vector<4x1x32xf32>
      %255 = arith.mulf %252, %254 : vector<4x1x32xf32>
      %256 = vector.shape_cast %234 : vector<1x32xf32> to vector<1x1x32xf32>
      %257 = vector.broadcast %256 : vector<1x1x32xf32> to vector<4x1x32xf32>
      %258 = arith.addf %255, %257 : vector<4x1x32xf32>
      %c0_100 = arith.constant 0 : index
      %c0_101 = arith.constant 0 : index
      %c0_102 = arith.constant 0 : index
      %259 = vector.load %arg19[%c0_100, %c0_101, %c0_102] : memref<4x5x32xf32, #tpu.memory_space<vmem>>, vector<4x1x32xf32>
      tpu.vector_store %arg19[%c0_100, %c0_101, %c0_102], %258 {strides = array<i32>} : memref<4x5x32xf32, #tpu.memory_space<vmem>>, vector<4x1x32xf32>,
      %cst_103 = arith.constant dense<0.000000e+00> : vector<4x4xf32>
      %260 = vector.multi_reduction <add>, %226, %cst_103 [2] : vector<4x4x32xf32> to vector<4x4xf32>
      %261 = vector.shape_cast %260 : vector<4x4xf32> to vector<4x4x1xf32>
      %cst_104 = arith.constant 3.200000e+01 : f32
      %262 = vector.broadcast %cst_104 : f32 to vector<4x4x1xf32>
      %263 = arith.divf %261, %262 : vector<4x4x1xf32>
      %264 = vector.broadcast %263 : vector<4x4x1xf32> to vector<4x4x32xf32>
      %265 = arith.subf %226, %264 : vector<4x4x32xf32>
      %266 = arith.mulf %265, %265 : vector<4x4x32xf32>
      %cst_105 = arith.constant dense<0.000000e+00> : vector<4x4xf32>
      %267 = vector.multi_reduction <add>, %266, %cst_105 [2] : vector<4x4x32xf32> to vector<4x4xf32>
      %268 = vector.shape_cast %267 : vector<4x4xf32> to vector<4x4x1xf32>
      %cst_106 = arith.constant 3.200000e+01 : f32
      %269 = vector.broadcast %cst_106 : f32 to vector<4x4x1xf32>
      %270 = arith.divf %268, %269 : vector<4x4x1xf32>
      %271 = vector.broadcast %263 : vector<4x4x1xf32> to vector<4x4x32xf32>
      %272 = arith.subf %226, %271 : vector<4x4x32xf32>
      %cst_107 = arith.constant 9.99999974E-6 : f32
      %273 = vector.broadcast %cst_107 : f32 to vector<4x4x1xf32>
      %274 = arith.addf %270, %273 : vector<4x4x1xf32>
      %275 = math.rsqrt %274 : vector<4x4x1xf32>
      %276 = vector.broadcast %275 : vector<4x4x1xf32> to vector<4x4x32xf32>
      %277 = arith.mulf %272, %276 : vector<4x4x32xf32>
      %278 = vector.shape_cast %233 : vector<1x32xf32> to vector<1x1x32xf32>
      %279 = vector.broadcast %278 : vector<1x1x32xf32> to vector<4x4x32xf32>
      %280 = arith.mulf %277, %279 : vector<4x4x32xf32>
      %281 = vector.shape_cast %234 : vector<1x32xf32> to vector<1x1x32xf32>
      %282 = vector.broadcast %281 : vector<1x1x32xf32> to vector<4x4x32xf32>
      %283 = arith.addf %280, %282 : vector<4x4x32xf32>
      %c0_108 = arith.constant 0 : index
      %c1 = arith.constant 1 : index
      %c0_109 = arith.constant 0 : index
      %284 = vector.load %arg19[%c0_108, %c1, %c0_109] : memref<4x5x32xf32, #tpu.memory_space<vmem>>, vector<4x4x32xf32>
      tpu.vector_store %arg19[%c0_108, %c1, %c0_109], %283 {strides = array<i32>} : memref<4x5x32xf32, #tpu.memory_space<vmem>>, vector<4x4x32xf32>,
    } else {
    }
    %c0 = arith.constant 0 : index
    %c0_1 = arith.constant 0 : index
    %c0_2 = arith.constant 0 : index
    %3 = vector.load %arg19[%c0, %c0_1, %c0_2] : memref<4x5x32xf32, #tpu.memory_space<vmem>>, vector<4x5x32xf32>
    %4 = vector.shape_cast %3 : vector<4x5x32xf32> to vector<20x32xf32>
    %c0_3 = arith.constant 0 : index
    %c0_4 = arith.constant 0 : index
    %c0_5 = arith.constant 0 : index
    %5 = vector.load %arg7[%c0_3, %c0_4, %c0_5] : memref<1x1x32xf32, #tpu.memory_space<vmem>>, vector<1x1x32xf32>
    %6 = vector.shape_cast %5 : vector<1x1x32xf32> to vector<1x32xf32>
    %c0_6 = arith.constant 0 : index
    %c0_7 = arith.constant 0 : index
    %c0_8 = arith.constant 0 : index
    %7 = vector.load %arg8[%c0_6, %c0_7, %c0_8] : memref<1x1x32xf32, #tpu.memory_space<vmem>>, vector<1x1x32xf32>
    %8 = vector.shape_cast %7 : vector<1x1x32xf32> to vector<1x32xf32>
    %c0_9 = arith.constant 0 : index
    %c0_10 = arith.constant 0 : index
    %c0_11 = arith.constant 0 : index
    %9 = vector.load %arg9[%c0_9, %c0_10, %c0_11] : memref<1x32x96xbf16, #tpu.memory_space<vmem>>, vector<1x32x96xbf16>
    %10 = vector.shape_cast %9 : vector<1x32x96xbf16> to vector<32x96xbf16>
    %c0_12 = arith.constant 0 : index
    %c0_13 = arith.constant 0 : index
    %c0_14 = arith.constant 0 : index
    %11 = vector.load %arg10[%c0_12, %c0_13, %c0_14] : memref<1x1x96xf32, #tpu.memory_space<vmem>>, vector<1x1x96xf32>
    %12 = vector.shape_cast %11 : vector<1x1x96xf32> to vector<1x96xf32>
    %c0_15 = arith.constant 0 : index
    %c0_16 = arith.constant 0 : index
    %c0_17 = arith.constant 0 : index
    %13 = vector.load %arg11[%c0_15, %c0_16, %c0_17] : memref<1x32x32xbf16, #tpu.memory_space<vmem>>, vector<1x32x32xbf16>
    %14 = vector.shape_cast %13 : vector<1x32x32xbf16> to vector<32x32xbf16>
    %c0_18 = arith.constant 0 : index
    %c0_19 = arith.constant 0 : index
    %c0_20 = arith.constant 0 : index
    %15 = vector.load %arg12[%c0_18, %c0_19, %c0_20] : memref<1x1x32xf32, #tpu.memory_space<vmem>>, vector<1x1x32xf32>
    %16 = vector.shape_cast %15 : vector<1x1x32xf32> to vector<1x32xf32>
    %c0_21 = arith.constant 0 : index
    %c0_22 = arith.constant 0 : index
    %c0_23 = arith.constant 0 : index
    %17 = vector.load %arg13[%c0_21, %c0_22, %c0_23] : memref<1x1x32xf32, #tpu.memory_space<vmem>>, vector<1x1x32xf32>
    %18 = vector.shape_cast %17 : vector<1x1x32xf32> to vector<1x32xf32>
    %c0_24 = arith.constant 0 : index
    %c0_25 = arith.constant 0 : index
    %c0_26 = arith.constant 0 : index
    %19 = vector.load %arg14[%c0_24, %c0_25, %c0_26] : memref<1x1x32xf32, #tpu.memory_space<vmem>>, vector<1x1x32xf32>
    %20 = vector.shape_cast %19 : vector<1x1x32xf32> to vector<1x32xf32>
    %c0_27 = arith.constant 0 : index
    %c0_28 = arith.constant 0 : index
    %c0_29 = arith.constant 0 : index
    %21 = vector.load %arg15[%c0_27, %c0_28, %c0_29] : memref<1x32x128xbf16, #tpu.memory_space<vmem>>, vector<1x32x128xbf16>
    %22 = vector.shape_cast %21 : vector<1x32x128xbf16> to vector<32x128xbf16>
    %c0_30 = arith.constant 0 : index
    %c0_31 = arith.constant 0 : index
    %c0_32 = arith.constant 0 : index
    %23 = vector.load %arg16[%c0_30, %c0_31, %c0_32] : memref<1x1x128xf32, #tpu.memory_space<vmem>>, vector<1x1x128xf32>
    %24 = vector.shape_cast %23 : vector<1x1x128xf32> to vector<1x128xf32>
    %c0_33 = arith.constant 0 : index
    %c0_34 = arith.constant 0 : index
    %c0_35 = arith.constant 0 : index
    %25 = vector.load %arg17[%c0_33, %c0_34, %c0_35] : memref<1x128x32xbf16, #tpu.memory_space<vmem>>, vector<1x128x32xbf16>
    %26 = vector.shape_cast %25 : vector<1x128x32xbf16> to vector<128x32xbf16>
    %c0_36 = arith.constant 0 : index
    %c0_37 = arith.constant 0 : index
    %c0_38 = arith.constant 0 : index
    %27 = vector.load %arg18[%c0_36, %c0_37, %c0_38] : memref<1x1x32xf32, #tpu.memory_space<vmem>>, vector<1x1x32xf32>
    %28 = vector.shape_cast %27 : vector<1x1x32xf32> to vector<1x32xf32>
    %cst = arith.constant dense<0.000000e+00> : vector<20xf32>
    %29 = vector.multi_reduction <add>, %4, %cst [1] : vector<20x32xf32> to vector<20xf32>
    %30 = vector.shape_cast %29 : vector<20xf32> to vector<20x1xf32>
    %cst_39 = arith.constant 3.200000e+01 : f32
    %31 = vector.broadcast %cst_39 : f32 to vector<20x1xf32>
    %32 = arith.divf %30, %31 : vector<20x1xf32>
    %33 = vector.broadcast %32 : vector<20x1xf32> to vector<20x32xf32>
    %34 = arith.subf %4, %33 : vector<20x32xf32>
    %35 = arith.mulf %34, %34 : vector<20x32xf32>
    %cst_40 = arith.constant dense<0.000000e+00> : vector<20xf32>
    %36 = vector.multi_reduction <add>, %35, %cst_40 [1] : vector<20x32xf32> to vector<20xf32>
    %37 = vector.shape_cast %36 : vector<20xf32> to vector<20x1xf32>
    %cst_41 = arith.constant 3.200000e+01 : f32
    %38 = vector.broadcast %cst_41 : f32 to vector<20x1xf32>
    %39 = arith.divf %37, %38 : vector<20x1xf32>
    %40 = vector.broadcast %32 : vector<20x1xf32> to vector<20x32xf32>
    %41 = arith.subf %4, %40 : vector<20x32xf32>
    %cst_42 = arith.constant 9.99999974E-6 : f32
    %42 = vector.broadcast %cst_42 : f32 to vector<20x1xf32>
    %43 = arith.addf %39, %42 : vector<20x1xf32>
    %44 = math.rsqrt %43 : vector<20x1xf32>
    %45 = vector.broadcast %44 : vector<20x1xf32> to vector<20x32xf32>
    %46 = arith.mulf %41, %45 : vector<20x32xf32>
    %47 = vector.broadcast %6 : vector<1x32xf32> to vector<20x32xf32>
    %48 = arith.mulf %46, %47 : vector<20x32xf32>
    %49 = vector.broadcast %8 : vector<1x32xf32> to vector<20x32xf32>
    %50 = arith.addf %48, %49 : vector<20x32xf32>
    %51 = arith.truncf %50 : vector<20x32xf32> to vector<20x32xbf16>
    %cst_43 = arith.constant dense<0.000000e+00> : vector<20x96xf32>
    %52 = tpu.matmul %51, %10, %cst_43 {dimension_numbers = #tpu.dot_dimension_numbers<[1], [0], [0], [1], [0, 0, 1, 1], [], []>} : vector<20x32xbf16>, vector<32x96xbf16>, vector<20x96xf32> -> vector<20x96xf32>
    %53 = vector.broadcast %12 : vector<1x96xf32> to vector<20x96xf32>
    %54 = arith.addf %52, %53 : vector<20x96xf32>
    %cst_44 = arith.constant 0.000000e+00 : f32
    %55 = vector.broadcast %cst_44 : f32 to vector<20x32xf32>
    %56 = vector.extract_strided_slice %54 {offsets = [0, 0], sizes = [20, 8], strides = [1, 1]} : vector<20x96xf32> to vector<20x8xf32>
    %57 = vector.shape_cast %56 : vector<20x8xf32> to vector<4x5x8xf32>
    %58 = vector.extract_strided_slice %54 {offsets = [0, 32], sizes = [20, 8], strides = [1, 1]} : vector<20x96xf32> to vector<20x8xf32>
    %59 = vector.shape_cast %58 : vector<20x8xf32> to vector<4x5x8xf32>
    %60 = vector.extract_strided_slice %54 {offsets = [0, 64], sizes = [20, 8], strides = [1, 1]} : vector<20x96xf32> to vector<20x8xf32>
    %61 = vector.shape_cast %60 : vector<20x8xf32> to vector<4x5x8xf32>
    %62 = arith.truncf %57 : vector<4x5x8xf32> to vector<4x5x8xbf16>
    %63 = arith.truncf %59 : vector<4x5x8xf32> to vector<4x5x8xbf16>
    "tpu.trace_start"() <{level = 10 : i32, message = "nqd,nkd->nqk"}> : () -> ()
    %cst_45 = arith.constant dense<0.000000e+00> : vector<4x5x5xf32>
    %64 = tpu.matmul %62, %63, %cst_45 {dimension_numbers = #tpu.dot_dimension_numbers<[2], [2], [1], [1], [0, 0, 0, 1, 1, 1], [0], [0]>} : vector<4x5x8xbf16>, vector<4x5x8xbf16>, vector<4x5x5xf32> -> vector<4x5x5xf32>
    "tpu.trace_stop"() : () -> ()
    %cst_46 = arith.constant 0.353553385 : f32
    %65 = vector.broadcast %cst_46 : f32 to vector<4x5x5xf32>
    %66 = arith.mulf %64, %65 : vector<4x5x5xf32>
    %cst_47 = arith.constant dense<0xFF800000> : vector<4x5xf32>
    %67 = vector.multi_reduction <maximumf>, %66, %cst_47 [2] : vector<4x5x5xf32> to vector<4x5xf32>
    %68 = vector.shape_cast %67 : vector<4x5xf32> to vector<4x5x1xf32>
    %69 = vector.broadcast %68 : vector<4x5x1xf32> to vector<4x5x5xf32>
    %70 = arith.subf %66, %69 : vector<4x5x5xf32>
    %71 = math.exp %70 : vector<4x5x5xf32>
    %cst_48 = arith.constant dense<0.000000e+00> : vector<4x5xf32>
    %72 = vector.multi_reduction <add>, %71, %cst_48 [2] : vector<4x5x5xf32> to vector<4x5xf32>
    %73 = vector.shape_cast %72 : vector<4x5xf32> to vector<4x5x1xf32>
    %74 = tpu.reciprocal %73 {approx = true} : vector<4x5x1xf32> -> vector<4x5x1xf32>
    %75 = vector.broadcast %74 : vector<4x5x1xf32> to vector<4x5x5xf32>
    %76 = arith.mulf %71, %75 : vector<4x5x5xf32>
    %77 = arith.truncf %76 : vector<4x5x5xf32> to vector<4x5x5xbf16>
    %78 = arith.truncf %61 : vector<4x5x8xf32> to vector<4x5x8xbf16>
    "tpu.trace_start"() <{level = 10 : i32, message = "nqk,nkd->nqd"}> : () -> ()
    %cst_49 = arith.constant dense<0.000000e+00> : vector<4x5x8xf32>
    %79 = tpu.matmul %77, %78, %cst_49 {dimension_numbers = #tpu.dot_dimension_numbers<[2], [1], [1], [2], [0, 0, 0, 1, 1, 2], [0], [0]>} : vector<4x5x5xbf16>, vector<4x5x8xbf16>, vector<4x5x8xf32> -> vector<4x5x8xf32>
    "tpu.trace_stop"() : () -> ()
    %80 = vector.shape_cast %79 : vector<4x5x8xf32> to vector<20x8xf32>
    %81 = arith.truncf %80 : vector<20x8xf32> to vector<20x8xbf16>
    %82 = vector.extract_strided_slice %14 {offsets = [0, 0], sizes = [8, 32], strides = [1, 1]} : vector<32x32xbf16> to vector<8x32xbf16>
    %cst_50 = arith.constant dense<0.000000e+00> : vector<20x32xf32>
    %83 = tpu.matmul %81, %82, %cst_50 {dimension_numbers = #tpu.dot_dimension_numbers<[1], [0], [0], [1], [0, 0, 1, 1], [], []>} : vector<20x8xbf16>, vector<8x32xbf16>, vector<20x32xf32> -> vector<20x32xf32>
    %84 = arith.addf %55, %83 : vector<20x32xf32>
    %85 = vector.extract_strided_slice %54 {offsets = [0, 8], sizes = [20, 8], strides = [1, 1]} : vector<20x96xf32> to vector<20x8xf32>
    %86 = vector.shape_cast %85 : vector<20x8xf32> to vector<4x5x8xf32>
    %87 = vector.extract_strided_slice %54 {offsets = [0, 40], sizes = [20, 8], strides = [1, 1]} : vector<20x96xf32> to vector<20x8xf32>
    %88 = vector.shape_cast %87 : vector<20x8xf32> to vector<4x5x8xf32>
    %89 = vector.extract_strided_slice %54 {offsets = [0, 72], sizes = [20, 8], strides = [1, 1]} : vector<20x96xf32> to vector<20x8xf32>
    %90 = vector.shape_cast %89 : vector<20x8xf32> to vector<4x5x8xf32>
    %91 = arith.truncf %86 : vector<4x5x8xf32> to vector<4x5x8xbf16>
    %92 = arith.truncf %88 : vector<4x5x8xf32> to vector<4x5x8xbf16>
    "tpu.trace_start"() <{level = 10 : i32, message = "nqd,nkd->nqk"}> : () -> ()
    %cst_51 = arith.constant dense<0.000000e+00> : vector<4x5x5xf32>
    %93 = tpu.matmul %91, %92, %cst_51 {dimension_numbers = #tpu.dot_dimension_numbers<[2], [2], [1], [1], [0, 0, 0, 1, 1, 1], [0], [0]>} : vector<4x5x8xbf16>, vector<4x5x8xbf16>, vector<4x5x5xf32> -> vector<4x5x5xf32>
    "tpu.trace_stop"() : () -> ()
    %cst_52 = arith.constant 0.353553385 : f32
    %94 = vector.broadcast %cst_52 : f32 to vector<4x5x5xf32>
    %95 = arith.mulf %93, %94 : vector<4x5x5xf32>
    %cst_53 = arith.constant dense<0xFF800000> : vector<4x5xf32>
    %96 = vector.multi_reduction <maximumf>, %95, %cst_53 [2] : vector<4x5x5xf32> to vector<4x5xf32>
    %97 = vector.shape_cast %96 : vector<4x5xf32> to vector<4x5x1xf32>
    %98 = vector.broadcast %97 : vector<4x5x1xf32> to vector<4x5x5xf32>
    %99 = arith.subf %95, %98 : vector<4x5x5xf32>
    %100 = math.exp %99 : vector<4x5x5xf32>
    %cst_54 = arith.constant dense<0.000000e+00> : vector<4x5xf32>
    %101 = vector.multi_reduction <add>, %100, %cst_54 [2] : vector<4x5x5xf32> to vector<4x5xf32>
    %102 = vector.shape_cast %101 : vector<4x5xf32> to vector<4x5x1xf32>
    %103 = tpu.reciprocal %102 {approx = true} : vector<4x5x1xf32> -> vector<4x5x1xf32>
    %104 = vector.broadcast %103 : vector<4x5x1xf32> to vector<4x5x5xf32>
    %105 = arith.mulf %100, %104 : vector<4x5x5xf32>
    %106 = arith.truncf %105 : vector<4x5x5xf32> to vector<4x5x5xbf16>
    %107 = arith.truncf %90 : vector<4x5x8xf32> to vector<4x5x8xbf16>
    "tpu.trace_start"() <{level = 10 : i32, message = "nqk,nkd->nqd"}> : () -> ()
    %cst_55 = arith.constant dense<0.000000e+00> : vector<4x5x8xf32>
    %108 = tpu.matmul %106, %107, %cst_55 {dimension_numbers = #tpu.dot_dimension_numbers<[2], [1], [1], [2], [0, 0, 0, 1, 1, 2], [0], [0]>} : vector<4x5x5xbf16>, vector<4x5x8xbf16>, vector<4x5x8xf32> -> vector<4x5x8xf32>
    "tpu.trace_stop"() : () -> ()
    %109 = vector.shape_cast %108 : vector<4x5x8xf32> to vector<20x8xf32>
    %110 = arith.truncf %109 : vector<20x8xf32> to vector<20x8xbf16>
    %111 = vector.extract_strided_slice %14 {offsets = [8, 0], sizes = [8, 32], strides = [1, 1]} : vector<32x32xbf16> to vector<8x32xbf16>
    %cst_56 = arith.constant dense<0.000000e+00> : vector<20x32xf32>
    %112 = tpu.matmul %110, %111, %cst_56 {dimension_numbers = #tpu.dot_dimension_numbers<[1], [0], [0], [1], [0, 0, 1, 1], [], []>} : vector<20x8xbf16>, vector<8x32xbf16>, vector<20x32xf32> -> vector<20x32xf32>
    %113 = arith.addf %84, %112 : vector<20x32xf32>
    %114 = vector.extract_strided_slice %54 {offsets = [0, 16], sizes = [20, 8], strides = [1, 1]} : vector<20x96xf32> to vector<20x8xf32>
    %115 = vector.shape_cast %114 : vector<20x8xf32> to vector<4x5x8xf32>
    %116 = vector.extract_strided_slice %54 {offsets = [0, 48], sizes = [20, 8], strides = [1, 1]} : vector<20x96xf32> to vector<20x8xf32>
    %117 = vector.shape_cast %116 : vector<20x8xf32> to vector<4x5x8xf32>
    %118 = vector.extract_strided_slice %54 {offsets = [0, 80], sizes = [20, 8], strides = [1, 1]} : vector<20x96xf32> to vector<20x8xf32>
    %119 = vector.shape_cast %118 : vector<20x8xf32> to vector<4x5x8xf32>
    %120 = arith.truncf %115 : vector<4x5x8xf32> to vector<4x5x8xbf16>
    %121 = arith.truncf %117 : vector<4x5x8xf32> to vector<4x5x8xbf16>
    "tpu.trace_start"() <{level = 10 : i32, message = "nqd,nkd->nqk"}> : () -> ()
    %cst_57 = arith.constant dense<0.000000e+00> : vector<4x5x5xf32>
    %122 = tpu.matmul %120, %121, %cst_57 {dimension_numbers = #tpu.dot_dimension_numbers<[2], [2], [1], [1], [0, 0, 0, 1, 1, 1], [0], [0]>} : vector<4x5x8xbf16>, vector<4x5x8xbf16>, vector<4x5x5xf32> -> vector<4x5x5xf32>
    "tpu.trace_stop"() : () -> ()
    %cst_58 = arith.constant 0.353553385 : f32
    %123 = vector.broadcast %cst_58 : f32 to vector<4x5x5xf32>
    %124 = arith.mulf %122, %123 : vector<4x5x5xf32>
    %cst_59 = arith.constant dense<0xFF800000> : vector<4x5xf32>
    %125 = vector.multi_reduction <maximumf>, %124, %cst_59 [2] : vector<4x5x5xf32> to vector<4x5xf32>
    %126 = vector.shape_cast %125 : vector<4x5xf32> to vector<4x5x1xf32>
    %127 = vector.broadcast %126 : vector<4x5x1xf32> to vector<4x5x5xf32>
    %128 = arith.subf %124, %127 : vector<4x5x5xf32>
    %129 = math.exp %128 : vector<4x5x5xf32>
    %cst_60 = arith.constant dense<0.000000e+00> : vector<4x5xf32>
    %130 = vector.multi_reduction <add>, %129, %cst_60 [2] : vector<4x5x5xf32> to vector<4x5xf32>
    %131 = vector.shape_cast %130 : vector<4x5xf32> to vector<4x5x1xf32>
    %132 = tpu.reciprocal %131 {approx = true} : vector<4x5x1xf32> -> vector<4x5x1xf32>
    %133 = vector.broadcast %132 : vector<4x5x1xf32> to vector<4x5x5xf32>
    %134 = arith.mulf %129, %133 : vector<4x5x5xf32>
    %135 = arith.truncf %134 : vector<4x5x5xf32> to vector<4x5x5xbf16>
    %136 = arith.truncf %119 : vector<4x5x8xf32> to vector<4x5x8xbf16>
    "tpu.trace_start"() <{level = 10 : i32, message = "nqk,nkd->nqd"}> : () -> ()
    %cst_61 = arith.constant dense<0.000000e+00> : vector<4x5x8xf32>
    %137 = tpu.matmul %135, %136, %cst_61 {dimension_numbers = #tpu.dot_dimension_numbers<[2], [1], [1], [2], [0, 0, 0, 1, 1, 2], [0], [0]>} : vector<4x5x5xbf16>, vector<4x5x8xbf16>, vector<4x5x8xf32> -> vector<4x5x8xf32>
    "tpu.trace_stop"() : () -> ()
    %138 = vector.shape_cast %137 : vector<4x5x8xf32> to vector<20x8xf32>
    %139 = arith.truncf %138 : vector<20x8xf32> to vector<20x8xbf16>
    %140 = vector.extract_strided_slice %14 {offsets = [16, 0], sizes = [8, 32], strides = [1, 1]} : vector<32x32xbf16> to vector<8x32xbf16>
    %cst_62 = arith.constant dense<0.000000e+00> : vector<20x32xf32>
    %141 = tpu.matmul %139, %140, %cst_62 {dimension_numbers = #tpu.dot_dimension_numbers<[1], [0], [0], [1], [0, 0, 1, 1], [], []>} : vector<20x8xbf16>, vector<8x32xbf16>, vector<20x32xf32> -> vector<20x32xf32>
    %142 = arith.addf %113, %141 : vector<20x32xf32>
    %143 = vector.extract_strided_slice %54 {offsets = [0, 24], sizes = [20, 8], strides = [1, 1]} : vector<20x96xf32> to vector<20x8xf32>
    %144 = vector.shape_cast %143 : vector<20x8xf32> to vector<4x5x8xf32>
    %145 = vector.extract_strided_slice %54 {offsets = [0, 56], sizes = [20, 8], strides = [1, 1]} : vector<20x96xf32> to vector<20x8xf32>
    %146 = vector.shape_cast %145 : vector<20x8xf32> to vector<4x5x8xf32>
    %147 = vector.extract_strided_slice %54 {offsets = [0, 88], sizes = [20, 8], strides = [1, 1]} : vector<20x96xf32> to vector<20x8xf32>
    %148 = vector.shape_cast %147 : vector<20x8xf32> to vector<4x5x8xf32>
    %149 = arith.truncf %144 : vector<4x5x8xf32> to vector<4x5x8xbf16>
    %150 = arith.truncf %146 : vector<4x5x8xf32> to vector<4x5x8xbf16>
    "tpu.trace_start"() <{level = 10 : i32, message = "nqd,nkd->nqk"}> : () -> ()
    %cst_63 = arith.constant dense<0.000000e+00> : vector<4x5x5xf32>
    %151 = tpu.matmul %149, %150, %cst_63 {dimension_numbers = #tpu.dot_dimension_numbers<[2], [2], [1], [1], [0, 0, 0, 1, 1, 1], [0], [0]>} : vector<4x5x8xbf16>, vector<4x5x8xbf16>, vector<4x5x5xf32> -> vector<4x5x5xf32>
    "tpu.trace_stop"() : () -> ()
    %cst_64 = arith.constant 0.353553385 : f32
    %152 = vector.broadcast %cst_64 : f32 to vector<4x5x5xf32>
    %153 = arith.mulf %151, %152 : vector<4x5x5xf32>
    %cst_65 = arith.constant dense<0xFF800000> : vector<4x5xf32>
    %154 = vector.multi_reduction <maximumf>, %153, %cst_65 [2] : vector<4x5x5xf32> to vector<4x5xf32>
    %155 = vector.shape_cast %154 : vector<4x5xf32> to vector<4x5x1xf32>
    %156 = vector.broadcast %155 : vector<4x5x1xf32> to vector<4x5x5xf32>
    %157 = arith.subf %153, %156 : vector<4x5x5xf32>
    %158 = math.exp %157 : vector<4x5x5xf32>
    %cst_66 = arith.constant dense<0.000000e+00> : vector<4x5xf32>
    %159 = vector.multi_reduction <add>, %158, %cst_66 [2] : vector<4x5x5xf32> to vector<4x5xf32>
    %160 = vector.shape_cast %159 : vector<4x5xf32> to vector<4x5x1xf32>
    %161 = tpu.reciprocal %160 {approx = true} : vector<4x5x1xf32> -> vector<4x5x1xf32>
    %162 = vector.broadcast %161 : vector<4x5x1xf32> to vector<4x5x5xf32>
    %163 = arith.mulf %158, %162 : vector<4x5x5xf32>
    %164 = arith.truncf %163 : vector<4x5x5xf32> to vector<4x5x5xbf16>
    %165 = arith.truncf %148 : vector<4x5x8xf32> to vector<4x5x8xbf16>
    "tpu.trace_start"() <{level = 10 : i32, message = "nqk,nkd->nqd"}> : () -> ()
    %cst_67 = arith.constant dense<0.000000e+00> : vector<4x5x8xf32>
    %166 = tpu.matmul %164, %165, %cst_67 {dimension_numbers = #tpu.dot_dimension_numbers<[2], [1], [1], [2], [0, 0, 0, 1, 1, 2], [0], [0]>} : vector<4x5x5xbf16>, vector<4x5x8xbf16>, vector<4x5x8xf32> -> vector<4x5x8xf32>
    "tpu.trace_stop"() : () -> ()
    %167 = vector.shape_cast %166 : vector<4x5x8xf32> to vector<20x8xf32>
    %168 = arith.truncf %167 : vector<20x8xf32> to vector<20x8xbf16>
    %169 = vector.extract_strided_slice %14 {offsets = [24, 0], sizes = [8, 32], strides = [1, 1]} : vector<32x32xbf16> to vector<8x32xbf16>
    %cst_68 = arith.constant dense<0.000000e+00> : vector<20x32xf32>
    %170 = tpu.matmul %168, %169, %cst_68 {dimension_numbers = #tpu.dot_dimension_numbers<[1], [0], [0], [1], [0, 0, 1, 1], [], []>} : vector<20x8xbf16>, vector<8x32xbf16>, vector<20x32xf32> -> vector<20x32xf32>
    %171 = arith.addf %142, %170 : vector<20x32xf32>
    %172 = arith.addf %4, %171 : vector<20x32xf32>
    %173 = vector.broadcast %16 : vector<1x32xf32> to vector<20x32xf32>
    %174 = arith.addf %172, %173 : vector<20x32xf32>
    %cst_69 = arith.constant dense<0.000000e+00> : vector<20xf32>
    %175 = vector.multi_reduction <add>, %174, %cst_69 [1] : vector<20x32xf32> to vector<20xf32>
    %176 = vector.shape_cast %175 : vector<20xf32> to vector<20x1xf32>
    %cst_70 = arith.constant 3.200000e+01 : f32
    %177 = vector.broadcast %cst_70 : f32 to vector<20x1xf32>
    %178 = arith.divf %176, %177 : vector<20x1xf32>
    %179 = vector.broadcast %178 : vector<20x1xf32> to vector<20x32xf32>
    %180 = arith.subf %174, %179 : vector<20x32xf32>
    %181 = arith.mulf %180, %180 : vector<20x32xf32>
    %cst_71 = arith.constant dense<0.000000e+00> : vector<20xf32>
    %182 = vector.multi_reduction <add>, %181, %cst_71 [1] : vector<20x32xf32> to vector<20xf32>
    %183 = vector.shape_cast %182 : vector<20xf32> to vector<20x1xf32>
    %cst_72 = arith.constant 3.200000e+01 : f32
    %184 = vector.broadcast %cst_72 : f32 to vector<20x1xf32>
    %185 = arith.divf %183, %184 : vector<20x1xf32>
    %186 = vector.broadcast %178 : vector<20x1xf32> to vector<20x32xf32>
    %187 = arith.subf %174, %186 : vector<20x32xf32>
    %cst_73 = arith.constant 9.99999974E-6 : f32
    %188 = vector.broadcast %cst_73 : f32 to vector<20x1xf32>
    %189 = arith.addf %185, %188 : vector<20x1xf32>
    %190 = math.rsqrt %189 : vector<20x1xf32>
    %191 = vector.broadcast %190 : vector<20x1xf32> to vector<20x32xf32>
    %192 = arith.mulf %187, %191 : vector<20x32xf32>
    %193 = vector.broadcast %18 : vector<1x32xf32> to vector<20x32xf32>
    %194 = arith.mulf %192, %193 : vector<20x32xf32>
    %195 = vector.broadcast %20 : vector<1x32xf32> to vector<20x32xf32>
    %196 = arith.addf %194, %195 : vector<20x32xf32>
    %197 = arith.truncf %196 : vector<20x32xf32> to vector<20x32xbf16>
    %cst_74 = arith.constant dense<0.000000e+00> : vector<20x128xf32>
    %198 = tpu.matmul %197, %22, %cst_74 {dimension_numbers = #tpu.dot_dimension_numbers<[1], [0], [0], [1], [0, 0, 1, 1], [], []>} : vector<20x32xbf16>, vector<32x128xbf16>, vector<20x128xf32> -> vector<20x128xf32>
    %199 = vector.broadcast %24 : vector<1x128xf32> to vector<20x128xf32>
    %200 = arith.addf %198, %199 : vector<20x128xf32>
    %cst_75 = arith.constant 1.702000e+00 : f32
    %201 = vector.broadcast %cst_75 : f32 to vector<20x128xf32>
    %202 = arith.mulf %201, %200 : vector<20x128xf32>
    %203 = arith.negf %202 : vector<20x128xf32>
    %204 = math.exp %203 : vector<20x128xf32>
    %cst_76 = arith.constant 1.000000e+00 : f32
    %205 = vector.broadcast %cst_76 : f32 to vector<20x128xf32>
    %206 = arith.addf %205, %204 : vector<20x128xf32>
    %207 = arith.divf %205, %206 : vector<20x128xf32>
    %208 = arith.mulf %200, %207 : vector<20x128xf32>
    %209 = arith.truncf %208 : vector<20x128xf32> to vector<20x128xbf16>
    %cst_77 = arith.constant dense<0.000000e+00> : vector<20x32xf32>
    %210 = tpu.matmul %209, %26, %cst_77 {dimension_numbers = #tpu.dot_dimension_numbers<[1], [0], [0], [1], [0, 0, 1, 1], [], []>} : vector<20x128xbf16>, vector<128x32xbf16>, vector<20x32xf32> -> vector<20x32xf32>
    %211 = vector.broadcast %28 : vector<1x32xf32> to vector<20x32xf32>
    %212 = arith.addf %210, %211 : vector<20x32xf32>
    %213 = arith.addf %174, %212 : vector<20x32xf32>
    %214 = vector.shape_cast %213 : vector<20x32xf32> to vector<4x5x32xf32>
    %c0_78 = arith.constant 0 : index
    %c0_79 = arith.constant 0 : index
    %c0_80 = arith.constant 0 : index
    %215 = vector.load %arg19[%c0_78, %c0_79, %c0_80] : memref<4x5x32xf32, #tpu.memory_space<vmem>>, vector<4x5x32xf32>
    tpu.vector_store %arg19[%c0_78, %c0_79, %c0_80], %214 {strides = array<i32>} : memref<4x5x32xf32, #tpu.memory_space<vmem>>, vector<4x5x32xf32>,
    return
  }
  func.func @transform_0(%arg0: i32) -> (i32, i32, i32) {
    %c0_i32 = arith.constant 0 : i32
    %c0_i32_0 = arith.constant 0 : i32
    %c0_i32_1 = arith.constant 0 : i32
    %c0_i32_2 = arith.constant 0 : i32
    return %c0_i32, %c0_i32_0, %c0_i32_1 : i32, i32, i32
  }
  func.func @transform_1(%arg0: i32) -> (i32, i32) {
    %c0_i32 = arith.constant 0 : i32
    %c0_i32_0 = arith.constant 0 : i32
    %c0_i32_1 = arith.constant 0 : i32
    return %c0_i32, %c0_i32_0 : i32, i32
  }
  func.func @transform_2(%arg0: i32) -> (i32, i32) {
    %c0_i32 = arith.constant 0 : i32
    %c0_i32_0 = arith.constant 0 : i32
    %c0_i32_1 = arith.constant 0 : i32
    return %c0_i32, %c0_i32_0 : i32, i32
  }
  func.func @transform_3(%arg0: i32) -> (i32, i32) {
    %c0_i32 = arith.constant 0 : i32
    %c0_i32_0 = arith.constant 0 : i32
    %c0_i32_1 = arith.constant 0 : i32
    return %c0_i32, %c0_i32_0 : i32, i32
  }
  func.func @transform_4(%arg0: i32) -> (i32, i32) {
    %c0_i32 = arith.constant 0 : i32
    %c0_i32_0 = arith.constant 0 : i32
    %c0_i32_1 = arith.constant 0 : i32
    return %c0_i32, %c0_i32_0 : i32, i32
  }
  func.func @transform_5(%arg0: i32) -> (i32, i32) {
    %c0_i32 = arith.constant 0 : i32
    %c0_i32_0 = arith.constant 0 : i32
    %c0_i32_1 = arith.constant 0 : i32
    return %c0_i32, %c0_i32_0 : i32, i32
  }
  func.func @transform_6(%arg0: i32) -> (i32, i32, i32) {
    %c0_i32 = arith.constant 0 : i32
    %c0_i32_0 = arith.constant 0 : i32
    %c0_i32_1 = arith.constant 0 : i32
    return %arg0, %c0_i32, %c0_i32_0 : i32, i32, i32
  }
  func.func @transform_7(%arg0: i32) -> (i32, i32, i32) {
    %c0_i32 = arith.constant 0 : i32
    %c0_i32_0 = arith.constant 0 : i32
    %c0_i32_1 = arith.constant 0 : i32
    return %arg0, %c0_i32, %c0_i32_0 : i32, i32, i32
  }
  func.func @transform_8(%arg0: i32) -> (i32, i32, i32) {
    %c0_i32 = arith.constant 0 : i32
    %c0_i32_0 = arith.constant 0 : i32
    %c0_i32_1 = arith.constant 0 : i32
    return %arg0, %c0_i32, %c0_i32_0 : i32, i32, i32
  }
  func.func @transform_9(%arg0: i32) -> (i32, i32, i32) {
    %c0_i32 = arith.constant 0 : i32
    %c0_i32_0 = arith.constant 0 : i32
    %c0_i32_1 = arith.constant 0 : i32
    return %arg0, %c0_i32, %c0_i32_0 : i32, i32, i32
  }
  func.func @transform_10(%arg0: i32) -> (i32, i32, i32) {
    %c0_i32 = arith.constant 0 : i32
    %c0_i32_0 = arith.constant 0 : i32
    %c0_i32_1 = arith.constant 0 : i32
    return %arg0, %c0_i32, %c0_i32_0 : i32, i32, i32
  }
  func.func @transform_11(%arg0: i32) -> (i32, i32, i32) {
    %c0_i32 = arith.constant 0 : i32
    %c0_i32_0 = arith.constant 0 : i32
    %c0_i32_1 = arith.constant 0 : i32
    return %arg0, %c0_i32, %c0_i32_0 : i32, i32, i32
  }
  func.func @transform_12(%arg0: i32) -> (i32, i32, i32) {
    %c0_i32 = arith.constant 0 : i32
    %c0_i32_0 = arith.constant 0 : i32
    %c0_i32_1 = arith.constant 0 : i32
    return %arg0, %c0_i32, %c0_i32_0 : i32, i32, i32
  }
  func.func @transform_13(%arg0: i32) -> (i32, i32, i32) {
    %c0_i32 = arith.constant 0 : i32
    %c0_i32_0 = arith.constant 0 : i32
    %c0_i32_1 = arith.constant 0 : i32
    return %arg0, %c0_i32, %c0_i32_0 : i32, i32, i32
  }
  func.func @transform_14(%arg0: i32) -> (i32, i32, i32) {
    %c0_i32 = arith.constant 0 : i32
    %c0_i32_0 = arith.constant 0 : i32
    %c0_i32_1 = arith.constant 0 : i32
    return %arg0, %c0_i32, %c0_i32_0 : i32, i32, i32
  }
  func.func @transform_15(%arg0: i32) -> (i32, i32, i32) {
    %c0_i32 = arith.constant 0 : i32
    %c0_i32_0 = arith.constant 0 : i32
    %c0_i32_1 = arith.constant 0 : i32
    return %arg0, %c0_i32, %c0_i32_0 : i32, i32, i32
  }
  func.func @transform_16(%arg0: i32) -> (i32, i32, i32) {
    %c0_i32 = arith.constant 0 : i32
    %c0_i32_0 = arith.constant 0 : i32
    %c0_i32_1 = arith.constant 0 : i32
    return %arg0, %c0_i32, %c0_i32_0 : i32, i32, i32
  }
  func.func @transform_17(%arg0: i32) -> (i32, i32, i32) {
    %c0_i32 = arith.constant 0 : i32
    %c0_i32_0 = arith.constant 0 : i32
    %c0_i32_1 = arith.constant 0 : i32
    return %arg0, %c0_i32, %c0_i32_0 : i32, i32, i32
  }
  func.func @transform_18(%arg0: i32) -> (i32, i32, i32) {
    %c0_i32 = arith.constant 0 : i32
    %c0_i32_0 = arith.constant 0 : i32
    %c0_i32_1 = arith.constant 0 : i32
    %c0_i32_2 = arith.constant 0 : i32
    return %c0_i32, %c0_i32_0, %c0_i32_1 : i32, i32, i32
  }
}

module attributes {stable_mosaic.version = 11 : i64} {
  func.func @_head_logits_kernel(%arg0: i32, %arg1: memref<4x32xf32, #tpu.memory_space<vmem>>, %arg2: memref<1x32xf32, #tpu.memory_space<vmem>>, %arg3: memref<1x32xf32, #tpu.memory_space<vmem>>, %arg4: memref<32x32xbf16, #tpu.memory_space<vmem>>, %arg5: memref<3x32xf32, #tpu.memory_space<vmem>>, %arg6: memref<1x32xf32, #tpu.memory_space<vmem>>, %arg7: memref<1x32xf32, #tpu.memory_space<vmem>>, %arg8: memref<32x32xbf16, #tpu.memory_space<vmem>>, %arg9: memref<1x1xf32, #tpu.memory_space<vmem>>, %arg10: memref<2x3xf32, #tpu.memory_space<vmem>>) attributes {dimension_semantics = [#tpu.dimension_semantics<arbitrary>], iteration_bounds = array<i64: 1>, scalar_prefetch = 0 : i64, scratch_operands = 0 : i64, tpu.core_type = #tpu.core_type<tc>, window_params = [{pipeline_mode = #tpu.pipeline_mode<synchronous>, transform_indices = @transform_0, window_bounds = array<i64: 4, 32>}, {pipeline_mode = #tpu.pipeline_mode<synchronous>, transform_indices = @transform_1, window_bounds = array<i64: 1, 32>}, {pipeline_mode = #tpu.pipeline_mode<synchronous>, transform_indices = @transform_2, window_bounds = array<i64: 1, 32>}, {pipeline_mode = #tpu.pipeline_mode<synchronous>, transform_indices = @transform_3, window_bounds = array<i64: 32, 32>}, {pipeline_mode = #tpu.pipeline_mode<synchronous>, transform_indices = @transform_4, window_bounds = array<i64: 3, 32>}, {pipeline_mode = #tpu.pipeline_mode<synchronous>, transform_indices = @transform_5, window_bounds = array<i64: 1, 32>}, {pipeline_mode = #tpu.pipeline_mode<synchronous>, transform_indices = @transform_6, window_bounds = array<i64: 1, 32>}, {pipeline_mode = #tpu.pipeline_mode<synchronous>, transform_indices = @transform_7, window_bounds = array<i64: 32, 32>}, {pipeline_mode = #tpu.pipeline_mode<synchronous>, transform_indices = @transform_8, window_bounds = array<i64: 1, 1>}, {pipeline_mode = #tpu.pipeline_mode<synchronous>, transform_indices = @transform_9, window_bounds = array<i64: 2, 3>}]} {
    %c0 = arith.constant 0 : index
    %c0_0 = arith.constant 0 : index
    %0 = vector.load %arg1[%c0, %c0_0] : memref<4x32xf32, #tpu.memory_space<vmem>>, vector<4x32xf32>
    %c0_1 = arith.constant 0 : index
    %c0_2 = arith.constant 0 : index
    %1 = vector.load %arg2[%c0_1, %c0_2] : memref<1x32xf32, #tpu.memory_space<vmem>>, vector<1x32xf32>
    %c0_3 = arith.constant 0 : index
    %c0_4 = arith.constant 0 : index
    %2 = vector.load %arg3[%c0_3, %c0_4] : memref<1x32xf32, #tpu.memory_space<vmem>>, vector<1x32xf32>
    %cst = arith.constant dense<0.000000e+00> : vector<4xf32>
    %3 = vector.multi_reduction <add>, %0, %cst [1] : vector<4x32xf32> to vector<4xf32>
    %4 = vector.shape_cast %3 : vector<4xf32> to vector<4x1xf32>
    %cst_5 = arith.constant 3.200000e+01 : f32
    %5 = vector.broadcast %cst_5 : f32 to vector<4x1xf32>
    %6 = arith.divf %4, %5 : vector<4x1xf32>
    %7 = vector.broadcast %6 : vector<4x1xf32> to vector<4x32xf32>
    %8 = arith.subf %0, %7 : vector<4x32xf32>
    %9 = arith.mulf %8, %8 : vector<4x32xf32>
    %cst_6 = arith.constant dense<0.000000e+00> : vector<4xf32>
    %10 = vector.multi_reduction <add>, %9, %cst_6 [1] : vector<4x32xf32> to vector<4xf32>
    %11 = vector.shape_cast %10 : vector<4xf32> to vector<4x1xf32>
    %cst_7 = arith.constant 3.200000e+01 : f32
    %12 = vector.broadcast %cst_7 : f32 to vector<4x1xf32>
    %13 = arith.divf %11, %12 : vector<4x1xf32>
    %14 = vector.broadcast %6 : vector<4x1xf32> to vector<4x32xf32>
    %15 = arith.subf %0, %14 : vector<4x32xf32>
    %cst_8 = arith.constant 9.99999974E-6 : f32
    %16 = vector.broadcast %cst_8 : f32 to vector<4x1xf32>
    %17 = arith.addf %13, %16 : vector<4x1xf32>
    %18 = math.rsqrt %17 : vector<4x1xf32>
    %19 = vector.broadcast %18 : vector<4x1xf32> to vector<4x32xf32>
    %20 = arith.mulf %15, %19 : vector<4x32xf32>
    %21 = vector.broadcast %1 : vector<1x32xf32> to vector<4x32xf32>
    %22 = arith.mulf %20, %21 : vector<4x32xf32>
    %23 = vector.broadcast %2 : vector<1x32xf32> to vector<4x32xf32>
    %24 = arith.addf %22, %23 : vector<4x32xf32>
    %25 = arith.truncf %24 : vector<4x32xf32> to vector<4x32xbf16>
    %c0_9 = arith.constant 0 : index
    %c0_10 = arith.constant 0 : index
    %26 = vector.load %arg4[%c0_9, %c0_10] : memref<32x32xbf16, #tpu.memory_space<vmem>>, vector<32x32xbf16>
    %cst_11 = arith.constant dense<0.000000e+00> : vector<4x32xf32>
    %27 = tpu.matmul %25, %26, %cst_11 {dimension_numbers = #tpu.dot_dimension_numbers<[1], [0], [0], [1], [0, 0, 1, 1], [], []>} : vector<4x32xbf16>, vector<32x32xbf16>, vector<4x32xf32> -> vector<4x32xf32>
    %28 = vector.shape_cast %27 : vector<4x32xf32> to vector<2x2x32xf32>
    %cst_12 = arith.constant dense<0.000000e+00> : vector<2x32xf32>
    %29 = vector.multi_reduction <add>, %28, %cst_12 [1] : vector<2x2x32xf32> to vector<2x32xf32>
    %cst_13 = arith.constant 2.000000e+00 : f32
    %30 = vector.broadcast %cst_13 : f32 to vector<2x32xf32>
    %31 = arith.divf %29, %30 : vector<2x32xf32>
    %c0_14 = arith.constant 0 : index
    %c0_15 = arith.constant 0 : index
    %32 = vector.load %arg5[%c0_14, %c0_15] : memref<3x32xf32, #tpu.memory_space<vmem>>, vector<3x32xf32>
    %c0_16 = arith.constant 0 : index
    %c0_17 = arith.constant 0 : index
    %33 = vector.load %arg6[%c0_16, %c0_17] : memref<1x32xf32, #tpu.memory_space<vmem>>, vector<1x32xf32>
    %c0_18 = arith.constant 0 : index
    %c0_19 = arith.constant 0 : index
    %34 = vector.load %arg7[%c0_18, %c0_19] : memref<1x32xf32, #tpu.memory_space<vmem>>, vector<1x32xf32>
    %cst_20 = arith.constant dense<0.000000e+00> : vector<3xf32>
    %35 = vector.multi_reduction <add>, %32, %cst_20 [1] : vector<3x32xf32> to vector<3xf32>
    %36 = vector.shape_cast %35 : vector<3xf32> to vector<3x1xf32>
    %cst_21 = arith.constant 3.200000e+01 : f32
    %37 = vector.broadcast %cst_21 : f32 to vector<3x1xf32>
    %38 = arith.divf %36, %37 : vector<3x1xf32>
    %39 = vector.broadcast %38 : vector<3x1xf32> to vector<3x32xf32>
    %40 = arith.subf %32, %39 : vector<3x32xf32>
    %41 = arith.mulf %40, %40 : vector<3x32xf32>
    %cst_22 = arith.constant dense<0.000000e+00> : vector<3xf32>
    %42 = vector.multi_reduction <add>, %41, %cst_22 [1] : vector<3x32xf32> to vector<3xf32>
    %43 = vector.shape_cast %42 : vector<3xf32> to vector<3x1xf32>
    %cst_23 = arith.constant 3.200000e+01 : f32
    %44 = vector.broadcast %cst_23 : f32 to vector<3x1xf32>
    %45 = arith.divf %43, %44 : vector<3x1xf32>
    %46 = vector.broadcast %38 : vector<3x1xf32> to vector<3x32xf32>
    %47 = arith.subf %32, %46 : vector<3x32xf32>
    %cst_24 = arith.constant 9.99999974E-6 : f32
    %48 = vector.broadcast %cst_24 : f32 to vector<3x1xf32>
    %49 = arith.addf %45, %48 : vector<3x1xf32>
    %50 = math.rsqrt %49 : vector<3x1xf32>
    %51 = vector.broadcast %50 : vector<3x1xf32> to vector<3x32xf32>
    %52 = arith.mulf %47, %51 : vector<3x32xf32>
    %53 = vector.broadcast %33 : vector<1x32xf32> to vector<3x32xf32>
    %54 = arith.mulf %52, %53 : vector<3x32xf32>
    %55 = vector.broadcast %34 : vector<1x32xf32> to vector<3x32xf32>
    %56 = arith.addf %54, %55 : vector<3x32xf32>
    %57 = arith.truncf %56 : vector<3x32xf32> to vector<3x32xbf16>
    %c0_25 = arith.constant 0 : index
    %c0_26 = arith.constant 0 : index
    %58 = vector.load %arg8[%c0_25, %c0_26] : memref<32x32xbf16, #tpu.memory_space<vmem>>, vector<32x32xbf16>
    %cst_27 = arith.constant dense<0.000000e+00> : vector<3x32xf32>
    %59 = tpu.matmul %57, %58, %cst_27 {dimension_numbers = #tpu.dot_dimension_numbers<[1], [0], [0], [1], [0, 0, 1, 1], [], []>} : vector<3x32xbf16>, vector<32x32xbf16>, vector<3x32xf32> -> vector<3x32xf32>
    %60 = arith.mulf %31, %31 : vector<2x32xf32>
    %cst_28 = arith.constant dense<0.000000e+00> : vector<2xf32>
    %61 = vector.multi_reduction <add>, %60, %cst_28 [1] : vector<2x32xf32> to vector<2xf32>
    %62 = vector.shape_cast %61 : vector<2xf32> to vector<2x1xf32>
    %63 = math.rsqrt %62 : vector<2x1xf32>
    %64 = vector.broadcast %63 : vector<2x1xf32> to vector<2x32xf32>
    %65 = arith.mulf %31, %64 : vector<2x32xf32>
    %66 = arith.mulf %59, %59 : vector<3x32xf32>
    %cst_29 = arith.constant dense<0.000000e+00> : vector<3xf32>
    %67 = vector.multi_reduction <add>, %66, %cst_29 [1] : vector<3x32xf32> to vector<3xf32>
    %68 = vector.shape_cast %67 : vector<3xf32> to vector<3x1xf32>
    %69 = math.rsqrt %68 : vector<3x1xf32>
    %70 = vector.broadcast %69 : vector<3x1xf32> to vector<3x32xf32>
    %71 = arith.mulf %59, %70 : vector<3x32xf32>
    %cst_30 = arith.constant dense<0.000000e+00> : vector<2x3xf32>
    %72 = tpu.matmul %65, %71, %cst_30 {dimension_numbers = #tpu.dot_dimension_numbers<[1], [1], [0], [0], [0, 0, 1, 0], [], []>} : vector<2x32xf32>, vector<3x32xf32>, vector<2x3xf32> -> vector<2x3xf32>
    %c0_31 = arith.constant 0 : index
    %c0_32 = arith.constant 0 : index
    %73 = vector.load %arg9[%c0_31, %c0_32] : memref<1x1xf32, #tpu.memory_space<vmem>>, vector<1x1xf32>
    %74 = math.exp %73 : vector<1x1xf32>
    %75 = vector.broadcast %74 : vector<1x1xf32> to vector<2x3xf32>
    %76 = arith.mulf %75, %72 : vector<2x3xf32>
    %c0_33 = arith.constant 0 : index
    %c0_34 = arith.constant 0 : index
    %77 = vector.load %arg10[%c0_33, %c0_34] : memref<2x3xf32, #tpu.memory_space<vmem>>, vector<2x3xf32>
    tpu.vector_store %arg10[%c0_33, %c0_34], %76 {strides = array<i32>} : memref<2x3xf32, #tpu.memory_space<vmem>>, vector<2x3xf32>,
    return
  }
  func.func @transform_0(%arg0: i32) -> (i32, i32) {
    %c0_i32 = arith.constant 0 : i32
    %c0_i32_0 = arith.constant 0 : i32
    %c0_i32_1 = arith.constant 0 : i32
    return %c0_i32, %c0_i32_0 : i32, i32
  }
  func.func @transform_1(%arg0: i32) -> (i32, i32) {
    %c0_i32 = arith.constant 0 : i32
    %c0_i32_0 = arith.constant 0 : i32
    %c0_i32_1 = arith.constant 0 : i32
    return %c0_i32, %c0_i32_0 : i32, i32
  }
  func.func @transform_2(%arg0: i32) -> (i32, i32) {
    %c0_i32 = arith.constant 0 : i32
    %c0_i32_0 = arith.constant 0 : i32
    %c0_i32_1 = arith.constant 0 : i32
    return %c0_i32, %c0_i32_0 : i32, i32
  }
  func.func @transform_3(%arg0: i32) -> (i32, i32) {
    %c0_i32 = arith.constant 0 : i32
    %c0_i32_0 = arith.constant 0 : i32
    %c0_i32_1 = arith.constant 0 : i32
    return %c0_i32, %c0_i32_0 : i32, i32
  }
  func.func @transform_4(%arg0: i32) -> (i32, i32) {
    %c0_i32 = arith.constant 0 : i32
    %c0_i32_0 = arith.constant 0 : i32
    %c0_i32_1 = arith.constant 0 : i32
    return %c0_i32, %c0_i32_0 : i32, i32
  }
  func.func @transform_5(%arg0: i32) -> (i32, i32) {
    %c0_i32 = arith.constant 0 : i32
    %c0_i32_0 = arith.constant 0 : i32
    %c0_i32_1 = arith.constant 0 : i32
    return %c0_i32, %c0_i32_0 : i32, i32
  }
  func.func @transform_6(%arg0: i32) -> (i32, i32) {
    %c0_i32 = arith.constant 0 : i32
    %c0_i32_0 = arith.constant 0 : i32
    %c0_i32_1 = arith.constant 0 : i32
    return %c0_i32, %c0_i32_0 : i32, i32
  }
  func.func @transform_7(%arg0: i32) -> (i32, i32) {
    %c0_i32 = arith.constant 0 : i32
    %c0_i32_0 = arith.constant 0 : i32
    %c0_i32_1 = arith.constant 0 : i32
    return %c0_i32, %c0_i32_0 : i32, i32
  }
  func.func @transform_8(%arg0: i32) -> (i32, i32) {
    %c0_i32 = arith.constant 0 : i32
    %c0_i32_0 = arith.constant 0 : i32
    %c0_i32_1 = arith.constant 0 : i32
    return %c0_i32, %c0_i32_0 : i32, i32
  }
  func.func @transform_9(%arg0: i32) -> (i32, i32) {
    %c0_i32 = arith.constant 0 : i32
    %c0_i32_0 = arith.constant 0 : i32
    %c0_i32_1 = arith.constant 0 : i32
    return %c0_i32, %c0_i32_0 : i32, i32
  }
}

</mosaic_0001>

<bundles_post_ra>
// kernel: custom_clip_forward.5
= control target key start
LH: loop header
LB: loop body
LE: loop exit
PB: predicated region body
PF: predicated region fallthrough
CT: control target
= control target key end

     0   :  { %s580_s0 = inlined_call_operand.vmem [shape: f32[4,32], index: 0, kind: input, shape index: {}]   ;;  %s581_s1 = inlined_call_operand.vmem [shape: f32[1,32], index: 1, kind: input, shape index: {}]   ;;  %s582_s2 = inlined_call_operand.vmem [shape: f32[1,32], index: 2, kind: input, shape index: {}]   ;;  %s583_s3 = inlined_call_operand.vmem [shape: bf16[32,32], index: 3, kind: input, shape index: {}]   ;;  %s584_s4 = inlined_call_operand.vmem [shape: f32[3,32], index: 4, kind: input, shape index: {}]   ;;  %s585_s5 = inlined_call_operand.vmem [shape: f32[1,32], index: 5, kind: input, shape index: {}]   ;;  %s586_s6 = inlined_call_operand.vmem [shape: f32[1,32], index: 6, kind: input, shape index: {}]   ;;  %s587_s7 = inlined_call_operand.vmem [shape: bf16[32,32], index: 7, kind: input, shape index: {}]   ;;  %s588_s8 = inlined_call_operand.<no memory space> [shape: f32[1,1], index: 8, kind: input, shape index: {}]   ;;  %s589_s9 = inlined_call_operand.hbm [shape: f32[2,3], index: 9, kind: output, shape index: {}]  }
   0x1   :  { %v14_v0 = vstv %s588_s8 }
   0x2   :  { %15 = vst [vmem:[#allocation2] sm:$0x1] %v14_v0 }
   0x3   :  { %v36_v1 = vld [vmem:[%s580_s0] sm:$0xf]  ;;  %vm39_vm0 = vcmask 257024   ;;  %vm161_vm1 = vcmask 256000  }
   0x4   :  { %v158_v2 = vld [vmem:[%s584_s4] sm:$0x7]  ;;  %v40_v3 = vsel %vm39_vm0, %v36_v1, 0.0 }
   0x5   :  { %v162_v4 = vsel %vm161_vm1, %v158_v2, 0.0  ;;  %41 = vadd.xlane.f32.xlu0 %v40_v3 }
   0x6   :  { %16 = vsyncpa [#allocation4], 0  ;;  %v427_v15 = vld [vmem:[%s583_s3] sm:$0xff]   ;;  %v465_v17 = vmov 0.0   ;;  %v428_v18 = vld [vmem:[%s583_s3 + $0x8] sm:$0xff]   ;;  %vm466_vm2 = vmmov 0   ;;  %v133_v42 = vlaneseq }
   0x7   :  { %v429_v16 = vld [vmem:[%s587_s7] sm:$0xff]   ;;  %400 = vmatprep.subr.bf16.mxu0 %v465_v17  ;;  %408 = vmatprep.subr.bf16.mxu1 %v465_v17  ;;  %v430_v19 = vld [vmem:[%s587_s7 + $0x8] sm:$0xff]   ;;  %vm85_vm3 = vcmask 261120   ;;  %v467_v40 = vmov 1983009808   ;;  %vm140_vm4 = vcmask 254976  }
   0x8   :  { %401 = vmatpush3.bf16.msra.mxu0 %v427_v15  ;;  %409 = vmatpush3.bf16.msra.mxu1 %v429_v16  ;;  %v380_v27 = vld [vmem:[%s581_s1] ss:$0 sm:$0xff]  ;;  %v131_v41 = vunpack.c.l.s4 %v467_v40  ;;  %v134_v44 = vshrl.u32 %v133_v42, 7  ;;  %vm253_vm5 = vcmask 1041409   ;;  %v468_v15 = vmov 0   ;;  %s469_s1 = smov [#allocation3]  }
   0x9   :  { %163 = vadd.xlane.f32.xlu0 %v162_v4  ;;  %402 = vmatprep.subr.bf16.mxu0 %v465_v17  ;;  %v381_v29 = vld [vmem:[%s582_s2] ss:$0 sm:$0xff]  ;;  %s372_s2 = sshll.u32 %s469_s1, 4  ;;  %vm364_vm6 = vcmask 17408   ;;  %s373_s2 = int_to_ptr.vmem [resolvable:$true] %s372_s2 }
   0xa   :  { %404 = vmatprep.mubr.msk.bf16.mxu0 %vm466_vm2, %v465_v17  ;;  %410 = vmatprep.subr.bf16.mxu1 %v465_v17  ;;  %v385_v32 = vld [vmem:[%s585_s5] ss:$0 sm:$0xff]  ;;  %v132_v43 = vunpack.c.0.s8 %v131_v41  ;;  %s441_s5 = scalar_lea.vmem %s373_s2, 32  ;;  %p446_p1 = scmp.lt.s32.totalorder %s373_s2, %s373_s2 }
   0xb   :  { %412 = vmatprep.mubr.msk.bf16.mxu1 %vm466_vm2, %v465_v17  ;;  %v386_v35 = vld [vmem:[%s586_s6] ss:$0 sm:$0xff]  ;;  %426 = vset.pattern.permute.xlu0 %v468_v15  ;;  %p442_p0 = scmp.ne.s32.totalorder %s373_s2, %s441_s5  ;;  %p447_p2 = scmp.lt.s32.totalorder %s441_s5, %s441_s5 }
   0xc   :  { %403 = vmatpush3.bf16.msra.mxu0 %v428_v18  ;;  %411 = vmatpush3.bf16.msra.mxu1 %v430_v19  ;;  %v135_v45 = vsub.s32 %v132_v43, %v134_v44 }
   0xd   :  { %416 = vmatprep.subr.mxu0 %v465_v17  ;;  %p448_p3 = por %p447_p2, %p446_p1 }
   0xf   :  { %p449_p4 = pnand %p448_p3, %p442_p0 }
  0x92   :  { %v42_v5 = vpop.xlane.xlu0 %41 }
  0x93   :  { %v44_v6 = vmul.f32 0.03125, %v42_v5 }
  0x95   :  { %v45_v7 = vsub.f32 %v36_v1, %v44_v6 }
  0x96   :  { %v164_v8 = vpop.xlane.xlu0 %163 }
  0x97   :  { %v165_v9 = vmul.f32 0.03125, %v164_v8  ;;  %v46_v10 = vmul.f32 %v45_v7, %v45_v7 }
  0x99   :  { %v166_v11 = vsub.f32 %v158_v2, %v165_v9  ;;  %v47_v12 = vsel %vm39_vm0, %v46_v10, 0.0 }
  0x9a   :  { %48 = vadd.xlane.f32.xlu1 %v47_v12 }
  0x9b   :  { %v167_v13 = vmul.f32 %v166_v11, %v166_v11 }
  0x9d   :  { %v168_v14 = vsel %vm161_vm1, %v167_v13, 0.0 }
  0x9e   :  { %169 = vadd.xlane.f32.xlu1 %v168_v14  ;;  %v351_v14 = vld [vmem:[#allocation2] sm:$0x1] }
  0x9f   :  { %v352_v16 = vmul.f32 1.442695, %v351_v14 }
 0x127   :  { %v49_v20 = vpop.xlane.xlu1 %48 }
 0x128   :  { %v50_v21 = vmul.f32 0.03125, %v49_v20 }
 0x12a   :  { %v51_v22 = vadd.f32 1e-05, %v50_v21 }
 0x12b   :  { %v170_v23 = vpop.xlane.xlu1 %169 }
 0x12c   :  { %431 = vrsqrt.f32 %v51_v22  ;;  %v171_v24 = vmul.f32 0.03125, %v170_v23 }
 0x12e   :  { %v172_v25 = vadd.f32 1e-05, %v171_v24 }
 0x130   :  { %433 = vrsqrt.f32 %v172_v25 }
 0x131   :  { %435 = vpow2.f32 %v352_v16 }
 0x136   :  { %v432_v26 = vpop.eup %431 }
 0x137   :  { %v53_v28 = vmul.f32 %v432_v26, %v45_v7 }
 0x139   :  { %v60_v30 = vmul.f32 %v380_v27, %v53_v28 }
 0x13a   :  { %v434_v31 = vpop.eup %433 }
 0x13b   :  { %v67_v33 = vadd.f32 %v381_v29, %v60_v30  ;;  %v174_v34 = vmul.f32 %v434_v31, %v166_v11  ;;  %v436_v18 = vpop.eup %435 }
 0x13d   :  { %v68_v36 = vpack.c.bf16 %v67_v33, %v67_v33  ;;  %v181_v37 = vmul.f32 %v385_v32, %v174_v34 }
 0x13f   :  { %405 = vmatmul.mubr.msk.bf16.vlgmr.msra.gmra.mrb[0].mxu0 %vm85_vm3, %v68_v36  ;;  %v188_v38 = vadd.f32 %v386_v35, %v181_v37 }
 0x140   :  { %418 = vmatprep.mubr.msk.f32.mxu0 %vm466_vm2, %v465_v17  ;;  %v357_v17 = vsub.s32 0, %v134_v44 }
 0x141   :  { %v189_v39 = vpack.c.bf16 %v188_v38, %v188_v38 }
 0x142   :  { %v358_v19 = vrot.slane %v436_v18, %v357_v17 }
 0x143   :  { %413 = vmatmul.mubr.msk.bf16.vlgmr.msra.gmra.mrb[0].mxu1 %vm85_vm3, %v189_v39 }
 0x212   :  { %v123_v46 = vpop.f32.mrb[0].mxu0 }
 0x213   :  { %v136_v47 = vrot.slane %v123_v46, %v135_v45  ;;  %v406_v48 = vpop.f32.mrb[1].mxu0 }
 0x214   :  { %v126_v49 = vpop.f32.mrb[2].mxu0 }
 0x215   :  { %v137_v50 = vcombine.high %v136_v47, %v136_v47  ;;  %v141_v51 = vsel %vm140_vm4, %v136_v47, 0.0  ;;  %v407_v52 = vpop.f32.mrb[3].mxu0 }
 0x216   :  { %v142_v53 = vrot.slane %v141_v51, 4  ;;  %v243_v54 = vpop.f32.mrb[0].mxu1 }
 0x217   :  { %v148_v55 = vsel %vm140_vm4, %v137_v50, 0.0  ;;  %v266_v56 = vmul.f32 %v243_v54, %v243_v54  ;;  %v414_v57 = vpop.f32.mrb[1].mxu1 }
 0x218   :  { %v143_v58 = vadd.f32 %v142_v53, %v141_v51  ;;  %v149_v59 = vrot.slane %v148_v55, 4  ;;  %v246_v60 = vpop.f32.mrb[2].mxu1 }
 0x219   :  { %v415_v61 = vpop.f32.mrb[3].mxu1  ;;  %v267_v62 = vsel %vm161_vm1, %v266_v56, 0.0 }
 0x21a   :  { %v144_v63 = vrot.slane %v143_v58, 2  ;;  %v150_v0 = vadd.f32 %v149_v59, %v148_v55  ;;  %268 = vadd.xlane.f32.xlu1 %v267_v62 }
 0x21c   :  { %v145_v1 = vadd.f32 %v144_v63, %v143_v58  ;;  %v151_v2 = vrot.slane %v150_v0, 2 }
 0x21e   :  { %v146_v3 = vrot.slane %v145_v1, 1  ;;  %v152_v4 = vadd.f32 %v151_v2, %v150_v0 }
 0x220   :  { %v147_v5 = vadd.f32 %v146_v3, %v145_v1  ;;  %v153_v6 = vrot.slane %v152_v4, 1 }
 0x222   :  { %v154_v7 = vadd.f32 %v153_v6, %v152_v4  ;;  %v156_v8 = vmul.f32 0.5, %v147_v5 }
 0x224   :  { %v157_v9 = vmul.f32 0.5, %v154_v7  ;;  %v249_v10 = vmul.f32 %v156_v8, %v156_v8 }
 0x226   :  { %v250_v11 = vmul.f32 %v157_v9, %v157_v9 }
 0x228   :  { %v254_v12 = vsel %vm253_vm5, %v250_v11, %v249_v10 }
 0x229   :  { %v256_v13 = vsel %vm140_vm4, %v254_v12, 0.0 }
 0x22a   :  { %257 = vadd.xlane.f32.xlu0 %v256_v13 }
 0x240   :  { %360 = vperm.xlu0 %426, %v358_v19  }
 0x2a7   :  { %v269_v20 = vpop.xlane.xlu1 %268 }
 0x2a8   :  { %437 = vrsqrt.f32 %v269_v20 }
 0x2b2   :  { %v438_v21 = vpop.eup %437 }
 0x2b3   :  { %v271_v22 = vmul.f32 %v438_v21, %v243_v54 }
 0x2b5   :  { %417 = vmatpush3.xpose.msk.msra.mxu0 %vm85_vm3, %v271_v22 }
 0x2b7   :  { %v258_v23 = vpop.xlane.xlu0 %257 }
 0x2b8   :  { %439 = vrsqrt.f32 %v258_v23 }
 0x2bf   :  { %v361_v30 = vpop.permute.xlu0 %360 }
 0x2c2   :  { %v440_v24 = vpop.eup %439 }
 0x2c3   :  { %v261_v25 = vrot.slane %v440_v24, 1  ;;  %v264_v27 = vmul.f32 %v440_v24, %v156_v8 }
 0x2c5   :  { %v265_v26 = vmul.f32 %v261_v25, %v157_v9 }
 0x2c7   :  { %v274_v28 = vrot.slane %v265_v26, 7 }
 0x2c9   :  { %v275_v29 = vsel %vm253_vm5, %v274_v28, %v264_v27 }
 0x2ca   :  { %419 = vmatmul.mubr.msk.f32.vlgmr.msra.gmra.mrb[4].mxu0 %vm85_vm3, %v275_v29 }
 0x39d   :  { %v347_v31 = vpop.f32.mrb[4].mxu0 }
 0x39e   :  { %v363_v32 = vmul.f32 %v361_v30, %v347_v31  ;;  %v420_v33 = vpop.f32.mrb[5].mxu0 }
 0x3a0   :  { %365 = vst.msk [vmem:[#allocation3] sm:$0x3] %vm364_vm6, %v363_v32 }
 0x3a1   :  { %452 = shalt.err (!%p449_p4)
}
 0x3a2   :  { %s453_s27 = scalar_lea.hbm %s589_s9, 32 }
 0x3a3   :  { %p454_p5 = scmp.ne.s32.totalorder %s589_s9, %s453_s27  ;;  %p457_p6 = scmp.lt.u32.totalorder %s453_s27, %s589_s9 }
 0x3a5   :  { %p459_p7 = pnand %p457_p6, %p454_p5 }
 0x3a7   :  { %462 = shalt.err (!%p459_p7)
}
 0x3a8   :  { %375 = dma.vmem_to_hbm [thread:$0]  %s373_s2, 32, %s589_s9, [#allocation4]  }
 0x3a9   :  { %463 = dma.done.wait [#allocation4], 32  }
 0x3aa   :  { %464 = vsyncadd [#allocation4], 4294967264 }
 0x3ab   :  { %379 = vsyncpa [#allocation4], 1 }

// kernel: custom_clip_forward.4
= control target key start
LH: loop header
LB: loop body
LE: loop exit
PB: predicated region body
PF: predicated region fallthrough
CT: control target
= control target key end

     0   :  { %s3387_s29 = smov 0   ;;  %s3856_s0 = inlined_call_operand.vmem [shape: f32[3,8,32], index: 0, kind: input, shape index: {}]   ;;  %s3857_s1 = inlined_call_operand.vmem [shape: f32[8,32], index: 1, kind: input, shape index: {}]   ;;  %s3858_s2 = inlined_call_operand.vmem [shape: f32[2,1,32], index: 2, kind: input, shape index: {}]   ;;  %s3859_s3 = inlined_call_operand.vmem [shape: f32[2,1,32], index: 3, kind: input, shape index: {}]   ;;  %s3860_s4 = inlined_call_operand.vmem [shape: bf16[2,32,96], index: 4, kind: input, shape index: {}]   ;;  %s3861_s5 = inlined_call_operand.vmem [shape: f32[2,1,96], index: 5, kind: input, shape index: {}]   ;;  %s3862_s6 = inlined_call_operand.vmem [shape: bf16[2,32,32], index: 6, kind: input, shape index: {}]   ;;  %s3863_s7 = inlined_call_operand.vmem [shape: f32[2,1,32], index: 7, kind: input, shape index: {}]   ;;  %s3864_s8 = inlined_call_operand.vmem [shape: f32[2,1,32], index: 8, kind: input, shape index: {}]   ;;  %s3865_s9 = inlined_call_operand.vmem [shape: f32[2,1,32], index: 9, kind: input, shape index: {}]   ;;  %s3866_s10 = inlined_call_operand.vmem [shape: bf16[2,32,128], index: 10, kind: input, shape index: {}]   ;;  %s3867_s11 = inlined_call_operand.vmem [shape: f32[2,1,128], index: 11, kind: input, shape index: {}]   ;;  %s3868_s12 = inlined_call_operand.vmem [shape: bf16[2,128,32], index: 12, kind: input, shape index: {}]   ;;  %s3869_s13 = inlined_call_operand.vmem [shape: f32[2,1,32], index: 13, kind: input, shape index: {}]   ;;  %s3870_s14 = inlined_call_operand.vmem [shape: f32[3,8,32], index: 14, kind: output, shape index: {}]  }
   0x1   :  { %3873 = sst [smem:[#allocation4_spill]] %s3858_s2 }
   0x2   :  { %3874 = sst [smem:[#allocation5_spill]] %s3859_s3 }
   0x3   :  { %3875 = sst [smem:[#allocation6_spill]] %s3860_s4 }
   0x4   :  { %3876 = sst [smem:[#allocation7_spill]] %s3862_s6 }
   0x5 LB: > { %3877 = sst [smem:[#allocation2_spill]] %s3297_s29  ;;  %s2819_s30 = sadd.s32 4294967295, %s3297_s29   ;;  %s3297_s29 = sphi %s3387_s29, %s24_s29  }
   0x6   : > { %p2822_p0 = scmp.ge.s32.totalorder %s3297_s29, 1  ;;  %p501_p1 = scmp.lt.s32.totalorder %s3297_s29, 3 }
   0x8   : > { %p502_p2 = pnand %p2822_p0, %p501_p1 }
   0xa   : > { %505 = sbr.rel (%p502_p2) target bundleno = 4556 (0x11cc), region = 76 }
  0x11   : > { %p581_p3 = scmp.lt.s32.totalorder %s2819_s30, 1  ;;  %s3880_s4 = sld [smem:[#allocation6_spill]] }
  0x12   : > { %s3881_s6 = sld [smem:[#allocation7_spill]]  ;;  %p2831_p4 = scmp.ne.s32.totalorder %s2819_s30, 0 }
  0x13   : > { %s3395_s15 = scalar_select %p581_p3, %s2819_s30, 1 }
  0x14   : > { %629 = sbr.rel (%p2831_p4) target bundleno = 27 (0x1b), region = 80  ;;  %v630_v0 = vld [vmem:[%s3856_s0] sm:$0xff] (!%p2831_p4)  ;;  %vm637_vm0 = vcmask (!%p2831_p4), 261120   ;;  %v631_v2 = vld [vmem:[%s3856_s0 + $0x8] sm:$0xff] (!%p2831_p4)  ;;  %v632_v5 = vld [vmem:[%s3856_s0 + $0x10] sm:$0xff] (!%p2831_p4) }
  0x15   : > { %s2893_s22 = sshll.u32 %s3395_s15, 4  ;;  %s605_s3 = scalar_lea.vmem %s3864_s8, %s3395_s15  ;;  %v633_v1 = vld [vmem:[%s3857_s1] sm:$0xff] (!%p2831_p4) }
  0x16   : > { %s608_s25 = scalar_lea.vmem %s3865_s9, %s3395_s15  ;;  %s624_s23 = scalar_lea.vmem %s3869_s13, %s3395_s15  ;;  %v634_v3 = vadd.f32 (!%p2831_p4), %v633_v1, %v630_v0  ;;  %v635_v4 = vadd.f32 (!%p2831_p4), %v633_v1, %v631_v2  ;;  %v636_v6 = vadd.f32 (!%p2831_p4), %v633_v1, %v632_v5 }
  0x17   : > { %s3413_s28 = scalar_lea.vmem %s3880_s4, %s2893_s22  ;;  %s3435_s4 = scalar_lea.vmem %s3866_s10, %s2893_s22 }
  0x18   : > { %s3418_s29 = scalar_lea.vmem %s3881_s6, %s2893_s22  ;;  %s616_s6 = scalar_lea.vmem %s3867_s11, %s3395_s15  ;;  %638 = vst.msk [vmem:[%s3870_s14] sm:$0xff] (!%p2831_p4), %vm637_vm0, %v634_v3  ;;  %639 = vst.msk [vmem:[%s3870_s14 + $0x8] sm:$0xff] (!%p2831_p4), %vm637_vm0, %v635_v4 }
  0x19   : > { %3882 = sst [smem:[#allocation3_spill]] %s3418_s29  ;;  %s2896_s29 = sshll.u32 %s3395_s15, 6  ;;  %640 = vst.msk [vmem:[%s3870_s14 + $0x10] sm:$0xff] (!%p2831_p4), %vm637_vm0, %v636_v6 }
  0x1a   : > { %s3445_s19 = scalar_lea.vmem %s3868_s12, %s2896_s29 }
  0x1b PF: > { %vm680_vm1 = vcmask 261120   ;;  %v3204_v28 = vld [vmem:[%s3413_s28] sm:$0xff]   ;;  %v3205_v29 = vld [vmem:[%s3413_s28 + $0x8] sm:$0xff]   ;;  %s3883_s18 = sld [smem:[#allocation4_spill]]  ;;  %s3885_s26 = sld [smem:[#allocation5_spill]]  ;;  %v3299_v55 = vmov 0.0  }
  0x1c   : > { %2975 = vmatprep.subr.bf16.mxu1 %v3204_v28  ;;  %3001 = vmatprep.subr.bf16.mxu0 %v3299_v55  ;;  %s3887_s17 = scalar_lea.vmem %s3861_s5, %s3395_s15  ;;  %vm3300_vm2 = vmmov 0   ;;  %s3301_s29 = smov 96   ;;  %vm824_vm3 = vcmask 64512   ;;  %vm1016_vm5 = vcmask 1043456  }
  0x1d   : > { %2976 = vmatpush3.bf16.msra.mxu1 %v3204_v28  ;;  %v2834_v56 = vld [vmem:[%s3887_s17] ss:$0 sm:$0xff]  ;;  %3003 = vmatprep.mubr.msk.bf16.mxu0 %vm3300_vm2, %v3299_v55  ;;  %s3302_s2 = smov 64   ;;  %s3303_s28 = smov 88  }
  0x1e   : > { %2977 = vmatprep.subr.bf16.mxu1 %v3205_v29  ;;  %s3304_s30 = smov 120   ;;  %s3307_s20 = smov 112  }
  0x1f   : > { %v641_v7 = vld [vmem:[%s3870_s14] sm:$0xff]  ;;  %v642_v9 = vld [vmem:[%s3870_s14 + $0x8] sm:$0xff]  ;;  %s3890_s24 = sld [smem:[#allocation3_spill]]  ;;  %s3310_s27 = smov 104  }
  0x20   : > { %v643_v8 = vld [vmem:[%s3870_s14 + $0x10] sm:$0xff]  ;;  %v681_v10 = vsel %vm680_vm1, %v641_v7, 0.0  ;;  %v684_v12 = vsel %vm680_vm1, %v642_v9, 0.0  ;;  %s3311_s16 = smov 40  }
  0x21   : > { %v687_v11 = vsel %vm680_vm1, %v643_v8, 0.0  ;;  %682 = vadd.xlane.f32.xlu0 %v681_v10  ;;  %2978 = vmatpush3.bf16.msra.mxu1 %v3205_v29  ;;  %s3884_s21 = scalar_lea.vmem %s3883_s18, %s3395_s15  ;;  %s3886_s22 = scalar_lea.vmem %s3885_s26, %s3395_s15 }
  0x22   : > { %688 = vadd.xlane.f32.xlu1 %v687_v11  ;;  %v2832_v41 = vld [vmem:[%s3884_s21] ss:$0 sm:$0xff]  ;;  %2983 = vmatprep.subr.bf16.mxu1 %v3299_v55  ;;  %s3305_s18 = smov 56   ;;  %s3306_s21 = smov 80  }
  0x23   : > { %v2833_v47 = vld [vmem:[%s3886_s22] ss:$0 sm:$0xff]  ;;  %s3308_s26 = smov 48   ;;  %s3309_s22 = smov 72  }
  0x25   : > { %685 = vadd.xlane.f32.xlu0 %v684_v12 }
  0xae   : > { %v683_v13 = vpop.xlane.xlu0 %682 }
  0xaf   : > { %v689_v14 = vpop.xlane.xlu1 %688  ;;  %v691_v15 = vmul.f32 0.03125, %v683_v13 }
  0xb0   : > { %v693_v16 = vmul.f32 0.03125, %v689_v14 }
  0xb1   : > { %v694_v17 = vsub.f32 %v641_v7, %v691_v15 }
  0xb2   : > { %v696_v18 = vsub.f32 %v643_v8, %v693_v16  ;;  %v686_v19 = vpop.xlane.xlu0 %685 }
  0xb3   : > { %v692_v20 = vmul.f32 0.03125, %v686_v19  ;;  %v697_v21 = vmul.f32 %v694_v17, %v694_v17 }
  0xb4   : > { %v699_v22 = vmul.f32 %v696_v18, %v696_v18 }
  0xb5   : > { %v695_v23 = vsub.f32 %v642_v9, %v692_v20  ;;  %v700_v24 = vsel %vm680_vm1, %v697_v21, 0.0  ;;  %v813_v9 = vlaneseq }
  0xb6   : > { %701 = vadd.xlane.f32.xlu1 %v700_v24  ;;  %v706_v25 = vsel %vm680_vm1, %v699_v22, 0.0 }
  0xb7   : > { %v698_v26 = vmul.f32 %v695_v23, %v695_v23  ;;  %v814_v10 = vshrl.u32 %v813_v9, 7  ;;  %v816_v11 = vand.u32 127, %v813_v9 }
  0xb9   : > { %v703_v27 = vsel %vm680_vm1, %v698_v26, 0.0  ;;  %vm3539_vm4 = vcmp.le.s32.totalorder %v816_v11, %v814_v10 }
  0xba   : > { %707 = vadd.xlane.f32.xlu1 %v706_v25  ;;  %704 = vadd.xlane.f32.xlu0 %v703_v27 }
 0x143   : > { %v702_v30 = vpop.xlane.xlu1 %701 }
 0x144   : > { %v709_v31 = vmul.f32 0.03125, %v702_v30 }
 0x146   : > { %v712_v32 = vadd.f32 1e-05, %v709_v31 }
 0x147   : > { %v708_v33 = vpop.xlane.xlu1 %707  ;;  %v705_v34 = vpop.xlane.xlu0 %704 }
 0x148   : > { %3216 = vrsqrt.f32 %v712_v32  ;;  %v711_v35 = vmul.f32 0.03125, %v708_v33  ;;  %v710_v36 = vmul.f32 0.03125, %v705_v34 }
 0x14a   : > { %v714_v37 = vadd.f32 1e-05, %v711_v35  ;;  %v713_v38 = vadd.f32 1e-05, %v710_v36 }
 0x14c   : > { %3218 = vrsqrt.f32 %v714_v37 }
 0x14d   : > { %3220 = vrsqrt.f32 %v713_v38 }
 0x152   : > { %v3217_v39 = vpop.eup %3216 }
 0x153   : > { %v718_v40 = vmul.f32 %v3217_v39, %v694_v17 }
 0x155   : > { %v727_v46 = vmul.f32 %v2832_v41, %v718_v40 }
 0x156   : > { %v3219_v42 = vpop.eup %3218 }
 0x157   : > { %v3221_v43 = vpop.eup %3220  ;;  %v720_v44 = vmul.f32 %v3219_v42, %v696_v18  ;;  %v736_v51 = vadd.f32 %v2833_v47, %v727_v46 }
 0x158   : > { %v719_v45 = vmul.f32 %v3221_v43, %v695_v23 }
 0x159   : > { %v729_v48 = vmul.f32 %v2832_v41, %v720_v44 }
 0x15a   : > { %v728_v49 = vmul.f32 %v2832_v41, %v719_v45 }
 0x15b   : > { %v738_v50 = vadd.f32 %v2833_v47, %v729_v48 }
 0x15c   : > { %v737_v52 = vadd.f32 %v2833_v47, %v728_v49 }
 0x15d   : > { %v740_v53 = vpack.c.bf16 %v738_v50, %v738_v50 }
 0x15e   : > { %v739_v54 = vpack.c.bf16 %v737_v52, %v736_v51 }
 0x160   : > { %2979 = vmatprep.mubr.msk.bf16.mxu1 %vm680_vm1, %v739_v54 }
 0x161   : > { %2980 = vmatmul.mubr.msk.bf16.vlgmr.msra.gmra.mrb[0].mxu1 %vm680_vm1, %v740_v53 }
 0x162   : > { %2985 = vmatprep.mubr.msk.bf16.mxu1 %vm3300_vm2, %v3299_v55 }
 0x234   : > { %v2981_v57 = vpop.f32.mrb[0].mxu1 }
 0x235   : > { %v799_v58 = vpop.f32.mrb[1].mxu1  ;;  %v808_v0 = vadd.f32 %v2981_v57, %v2834_v56 }
 0x236   : > { %v800_v59 = vadd.f32 %v2834_v56, %v799_v58  ;;  %v2982_v60 = vpop.f32.mrb[2].mxu1 }
 0x237   : > { %v802_v61 = vpop.f32.mrb[3].mxu1  ;;  %v3518_v2 = vpack.c.bf16 %v808_v0, %v808_v0 }
 0x238   : > { %v3512_v62 = vpack.c.bf16 %v800_v59, %v800_v59  ;;  %v803_v63 = vadd.f32 %v2834_v56, %v802_v61 }
 0x23a   : > { %v3514_v1 = vpack.c.bf16 %v803_v63, %v803_v63  ;;  %822 = vrot.lane.b32.xlu0 %v3512_v62, %s3301_s29 }
 0x23c   : > { %872 = vrot.lane.b32.xlu1 %v3514_v1, %s3301_s29 }
 0x240   : > { %921 = vrot.lane.b32.xlu1 %v3518_v2, %s3301_s29 }
 0x2ac   : > { %v823_v3 = vpop.permute.xlu0 %822 }
 0x2ad   : > { %v829_v4 = vsel %vm824_vm3, %v823_v3, 0 }
 0x2ae   : > { %2984 = vmatpush3.bf16.xpose.msra.mxu1 %v829_v4  ;;  %v873_v5 = vpop.permute.xlu1 %872 }
 0x2af   : > { %2989 = vmatprep.subr.bf16.mxu1 %v3299_v55  ;;  %v878_v6 = vsel %vm824_vm3, %v873_v5, 0 }
 0x2b2   : > { %v922_v7 = vpop.permute.xlu1 %921 }
 0x2b3   : > { %v927_v8 = vsel %vm824_vm3, %v922_v7, 0 }
 0x2b5   : > { %2986 = vmatmul.mubr.msk.bf16.vlgmr.msra.gmra.mrb[4].mxu1 %vm824_vm3, %v3512_v62 }
 0x2b6   : > { %2990 = vmatpush3.bf16.xpose.msra.mxu1 %v878_v6  ;;  %2991 = vmatprep.mubr.msk.bf16.mxu1 %vm3300_vm2, %v3299_v55 }
 0x2b7   : > { %2995 = vmatprep.subr.bf16.mxu1 %v3299_v55 }
 0x2bd   : > { %2992 = vmatmul.mubr.msk.bf16.vlgmr.msra.gmra.mrb[8].mxu1 %vm824_vm3, %v3514_v1 }
 0x2be   : > { %2996 = vmatpush3.bf16.xpose.msra.mxu1 %v927_v8  ;;  %2997 = vmatprep.mubr.msk.bf16.mxu1 %vm3300_vm2, %v3299_v55 }
 0x2bf   : > { %3007 = vmatprep.subr.bf16.mxu1 %v3299_v55 }
 0x2c5   : > { %2998 = vmatmul.mubr.msk.bf16.vlgmr.msra.gmra.mrb[12].mxu1 %vm824_vm3, %v3518_v2 }
 0x2c6   : > { %3009 = vmatprep.mubr.msk.bf16.mxu1 %vm3300_vm2, %v3299_v55 }
 0x388   : > { %v865_v12 = vpop.f32.mrb[4].mxu1 }
 0x389   : > { %v969_v14 = vmul.f32 0.35355338, %v865_v12  ;;  %v2987_v15 = vpop.f32.mrb[5].mxu1 }
 0x38a   : > { %v868_v16 = vpop.f32.mrb[6].mxu1 }
 0x38b   : > { %v2988_v17 = vpop.f32.mrb[7].mxu1  ;;  %v972_v18 = vsel %vm3539_vm4, %v969_v14, -1e+30 }
 0x38c   : > { %v975_v19 = vsel %vm824_vm3, %v972_v18, -inf }
 0x38d   : > { %976 = vmax.xlane.f32.xlu1 %v975_v19 }
 0x390   : > { %v914_v20 = vpop.f32.mrb[8].mxu1 }
 0x391   : > { %v970_v21 = vmul.f32 0.35355338, %v914_v20  ;;  %v2993_v22 = vpop.f32.mrb[9].mxu1 }
 0x392   : > { %v917_v23 = vpop.f32.mrb[10].mxu1 }
 0x393   : > { %v2994_v24 = vpop.f32.mrb[11].mxu1  ;;  %v973_v25 = vsel %vm3539_vm4, %v970_v21, -1e+30 }
 0x394   : > { %v978_v26 = vsel %vm824_vm3, %v973_v25, -inf }
 0x395   : > { %979 = vmax.xlane.f32.xlu0 %v978_v26 }
 0x398   : > { %v963_v27 = vpop.f32.mrb[12].mxu1 }
 0x399   : > { %v971_v28 = vmul.f32 0.35355338, %v963_v27  ;;  %v2999_v29 = vpop.f32.mrb[13].mxu1 }
 0x39a   : > { %v966_v30 = vpop.f32.mrb[14].mxu1 }
 0x39b   : > { %v3000_v31 = vpop.f32.mrb[15].mxu1  ;;  %v974_v32 = vsel %vm3539_vm4, %v971_v28, -1e+30 }
 0x39c   : > { %v981_v33 = vsel %vm824_vm3, %v974_v32, -inf }
 0x39d   : > { %982 = vmax.xlane.f32.xlu0 %v981_v33 }
 0x39e   : > { %1060 = vrot.lane.b32.xlu1 %v3514_v1, %s3302_s2 }
 0x3a2   : > { %1108 = vrot.lane.b32.xlu1 %v3518_v2, %s3302_s2 }
 0x3a6   : > { %1160 = vrot.lane.b32.xlu1 %v3512_v62, %s3303_s28 }
 0x41a   : > { %v977_v34 = vpop.xlane.xlu1 %976 }
 0x41b   : > { %v984_v35 = vsub.f32 %v972_v18, %v977_v34 }
 0x41d   : > { %v987_v36 = vmul.f32 1.442695, %v984_v35 }
 0x41e   : > { %v1061_v37 = vpop.permute.xlu1 %1060 }
 0x41f   : > { %3222 = vpow2.f32 %v987_v36  ;;  %v1066_v38 = vsel %vm1016_vm5, %v1061_v37, 0 }
 0x420   : > { %3008 = vmatpush3.bf16.msra.mxu1 %v1066_v38 }
 0x421   : > { %3019 = vmatprep.subr.bf16.mxu1 %v3299_v55 }
 0x422   : > { %v980_v39 = vpop.xlane.xlu0 %979  ;;  %v1109_v51 = vpop.permute.xlu1 %1108 }
 0x423   : > { %v985_v40 = vsub.f32 %v973_v25, %v980_v39  ;;  %v1114_v61 = vsel %vm1016_vm5, %v1109_v51, 0 }
 0x425   : > { %v989_v41 = vmul.f32 1.442695, %v985_v40 }
 0x426   : > { %v1161_v53 = vpop.permute.xlu1 %1160 }
 0x427   : > { %3224 = vpow2.f32 %v989_v41  ;;  %v1166_v4 = vsel %vm824_vm3, %v1161_v53, 0 }
 0x429   : > { %v3223_v42 = vpop.eup %3222 }
 0x42a   : > { %v993_v43 = vsel %vm824_vm3, %v3223_v42, 0.0  ;;  %v983_v46 = vpop.xlane.xlu0 %982 }
 0x42b   : > { %994 = vadd.xlane.f32.xlu0 %v993_v43  ;;  %v986_v47 = vsub.f32 %v974_v32, %v983_v46 }
 0x42d   : > { %v991_v48 = vmul.f32 1.442695, %v986_v47 }
 0x42f   : > { %3226 = vpow2.f32 %v991_v48 }
 0x431   : > { %v3225_v44 = vpop.eup %3224 }
 0x432   : > { %v996_v45 = vsel %vm824_vm3, %v3225_v44, 0.0 }
 0x433   : > { %997 = vadd.xlane.f32.xlu1 %v996_v45 }
 0x439   : > { %v3227_v49 = vpop.eup %3226 }
 0x43a   : > { %v999_v50 = vsel %vm824_vm3, %v3227_v49, 0.0 }
 0x441   : > { %1011 = vrot.lane.b32.xlu0 %v3512_v62, %s3302_s2  ;;  %s3891_s2 = scalar_lea.vmem %s3863_s7, %s3395_s15 }
 0x444   : > { %1210 = vrot.lane.b32.xlu1 %v3514_v1, %s3303_s28 }
 0x448   : > { %1260 = vrot.lane.b32.xlu1 %v3518_v2, %s3303_s28 }
 0x44c   : > { %1258 = vrot.lane.b32.xlu1 %v3518_v2, %s3304_s30 }
 0x460   : > { %1000 = vadd.xlane.f32.xlu0 %v999_v50 }
 0x476   : > { %1158 = vrot.lane.b32.xlu0 %v3512_v62, %s3304_s30 }
 0x47a   : > { %1208 = vrot.lane.b32.xlu0 %v3514_v1, %s3304_s30 }
 0x4b8   : > { %v995_v52 = vpop.xlane.xlu0 %994 }
 0x4b9   : > { %3228 = vrcp.f32 %v995_v52 }
 0x4bc   : > { %v1012_v54 = vpop.permute.xlu0 %1011 }
 0x4bd   : > { %v1018_v56 = vsel %vm1016_vm5, %v1012_v54, 0 }
 0x4be   : > { %3002 = vmatpush3.bf16.msra.mxu0 %v1018_v56 }
 0x4bf   : > { %3013 = vmatprep.subr.bf16.mxu0 %v3299_v55 }
 0x4c0   : > { %v998_v57 = vpop.xlane.xlu1 %997 }
 0x4c1   : > { %3230 = vrcp.f32 %v998_v57 }
 0x4c3   : > { %v3229_v58 = vpop.eup %3228 }
 0x4c4   : > { %v1005_v59 = vmul.f32 %v3229_v58, %v3223_v42  ;;  %v1211_v5 = vpop.permute.xlu1 %1210 }
 0x4c5   : > { %v1216_v15 = vsel %vm824_vm3, %v1211_v5, 0 }
 0x4c6   : > { %v1008_v60 = vpack.c.bf16 %v1005_v59, %v1005_v59 }
 0x4c8   : > { %3004 = vmatmul.mubr.msk.bf16.vlgmr.msra.gmra.mrb[0].mxu0 %vm824_vm3, %v1008_v60  ;;  %v1261_v7 = vpop.permute.xlu1 %1260 }
 0x4c9   : > { %3014 = vmatpush3.bf16.msra.mxu0 %v1114_v61  ;;  %3015 = vmatprep.mubr.msk.bf16.mxu0 %vm3300_vm2, %v3299_v55  ;;  %v1266_v9 = vsel %vm824_vm3, %v1261_v7, 0 }
 0x4ca   : > { %3025 = vmatprep.subr.bf16.mxu0 %v3299_v55 }
 0x4cb   : > { %v3231_v63 = vpop.eup %3230 }
 0x4cc   : > { %v1006_v0 = vmul.f32 %v3231_v63, %v3225_v44  ;;  %v1259_v11 = vpop.permute.xlu1 %1258 }
 0x4ce   : > { %v1009_v3 = vpack.c.bf16 %v1006_v0, %v1006_v0 }
 0x4d0   : > { %3010 = vmatmul.mubr.msk.bf16.vlgmr.msra.gmra.mrb[16].mxu1 %vm824_vm3, %v1009_v3 }
 0x4d1   : > { %3020 = vmatpush3.bf16.xpose.msra.mxu1 %v1166_v4  ;;  %3021 = vmatprep.mubr.msk.bf16.mxu1 %vm3300_vm2, %v3299_v55 }
 0x4d2   : > { %3031 = vmatprep.subr.bf16.mxu1 %v3299_v55 }
 0x4ed   : > { %v1001_v6 = vpop.xlane.xlu0 %1000 }
 0x4ee   : > { %3232 = vrcp.f32 %v1001_v6 }
 0x4f1   : > { %v1159_v8 = vpop.permute.xlu0 %1158 }
 0x4f2   : > { %3022 = vmatmul.mubr.msk.bf16.vlgmr.msra.gmra.mrb[20].mxu1 %vm824_vm3, %v1159_v8 }
 0x4f3   : > { %3032 = vmatpush3.bf16.xpose.msra.mxu1 %v1266_v9  ;;  %3033 = vmatprep.mubr.msk.bf16.mxu1 %vm3300_vm2, %v3299_v55 }
 0x4f4   : > { %3043 = vmatprep.subr.bf16.mxu1 %v3299_v55 }
 0x4f5   : > { %v1209_v16 = vpop.permute.xlu0 %1208 }
 0x4f8   : > { %v3233_v10 = vpop.eup %3232 }
 0x4f9   : > { %v1007_v12 = vmul.f32 %v3233_v10, %v3227_v49 }
 0x4fa   : > { %3034 = vmatmul.mubr.msk.bf16.vlgmr.msra.gmra.mrb[24].mxu1 %vm824_vm3, %v1259_v11 }
 0x4fb   : > { %v1010_v14 = vpack.c.bf16 %v1007_v12, %v1007_v12  ;;  %3045 = vmatprep.mubr.msk.bf16.mxu1 %vm3300_vm2, %v3299_v55 }
 0x4fd   : > { %3016 = vmatmul.mubr.msk.bf16.vlgmr.msra.gmra.mrb[4].mxu0 %vm824_vm3, %v1010_v14 }
 0x4fe   : > { %3026 = vmatpush3.bf16.xpose.msra.mxu0 %v1216_v15  ;;  %3027 = vmatprep.mubr.msk.bf16.mxu0 %vm3300_vm2, %v3299_v55 }
 0x4ff   : > { %3037 = vmatprep.subr.bf16.mxu0 %v3299_v55 }
 0x505   : > { %3028 = vmatmul.mubr.msk.bf16.vlgmr.msra.gmra.mrb[8].mxu0 %vm824_vm3, %v1209_v16 }
 0x506   : > { %3039 = vmatprep.mubr.msk.bf16.mxu0 %vm3300_vm2, %v3299_v55 }
 0x59b   : > { %v3594_v17 = vpop.f32.mrb[0].mxu0 }
 0x59c   : > { %v3005_v18 = vpop.f32.mrb[1].mxu0 }
 0x59d   : > { %v1057_v19 = vpop.f32.mrb[2].mxu0 }
 0x59e   : > { %v3006_v20 = vpop.f32.mrb[3].mxu0 }
 0x59f   : > { %v651_v20 = vld [vmem:[%s3890_s24] sm:$0xf] }
 0x5a3   : > { %v3596_v21 = vpop.f32.mrb[16].mxu1 }
 0x5a4   : > { %v1156_v22 = vpack.c.bf16 %v3596_v21, %v3594_v17  ;;  %v3011_v23 = vpop.f32.mrb[17].mxu1  ;;  %v652_v21 = vld [vmem:[%s3890_s24 + $0x4] sm:$0xf] }
 0x5a5   : > { %v1105_v24 = vpop.f32.mrb[18].mxu1 }
 0x5a6   : > { %v3012_v25 = vpop.f32.mrb[19].mxu1 }
 0x5c5   : > { %v1202_v26 = vpop.f32.mrb[20].mxu1 }
 0x5c6   : > { %v1308_v27 = vmul.f32 0.35355338, %v1202_v26  ;;  %v3023_v28 = vpop.f32.mrb[21].mxu1 }
 0x5c7   : > { %v1205_v29 = vpop.f32.mrb[22].mxu1 }
 0x5c8   : > { %v3024_v30 = vpop.f32.mrb[23].mxu1  ;;  %v1311_v31 = vsel %vm3539_vm4, %v1308_v27, -1e+30  ;;  %v1560_v29 = vsel %vm1016_vm5, %v651_v20, 0 }
 0x5c9   : > { %v1314_v32 = vsel %vm824_vm3, %v1311_v31, -inf }
 0x5ca   : > { %1315 = vmax.xlane.f32.xlu0 %v1314_v32 }
 0x5cd   : > { %v1302_v33 = vpop.f32.mrb[24].mxu1 }
 0x5ce   : > { %v1310_v34 = vmul.f32 0.35355338, %v1302_v33  ;;  %v3035_v35 = vpop.f32.mrb[25].mxu1 }
 0x5cf   : > { %v1305_v36 = vpop.f32.mrb[26].mxu1 }
 0x5d0   : > { %v3603_v37 = vpop.f32.mrb[4].mxu0  ;;  %v3036_v38 = vpop.f32.mrb[27].mxu1  ;;  %v1313_v39 = vsel %vm3539_vm4, %v1310_v34, -1e+30 }
 0x5d1   : > { %v3017_v40 = vpop.f32.mrb[5].mxu0  ;;  %v1320_v41 = vsel %vm824_vm3, %v1313_v39, -inf }
 0x5d2   : > { %v1153_v42 = vpop.f32.mrb[6].mxu0  ;;  %1321 = vmax.xlane.f32.xlu0 %v1320_v41 }
 0x5d3   : > { %v3018_v43 = vpop.f32.mrb[7].mxu0 }
 0x5d8   : > { %v1252_v44 = vpop.f32.mrb[8].mxu0 }
 0x5d9   : > { %v1309_v45 = vmul.f32 0.35355338, %v1252_v44  ;;  %v3029_v46 = vpop.f32.mrb[9].mxu0 }
 0x5da   : > { %v1255_v47 = vpop.f32.mrb[10].mxu0 }
 0x5db   : > { %v3030_v48 = vpop.f32.mrb[11].mxu0  ;;  %v1312_v49 = vsel %vm3539_vm4, %v1309_v45, -1e+30 }
 0x5dc   : > { %v1317_v50 = vsel %vm824_vm3, %v1312_v49, -inf }
 0x5dd   : > { %1318 = vmax.xlane.f32.xlu1 %v1317_v50 }
 0x5ee   : > { %1398 = vrot.lane.b32.xlu1 %v3514_v1, %s3305_s18 }
 0x657   : > { %v1316_v51 = vpop.xlane.xlu0 %1315 }
 0x658   : > { %v1323_v52 = vsub.f32 %v1311_v31, %v1316_v51  ;;  %v1157_v31 = vpack.c.bf16 %v3603_v37, %v3603_v37 }
 0x65a   : > { %v1326_v53 = vmul.f32 1.442695, %v1323_v52 }
 0x65c   : > { %3234 = vpow2.f32 %v1326_v53 }
 0x65f   : > { %v1322_v54 = vpop.xlane.xlu0 %1321 }
 0x660   : > { %v1325_v56 = vsub.f32 %v1313_v39, %v1322_v54 }
 0x662   : > { %v1330_v57 = vmul.f32 1.442695, %v1325_v56 }
 0x664   : > { %3236 = vpow2.f32 %v1330_v57 }
 0x666   : > { %v3235_v58 = vpop.eup %3234 }
 0x667   : > { %v1332_v59 = vsel %vm824_vm3, %v3235_v58, 0.0 }
 0x668   : > { %1333 = vadd.xlane.f32.xlu0 %v1332_v59 }
 0x66a   : > { %v1319_v60 = vpop.xlane.xlu1 %1318 }
 0x66b   : > { %v1324_v61 = vsub.f32 %v1312_v49, %v1319_v60 }
 0x66d   : > { %v1328_v63 = vmul.f32 1.442695, %v1324_v61 }
 0x66e   : > { %v3237_v0 = vpop.eup %3236  ;;  %v1399_v3 = vpop.permute.xlu1 %1398 }
 0x66f   : > { %3238 = vpow2.f32 %v1328_v63  ;;  %v1404_v4 = vsel %vm1016_vm5, %v1399_v3, 0  ;;  %v1338_v5 = vsel %vm824_vm3, %v3237_v0, 0.0 }
 0x670   : > { %3044 = vmatpush3.bf16.msra.mxu1 %v1404_v4  ;;  %1339 = vadd.xlane.f32.xlu1 %v1338_v5 }
 0x671   : > { %3179 = vmatprep.subr.msk.bf16.mxu1 %vm1016_vm5, %v652_v21 }
 0x679   : > { %v3239_v6 = vpop.eup %3238 }
 0x67a   : > { %v1335_v7 = vsel %vm824_vm3, %v3239_v6, 0.0 }
 0x67b   : > { %1336 = vadd.xlane.f32.xlu0 %v1335_v7 }
 0x681   : > { %1446 = vrot.lane.b32.xlu1 %v3518_v2, %s3305_s18 }
 0x685   : > { %1612 = vrot.lane.b32.xlu1 %v3512_v62, %s3306_s21 }
 0x689   : > { %1610 = vrot.lane.b32.xlu1 %v3512_v62, %s3307_s20 }
 0x68d   : > { %1660 = vrot.lane.b32.xlu1 %v3514_v1, %s3307_s20 }
 0x691   : > { %1350 = vrot.lane.b32.xlu0 %v3512_v62, %s3305_s18 }
 0x695   : > { %1662 = vrot.lane.b32.xlu0 %v3514_v1, %s3306_s21 }
 0x699   : > { %1712 = vrot.lane.b32.xlu0 %v3518_v2, %s3306_s21 }
 0x69d   : > { %1710 = vrot.lane.b32.xlu0 %v3518_v2, %s3307_s20 }
 0x6f5   : > { %v1334_v8 = vpop.xlane.xlu0 %1333 }
 0x6f6   : > { %3240 = vrcp.f32 %v1334_v8 }
 0x6fd   : > { %v1340_v9 = vpop.xlane.xlu1 %1339 }
 0x6fe   : > { %3242 = vrcp.f32 %v1340_v9 }
 0x700   : > { %v3241_v10 = vpop.eup %3240 }
 0x701   : > { %v1344_v12 = vmul.f32 %v3241_v10, %v3235_v58  ;;  %v1447_v16 = vpop.permute.xlu1 %1446 }
 0x702   : > { %v1452_v23 = vsel %vm1016_vm5, %v1447_v16, 0 }
 0x703   : > { %v1347_v18 = vpack.c.bf16 %v1344_v12, %v1344_v12 }
 0x705   : > { %v1613_v30 = vpop.permute.xlu1 %1612 }
 0x706   : > { %v1618_v48 = vsel %vm824_vm3, %v1613_v30, 0 }
 0x708   : > { %v1337_v11 = vpop.xlane.xlu0 %1336  ;;  %v3243_v19 = vpop.eup %3242 }
 0x709   : > { %3244 = vrcp.f32 %v1337_v11  ;;  %v1346_v25 = vmul.f32 %v3243_v19, %v3237_v0  ;;  %v1611_v34 = vpop.permute.xlu1 %1610 }
 0x70b   : > { %v1349_v28 = vpack.c.bf16 %v1346_v25, %v1346_v25 }
 0x70c   : > { %v1351_v14 = vpop.permute.xlu0 %1350 }
 0x70d   : > { %v1356_v15 = vsel %vm1016_vm5, %v1351_v14, 0  ;;  %v1661_v17 = vpop.permute.xlu1 %1660 }
 0x70e   : > { %3038 = vmatpush3.bf16.msra.mxu0 %v1356_v15 }
 0x70f   : > { %3049 = vmatprep.subr.bf16.mxu0 %v3299_v55 }
 0x710   : > { %v1663_v32 = vpop.permute.xlu0 %1662 }
 0x711   : > { %3040 = vmatmul.mubr.msk.bf16.vlgmr.msra.gmra.mrb[12].mxu0 %vm824_vm3, %v1347_v18  ;;  %v1668_v33 = vsel %vm824_vm3, %v1663_v32, 0 }
 0x712   : > { %3050 = vmatpush3.bf16.msra.mxu0 %v1452_v23  ;;  %3051 = vmatprep.mubr.msk.bf16.mxu0 %vm3300_vm2, %v3299_v55 }
 0x713   : > { %v3245_v24 = vpop.eup %3244  ;;  %3180 = vmatprep.subr.msk.bf16.mxu0 %vm1016_vm5, %v651_v20 }
 0x714   : > { %v1345_v26 = vmul.f32 %v3245_v24, %v3239_v6  ;;  %v1713_v50 = vpop.permute.xlu0 %1712 }
 0x715   : > { %v1718_v54 = vsel %vm824_vm3, %v1713_v50, 0 }
 0x716   : > { %v1348_v27 = vpack.c.bf16 %v1345_v26, %v1345_v26 }
 0x718   : > { %3046 = vmatmul.mubr.msk.bf16.vlgmr.msra.gmra.mrb[28].mxu1 %vm824_vm3, %v1348_v27  ;;  %v1711_v58 = vpop.permute.xlu0 %1710 }
 0x719   : > { %3052 = vmatmul.mubr.msk.bf16.vlgmr.msra.gmra.mrb[16].mxu0 %vm824_vm3, %v1349_v28 }
 0x71a   : > { %3062 = vmatpush3.bf16.msra.mxu0 %v1560_v29  ;;  %3063 = vmatprep.mubr.msk.bf16.mxu0 %vm824_vm3, %v1156_v22  ;;  %v1503_v22 = vsel %vm1016_vm5, %v652_v21, 0 }
 0x71b   : > { %3073 = vmatprep.subr.bf16.mxu0 %v3299_v55  ;;  %3056 = vmatpush3.bf16.msra.mxu1 %v1503_v22 }
 0x71c   : > { %3067 = vmatprep.subr.bf16.mxu1 %v3299_v55 }
 0x721   : > { %3064 = vmatmul.mubr.msk.bf16.vlgmr.msra.gmra.mrb[20].mxu0 %vm824_vm3, %v1157_v31 }
 0x722   : > { %3075 = vmatprep.mubr.msk.bf16.mxu0 %vm3300_vm2, %v3299_v55 }
 0x723   : > { %3074 = vmatpush3.bf16.xpose.msra.mxu0 %v1668_v33 }
 0x724   : > { %3085 = vmatprep.subr.bf16.mxu0 %v3299_v55 }
 0x72a   : > { %3076 = vmatmul.mubr.msk.bf16.vlgmr.msra.gmra.mrb[24].mxu0 %vm824_vm3, %v1661_v17 }
 0x72b   : > { %3087 = vmatprep.mubr.msk.bf16.mxu0 %vm3300_vm2, %v3299_v55 }
 0x7e4   : > { %v1392_v35 = vpop.f32.mrb[12].mxu0 }
 0x7e5   : > { %v3041_v36 = vpop.f32.mrb[13].mxu0 }
 0x7e6   : > { %v1395_v37 = vpop.f32.mrb[14].mxu0 }
 0x7e7   : > { %v3042_v38 = vpop.f32.mrb[15].mxu0 }
 0x7eb   : > { %v1440_v39 = vpop.f32.mrb[28].mxu1 }
 0x7ec   : > { %v1494_v40 = vpack.c.bf16 %v1440_v39, %v1392_v35  ;;  %v3047_v41 = vpop.f32.mrb[29].mxu1  ;;  %v1488_v42 = vpop.f32.mrb[16].mxu0 }
 0x7ed   : > { %v1495_v43 = vpack.c.bf16 %v1488_v42, %v1488_v42  ;;  %v1443_v44 = vpop.f32.mrb[30].mxu1  ;;  %v3053_v45 = vpop.f32.mrb[17].mxu0 }
 0x7ee   : > { %v3048_v46 = vpop.f32.mrb[31].mxu1  ;;  %v1491_v47 = vpop.f32.mrb[18].mxu0  ;;  %3057 = vmatprep.mubr.msk.bf16.mxu1 %vm824_vm3, %v1494_v40 }
 0x7ef   : > { %v3054_v49 = vpop.f32.mrb[19].mxu0  ;;  %3058 = vmatmul.mubr.msk.bf16.vlgmr.msra.gmra.mrb[32].mxu1 %vm824_vm3, %v1495_v43 }
 0x7f0   : > { %3068 = vmatpush3.bf16.xpose.msra.mxu1 %v1618_v48  ;;  %3069 = vmatprep.mubr.msk.bf16.mxu1 %vm3300_vm2, %v3299_v55 }
 0x7f1   : > { %3079 = vmatprep.subr.bf16.mxu1 %v3299_v55 }
 0x7f4   : > { %v3065_v51 = vpop.f32.mrb[20].mxu0 }
 0x7f5   : > { %v1596_v52 = vpop.f32.mrb[21].mxu0 }
 0x7f6   : > { %v3066_v53 = vpop.f32.mrb[22].mxu0 }
 0x7f7   : > { %v1599_v56 = vpop.f32.mrb[23].mxu0  ;;  %3070 = vmatmul.mubr.msk.bf16.vlgmr.msra.gmra.mrb[36].mxu1 %vm824_vm3, %v1611_v34 }
 0x7f8   : > { %3080 = vmatpush3.bf16.xpose.msra.mxu1 %v1718_v54  ;;  %3081 = vmatprep.mubr.msk.bf16.mxu1 %vm3300_vm2, %v3299_v55 }
 0x7f9   : > { %3091 = vmatprep.subr.bf16.mxu1 %v3299_v55 }
 0x7fd   : > { %v1704_v57 = vpop.f32.mrb[24].mxu0 }
 0x7fe   : > { %v1761_v59 = vmul.f32 0.35355338, %v1704_v57  ;;  %v3077_v60 = vpop.f32.mrb[25].mxu0 }
 0x7ff   : > { %v1707_v61 = vpop.f32.mrb[26].mxu0  ;;  %3082 = vmatmul.mubr.msk.bf16.vlgmr.msra.gmra.mrb[40].mxu1 %vm824_vm3, %v1711_v58 }
 0x800   : > { %v3078_v63 = vpop.f32.mrb[27].mxu0  ;;  %v1764_v0 = vsel %vm3539_vm4, %v1761_v59, -1e+30  ;;  %3093 = vmatprep.mubr.msk.bf16.mxu1 %vm3300_vm2, %v3299_v55 }
 0x801   : > { %v1769_v3 = vsel %vm824_vm3, %v1764_v0, -inf }
 0x802   : > { %1770 = vmax.xlane.f32.xlu0 %v1769_v3 }
 0x88f   : > { %v1771_v4 = vpop.xlane.xlu0 %1770 }
 0x890   : > { %v1776_v5 = vsub.f32 %v1764_v0, %v1771_v4 }
 0x892   : > { %v1780_v6 = vmul.f32 1.442695, %v1776_v5 }
 0x894   : > { %3246 = vpow2.f32 %v1780_v6  ;;  %v653_v6 = vld [vmem:[%s3890_s24 + $0x8] sm:$0xf] }
 0x89e   : > { %v3247_v25 = vpop.eup %3246 }
 0x89f   : > { %v1787_v27 = vsel %vm824_vm3, %v3247_v25, 0.0 }
 0x8c2   : > { %v3059_v7 = vpop.f32.mrb[32].mxu1 }
 0x8c3   : > { %v3674_v8 = vadd.f32 %v3065_v51, %v3059_v7  ;;  %v1539_v9 = vpop.f32.mrb[33].mxu1  ;;  %v1955_v7 = vsel %vm1016_vm5, %v653_v6, 0 }
 0x8c4   : > { %v3676_v10 = vadd.f32 %v1596_v52, %v1539_v9  ;;  %v3060_v11 = vpop.f32.mrb[34].mxu1 }
 0x8c5   : > { %v1542_v12 = vpop.f32.mrb[35].mxu1 }
 0x8c6   : > { %v3678_v14 = vadd.f32 %v1599_v56, %v1542_v12 }
 0x8ca   : > { %v1654_v15 = vpop.f32.mrb[36].mxu1 }
 0x8cb   : > { %v1760_v16 = vmul.f32 0.35355338, %v1654_v15  ;;  %v3071_v18 = vpop.f32.mrb[37].mxu1 }
 0x8cc   : > { %v1657_v19 = vpop.f32.mrb[38].mxu1 }
 0x8cd   : > { %v3072_v20 = vpop.f32.mrb[39].mxu1  ;;  %v1763_v23 = vsel %vm3539_vm4, %v1760_v16, -1e+30 }
 0x8ce   : > { %v1766_v24 = vsel %vm824_vm3, %v1763_v23, -inf }
 0x8cf   : > { %1767 = vmax.xlane.f32.xlu1 %v1766_v24 }
 0x8d2   : > { %v1754_v26 = vpop.f32.mrb[40].mxu1 }
 0x8d3   : > { %v1762_v28 = vmul.f32 0.35355338, %v1754_v26  ;;  %1788 = vadd.xlane.f32.xlu1 %v1787_v27  ;;  %v3083_v29 = vpop.f32.mrb[41].mxu1 }
 0x8d4   : > { %v1757_v30 = vpop.f32.mrb[42].mxu1 }
 0x8d5   : > { %v3084_v31 = vpop.f32.mrb[43].mxu1  ;;  %v1765_v32 = vsel %vm3539_vm4, %v1762_v28, -1e+30 }
 0x8d6   : > { %v1772_v33 = vsel %vm824_vm3, %v1765_v32, -inf }
 0x8d7   : > { %1773 = vmax.xlane.f32.xlu0 %v1772_v33 }
 0x8e4   : > { %1802 = vrot.lane.b32.xlu1 %v3512_v62, %s3308_s26 }
 0x8e8   : > { %1898 = vrot.lane.b32.xlu1 %v3518_v2, %s3308_s26 }
 0x8ec   : > { %2010 = vrot.lane.b32.xlu1 %v3512_v62, %s3309_s22 }
 0x8f0   : > { %2060 = vrot.lane.b32.xlu1 %v3514_v1, %s3309_s22 }
 0x8f4   : > { %2110 = vrot.lane.b32.xlu1 %v3518_v2, %s3309_s22 }
 0x8f8   : > { %2108 = vrot.lane.b32.xlu1 %v3518_v2, %s3310_s27 }
 0x95c   : > { %v1768_v34 = vpop.xlane.xlu1 %1767 }
 0x95d   : > { %v1775_v17 = vsub.f32 %v1763_v23, %v1768_v34 }
 0x95f   : > { %v1778_v21 = vmul.f32 1.442695, %v1775_v17 }
 0x960   : > { %v1789_v22 = vpop.xlane.xlu1 %1788 }
 0x961   : > { %3248 = vpow2.f32 %v1778_v21 }
 0x964   : > { %v1803_v35 = vpop.permute.xlu1 %1802  ;;  %v1774_v36 = vpop.xlane.xlu0 %1773 }
 0x965   : > { %v1808_v37 = vsel %vm1016_vm5, %v1803_v35, 0  ;;  %v1777_v38 = vsub.f32 %v1765_v32, %v1774_v36 }
 0x966   : > { %3086 = vmatpush3.bf16.msra.mxu0 %v1808_v37 }
 0x967   : > { %v1782_v39 = vmul.f32 1.442695, %v1777_v38  ;;  %3097 = vmatprep.subr.bf16.mxu0 %v3299_v55 }
 0x968   : > { %v1899_v49 = vpop.permute.xlu1 %1898 }
 0x969   : > { %3250 = vpow2.f32 %v1782_v39  ;;  %v1904_v56 = vsel %vm1016_vm5, %v1899_v49, 0 }
 0x96a   : > { %3252 = vrcp.f32 %v1789_v22 }
 0x96b   : > { %v3249_v40 = vpop.eup %3248 }
 0x96c   : > { %v1784_v41 = vsel %vm824_vm3, %v3249_v40, 0.0  ;;  %v2011_v57 = vpop.permute.xlu1 %2010 }
 0x96d   : > { %1785 = vadd.xlane.f32.xlu0 %v1784_v41  ;;  %v2016_v63 = vsel %vm824_vm3, %v2011_v57, 0 }
 0x970   : > { %v2061_v61 = vpop.permute.xlu1 %2060 }
 0x971   : > { %v2066_v28 = vsel %vm824_vm3, %v2061_v61, 0 }
 0x973   : > { %v3251_v42 = vpop.eup %3250 }
 0x974   : > { %v1790_v43 = vsel %vm824_vm3, %v3251_v42, 0.0  ;;  %v3253_v45 = vpop.eup %3252  ;;  %v2111_v0 = vpop.permute.xlu1 %2110 }
 0x975   : > { %1791 = vadd.xlane.f32.xlu0 %v1790_v43  ;;  %v1797_v48 = vmul.f32 %v3253_v45, %v3247_v25  ;;  %v2116_v4 = vsel %vm824_vm3, %v2111_v0, 0 }
 0x977   : > { %v1800_v54 = vpack.c.bf16 %v1797_v48, %v1797_v48 }
 0x978   : > { %v2109_v5 = vpop.permute.xlu1 %2108 }
 0x98b   : > { %1850 = vrot.lane.b32.xlu0 %v3514_v1, %s3308_s26 }
 0x98f   : > { %2008 = vrot.lane.b32.xlu0 %v3512_v62, %s3310_s27 }
 0x993   : > { %2058 = vrot.lane.b32.xlu0 %v3514_v1, %s3310_s27 }
 0x9fa   : > { %v1786_v44 = vpop.xlane.xlu0 %1785 }
 0x9fb   : > { %3254 = vrcp.f32 %v1786_v44 }
 0xa02   : > { %v1792_v46 = vpop.xlane.xlu0 %1791 }
 0xa03   : > { %3256 = vrcp.f32 %v1792_v46 }
 0xa05   : > { %v3255_v47 = vpop.eup %3254 }
 0xa06   : > { %v1796_v50 = vmul.f32 %v3255_v47, %v3249_v40  ;;  %v1851_v51 = vpop.permute.xlu0 %1850 }
 0xa07   : > { %v1856_v52 = vsel %vm1016_vm5, %v1851_v51, 0 }
 0xa08   : > { %3092 = vmatpush3.bf16.msra.mxu1 %v1856_v52  ;;  %v1799_v53 = vpack.c.bf16 %v1796_v50, %v1796_v50 }
 0xa09   : > { %3181 = vmatprep.subr.msk.bf16.mxu1 %vm1016_vm5, %v653_v6 }
 0xa0a   : > { %3088 = vmatmul.mubr.msk.bf16.vlgmr.msra.gmra.mrb[28].mxu0 %vm824_vm3, %v1799_v53  ;;  %v2009_v3 = vpop.permute.xlu0 %2008 }
 0xa0b   : > { %3098 = vmatpush3.bf16.msra.mxu0 %v1904_v56  ;;  %3094 = vmatmul.mubr.msk.bf16.vlgmr.msra.gmra.mrb[44].mxu1 %vm824_vm3, %v1800_v54 }
 0xa0c   : > { %3099 = vmatprep.mubr.msk.bf16.mxu0 %vm3300_vm2, %v3299_v55  ;;  %3109 = vmatprep.subr.bf16.mxu0 %v3299_v55 }
 0xa0d   : > { %v3257_v58 = vpop.eup %3256  ;;  %3104 = vmatpush3.bf16.msra.mxu1 %v1955_v7 }
 0xa0e   : > { %v1798_v59 = vmul.f32 %v3257_v58, %v3251_v42  ;;  %3115 = vmatprep.subr.bf16.mxu1 %v3299_v55  ;;  %v2059_v31 = vpop.permute.xlu0 %2058 }
 0xa10   : > { %v1801_v60 = vpack.c.bf16 %v1798_v59, %v1798_v59 }
 0xa12   : > { %3100 = vmatmul.mubr.msk.bf16.vlgmr.msra.gmra.mrb[32].mxu0 %vm824_vm3, %v1801_v60 }
 0xa13   : > { %3111 = vmatprep.mubr.msk.bf16.mxu0 %vm3300_vm2, %v3299_v55 }
 0xa14   : > { %3110 = vmatpush3.bf16.xpose.msra.mxu0 %v2016_v63 }
 0xa15   : > { %3121 = vmatprep.subr.bf16.mxu0 %v3299_v55 }
 0xa1b   : > { %3112 = vmatmul.mubr.msk.bf16.vlgmr.msra.gmra.mrb[36].mxu0 %vm824_vm3, %v2009_v3 }
 0xa1c   : > { %3122 = vmatpush3.bf16.xpose.msra.mxu0 %v2116_v4  ;;  %3123 = vmatprep.mubr.msk.bf16.mxu0 %vm3300_vm2, %v3299_v55 }
 0xa1d   : > { %3133 = vmatprep.subr.bf16.mxu0 %v3299_v55 }
 0xa23   : > { %3124 = vmatmul.mubr.msk.bf16.vlgmr.msra.gmra.mrb[40].mxu0 %vm824_vm3, %v2109_v5 }
 0xa24   : > { %3135 = vmatprep.mubr.msk.bf16.mxu0 %vm3300_vm2, %v3299_v55 }
 0xadd   : > { %v1844_v9 = vpop.f32.mrb[28].mxu0 }
 0xade   : > { %v3089_v11 = vpop.f32.mrb[29].mxu0  ;;  %v1892_v12 = vpop.f32.mrb[44].mxu1 }
 0xadf   : > { %v1946_v15 = vpack.c.bf16 %v1892_v12, %v1844_v9  ;;  %v1847_v16 = vpop.f32.mrb[30].mxu0  ;;  %v3095_v18 = vpop.f32.mrb[45].mxu1 }
 0xae0   : > { %v3090_v19 = vpop.f32.mrb[31].mxu0  ;;  %v1895_v20 = vpop.f32.mrb[46].mxu1 }
 0xae1   : > { %v3096_v23 = vpop.f32.mrb[47].mxu1  ;;  %3105 = vmatprep.mubr.msk.bf16.mxu1 %vm824_vm3, %v1946_v15 }
 0xae5   : > { %v1940_v24 = vpop.f32.mrb[32].mxu0 }
 0xae6   : > { %v1947_v25 = vpack.c.bf16 %v1940_v24, %v1940_v24  ;;  %v3101_v26 = vpop.f32.mrb[33].mxu0 }
 0xae7   : > { %v1943_v27 = vpop.f32.mrb[34].mxu0 }
 0xae8   : > { %v3102_v29 = vpop.f32.mrb[35].mxu0  ;;  %3106 = vmatmul.mubr.msk.bf16.vlgmr.msra.gmra.mrb[48].mxu1 %vm824_vm3, %v1947_v25 }
 0xae9   : > { %3116 = vmatpush3.bf16.xpose.msra.mxu1 %v2066_v28  ;;  %3117 = vmatprep.mubr.msk.bf16.mxu1 %vm3300_vm2, %v3299_v55  ;;  %v654_v29 = vld [vmem:[%s3890_s24 + $0xc] sm:$0xf] }
 0xaea   : > { %3127 = vmatprep.subr.bf16.mxu1 %v3299_v55 }
 0xaee   : > { %v2052_v30 = vpop.f32.mrb[36].mxu0 }
 0xaef   : > { %v2158_v32 = vmul.f32 0.35355338, %v2052_v30  ;;  %v3113_v33 = vpop.f32.mrb[37].mxu0  ;;  %v2353_v30 = vsel %vm1016_vm5, %v654_v29, 0 }
 0xaf0   : > { %v2055_v34 = vpop.f32.mrb[38].mxu0  ;;  %3118 = vmatmul.mubr.msk.bf16.vlgmr.msra.gmra.mrb[52].mxu1 %vm824_vm3, %v2059_v31 }
 0xaf1   : > { %v3114_v17 = vpop.f32.mrb[39].mxu0  ;;  %v2161_v21 = vsel %vm3539_vm4, %v2158_v32, -1e+30  ;;  %3129 = vmatprep.mubr.msk.bf16.mxu1 %vm3300_vm2, %v3299_v55 }
 0xaf2   : > { %v2164_v22 = vsel %vm824_vm3, %v2161_v21, -inf }
 0xaf3   : > { %2165 = vmax.xlane.f32.xlu0 %v2164_v22 }
 0xaf6   : > { %v2152_v35 = vpop.f32.mrb[40].mxu0 }
 0xaf7   : > { %v2160_v36 = vmul.f32 0.35355338, %v2152_v35  ;;  %v3125_v37 = vpop.f32.mrb[41].mxu0 }
 0xaf8   : > { %v2155_v38 = vpop.f32.mrb[42].mxu0 }
 0xaf9   : > { %v3126_v39 = vpop.f32.mrb[43].mxu0  ;;  %v2163_v40 = vsel %vm3539_vm4, %v2160_v36, -1e+30 }
 0xafa   : > { %v2170_v41 = vsel %vm824_vm3, %v2163_v40, -inf }
 0xafb   : > { %2171 = vmax.xlane.f32.xlu0 %v2170_v41 }
 0xb80   : > { %v2166_v42 = vpop.xlane.xlu0 %2165 }
 0xb81   : > { %v2173_v43 = vsub.f32 %v2161_v21, %v2166_v42 }
 0xb83   : > { %v2176_v44 = vmul.f32 1.442695, %v2173_v43 }
 0xb85   : > { %3258 = vpow2.f32 %v2176_v44 }
 0xb88   : > { %v2172_v47 = vpop.xlane.xlu0 %2171 }
 0xb89   : > { %v2175_v48 = vsub.f32 %v2163_v40, %v2172_v47 }
 0xb8b   : > { %v2180_v49 = vmul.f32 1.442695, %v2175_v48  ;;  %v3288_v48 = vld [vmem:[%s3870_s14] sm:$0xff] }
 0xb8d   : > { %3260 = vpow2.f32 %v2180_v49 }
 0xb8f   : > { %v3259_v45 = vpop.eup %3258 }
 0xb90   : > { %v2182_v46 = vsel %vm824_vm3, %v3259_v45, 0.0 }
 0xb91   : > { %2183 = vadd.xlane.f32.xlu0 %v2182_v46  ;;  %v2871_v46 = vld [vmem:[%s3891_s2] ss:$0 sm:$0xff] }
 0xb97   : > { %v3261_v3 = vpop.eup %3260 }
 0xbbb   : > { %v3107_v50 = vpop.f32.mrb[48].mxu1 }
 0xbbc   : > { %v3741_v51 = vadd.f32 %v3107_v50, %v3674_v8  ;;  %v1991_v52 = vpop.f32.mrb[49].mxu1 }
 0xbbd   : > { %v3744_v53 = vadd.f32 %v1991_v52, %v3676_v10  ;;  %v3108_v54 = vpop.f32.mrb[50].mxu1  ;;  %v2188_v10 = vsel %vm824_vm3, %v3261_v3, 0.0 }
 0xbbe   : > { %v1994_v56 = vpop.f32.mrb[51].mxu1  ;;  %v3290_v54 = vld [vmem:[%s3870_s14 + $0x8] sm:$0xff] }
 0xbbf   : > { %v3747_v57 = vadd.f32 %v1994_v56, %v3678_v14 }
 0xbc3   : > { %v2102_v58 = vpop.f32.mrb[52].mxu1 }
 0xbc4   : > { %v2159_v59 = vmul.f32 0.35355338, %v2102_v58  ;;  %v3119_v60 = vpop.f32.mrb[53].mxu1 }
 0xbc5   : > { %v2105_v61 = vpop.f32.mrb[54].mxu1 }
 0xbc6   : > { %v3120_v63 = vpop.f32.mrb[55].mxu1  ;;  %v2162_v0 = vsel %vm3539_vm4, %v2159_v59, -1e+30 }
 0xbc7   : > { %v2167_v8 = vsel %vm824_vm3, %v2162_v0, -inf }
 0xbc8   : > { %2168 = vmax.xlane.f32.xlu1 %v2167_v8 }
 0xbcc   : > { %2189 = vadd.xlane.f32.xlu1 %v2188_v10 }
 0xbdd   : > { %2248 = vrot.lane.b32.xlu1 %v3514_v1, %s3311_s16 }
 0xbe1   : > { %2296 = vrot.lane.b32.xlu1 %v3518_v2, %s3311_s16 }
 0xc1e   : > { %v2184_v12 = vpop.xlane.xlu0 %2183 }
 0xc55   : > { %v2169_v14 = vpop.xlane.xlu1 %2168 }
 0xc56   : > { %v2174_v4 = vsub.f32 %v2162_v0, %v2169_v14 }
 0xc58   : > { %v2178_v5 = vmul.f32 1.442695, %v2174_v4 }
 0xc59   : > { %v2190_v6 = vpop.xlane.xlu1 %2189 }
 0xc5a   : > { %3262 = vpow2.f32 %v2178_v5 }
 0xc5b   : > { %3264 = vrcp.f32 %v2184_v12 }
 0xc5c   : > { %3266 = vrcp.f32 %v2190_v6 }
 0xc5d   : > { %v2249_v7 = vpop.permute.xlu1 %2248 }
 0xc5e   : > { %v2254_v13 = vsel %vm1016_vm5, %v2249_v7, 0 }
 0xc5f   : > { %3134 = vmatpush3.bf16.msra.mxu0 %v2254_v13 }
 0xc60   : > { %3182 = vmatprep.subr.msk.bf16.mxu0 %vm1016_vm5, %v654_v29 }
 0xc61   : > { %v2297_v19 = vpop.permute.xlu1 %2296 }
 0xc62   : > { %v2302_v24 = vsel %vm1016_vm5, %v2297_v19, 0 }
 0xc64   : > { %v3263_v9 = vpop.eup %3262 }
 0xc65   : > { %v2185_v11 = vsel %vm824_vm3, %v3263_v9, 0.0  ;;  %v3265_v1 = vpop.eup %3264 }
 0xc66   : > { %2186 = vadd.xlane.f32.xlu0 %v2185_v11  ;;  %v2194_v15 = vmul.f32 %v3265_v1, %v3259_v45  ;;  %v3267_v23 = vpop.eup %3266 }
 0xc67   : > { %v2196_v25 = vmul.f32 %v3267_v23, %v3261_v3 }
 0xc68   : > { %v2197_v20 = vpack.c.bf16 %v2194_v15, %v2194_v15  ;;  %v3207_v15 = vld [vmem:[%s3435_s4 + $0x8] sm:$0xff]  }
 0xc69   : > { %v2199_v28 = vpack.c.bf16 %v2196_v25, %v2196_v25 }
 0xc7c   : > { %2200 = vrot.lane.b32.xlu0 %v3512_v62, %s3311_s16 }
 0xcf3   : > { %v2187_v2 = vpop.xlane.xlu0 %2186 }
 0xcf4   : > { %3268 = vrcp.f32 %v2187_v2  ;;  %v3206_v2 = vld [vmem:[%s3435_s4] sm:$0xff]  }
 0xcf7   : > { %v2201_v16 = vpop.permute.xlu0 %2200 }
 0xcf8   : > { %v2206_v18 = vsel %vm1016_vm5, %v2201_v16, 0 }
 0xcf9   : > { %3128 = vmatpush3.bf16.msra.mxu1 %v2206_v18 }
 0xcfa   : > { %3139 = vmatprep.subr.bf16.mxu1 %v3299_v55 }
 0xcfc   : > { %3130 = vmatmul.mubr.msk.bf16.vlgmr.msra.gmra.mrb[56].mxu1 %vm824_vm3, %v2197_v20 }
 0xcfd   : > { %3140 = vmatpush3.bf16.msra.mxu1 %v2302_v24  ;;  %3141 = vmatprep.mubr.msk.bf16.mxu1 %vm3300_vm2, %v3299_v55 }
 0xcfe   : > { %v3269_v62 = vpop.eup %3268  ;;  %3151 = vmatprep.subr.bf16.mxu1 %v3206_v2 }
 0xcff   : > { %v2195_v26 = vmul.f32 %v3269_v62, %v3263_v9 }
 0xd01   : > { %v2198_v27 = vpack.c.bf16 %v2195_v26, %v2195_v26 }
 0xd03   : > { %3136 = vmatmul.mubr.msk.bf16.vlgmr.msra.gmra.mrb[44].mxu0 %vm824_vm3, %v2198_v27 }
 0xd04   : > { %3142 = vmatmul.mubr.msk.bf16.vlgmr.msra.gmra.mrb[60].mxu1 %vm824_vm3, %v2199_v28  ;;  %3146 = vmatpush3.bf16.msra.mxu0 %v2353_v30  ;;  %v2872_v28 = vld [vmem:[%s605_s3] ss:$0 sm:$0xff] }
 0xd05   : > { %3152 = vmatpush3.bf16.msra.mxu1 %v3206_v2 }
 0xd06   : > { %3153 = vmatprep.subr.bf16.mxu1 %v3207_v15 }
 0xd09   : > { %3154 = vmatpush3.bf16.msra.mxu1 %v3207_v15 }
 0xdcf   : > { %v2242_v31 = vpop.f32.mrb[56].mxu1 }
 0xdd0   : > { %v3131_v32 = vpop.f32.mrb[57].mxu1 }
 0xdd1   : > { %v2245_v33 = vpop.f32.mrb[58].mxu1 }
 0xdd2   : > { %v3132_v34 = vpop.f32.mrb[59].mxu1  ;;  %v2873_v33 = vld [vmem:[%s608_s25] ss:$0 sm:$0xff] }
 0xdd6   : > { %v2290_v55 = vpop.f32.mrb[44].mxu0 }
 0xdd7   : > { %v2344_v17 = vpack.c.bf16 %v2290_v55, %v2242_v31  ;;  %v3137_v21 = vpop.f32.mrb[45].mxu0  ;;  %v2338_v22 = vpop.f32.mrb[60].mxu1 }
 0xdd8   : > { %v2345_v35 = vpack.c.bf16 %v2338_v22, %v2338_v22  ;;  %v2293_v36 = vpop.f32.mrb[46].mxu0  ;;  %v3143_v37 = vpop.f32.mrb[61].mxu1 }
 0xdd9   : > { %v3138_v38 = vpop.f32.mrb[47].mxu0  ;;  %v2341_v39 = vpop.f32.mrb[62].mxu1  ;;  %3147 = vmatprep.mubr.msk.bf16.mxu0 %vm824_vm3, %v2344_v17 }
 0xdda   : > { %v3144_v40 = vpop.f32.mrb[63].mxu1  ;;  %3148 = vmatmul.mubr.msk.bf16.vlgmr.msra.gmra.mrb[48].mxu0 %vm824_vm3, %v2345_v35  ;;  %v3208_v39 = vld [vmem:[%s3445_s19] sm:$0xff]  }
 0xddb   : > { %3159 = vmatprep.subr.bf16.mxu0 %v3208_v39  ;;  %v3209_v40 = vld [vmem:[%s3445_s19 + $0x8] sm:$0xff]  }
 0xddc   : > { %3160 = vmatpush3.bf16.msra.mxu0 %v3208_v39 }
 0xddd   : > { %3161 = vmatprep.subr.bf16.mxu0 %v3209_v40 }
 0xde0   : > { %3162 = vmatpush3.bf16.msra.mxu0 %v3209_v40 }
 0xead   : > { %v3149_v41 = vpop.f32.mrb[48].mxu0 }
 0xeae   : > { %v2405_v42 = vadd.f32 %v3149_v41, %v3741_v51  ;;  %v2389_v43 = vpop.f32.mrb[49].mxu0  ;;  %v3289_v51 = vld [vmem:[%s3870_s14 + $0x10] sm:$0xff] }
 0xeaf   : > { %v2403_v44 = vadd.f32 %v2389_v43, %v3744_v53  ;;  %v3150_v45 = vpop.f32.mrb[50].mxu0  ;;  %v3210_v41 = vld [vmem:[%s3445_s19 + $0x10] sm:$0xff]   ;;  %v3212_v43 = vld [vmem:[%s3445_s19 + $0x20] sm:$0xff]  }
 0xeb0   : > { %v2392_v47 = vpop.f32.mrb[51].mxu0  ;;  %v2408_v52 = vadd.f32 %v3289_v51, %v2405_v42  ;;  %3163 = vmatprep.subr.bf16.mxu0 %v3210_v41  ;;  %v3211_v42 = vld [vmem:[%s3445_s19 + $0x18] sm:$0xff]   ;;  %v3214_v45 = vld [vmem:[%s3445_s19 + $0x30] sm:$0xff]  }
 0xeb1   : > { %v2406_v49 = vadd.f32 %v3288_v48, %v2403_v44  ;;  %v2404_v50 = vadd.f32 %v2392_v47, %v3747_v57  ;;  %3164 = vmatpush3.bf16.msra.mxu0 %v3210_v41  ;;  %v3213_v44 = vld [vmem:[%s3445_s19 + $0x28] sm:$0xff]   ;;  %v2874_v47 = vld [vmem:[%s616_s6] ss:$0 sm:$0xff] }
 0xeb2   : > { %v3794_v60 = vadd.f32 %v2871_v46, %v2408_v52  ;;  %3165 = vmatprep.subr.bf16.mxu0 %v3211_v42 }
 0xeb3   : > { %v3785_v53 = vadd.f32 %v2871_v46, %v2406_v49  ;;  %v2407_v56 = vadd.f32 %v3290_v54, %v2404_v50 }
 0xeb4   : > { %v2424_v61 = vsel %vm680_vm1, %v3794_v60, 0.0 }
 0xeb5   : > { %v3790_v58 = vadd.f32 %v2871_v46, %v2407_v56  ;;  %v2418_v59 = vsel %vm680_vm1, %v3785_v53, 0.0  ;;  %3166 = vmatpush3.bf16.msra.mxu0 %v3211_v42  ;;  %v3215_v46 = vld [vmem:[%s3445_s19 + $0x38] sm:$0xff]  }
 0xeb6   : > { %2419 = vadd.xlane.f32.xlu1 %v2418_v59  ;;  %3167 = vmatprep.subr.bf16.mxu0 %v3212_v43 }
 0xeb7   : > { %v2421_v57 = vsel %vm680_vm1, %v3790_v58, 0.0 }
 0xeb8   : > { %2422 = vadd.xlane.f32.xlu0 %v2421_v57 }
 0xeb9   : > { %3168 = vmatpush3.bf16.msra.mxu0 %v3212_v43 }
 0xeba   : > { %3169 = vmatprep.subr.bf16.mxu0 %v3213_v44 }
 0xebc   : > { %2425 = vadd.xlane.f32.xlu0 %v2424_v61 }
 0xebd   : > { %3170 = vmatpush3.bf16.msra.mxu0 %v3213_v44 }
 0xebe   : > { %3171 = vmatprep.subr.bf16.mxu0 %v3214_v45 }
 0xec1   : > { %3172 = vmatpush3.bf16.msra.mxu0 %v3214_v45 }
 0xec2   : > { %3173 = vmatprep.subr.bf16.mxu0 %v3215_v46 }
 0xec5   : > { %3174 = vmatpush3.bf16.msra.mxu0 %v3215_v46 }
 0xf43   : > { %v2420_v63 = vpop.xlane.xlu1 %2419 }
 0xf44   : > { %v2427_v0 = vmul.f32 0.03125, %v2420_v63 }
 0xf45   : > { %v2423_v8 = vpop.xlane.xlu0 %2422 }
 0xf46   : > { %v2430_v3 = vsub.f32 %v3785_v53, %v2427_v0  ;;  %v2428_v10 = vmul.f32 0.03125, %v2423_v8 }
 0xf48   : > { %v2431_v14 = vsub.f32 %v3790_v58, %v2428_v10  ;;  %v2433_v4 = vmul.f32 %v2430_v3, %v2430_v3 }
 0xf49   : > { %v2426_v5 = vpop.xlane.xlu0 %2425 }
 0xf4a   : > { %v2429_v6 = vmul.f32 0.03125, %v2426_v5  ;;  %v2436_v7 = vsel %vm680_vm1, %v2433_v4, 0.0  ;;  %v2434_v13 = vmul.f32 %v2431_v14, %v2431_v14 }
 0xf4b   : > { %2437 = vadd.xlane.f32.xlu0 %v2436_v7 }
 0xf4c   : > { %v2432_v9 = vsub.f32 %v3794_v60, %v2429_v6  ;;  %v2439_v11 = vsel %vm680_vm1, %v2434_v13, 0.0 }
 0xf4d   : > { %2440 = vadd.xlane.f32.xlu1 %v2439_v11 }
 0xf4e   : > { %v2435_v12 = vmul.f32 %v2432_v9, %v2432_v9 }
 0xf50   : > { %v2442_v1 = vsel %vm680_vm1, %v2435_v12, 0.0 }
 0xf51   : > { %2443 = vadd.xlane.f32.xlu0 %v2442_v1 }
 0xfd8   : > { %v2438_v16 = vpop.xlane.xlu0 %2437 }
 0xfd9   : > { %v2445_v18 = vmul.f32 0.03125, %v2438_v16  ;;  %v2882_v16 = vld [vmem:[%s624_s23] ss:$0 sm:$0xff] }
 0xfda   : > { %v2441_v19 = vpop.xlane.xlu1 %2440 }
 0xfdb   : > { %v2448_v20 = vadd.f32 1e-05, %v2445_v18  ;;  %v2446_v23 = vmul.f32 0.03125, %v2441_v19 }
 0xfdd   : > { %3270 = vrsqrt.f32 %v2448_v20  ;;  %v2449_v24 = vadd.f32 1e-05, %v2446_v23 }
 0xfde   : > { %v2444_v62 = vpop.xlane.xlu0 %2443 }
 0xfdf   : > { %3272 = vrsqrt.f32 %v2449_v24  ;;  %v2447_v25 = vmul.f32 0.03125, %v2444_v62 }
 0xfe1   : > { %v2450_v26 = vadd.f32 1e-05, %v2447_v25 }
 0xfe3   : > { %3274 = vrsqrt.f32 %v2450_v26 }
 0xfe7   : > { %v3271_v27 = vpop.eup %3270 }
 0xfe8   : > { %v2454_v29 = vmul.f32 %v3271_v27, %v2430_v3 }
 0xfe9   : > { %v3273_v30 = vpop.eup %3272 }
 0xfea   : > { %v2455_v31 = vmul.f32 %v3273_v30, %v2431_v14  ;;  %v2463_v32 = vmul.f32 %v2872_v28, %v2454_v29 }
 0xfec   : > { %v2464_v34 = vmul.f32 %v2872_v28, %v2455_v31  ;;  %v2472_v21 = vadd.f32 %v2873_v33, %v2463_v32 }
 0xfed   : > { %v3275_v55 = vpop.eup %3274 }
 0xfee   : > { %v2456_v17 = vmul.f32 %v3275_v55, %v2432_v9  ;;  %v2473_v22 = vadd.f32 %v2873_v33, %v2464_v34 }
 0xff0   : > { %v2465_v35 = vmul.f32 %v2872_v28, %v2456_v17  ;;  %v2475_v36 = vpack.c.bf16 %v2473_v22, %v2472_v21 }
 0xff2   : > { %3155 = vmatprep.mubr.msk.bf16.mxu1 %vm680_vm1, %v2475_v36  ;;  %v2474_v37 = vadd.f32 %v2873_v33, %v2465_v35 }
 0xff4   : > { %v2476_v38 = vpack.c.bf16 %v2474_v37, %v2474_v37 }
 0xff6   : > { %3156 = vmatmul.mubr.msk.bf16.vlgmr.msra.gmra.mrb[64].mxu1 %vm680_vm1, %v2476_v38 }
0x10c9   : > { %v3157_v48 = vpop.f32.mrb[64].mxu1 }
0x10ca   : > { %v2544_v49 = vadd.f32 %v3157_v48, %v2874_v47  ;;  %v2535_v50 = vpop.f32.mrb[65].mxu1 }
0x10cb   : > { %v2536_v51 = vadd.f32 %v2874_v47, %v2535_v50  ;;  %v3158_v52 = vpop.f32.mrb[66].mxu1 }
0x10cc   : > { %v2881_v54 = vmul.f32 -1.702, %v2544_v49  ;;  %v2538_v56 = vpop.f32.mrb[67].mxu1 }
0x10cd   : > { %v2879_v59 = vmul.f32 -1.702, %v2536_v51  ;;  %v2539_v57 = vadd.f32 %v2874_v47, %v2538_v56 }
0x10ce   : > { %v2559_v61 = vmul.f32 1.442695, %v2881_v54 }
0x10cf   : > { %v2555_v63 = vmul.f32 1.442695, %v2879_v59  ;;  %v2880_v0 = vmul.f32 -1.702, %v2539_v57 }
0x10d0   : > { %3276 = vpow2.f32 %v2559_v61 }
0x10d1   : > { %3278 = vpow2.f32 %v2555_v63  ;;  %v2557_v8 = vmul.f32 1.442695, %v2880_v0 }
0x10d3   : > { %3280 = vpow2.f32 %v2557_v8 }
0x10da   : > { %v3277_v3 = vpop.eup %3276 }
0x10db   : > { %v3279_v10 = vpop.eup %3278  ;;  %v2563_v14 = vadd.f32 1.0, %v3277_v3 }
0x10dc   : > { %v2561_v4 = vadd.f32 1.0, %v3279_v10 }
0x10dd   : > { %v3281_v5 = vpop.eup %3280  ;;  %3282 = vrcp.f32 %v2563_v14 }
0x10de   : > { %3284 = vrcp.f32 %v2561_v4  ;;  %v2562_v6 = vadd.f32 1.0, %v3281_v5 }
0x10e0   : > { %3286 = vrcp.f32 %v2562_v6 }
0x10e7   : > { %v3283_v7 = vpop.eup %3282 }
0x10e8   : > { %v3285_v13 = vpop.eup %3284  ;;  %v2572_v11 = vmul.f32 %v3283_v7, %v2544_v49 }
0x10e9   : > { %v2570_v12 = vmul.f32 %v3285_v13, %v2536_v51 }
0x10ea   : > { %v3287_v9 = vpop.eup %3286  ;;  %v2574_v15 = vpack.c.bf16 %v2572_v11, %v2572_v11 }
0x10eb   : > { %v2571_v1 = vmul.f32 %v3287_v9, %v2539_v57 }
0x10ed   : > { %v2573_v2 = vpack.c.bf16 %v2571_v1, %v2570_v12 }
0x10ef   : > { %3175 = vmatprep.mubr.bf16.mxu0 %v2573_v2 }
0x10f0   : > { %3176 = vmatmul.mubr.bf16.vlgmr.msra.gmra.mrb[52].mxu0 %v2574_v15 }
0x11c3   : > { %v3177_v18 = vpop.f32.mrb[52].mxu0 }
0x11c4   : > { %v2672_v19 = vadd.f32 %v3177_v18, %v2882_v16  ;;  %v2663_v20 = vpop.f32.mrb[53].mxu0 }
0x11c5   : > { %v2664_v23 = vadd.f32 %v2882_v16, %v2663_v20  ;;  %v3178_v24 = vpop.f32.mrb[54].mxu0 }
0x11c6   : > { %v2679_v62 = vadd.f32 %v2672_v19, %v3794_v60  ;;  %v2666_v25 = vpop.f32.mrb[55].mxu0 }
0x11c7   : > { %v2677_v26 = vadd.f32 %v2664_v23, %v3785_v53  ;;  %v2667_v27 = vadd.f32 %v2882_v16, %v2666_v25 }
0x11c8   : > { %2682 = vst.msk [vmem:[%s3870_s14 + $0x10] sm:$0xff] %vm680_vm1, %v2679_v62 }
0x11c9   : > { %2680 = vst.msk [vmem:[%s3870_s14] sm:$0xff] %vm680_vm1, %v2677_v26  ;;  %v2678_v28 = vadd.f32 %v2667_v27, %v3790_v58 }
0x11cb   : > { %2681 = vst.msk [vmem:[%s3870_s14 + $0x8] sm:$0xff] %vm680_vm1, %v2678_v28 }
0x11cc PF: > { %s3892_s28 = sld [smem:[#allocation2_spill]] }
0x11d2   : > { %s24_s29 = sadd.s32 1, %s3892_s28  }
0x11d3   : > { %p21_p5 = scmp.ge.s32.totalorder %s24_s29, 4  }
0x11d5   :  { %23 = sbr.rel (!%p21_p5) target bundleno = 5 (0x5), region = 139 }

// kernel: custom_clip_forward.3
= control target key start
LH: loop header
LB: loop body
LE: loop exit
PB: predicated region body
PF: predicated region fallthrough
CT: control target
= control target key end

     0   :  { %s8223_s27 = smov 0   ;;  %s9927_s0 = inlined_call_operand.vmem [shape: f32[4,4,192], index: 0, kind: input, shape index: {}]   ;;  %s9928_s1 = inlined_call_operand.vmem [shape: bf16[192,32], index: 1, kind: input, shape index: {}]   ;;  %s9929_s2 = inlined_call_operand.vmem [shape: f32[1,32], index: 2, kind: input, shape index: {}]   ;;  %s9930_s3 = inlined_call_operand.vmem [shape: f32[5,32], index: 3, kind: input, shape index: {}]   ;;  %s9931_s4 = inlined_call_operand.vmem [shape: f32[1,32], index: 4, kind: input, shape index: {}]   ;;  %s9932_s5 = inlined_call_operand.vmem [shape: f32[1,32], index: 5, kind: input, shape index: {}]   ;;  %s9933_s6 = inlined_call_operand.vmem [shape: f32[2,1,32], index: 6, kind: input, shape index: {}]   ;;  %s9934_s7 = inlined_call_operand.vmem [shape: f32[2,1,32], index: 7, kind: input, shape index: {}]   ;;  %s9935_s8 = inlined_call_operand.vmem [shape: bf16[2,32,96], index: 8, kind: input, shape index: {}]   ;;  %s9936_s9 = inlined_call_operand.vmem [shape: f32[2,1,96], index: 9, kind: input, shape index: {}]   ;;  %s9937_s10 = inlined_call_operand.vmem [shape: bf16[2,32,32], index: 10, kind: input, shape index: {}]   ;;  %s9938_s11 = inlined_call_operand.vmem [shape: f32[2,1,32], index: 11, kind: input, shape index: {}]   ;;  %s9939_s12 = inlined_call_operand.vmem [shape: f32[2,1,32], index: 12, kind: input, shape index: {}]   ;;  %s9940_s13 = inlined_call_operand.vmem [shape: f32[2,1,32], index: 13, kind: input, shape index: {}]   ;;  %s9941_s14 = inlined_call_operand.vmem [shape: bf16[2,32,128], index: 14, kind: input, shape index: {}]   ;;  %s9942_s15 = inlined_call_operand.vmem [shape: f32[2,1,128], index: 15, kind: input, shape index: {}]   ;;  %s9943_s16 = inlined_call_operand.vmem [shape: bf16[2,128,32], index: 16, kind: input, shape index: {}]   ;;  %s9944_s17 = inlined_call_operand.vmem [shape: f32[2,1,32], index: 17, kind: input, shape index: {}]   ;;  %s9945_s18 = inlined_call_operand.vmem [shape: f32[4,5,32], index: 18, kind: output, shape index: {}]  }
   0x1   :  { %9990 = sst [smem:[#allocation23_spill]] %s9927_s0 }
   0x2   :  { %9991 = sst [smem:[#allocation24_spill]] %s9928_s1 }
   0x3   :  { %9992 = sst [smem:[#allocation25_spill]] %s9929_s2 }
   0x4   :  { %9993 = sst [smem:[#allocation26_spill]] %s9933_s6 }
   0x5   :  { %9994 = sst [smem:[#allocation27_spill]] %s9934_s7 }
   0x6   :  { %9995 = sst [smem:[#allocation28_spill]] %s9935_s8 }
   0x7   :  { %9996 = sst [smem:[#allocation29_spill]] %s9937_s10 }
   0x8   :  { %9997 = sst [smem:[#allocation30_spill]] %s9945_s18 }
   0x9 LB: > { %9998 = sst [smem:[#allocation2_spill]] %s8110_s27  ;;  %s7473_s28 = sadd.s32 4294967295, %s8110_s27   ;;  %s8110_s27 = sphi %s8223_s27, %s28_s27  }
   0xa   : > { %p7476_p0 = scmp.ge.s32.totalorder %s8110_s27, 1  ;;  %p601_p1 = scmp.lt.s32.totalorder %s8110_s27, 3 }
   0xc   : > { %p602_p2 = pnand %p7476_p0, %p601_p1 }
   0xe   : > { %605 = sbr.rel (%p602_p2) target bundleno = 5415 (0x1527), region = 92 }
  0x15   : > { %p689_p3 = scmp.lt.s32.totalorder %s7473_s28, 1  ;;  %s10001_s8 = sld [smem:[#allocation28_spill]] }
  0x16   : > { %s10002_s10 = sld [smem:[#allocation29_spill]]  ;;  %p7485_p4 = scmp.ne.s32.totalorder %s7473_s28, 0 }
  0x17   : > { %s8231_s29 = scalar_select %p689_p3, %s7473_s28, 1 }
  0x18   : > { %737 = sbr.rel (%p7485_p4) target bundleno = 617 (0x269), region = 96  ;;  %v8112_v1 = vmov (!%p7485_p4), 0   ;;  %s10005_s20 = sld [smem:[#allocation23_spill]] (!%p7485_p4)  ;;  %v897_v8 = vld [vmem:[%s9930_s3] sm:$0x1f] (!%p7485_p4)  ;;  %vm852_vm0 = vcmask (!%p7485_p4), 523264  }
  0x19   : > { %s7581_s22 = sshll.u32 %s8231_s29, 4  ;;  %s713_s7 = scalar_lea.vmem %s9939_s12, %s8231_s29  ;;  %856 = vmatprep.subr.bf16.mxu0 (!%p7485_p4), %v8112_v1  ;;  %vm922_vm1 = vcmask (!%p7485_p4), 253952   ;;  %v905_v23 = vcombine.high (!%p7485_p4), %v897_v8, %v897_v8  ;;  %vm906_vm2 = vcmask (!%p7485_p4), 1042432   ;;  %vm907_vm3 = vcmask (!%p7485_p4), 1046532  }
  0x1a   : > { %s716_s24 = scalar_lea.vmem %s9940_s13, %s8231_s29  ;;  %s10006_s2 = sld [smem:[#allocation25_spill]] (!%p7485_p4)  ;;  %v7499_v24 = vrot.slane (!%p7485_p4), %v897_v8, 9  ;;  %vm908_vm4 = vmor (!%p7485_p4), %vm906_vm2, %vm907_vm3  ;;  %vm943_vm5 = vcmask (!%p7485_p4), 257024  }
  0x1b   : > { %s8249_s30 = scalar_lea.vmem %s10001_s8, %s7581_s22  ;;  %s8271_s8 = scalar_lea.vmem %s9941_s14, %s7581_s22  ;;  %v911_v25 = vrot.slane (!%p7485_p4), %v905_v23, 5 }
  0x1c   : > { %s8254_s18 = scalar_lea.vmem %s10002_s10, %s7581_s22  ;;  %s10004_s22 = sld [smem:[#allocation24_spill]] (!%p7485_p4) }
  0x1d   : > { %10003 = sst [smem:[#allocation3_spill]] %s8254_s18  ;;  %s7584_s18 = sshll.u32 %s8231_s29, 6  ;;  %v912_v27 = vsel (!%p7485_p4), %vm908_vm4, %v7499_v24, %v911_v25 }
  0x1e   : > { %s8281_s1 = scalar_lea.vmem %s9943_s16, %s7584_s18  ;;  %v7985_v5 = vld [vmem:[%s10005_s20 + $0x4] ss:$8 sps:$4 sm:$0xff] (!%p7485_p4)   ;;  %v7988_v7 = vld [vmem:[%s10005_s20 + $0x14] ss:$8 sps:$4 sm:$0xff] (!%p7485_p4)   ;;  %v7983_v19 = vld [vmem:[%s10005_s20] ss:$8 sps:$4 sm:$0xff] (!%p7485_p4)  }
  0x1f   : > { %v755_v10 = vpack.c.bf16 %v7988_v7, %v7985_v5  ;;  %v7986_v20 = vld [vmem:[%s10005_s20 + $0x10] ss:$8 sps:$4 sm:$0xff]   ;;  %s10007_s23 = sld [smem:[#allocation30_spill]] }
  0x20   : > { %v918_v9 = vld [vmem:[%s10006_s2] sm:$0x1]  ;;  %v754_v22 = vpack.c.bf16 %v7986_v20, %v7983_v19 }
  0x21   : > { %v919_v11 = vadd.f32 %v918_v9, %v897_v8  ;;  %7498 = vmatprep.mubr.msk.bf16.mxu0 %vm852_vm0, %v755_v10  ;;  %v921_v8 = vld [vmem:[%s9932_s5] sm:$0x1] }
  0x22   : > { %v7971_v0 = vld [vmem:[%s10004_s22] sm:$0xff]   ;;  %v7972_v2 = vld [vmem:[%s10004_s22 + $0x8] sm:$0xff]   ;;  %v7973_v3 = vld [vmem:[%s10004_s22 + $0x10] sm:$0xff]  }
  0x23   : > { %857 = vmatpush1.bf16.msra.mxu0 %v7971_v0  ;;  %v7974_v4 = vld [vmem:[%s10004_s22 + $0x18] sm:$0xff]   ;;  %v7975_v6 = vld [vmem:[%s10004_s22 + $0x20] sm:$0xff]   ;;  %v7976_v12 = vld [vmem:[%s10004_s22 + $0x28] sm:$0xff]   ;;  %v923_v13 = vsel %vm922_vm1, %v919_v11, 0.0 }
  0x24   : > { %858 = vmatprep.subr.bf16.mxu0 %v8112_v1  ;;  %924 = vadd.xlane.f32.xlu0 %v923_v13  ;;  %v7977_v14 = vld [vmem:[%s10004_s22 + $0x30] sm:$0xff]   ;;  %v7978_v15 = vld [vmem:[%s10004_s22 + $0x38] sm:$0xff]   ;;  %v7979_v16 = vld [vmem:[%s10004_s22 + $0x40] sm:$0xff]   ;;  %v997_v13 = vlaneseq }
  0x25   : > { %v7980_v17 = vld [vmem:[%s10004_s22 + $0x48] sm:$0xff]   ;;  %v7981_v18 = vld [vmem:[%s10004_s22 + $0x50] sm:$0xff]   ;;  %v7982_v21 = vld [vmem:[%s10004_s22 + $0x58] sm:$0xff]  }
  0x27   : > { %859 = vmatpush1.bf16.msra.mxu0 %v7972_v2 }
  0x28   : > { %860 = vmatprep.subr.bf16.mxu0 %v8112_v1 }
  0x2b   : > { %861 = vmatpush1.bf16.msra.mxu0 %v7973_v3 }
  0x2c   : > { %862 = vmatprep.subr.bf16.mxu0 %v8112_v1 }
  0x2f   : > { %863 = vmatpush1.bf16.msra.mxu0 %v7974_v4 }
  0x30   : > { %864 = vmatprep.subr.bf16.mxu0 %v8112_v1 }
  0x33   : > { %865 = vmatpush1.bf16.msra.mxu0 %v7975_v6  ;;  %v920_v6 = vld [vmem:[%s9931_s4] sm:$0x1] }
  0x34   : > { %866 = vmatprep.subr.bf16.mxu0 %v8112_v1 }
  0x37   : > { %867 = vmatpush1.bf16.msra.mxu0 %v7976_v12 }
  0x38   : > { %868 = vmatprep.subr.bf16.mxu0 %v8112_v1 }
  0x3b   : > { %869 = vmatpush1.bf16.msra.mxu0 %v7977_v14 }
  0x3c   : > { %870 = vmatprep.subr.bf16.mxu0 %v8112_v1 }
  0x3f   : > { %871 = vmatpush1.bf16.msra.mxu0 %v7978_v15 }
  0x40   : > { %872 = vmatprep.subr.bf16.mxu0 %v8112_v1 }
  0x43   : > { %873 = vmatpush1.bf16.msra.mxu0 %v7979_v16 }
  0x44   : > { %874 = vmatprep.subr.bf16.mxu0 %v8112_v1 }
  0x47   : > { %875 = vmatpush1.bf16.msra.mxu0 %v7980_v17 }
  0x48   : > { %876 = vmatprep.subr.bf16.mxu0 %v8112_v1 }
  0x4b   : > { %877 = vmatpush1.bf16.msra.mxu0 %v7981_v18  ;;  %v998_v18 = vshrl.u32 %v997_v13, 7 }
  0x4c   : > { %878 = vmatprep.subr.bf16.mxu0 %v8112_v1 }
  0x4d   : > { %v999_v25 = vsub.s32 0, %v998_v18 }
  0x4f   : > { %879 = vmatpush1.bf16.msra.mxu0 %v7982_v21 }
  0x52   : > { %889 = vmatmul.mubr.bf16.vlgmr.msra.gmra.mrb[0].mxu0 %v754_v22 }
  0xb1   : > { %v925_v26 = vpop.xlane.xlu0 %924 }
  0xb2   : > { %v927_v28 = vmul.f32 0.03125, %v925_v26  ;;  %v1000_v26 = vrot.slane %v920_v6, %v999_v25 }
  0xb4   : > { %v928_v34 = vsub.f32 %v919_v11, %v927_v28  ;;  %v1010_v28 = vrot.slane %v921_v8, %v999_v25 }
  0xb6   : > { %v929_v43 = vmul.f32 %v928_v34, %v928_v34 }
  0xb8   : > { %v930_v45 = vsel %vm922_vm1, %v929_v43, 0.0 }
 0x125   : > { %v890_v29 = vpop.f32.mrb[0].mxu0 }
 0x126   : > { %v900_v30 = vcombine.high %v890_v29, %v890_v29  ;;  %v914_v31 = vadd.f32 %v912_v27, %v890_v29  ;;  %v892_v32 = vpop.f32.mrb[1].mxu0 }
 0x127   : > { %v893_v33 = vpop.f32.mrb[2].mxu0 }
 0x128   : > { %v901_v35 = vcombine.high %v893_v33, %v893_v33  ;;  %v916_v36 = vadd.f32 %v912_v27, %v893_v33  ;;  %v895_v37 = vpop.f32.mrb[3].mxu0  ;;  %v944_v38 = vsel %vm943_vm5, %v914_v31, 0.0  ;;  %v915_v39 = vadd.f32 %v912_v27, %v900_v30 }
 0x129   : > { %945 = vadd.xlane.f32.xlu0 %v944_v38 }
 0x12a   : > { %v947_v40 = vsel %vm943_vm5, %v915_v39, 0.0  ;;  %v917_v41 = vadd.f32 %v912_v27, %v901_v35  ;;  %v950_v44 = vsel %vm943_vm5, %v916_v36, 0.0 }
 0x12b   : > { %948 = vadd.xlane.f32.xlu1 %v947_v40 }
 0x12c   : > { %v953_v42 = vsel %vm943_vm5, %v917_v41, 0.0 }
 0x12d   : > { %954 = vadd.xlane.f32.xlu0 %v953_v42 }
 0x12f   : > { %951 = vadd.xlane.f32.xlu1 %v950_v44 }
 0x133   : > { %931 = vadd.xlane.f32.xlu1 %v930_v45 }
 0x1b6   : > { %v946_v46 = vpop.xlane.xlu0 %945 }
 0x1b7   : > { %v956_v47 = vmul.f32 0.03125, %v946_v46 }
 0x1b8   : > { %v949_v48 = vpop.xlane.xlu1 %948 }
 0x1b9   : > { %v960_v49 = vsub.f32 %v914_v31, %v956_v47  ;;  %v957_v50 = vmul.f32 0.03125, %v949_v48 }
 0x1ba   : > { %v955_v51 = vpop.xlane.xlu0 %954 }
 0x1bb   : > { %v961_v52 = vsub.f32 %v915_v39, %v957_v50  ;;  %v959_v53 = vmul.f32 0.03125, %v955_v51  ;;  %v964_v54 = vmul.f32 %v960_v49, %v960_v49 }
 0x1bc   : > { %v952_v55 = vpop.xlane.xlu1 %951 }
 0x1bd   : > { %v963_v56 = vsub.f32 %v917_v41, %v959_v53  ;;  %v958_v57 = vmul.f32 0.03125, %v952_v55  ;;  %v968_v58 = vsel %vm943_vm5, %v964_v54, 0.0  ;;  %v965_v59 = vmul.f32 %v961_v52, %v961_v52 }
 0x1be   : > { %969 = vadd.xlane.f32.xlu0 %v968_v58 }
 0x1bf   : > { %v962_v60 = vsub.f32 %v916_v36, %v958_v57  ;;  %v971_v61 = vsel %vm943_vm5, %v965_v59, 0.0  ;;  %v967_v62 = vmul.f32 %v963_v56, %v963_v56 }
 0x1c0   : > { %972 = vadd.xlane.f32.xlu1 %v971_v61  ;;  %v932_v63 = vpop.xlane.xlu1 %931 }
 0x1c1   : > { %v933_v0 = vmul.f32 0.03125, %v932_v63  ;;  %v966_v1 = vmul.f32 %v962_v60, %v962_v60  ;;  %v977_v4 = vsel %vm943_vm5, %v967_v62, 0.0 }
 0x1c3   : > { %v934_v2 = vadd.f32 1e-05, %v933_v0  ;;  %v974_v3 = vsel %vm943_vm5, %v966_v1, 0.0 }
 0x1c4   : > { %975 = vadd.xlane.f32.xlu0 %v974_v3  ;;  %978 = vadd.xlane.f32.xlu1 %v977_v4 }
 0x1c5   : > { %7990 = vrsqrt.f32 %v934_v2 }
 0x1cf   : > { %v7991_v5 = vpop.eup %7990 }
 0x1d0   : > { %v936_v7 = vmul.f32 %v7991_v5, %v928_v34 }
 0x1d2   : > { %v937_v9 = vmul.f32 %v936_v7, %v920_v6 }
 0x1d4   : > { %v938_v10 = vadd.f32 %v937_v9, %v921_v8 }
 0x1d6   : > { %939 = vst.msk [vmem:[%s10007_s23] sm:$0x1] %vm922_vm1, %v938_v10  ;;  %940 = vst.msk [vmem:[%s10007_s23 + $0x8] sm:$0x1] %vm922_vm1, %v938_v10 }
 0x1d7   : > { %941 = vst.msk [vmem:[%s10007_s23 + $0x10] sm:$0x1] %vm922_vm1, %v938_v10  ;;  %942 = vst.msk [vmem:[%s10007_s23 + $0x18] sm:$0x1] %vm922_vm1, %v938_v10 }
 0x24b   : > { %v970_v11 = vpop.xlane.xlu0 %969 }
 0x24c   : > { %v980_v12 = vmul.f32 0.03125, %v970_v11 }
 0x24d   : > { %v973_v14 = vpop.xlane.xlu1 %972 }
 0x24e   : > { %v984_v15 = vadd.f32 1e-05, %v980_v12  ;;  %v981_v16 = vmul.f32 0.03125, %v973_v14 }
 0x250   : > { %7992 = vrsqrt.f32 %v984_v15  ;;  %v985_v17 = vadd.f32 1e-05, %v981_v16 }
 0x251   : > { %v979_v19 = vpop.xlane.xlu1 %978  ;;  %v976_v20 = vpop.xlane.xlu0 %975 }
 0x252   : > { %7994 = vrsqrt.f32 %v985_v17  ;;  %v983_v21 = vmul.f32 0.03125, %v979_v19  ;;  %v982_v22 = vmul.f32 0.03125, %v976_v20 }
 0x254   : > { %v987_v23 = vadd.f32 1e-05, %v983_v21  ;;  %v986_v24 = vadd.f32 1e-05, %v982_v22 }
 0x256   : > { %7996 = vrsqrt.f32 %v987_v23 }
 0x257   : > { %7998 = vrsqrt.f32 %v986_v24 }
 0x25a   : > { %v7993_v27 = vpop.eup %7992 }
 0x25b   : > { %v992_v29 = vmul.f32 %v7993_v27, %v960_v49 }
 0x25c   : > { %v7995_v30 = vpop.eup %7994 }
 0x25d   : > { %v1002_v31 = vmul.f32 %v1000_v26, %v992_v29  ;;  %v993_v32 = vmul.f32 %v7995_v30, %v961_v52 }
 0x25f   : > { %v1012_v33 = vadd.f32 %v1010_v28, %v1002_v31  ;;  %v1003_v34 = vmul.f32 %v1000_v26, %v993_v32 }
 0x260   : > { %v7997_v35 = vpop.eup %7996 }
 0x261   : > { %v7999_v36 = vpop.eup %7998  ;;  %1016 = vst.msk [vmem:[%s10007_s23 + $0x1] sm:$0xf] %vm943_vm5, %v1012_v33  ;;  %v1013_v37 = vadd.f32 %v1010_v28, %v1003_v34  ;;  %v995_v38 = vmul.f32 %v7997_v35, %v963_v56 }
 0x262   : > { %v994_v39 = vmul.f32 %v7999_v36, %v962_v60 }
 0x263   : > { %1017 = vst.msk [vmem:[%s10007_s23 + $0x9] sm:$0xf] %vm943_vm5, %v1013_v37  ;;  %v1005_v40 = vmul.f32 %v1000_v26, %v995_v38 }
 0x264   : > { %v1004_v41 = vmul.f32 %v1000_v26, %v994_v39 }
 0x265   : > { %v1015_v42 = vadd.f32 %v1010_v28, %v1005_v40 }
 0x266   : > { %v1014_v43 = vadd.f32 %v1010_v28, %v1004_v41 }
 0x267   : > { %1019 = vst.msk [vmem:[%s10007_s23 + $0x19] sm:$0xf] %vm943_vm5, %v1015_v42 }
 0x268   : > { %1018 = vst.msk [vmem:[%s10007_s23 + $0x11] sm:$0xf] %vm943_vm5, %v1014_v43 }
 0x269 PF: > { %s10008_s28 = sld [smem:[#allocation30_spill]]  ;;  %v1032_v45 = vlaneseq  ;;  %v8113_v47 = vmov 1966171168   ;;  %vm1365_vm6 = vcmask 261120   ;;  %vm1372_vm7 = vcmask 257024   ;;  %s10028_s26 = sld [smem:[#allocation26_spill]] }
 0x26a   : > { %v1030_v48 = vunpack.c.l.s4 %v8113_v47  ;;  %s10030_s6 = sld [smem:[#allocation27_spill]]  ;;  %s10032_s25 = scalar_lea.vmem %s9936_s9, %s8231_s29  ;;  %vm8115_vm8 = vmmov 0   ;;  %vm2484_vm9 = vcmask 64512   ;;  %vm2682_vm10 = vcmask 36864  }
 0x26b   : > { %v8401_v51 = vshrl.u32 %v1032_v45, 7  ;;  %s8116_s2 = smov 96   ;;  %s8117_s10 = smov 64   ;;  %vm2737_vm11 = vcmask 1041408   ;;  %vm2738_vm12 = vcmask 1042432   ;;  %vm2733_vm13 = vcmask 39936  }
 0x26c   : > { %v1031_v53 = vunpack.c.0.s8 %v1030_v48  ;;  %s8119_s23 = smov 88   ;;  %s8122_s18 = smov 80   ;;  %vm3952_vm14 = vcmask 1043456   ;;  %vm7332_vm15 = vcmask 258048  }
 0x26d   : > { %s8123_s0 = smov 112   ;;  %s8126_s21 = smov 104  }
 0x26e   : > { %v8404_v57 = vsub.s32 %v1031_v53, %v8401_v51 }
 0x26f   : > { %v1020_v44 = vld [vmem:[%s10008_s28] sm:$0x1f]  ;;  %v1021_v46 = vld [vmem:[%s10008_s28 + $0x8] sm:$0x1f]  ;;  %v1022_v49 = vld [vmem:[%s10008_s28 + $0x10] sm:$0x1f]  ;;  %s10029_s27 = scalar_lea.vmem %s10028_s26, %s8231_s29 }
 0x270   : > { %v1023_v50 = vld [vmem:[%s10008_s28 + $0x18] sm:$0x1f]  ;;  %v1028_v52 = vcombine.high %v1020_v44, %v1020_v44  ;;  %v1067_v54 = vcombine.high %v1021_v46, %v1021_v46  ;;  %v1106_v55 = vcombine.high %v1022_v49, %v1022_v49  ;;  %v1035_v58 = vrot.slane %v1020_v44, %v8404_v57  ;;  %s10031_s19 = scalar_lea.vmem %s10030_s6, %s8231_s29  ;;  %s8120_s26 = smov 120  }
 0x271   : > { %v1145_v56 = vcombine.high %v1023_v50, %v1023_v50  ;;  %v1074_v60 = vrot.slane %v1021_v46, %v8404_v57  ;;  %v1113_v62 = vrot.slane %v1022_v49, %v8404_v57  ;;  %v1152_v0 = vrot.slane %v1023_v50, %v8404_v57  ;;  %s10033_s6 = sld [smem:[#allocation3_spill]] }
 0x272   : > { %v1042_v59 = vrot.slane %v1028_v52, %v8404_v57  ;;  %v1081_v61 = vrot.slane %v1067_v54, %v8404_v57  ;;  %v1120_v63 = vrot.slane %v1106_v55, %v8404_v57  ;;  %v1043_v2 = vcombine.high %v1035_v58, %v1035_v58 }
 0x273   : > { %v1159_v1 = vrot.slane %v1145_v56, %v8404_v57  ;;  %v8415_v3 = vrot.slane %v1035_v58, %v8404_v57  ;;  %v1082_v5 = vcombine.high %v1074_v60, %v1074_v60  ;;  %v8421_v6 = vrot.slane %v1074_v60, %v8404_v57 }
 0x274   : > { %v8418_v4 = vrot.slane %v1042_v59, %v8404_v57  ;;  %v8424_v7 = vrot.slane %v1081_v61, %v8404_v57  ;;  %v1121_v8 = vcombine.high %v1113_v62, %v1113_v62  ;;  %v8427_v9 = vrot.slane %v1113_v62, %v8404_v57 }
 0x275   : > { %10009 = vst [vmem:[#allocation4_spill] sm:$0xff] %v8415_v3  ;;  %10011 = vst [vmem:[#allocation6_spill] sm:$0xff] %v8421_v6  ;;  %v8430_v10 = vrot.slane %v1043_v2, %v8404_v57  ;;  %v8433_v11 = vrot.slane %v1082_v5, %v8404_v57  ;;  %v8436_v12 = vrot.slane %v1120_v63, %v8404_v57  ;;  %v8505_v59 = vsub.s32 0, %v8401_v51 }
 0x276   : > { %10010 = vst [vmem:[#allocation5_spill] sm:$0xff] %v8418_v4  ;;  %10012 = vst [vmem:[#allocation7_spill] sm:$0xff] %v8424_v7  ;;  %v8439_v13 = vrot.slane %v1152_v0, %v8404_v57  ;;  %v8443_v14 = vcombine.high %v8421_v6, %v8421_v6  ;;  %v1242_v15 = vcombine.low %v8418_v4, %v8421_v6  ;;  %v8508_v60 = vsub.s32 1, %v8401_v51 }
 0x277   : > { %10013 = vst [vmem:[#allocation8_spill] sm:$0xff] %v8427_v9  ;;  %10014 = vst [vmem:[#allocation9_spill] sm:$0xff] %v8430_v10  ;;  %v8448_v16 = vrot.slane %v1121_v8, %v8404_v57  ;;  %v1160_v17 = vcombine.high %v1152_v0, %v1152_v0  ;;  %v1240_v18 = vcombine.low %v8415_v3, %v8430_v10  ;;  %v8511_v61 = vsub.s32 2, %v8401_v51 }
 0x278   : > { %10015 = vst [vmem:[#allocation10_spill] sm:$0xff] %v8433_v11  ;;  %10016 = vst [vmem:[#allocation11_spill] sm:$0xff] %v8436_v12  ;;  %v7500_v19 = vcombine.high %v8415_v3, %v8430_v10  ;;  %v8456_v20 = vcombine.high %v8433_v11, %v8433_v11  ;;  %v1292_v21 = vcombine.low %v8436_v12, %v8439_v13  ;;  %v8514_v62 = vsub.s32 3, %v8401_v51 }
 0x279   : > { %10017 = vst [vmem:[#allocation12_spill] sm:$0xff] %v8439_v13  ;;  %10018 = vst [vmem:[#allocation13_spill] sm:$0xff] %v8443_v14  ;;  %v1243_v22 = vcombine.low %v8433_v11, %v8443_v14  ;;  %v1264_v23 = vrot.slane %v1242_v15, %v8404_v57  ;;  %v1290_v24 = vcombine.low %v8427_v9, %v8448_v16  ;;  %v8517_v0 = vsub.s32 4, %v8401_v51 }
 0x27a   : > { %10019 = vst [vmem:[#allocation14_spill] sm:$0xff] %v8448_v16  ;;  %10020 = vst [vmem:[#allocation15_spill] sm:$0xff] %v8456_v20  ;;  %v7501_v25 = vcombine.high %v8427_v9, %v8448_v16  ;;  %v1250_v26 = vrot.slane %v1240_v18, %v8404_v57  ;;  %v1257_v27 = vrot.slane %v7500_v19, %v8404_v57  ;;  %v8523_v2 = vsub.s32 6, %v8401_v51 }
 0x27b   : > { %v1289_v28 = vcombine.low %v8456_v20, %v8424_v7  ;;  %v1320_v29 = vrot.slane %v1292_v21, %v8404_v57  ;;  %v1271_v30 = vrot.slane %v1243_v22, %v8404_v57  ;;  %v1306_v31 = vrot.slane %v1290_v24, %v8404_v57 }
 0x27c   : > { %v1313_v32 = vrot.slane %v7501_v25, %v8404_v57  ;;  %v8476_v33 = vrot.slane %v1159_v1, %v8404_v57  ;;  %v1272_v34 = vcombine.low %v1250_v26, %v1257_v27  ;;  %v8480_v36 = vrot.slane %v1160_v17, %v8404_v57 }
 0x27d   : > { %v1299_v35 = vrot.slane %v1289_v28, %v8404_v57  ;;  %v8484_v37 = vcombine.high %v8439_v13, %v8439_v13  ;;  %v1273_v38 = vcombine.low %v1264_v23, %v1271_v30  ;;  %v8520_v1 = vsub.s32 5, %v8401_v51 }
 0x27e   : > { %10021 = vst [vmem:[#allocation16_spill] sm:$0xff] %v8476_v33  ;;  %v1322_v39 = vcombine.low %v1313_v32, %v1320_v29  ;;  %v1280_v40 = vrot.slane %v1272_v34, %v8404_v57  ;;  %v8489_v42 = vcombine.high %v8480_v36, %v8480_v36  ;;  %v8526_v5 = vsub.s32 7, %v8401_v51 }
 0x27f   : > { %10022 = vst [vmem:[#allocation17_spill] sm:$0xff] %v8484_v37  ;;  %v1321_v41 = vcombine.low %v1299_v35, %v1306_v31  ;;  %v1338_v43 = vcombine.low %v8480_v36, %v8484_v37  ;;  %v1287_v44 = vrot.slane %v1273_v38, %v8404_v57  ;;  %v8530_v15 = vcombine.high %v8415_v3, %v8415_v3 }
 0x280   : > { %10023 = vst [vmem:[#allocation18_spill] sm:$0xff] %v8489_v42  ;;  %v1336_v45 = vrot.slane %v1322_v39, %v8404_v57  ;;  %v1339_v47 = vcombine.low %v8489_v42, %v8476_v33  ;;  %v8534_v17 = vcombine.high %v8430_v10, %v8430_v10  ;;  %v8538_v18 = vcombine.high %v8427_v9, %v8427_v9 }
 0x281   : > { %v1329_v46 = vrot.slane %v1321_v41, %v8404_v57  ;;  %v1346_v48 = vrot.slane %v1338_v43, %v8404_v57  ;;  %v1288_v49 = vcombine.low %v1280_v40, %v1287_v44  ;;  %10024 = vst [vmem:[#allocation19_spill] sm:$0xff] %v8530_v15  ;;  %v8542_v19 = vcombine.high %v8448_v16, %v8448_v16 }
 0x282   : > { %v1353_v52 = vrot.slane %v1339_v47, %v8404_v57  ;;  %10025 = vst [vmem:[#allocation20_spill] sm:$0xff] %v8534_v17  ;;  %10026 = vst [vmem:[#allocation21_spill] sm:$0xff] %v8538_v18 }
 0x283   : > { %v1337_v50 = vcombine.low %v1329_v46, %v1336_v45  ;;  %v1366_v53 = vsel %vm1365_vm6, %v1288_v49, 0.0  ;;  %10027 = vst [vmem:[#allocation22_spill] sm:$0xff] %v8542_v19 }
 0x284   : > { %1367 = vadd.xlane.f32.xlu0 %v1366_v53  ;;  %v1354_v54 = vcombine.low %v1346_v48, %v1353_v52 }
 0x285   : > { %v1369_v55 = vsel %vm1365_vm6, %v1337_v50, 0.0 }
 0x286   : > { %v1361_v56 = vrot.slane %v1354_v54, %v8404_v57 }
 0x288   : > { %1370 = vadd.xlane.f32.xlu0 %v1369_v55  ;;  %v1373_v58 = vsel %vm1372_vm7, %v1361_v56, 0.0 }
 0x289   : > { %1374 = vadd.xlane.f32.xlu1 %v1373_v58 }
 0x311   : > { %v1368_v63 = vpop.xlane.xlu0 %1367 }
 0x312   : > { %v1377_v8 = vmul.f32 0.03125, %v1368_v63 }
 0x314   : > { %v1386_v51 = vrot.slane %v1377_v8, %v8505_v59  ;;  %v1390_v21 = vrot.slane %v1377_v8, %v8508_v60  ;;  %v1394_v22 = vrot.slane %v1377_v8, %v8511_v61  ;;  %v1398_v23 = vrot.slane %v1377_v8, %v8514_v62 }
 0x315   : > { %v1371_v24 = vpop.xlane.xlu0 %1370  ;;  %v1402_v25 = vrot.slane %v1377_v8, %v8517_v0  ;;  %v1406_v26 = vrot.slane %v1377_v8, %v8520_v1  ;;  %v1410_v27 = vrot.slane %v1377_v8, %v8523_v2  ;;  %v1414_v28 = vrot.slane %v1377_v8, %v8526_v5 }
 0x316   : > { %v8552_v29 = vmul.f32 0.03125, %v1371_v24  ;;  %v1375_v30 = vpop.xlane.xlu1 %1374  ;;  %v8555_v31 = vsub.f32 %v8415_v3, %v1386_v51  ;;  %v8558_v32 = vsub.f32 %v8430_v10, %v1390_v21  ;;  %v8561_v34 = vsub.f32 %v8530_v15, %v1394_v22 }
 0x317   : > { %v1379_v35 = vmul.f32 0.03125, %v1375_v30  ;;  %v8564_v38 = vsub.f32 %v8534_v17, %v1398_v23  ;;  %v8567_v39 = vsub.f32 %v8418_v4, %v1402_v25  ;;  %v8570_v40 = vsub.f32 %v8421_v6, %v1406_v26 }
 0x318   : > { %v8573_v41 = vsub.f32 %v8433_v11, %v1410_v27  ;;  %v8576_v43 = vsub.f32 %v8443_v14, %v1414_v28  ;;  %v1503_v44 = vmul.f32 %v8555_v31, %v8555_v31  ;;  %v1504_v45 = vmul.f32 %v8558_v32, %v8558_v32 }
 0x319   : > { %v1450_v46 = vrot.slane %v1379_v35, %v8505_v59  ;;  %v1454_v47 = vrot.slane %v1379_v35, %v8508_v60  ;;  %v1458_v48 = vrot.slane %v1379_v35, %v8511_v61  ;;  %v1462_v49 = vrot.slane %v1379_v35, %v8514_v62 }
 0x31a   : > { %v1505_v50 = vmul.f32 %v8561_v34, %v8561_v34  ;;  %v1506_v52 = vmul.f32 %v8564_v38, %v8564_v38  ;;  %v1507_v53 = vmul.f32 %v8567_v39, %v8567_v39  ;;  %v1508_v54 = vmul.f32 %v8570_v40, %v8570_v40 }
 0x31b   : > { %v8595_v55 = vsub.f32 %v8480_v36, %v1450_v46  ;;  %v8598_v56 = vsub.f32 %v8484_v37, %v1454_v47  ;;  %v8601_v58 = vsub.f32 %v8489_v42, %v1458_v48  ;;  %v8604_v63 = vsub.f32 %v8476_v33, %v1462_v49 }
 0x31c   : > { %v1509_v8 = vmul.f32 %v8573_v41, %v8573_v41  ;;  %v1510_v51 = vmul.f32 %v8576_v43, %v8576_v43  ;;  %v1543_v21 = vcombine.low %v1503_v44, %v1504_v45  ;;  %v1544_v22 = vcombine.low %v1505_v50, %v1506_v52 }
 0x31d   : > { %v1545_v23 = vcombine.low %v1507_v53, %v1508_v54  ;;  %v1519_v24 = vmul.f32 %v8595_v55, %v8595_v55  ;;  %v1520_v25 = vmul.f32 %v8598_v56, %v8598_v56  ;;  %v1521_v26 = vmul.f32 %v8601_v58, %v8601_v58 }
 0x31e   : > { %v1546_v27 = vcombine.low %v1509_v8, %v1510_v51  ;;  %v1553_v28 = vrot.slane %v1543_v21, %v8404_v57  ;;  %v1560_v30 = vrot.slane %v1544_v22, %v8404_v57  ;;  %v1522_v35 = vmul.f32 %v8604_v63, %v8604_v63 }
 0x31f   : > { %v1567_v44 = vrot.slane %v1545_v23, %v8404_v57  ;;  %v1641_v45 = vcombine.low %v1519_v24, %v1520_v25  ;;  %v1418_v46 = vrot.slane %v8552_v29, %v8505_v59  ;;  %v1422_v47 = vrot.slane %v8552_v29, %v8508_v60 }
 0x320   : > { %v1574_v48 = vrot.slane %v1546_v27, %v8404_v57  ;;  %v1575_v49 = vcombine.low %v1553_v28, %v1560_v30  ;;  %v1642_v50 = vcombine.low %v1521_v26, %v1522_v35  ;;  %v1426_v52 = vrot.slane %v8552_v29, %v8511_v61 }
 0x321   : > { %v1649_v53 = vrot.slane %v1641_v45, %v8404_v57  ;;  %v1430_v54 = vrot.slane %v8552_v29, %v8514_v62  ;;  %v1434_v8 = vrot.slane %v8552_v29, %v8517_v0  ;;  %v1438_v51 = vrot.slane %v8552_v29, %v8520_v1 }
 0x322   : > { %v1576_v21 = vcombine.low %v1567_v44, %v1574_v48  ;;  %v1583_v22 = vrot.slane %v1575_v49, %v8404_v57  ;;  %v1656_v23 = vrot.slane %v1642_v50, %v8404_v57  ;;  %v1442_v24 = vrot.slane %v8552_v29, %v8523_v2 }
 0x323   : > { %v1446_v25 = vrot.slane %v8552_v29, %v8526_v5  ;;  %v8642_v26 = vsub.f32 %v8456_v20, %v1418_v46  ;;  %v8645_v27 = vsub.f32 %v8424_v7, %v1422_v47  ;;  %v8648_v28 = vsub.f32 %v8427_v9, %v1426_v52 }
 0x324   : > { %v1590_v30 = vrot.slane %v1576_v21, %v8404_v57  ;;  %v1657_v35 = vcombine.low %v1649_v53, %v1656_v23  ;;  %v8652_v44 = vsub.f32 %v8448_v16, %v1430_v54  ;;  %v8655_v45 = vsub.f32 %v8538_v18, %v1434_v8 }
 0x325   : > { %v8658_v29 = vsub.f32 %v8542_v19, %v1438_v51  ;;  %v8661_v46 = vsub.f32 %v8436_v12, %v1442_v24  ;;  %v8664_v47 = vsub.f32 %v8439_v13, %v1446_v25  ;;  %v1511_v48 = vmul.f32 %v8642_v26, %v8642_v26 }
 0x326   : > { %v1591_v49 = vcombine.low %v1583_v22, %v1590_v30  ;;  %v1664_v50 = vrot.slane %v1657_v35, %v8404_v57  ;;  %v1512_v52 = vmul.f32 %v8645_v27, %v8645_v27  ;;  %v1513_v53 = vmul.f32 %v8648_v28, %v8648_v28 }
 0x327   : > { %v1514_v54 = vmul.f32 %v8652_v44, %v8652_v44  ;;  %v1515_v8 = vmul.f32 %v8655_v45, %v8655_v45  ;;  %v1516_v51 = vmul.f32 %v8658_v29, %v8658_v29  ;;  %v1517_v21 = vmul.f32 %v8661_v46, %v8661_v46 }
 0x328   : > { %v1668_v22 = vsel %vm1365_vm6, %v1591_v49, 0.0  ;;  %v1518_v23 = vmul.f32 %v8664_v47, %v8664_v47  ;;  %v1592_v24 = vcombine.low %v1511_v48, %v1512_v52  ;;  %v1674_v35 = vsel %vm1372_vm7, %v1664_v50, 0.0 }
 0x329   : > { %1669 = vadd.xlane.f32.xlu1 %v1668_v22  ;;  %v1593_v25 = vcombine.low %v1513_v53, %v1514_v54  ;;  %v1594_v30 = vcombine.low %v1515_v8, %v1516_v51  ;;  %v8004_v51 = vld [vmem:[%s8249_s30] sm:$0xff]  }
 0x32a   : > { %v1595_v13 = vcombine.low %v1517_v21, %v1518_v23  ;;  %v1602_v16 = vrot.slane %v1592_v24, %v8404_v57  ;;  %v8005_v21 = vld [vmem:[%s8249_s30 + $0x8] sm:$0xff]   ;;  %7679 = vmatprep.subr.bf16.mxu1 %v8004_v51  ;;  %s8125_s30 = smov 72  }
 0x32b   : > { %v1609_v12 = vrot.slane %v1593_v25, %v8404_v57  ;;  %v1616_v19 = vrot.slane %v1594_v30, %v8404_v57  ;;  %7680 = vmatpush3.bf16.msra.mxu1 %v8004_v51 }
 0x32c   : > { %v1623_v49 = vrot.slane %v1595_v13, %v8404_v57  ;;  %7681 = vmatprep.subr.bf16.mxu1 %v8005_v21  ;;  %v7503_v13 = vld [vmem:[%s10031_s19] ss:$0 sm:$0xff]  ;;  %s8124_s19 = smov 48  }
 0x32d   : > { %1675 = vadd.xlane.f32.xlu1 %v1674_v35  ;;  %v1624_v48 = vcombine.low %v1602_v16, %v1609_v12  ;;  %v7502_v12 = vld [vmem:[%s10029_s27] ss:$0 sm:$0xff]  ;;  %v1903_v35 = vrot.slane %v7503_v13, %v8404_v57  ;;  %s8121_s27 = smov 56  }
 0x32e   : > { %v1625_v52 = vcombine.low %v1616_v19, %v1623_v49  ;;  %v1814_v16 = vcombine.high %v7502_v12, %v7502_v12  ;;  %v1896_v19 = vcombine.high %v7503_v13, %v7503_v13  ;;  %v1821_v24 = vrot.slane %v7502_v12, %v8404_v57 }
 0x32f   : > { %v1632_v53 = vrot.slane %v1624_v48, %v8404_v57  ;;  %7682 = vmatpush3.bf16.msra.mxu1 %v8005_v21 }
 0x330   : > { %v1639_v54 = vrot.slane %v1625_v52, %v8404_v57  ;;  %v1828_v25 = vrot.slane %v1814_v16, %v8404_v57  ;;  %v1910_v49 = vrot.slane %v1896_v19, %v8404_v57  ;;  %v8709_v21 = vrot.slane %v1821_v24, %v8404_v57 }
 0x331   : > { %v8721_v19 = vrot.slane %v1903_v35, %v8404_v57 }
 0x332   : > { %v1640_v8 = vcombine.low %v1632_v53, %v1639_v54  ;;  %v1829_v53 = vcombine.high %v1821_v24, %v1821_v24  ;;  %v1830_v54 = vcombine.high %v1828_v25, %v1828_v25  ;;  %v1912_v51 = vcombine.high %v1910_v49, %v1910_v49 }
 0x333   : > { %v8712_v12 = vrot.slane %v1828_v25, %v8404_v57 }
 0x334   : > { %v1671_v50 = vsel %vm1365_vm6, %v1640_v8, 0.0  ;;  %v8715_v16 = vrot.slane %v1829_v53, %v8404_v57  ;;  %v8718_v13 = vrot.slane %v1830_v54, %v8404_v57  ;;  %v8730_v24 = vrot.slane %v1912_v51, %v8404_v57 }
 0x335   : > { %1672 = vadd.xlane.f32.xlu0 %v1671_v50  ;;  %v1911_v50 = vcombine.high %v1903_v35, %v1903_v35  ;;  %v8738_v35 = vcombine.high %v8712_v12, %v8712_v12  ;;  %v8750_v53 = vcombine.high %v8721_v19, %v8721_v19 }
 0x3b6   : > { %v1670_v22 = vpop.xlane.xlu1 %1669 }
 0x3b7   : > { %v1677_v23 = vmul.f32 0.03125, %v1670_v22  ;;  %v8724_v22 = vrot.slane %v1910_v49, %v8404_v57  ;;  %v8742_v49 = vcombine.high %v8715_v16, %v8715_v16 }
 0x3b9   : > { %v1680_v30 = vadd.f32 1e-05, %v1677_v23  ;;  %v8727_v23 = vrot.slane %v1911_v50, %v8404_v57  ;;  %v8754_v50 = vcombine.high %v8724_v22, %v8724_v22 }
 0x3ba   : > { %v1676_v48 = vpop.xlane.xlu1 %1675 }
 0x3bb   : > { %8016 = vrsqrt.f32 %v1680_v30  ;;  %v1679_v52 = vmul.f32 0.03125, %v1676_v48  ;;  %v8734_v48 = vcombine.high %v8709_v21, %v8709_v21  ;;  %v8758_v51 = vcombine.high %v8727_v23, %v8727_v23 }
 0x3bd   : > { %v1682_v8 = vadd.f32 1e-05, %v1679_v52  ;;  %v8746_v52 = vcombine.high %v8718_v13, %v8718_v13 }
 0x3bf   : > { %8018 = vrsqrt.f32 %v1682_v8 }
 0x3c2   : > { %v1673_v25 = vpop.xlane.xlu0 %1672 }
 0x3c3   : > { %v1678_v30 = vmul.f32 0.03125, %v1673_v25  ;;  %v8762_v25 = vcombine.high %v8730_v24, %v8730_v24 }
 0x3c5   : > { %v8017_v54 = vpop.eup %8016  ;;  %v1681_v8 = vadd.f32 1e-05, %v1678_v30 }
 0x3c6   : > { %v1692_v9 = vrot.slane %v8017_v54, %v8505_v59  ;;  %v1696_v7 = vrot.slane %v8017_v54, %v8508_v60  ;;  %v1700_v18 = vrot.slane %v8017_v54, %v8511_v61  ;;  %v1704_v30 = vrot.slane %v8017_v54, %v8514_v62 }
 0x3c7   : > { %8020 = vrsqrt.f32 %v1681_v8  ;;  %v1708_v20 = vrot.slane %v8017_v54, %v8517_v0  ;;  %v1712_v14 = vrot.slane %v8017_v54, %v8520_v1  ;;  %v1716_v11 = vrot.slane %v8017_v54, %v8523_v2 }
 0x3c8   : > { %v1720_v6 = vrot.slane %v8017_v54, %v8526_v5  ;;  %v1789_v4 = vmul.f32 %v1692_v9, %v8555_v31  ;;  %v1790_v17 = vmul.f32 %v1696_v7, %v8558_v32  ;;  %v1791_v15 = vmul.f32 %v1700_v18, %v8561_v34 }
 0x3c9   : > { %v1792_v10 = vmul.f32 %v1704_v30, %v8564_v38  ;;  %v1793_v33 = vmul.f32 %v1708_v20, %v8567_v39  ;;  %v1794_v8 = vmul.f32 %v1712_v14, %v8570_v40  ;;  %v1795_v3 = vmul.f32 %v1716_v11, %v8573_v41  ;;  %v8019_v31 = vpop.eup %8018 }
 0x3ca   : > { %v1796_v42 = vmul.f32 %v1720_v6, %v8576_v43  ;;  %v1871_v37 = vmul.f32 %v8709_v21, %v1789_v4  ;;  %v1872_v54 = vmul.f32 %v8715_v16, %v1790_v17  ;;  %v1873_v9 = vmul.f32 %v8734_v48, %v1791_v15 }
 0x3cb   : > { %v1874_v7 = vmul.f32 %v8742_v49, %v1792_v10  ;;  %v1875_v18 = vmul.f32 %v8712_v12, %v1793_v33  ;;  %v1876_v32 = vmul.f32 %v8718_v13, %v1794_v8  ;;  %v1877_v20 = vmul.f32 %v8738_v35, %v1795_v3 }
 0x3cc   : > { %v1878_v14 = vmul.f32 %v8746_v52, %v1796_v42  ;;  %v1953_v11 = vadd.f32 %v8721_v19, %v1871_v37  ;;  %v1954_v6 = vadd.f32 %v8727_v23, %v1872_v54  ;;  %v1955_v4 = vadd.f32 %v8750_v53, %v1873_v9 }
 0x3cd   : > { %v1956_v17 = vadd.f32 %v8758_v51, %v1874_v7  ;;  %v1957_v15 = vadd.f32 %v8724_v22, %v1875_v18  ;;  %v1958_v10 = vadd.f32 %v8730_v24, %v1876_v32  ;;  %v1959_v33 = vadd.f32 %v8754_v50, %v1877_v20 }
 0x3ce   : > { %v1960_v34 = vadd.f32 %v8762_v25, %v1878_v14  ;;  %v1993_v38 = vcombine.low %v1953_v11, %v1954_v6  ;;  %v1756_v3 = vrot.slane %v8019_v31, %v8505_v59  ;;  %v1760_v42 = vrot.slane %v8019_v31, %v8508_v60 }
 0x3cf   : > { %v1994_v37 = vcombine.low %v1955_v4, %v1956_v17  ;;  %v1995_v39 = vcombine.low %v1957_v15, %v1958_v10  ;;  %v1764_v40 = vrot.slane %v8019_v31, %v8511_v61  ;;  %v1768_v41 = vrot.slane %v8019_v31, %v8514_v62 }
 0x3d0   : > { %v1996_v43 = vcombine.low %v1959_v33, %v1960_v34  ;;  %v2003_v30 = vrot.slane %v1993_v38, %v8404_v57  ;;  %v1805_v8 = vmul.f32 %v1756_v3, %v8595_v55  ;;  %v1806_v54 = vmul.f32 %v1760_v42, %v8598_v56 }
 0x3d1   : > { %v8021_v9 = vpop.eup %8020  ;;  %v2010_v7 = vrot.slane %v1994_v37, %v8404_v57  ;;  %v2017_v18 = vrot.slane %v1995_v39, %v8404_v57  ;;  %v1807_v32 = vmul.f32 %v1764_v40, %v8601_v58  ;;  %v1808_v20 = vmul.f32 %v1768_v41, %v8604_v63 }
 0x3d2   : > { %v1724_v14 = vrot.slane %v8021_v9, %v8505_v59  ;;  %v1728_v31 = vrot.slane %v8021_v9, %v8508_v60  ;;  %v1732_v11 = vrot.slane %v8021_v9, %v8511_v61  ;;  %v1736_v6 = vrot.slane %v8021_v9, %v8514_v62 }
 0x3d3   : > { %v1740_v55 = vrot.slane %v8021_v9, %v8517_v0  ;;  %v1744_v56 = vrot.slane %v8021_v9, %v8520_v1  ;;  %v1748_v4 = vrot.slane %v8021_v9, %v8523_v2  ;;  %v1752_v17 = vrot.slane %v8021_v9, %v8526_v5 }
 0x3d4   : > { %v1797_v58 = vmul.f32 %v1724_v14, %v8642_v26  ;;  %v1798_v63 = vmul.f32 %v1728_v31, %v8645_v27  ;;  %v1799_v15 = vmul.f32 %v1732_v11, %v8648_v28  ;;  %v1800_v10 = vmul.f32 %v1736_v6, %v8652_v44 }
 0x3d5   : > { %v1801_v33 = vmul.f32 %v1740_v55, %v8655_v45  ;;  %v1802_v34 = vmul.f32 %v1744_v56, %v8658_v29  ;;  %v1803_v38 = vmul.f32 %v1748_v4, %v8661_v46  ;;  %v1804_v3 = vmul.f32 %v1752_v17, %v8664_v47 }
 0x3d6   : > { %v1879_v42 = vmul.f32 %v8709_v21, %v1797_v58  ;;  %v1880_v37 = vmul.f32 %v8715_v16, %v1798_v63  ;;  %v1881_v26 = vmul.f32 %v8734_v48, %v1799_v15  ;;  %v1882_v27 = vmul.f32 %v8742_v49, %v1800_v10 }
 0x3d7   : > { %v1883_v28 = vmul.f32 %v8712_v12, %v1801_v33  ;;  %v1884_v44 = vmul.f32 %v8718_v13, %v1802_v34  ;;  %v1885_v45 = vmul.f32 %v8738_v35, %v1803_v38  ;;  %v1886_v29 = vmul.f32 %v8746_v52, %v1804_v3 }
 0x3d8   : > { %v1961_v46 = vadd.f32 %v8721_v19, %v1879_v42  ;;  %v1962_v47 = vadd.f32 %v8727_v23, %v1880_v37  ;;  %v1963_v39 = vadd.f32 %v8750_v53, %v1881_v26  ;;  %v1964_v40 = vadd.f32 %v8758_v51, %v1882_v27 }
 0x3d9   : > { %v1965_v41 = vadd.f32 %v8724_v22, %v1883_v28  ;;  %v1966_v9 = vadd.f32 %v8730_v24, %v1884_v44  ;;  %v1967_v12 = vadd.f32 %v8754_v50, %v1885_v45  ;;  %v1968_v13 = vadd.f32 %v8762_v25, %v1886_v29 }
 0x3da   : > { %v2024_v35 = vrot.slane %v1996_v43, %v8404_v57  ;;  %v2025_v14 = vcombine.low %v2003_v30, %v2010_v7  ;;  %v2042_v52 = vcombine.low %v1961_v46, %v1962_v47  ;;  %v2043_v31 = vcombine.low %v1963_v39, %v1964_v40 }
 0x3db   : > { %v2044_v11 = vcombine.low %v1965_v41, %v1966_v9  ;;  %v2045_v6 = vcombine.low %v1967_v12, %v1968_v13  ;;  %v1887_v55 = vmul.f32 %v8709_v21, %v1805_v8  ;;  %v1888_v56 = vmul.f32 %v8715_v16, %v1806_v54 }
 0x3dc   : > { %v2026_v4 = vcombine.low %v2017_v18, %v2024_v35  ;;  %v2052_v22 = vrot.slane %v2042_v52, %v8404_v57  ;;  %v2059_v24 = vrot.slane %v2043_v31, %v8404_v57  ;;  %v1889_v43 = vmul.f32 %v8734_v48, %v1807_v32 }
 0x3dd   : > { %v2066_v50 = vrot.slane %v2044_v11, %v8404_v57  ;;  %v2073_v25 = vrot.slane %v2045_v6, %v8404_v57  ;;  %v1890_v30 = vmul.f32 %v8742_v49, %v1808_v20  ;;  %v2033_v7 = vrot.slane %v2025_v14, %v8404_v57 }
 0x3de   : > { %v2074_v17 = vcombine.low %v2052_v22, %v2059_v24  ;;  %v1969_v21 = vadd.f32 %v8721_v19, %v1887_v55  ;;  %v1970_v16 = vadd.f32 %v8727_v23, %v1888_v56  ;;  %v2040_v8 = vrot.slane %v2026_v4, %v8404_v57 }
 0x3df   : > { %v2075_v54 = vcombine.low %v2066_v50, %v2073_v25  ;;  %v1971_v18 = vadd.f32 %v8750_v53, %v1889_v43  ;;  %v1972_v58 = vadd.f32 %v8758_v51, %v1890_v30  ;;  %v7504_v51 = vld [vmem:[%s10032_s25] ss:$0 sm:$0xff]  ;;  %s8127_s25 = smov 40  }
 0x3e0   : > { %v2082_v63 = vrot.slane %v2074_v17, %v8404_v57  ;;  %v2091_v48 = vcombine.low %v1969_v21, %v1970_v16  ;;  %v2041_v15 = vcombine.low %v2033_v7, %v2040_v8 }
 0x3e1   : > { %v2089_v49 = vrot.slane %v2075_v54, %v8404_v57  ;;  %v2092_v32 = vcombine.low %v1971_v18, %v1972_v58 }
 0x3e2   : > { %v2099_v20 = vrot.slane %v2091_v48, %v8404_v57 }
 0x3e3   : > { %v2090_v19 = vcombine.low %v2082_v63, %v2089_v49  ;;  %v2106_v23 = vrot.slane %v2092_v32, %v8404_v57 }
 0x3e5   : > { %v2118_v10 = vpack.c.bf16 %v2090_v19, %v2041_v15  ;;  %v2107_v33 = vcombine.low %v2099_v20, %v2106_v23 }
 0x3e7   : > { %7683 = vmatprep.mubr.msk.bf16.mxu1 %vm1365_vm6, %v2118_v10  ;;  %v2114_v53 = vrot.slane %v2107_v33, %v8404_v57 }
 0x3e9   : > { %v2119_v34 = vpack.c.bf16 %v2114_v53, %v2114_v53  ;;  %v8114_v53 = vmov 0.0  }
 0x3ea   : > { %7687 = vmatprep.subr.bf16.mxu1 %v8114_v53  ;;  %7705 = vmatprep.subr.bf16.mxu0 %v8114_v53 }
 0x3eb   : > { %7684 = vmatmul.mubr.msk.bf16.vlgmr.msra.gmra.mrb[0].mxu1 %vm1365_vm6, %v2119_v34  ;;  %7707 = vmatprep.mubr.msk.bf16.mxu0 %vm8115_vm8, %v8114_v53 }
 0x3ec   : > { %7689 = vmatprep.mubr.msk.bf16.mxu1 %vm8115_vm8, %v8114_v53 }
 0x4be   : > { %v7685_v38 = vpop.f32.mrb[0].mxu1 }
 0x4bf   : > { %v2187_v3 = vadd.f32 %v7685_v38, %v7504_v51  ;;  %v2178_v42 = vpop.f32.mrb[1].mxu1 }
 0x4c0   : > { %v2179_v37 = vadd.f32 %v7504_v51, %v2178_v42  ;;  %v7686_v26 = vpop.f32.mrb[2].mxu1 }
 0x4c1   : > { %v2299_v27 = vrot.slane %v2187_v3, %v8404_v57  ;;  %v2181_v28 = vpop.f32.mrb[3].mxu1 }
 0x4c2   : > { %v2195_v44 = vcombine.high %v2179_v37, %v2179_v37  ;;  %v2202_v45 = vrot.slane %v2179_v37, %v8404_v57  ;;  %v2182_v29 = vadd.f32 %v7504_v51, %v2181_v28 }
 0x4c3   : > { %v2300_v46 = vcombine.high %v2299_v27, %v2299_v27  ;;  %v2307_v47 = vrot.slane %v2299_v27, %v8404_v57 }
 0x4c4   : > { %v2209_v39 = vrot.slane %v2195_v44, %v8404_v57  ;;  %v2210_v40 = vcombine.high %v2202_v45, %v2202_v45  ;;  %v2244_v41 = vcombine.high %v2182_v29, %v2182_v29  ;;  %v2218_v12 = vrot.slane %v2202_v45, %v8404_v57 }
 0x4c5   : > { %v2314_v9 = vrot.slane %v2300_v46, %v8404_v57  ;;  %v2251_v13 = vrot.slane %v2182_v29, %v8404_v57  ;;  %v2315_v11 = vcombine.high %v2307_v47, %v2307_v47 }
 0x4c6   : > { %v2211_v35 = vcombine.high %v2209_v39, %v2209_v39  ;;  %v2225_v14 = vrot.slane %v2209_v39, %v8404_v57  ;;  %v2232_v52 = vrot.slane %v2210_v40, %v8404_v57  ;;  %v2258_v31 = vrot.slane %v2244_v41, %v8404_v57 }
 0x4c7   : > { %v2259_v6 = vcombine.high %v2251_v13, %v2251_v13  ;;  %v2316_v24 = vcombine.high %v2314_v9, %v2314_v9  ;;  %v2267_v43 = vrot.slane %v2251_v13, %v8404_v57  ;;  %v2435_v16 = vcombine.low %v2314_v9, %v2315_v11 }
 0x4c8   : > { %v2239_v55 = vrot.slane %v2211_v35, %v8404_v57  ;;  %v2241_v56 = vcombine.high %v2225_v14, %v2225_v14  ;;  %v2317_v4 = vcombine.low %v2218_v12, %v2232_v52  ;;  %v7509_v22 = vcombine.high %v2218_v12, %v2232_v52 }
 0x4c9   : > { %v2339_v50 = vrot.slane %v2225_v14, %v8404_v57  ;;  %v2260_v25 = vcombine.high %v2258_v31, %v2258_v31  ;;  %v2274_v54 = vrot.slane %v2258_v31, %v8404_v57  ;;  %v2281_v18 = vrot.slane %v2259_v6, %v8404_v57 }
 0x4ca   : > { %v2325_v30 = vrot.slane %v2317_v4, %v8404_v57  ;;  %v2332_v7 = vrot.slane %v7509_v22, %v8404_v57  ;;  %v2356_v17 = vcombine.low %v2239_v55, %v2241_v56  ;;  %v2243_v21 = vcombine.high %v2239_v55, %v2239_v55 }
 0x4cb   : > { %v2354_v8 = vrot.slane %v2339_v50, %v8404_v57  ;;  %v2288_v63 = vrot.slane %v2260_v25, %v8404_v57  ;;  %v2290_v32 = vcombine.high %v2274_v54, %v2274_v54  ;;  %v2378_v20 = vrot.slane %v2281_v18, %v8404_v57 }
 0x4cc   : > { %v2340_v58 = vcombine.low %v2325_v30, %v2332_v7  ;;  %v2357_v48 = vcombine.low %v2243_v21, %v2267_v43  ;;  %v2364_v49 = vrot.slane %v2356_v17, %v8404_v57  ;;  %v7510_v15 = vcombine.high %v2267_v43, %v2281_v18 }
 0x4cd   : > { %v2292_v23 = vcombine.high %v2288_v63, %v2288_v63  ;;  %v2396_v33 = vcombine.low %v2274_v54, %v2288_v63  ;;  %v2417_v51 = vrot.slane %v2290_v32, %v8404_v57  ;;  %v2449_v26 = vrot.slane %v2435_v16, %v8404_v57 }
 0x4ce   : > { %v2347_v19 = vrot.slane %v2340_v58, %v8404_v57  ;;  %v2371_v10 = vrot.slane %v2357_v48, %v8404_v57  ;;  %v2403_v34 = vrot.slane %v7510_v15, %v8404_v57  ;;  %v2456_v27 = vrot.slane %v2316_v24, %v8404_v57 }
 0x4cf   : > { %v2410_v42 = vrot.slane %v2396_v33, %v8404_v57  ;;  %v2434_v37 = vcombine.low %v2292_v23, %v2307_v47  ;;  %v2393_v28 = vrot.slane %v2378_v20, %v8404_v57  ;;  %v2432_v40 = vrot.slane %v2417_v51, %v8404_v57 }
 0x4d0   : > { %v2355_v38 = vcombine.low %v2347_v19, %v2354_v8  ;;  %v2379_v3 = vcombine.low %v2364_v49, %v2371_v10  ;;  %v2471_v9 = vrot.slane %v2456_v27, %v8404_v57 }
 0x4d1   : > { %v2418_v29 = vcombine.low %v2403_v34, %v2410_v42  ;;  %v2442_v46 = vrot.slane %v2434_v37, %v8404_v57 }
 0x4d2   : > { %v8901_v44 = vpack.c.bf16 %v2355_v38, %v2355_v38  ;;  %v2386_v45 = vrot.slane %v2379_v3, %v8404_v57 }
 0x4d3   : > { %v2425_v39 = vrot.slane %v2418_v29, %v8404_v57  ;;  %v2457_v41 = vcombine.low %v2442_v46, %v2449_v26  ;;  %v8118_v26 = vmov 65535  }
 0x4d4   : > { %v2394_v47 = vcombine.low %v2386_v45, %v2393_v28  ;;  %2482 = vrot.lane.b32.xlu0 %v8901_v44, %s8116_s2  ;;  %v2739_v27 = vsel %vm2737_vm11, 4294967295, %v8118_v26 }
 0x4d5   : > { %v2433_v12 = vcombine.low %v2425_v39, %v2432_v40  ;;  %v2464_v13 = vrot.slane %v2457_v41, %v8404_v57  ;;  %v8951_v45 = vsel %vm2738_vm12, %v2739_v27, 0 }
 0x4d6   : > { %v8910_v35 = vpack.c.bf16 %v2394_v47, %v2394_v47 }
 0x4d7   : > { %v2472_v14 = vcombine.low %v2464_v13, %v2471_v9  ;;  %v8913_v52 = vpack.c.bf16 %v2433_v12, %v2433_v12 }
 0x4d8   : > { %2532 = vrot.lane.b32.xlu1 %v8910_v35, %s8116_s2 }
 0x4d9   : > { %v8916_v31 = vpack.c.bf16 %v2472_v14, %v2472_v14 }
 0x4dc   : > { %2581 = vrot.lane.b32.xlu1 %v8913_v52, %s8116_s2 }
 0x4e0   : > { %2630 = vrot.lane.b32.xlu1 %v8916_v31, %s8116_s2 }
 0x546   : > { %v2483_v11 = vpop.permute.xlu0 %2482 }
 0x547   : > { %v2489_v6 = vsel %vm2484_vm9, %v2483_v11, 0 }
 0x548   : > { %7688 = vmatpush3.bf16.xpose.msra.mxu1 %v2489_v6 }
 0x549   : > { %7693 = vmatprep.subr.bf16.mxu1 %v8114_v53 }
 0x54a   : > { %v2533_v55 = vpop.permute.xlu1 %2532 }
 0x54b   : > { %v2538_v4 = vsel %vm2484_vm9, %v2533_v55, 0 }
 0x54e   : > { %v2582_v56 = vpop.permute.xlu1 %2581 }
 0x54f   : > { %7690 = vmatmul.mubr.msk.bf16.vlgmr.msra.gmra.mrb[4].mxu1 %vm2484_vm9, %v8901_v44  ;;  %v2587_v50 = vsel %vm2484_vm9, %v2582_v56, 0 }
 0x550   : > { %7694 = vmatpush3.bf16.xpose.msra.mxu1 %v2538_v4  ;;  %7695 = vmatprep.mubr.msk.bf16.mxu1 %vm8115_vm8, %v8114_v53 }
 0x551   : > { %7699 = vmatprep.subr.bf16.mxu1 %v8114_v53 }
 0x552   : > { %v2631_v22 = vpop.permute.xlu1 %2630 }
 0x553   : > { %v2636_v24 = vsel %vm2484_vm9, %v2631_v22, 0 }
 0x554   : > { %7706 = vmatpush3.bf16.xpose.msra.mxu0 %v2636_v24 }
 0x555   : > { %7717 = vmatprep.subr.bf16.mxu0 %v8114_v53 }
 0x557   : > { %7696 = vmatmul.mubr.msk.bf16.vlgmr.msra.gmra.mrb[8].mxu1 %vm2484_vm9, %v8910_v35 }
 0x558   : > { %7700 = vmatpush3.bf16.xpose.msra.mxu1 %v2587_v50  ;;  %7701 = vmatprep.mubr.msk.bf16.mxu1 %vm8115_vm8, %v8114_v53 }
 0x559   : > { %7711 = vmatprep.subr.bf16.mxu1 %v8114_v53 }
 0x55b   : > { %7708 = vmatmul.mubr.msk.bf16.vlgmr.msra.gmra.mrb[0].mxu0 %vm2484_vm9, %v8916_v31 }
 0x55c   : > { %7719 = vmatprep.mubr.msk.bf16.mxu0 %vm8115_vm8, %v8114_v53 }
 0x55f   : > { %7702 = vmatmul.mubr.msk.bf16.vlgmr.msra.gmra.mrb[12].mxu1 %vm2484_vm9, %v8913_v52 }
 0x560   : > { %7713 = vmatprep.mubr.msk.bf16.mxu1 %vm8115_vm8, %v8114_v53 }
 0x622   : > { %v2525_v25 = vpop.f32.mrb[4].mxu1 }
 0x623   : > { %v2678_v43 = vmul.f32 0.35355338, %v2525_v25  ;;  %v7691_v30 = vpop.f32.mrb[5].mxu1 }
 0x624   : > { %v2528_v7 = vpop.f32.mrb[6].mxu1 }
 0x625   : > { %v7692_v17 = vpop.f32.mrb[7].mxu1  ;;  %v2683_v21 = vsel %vm2682_vm10, %v2678_v43, -inf }
 0x626   : > { %2684 = vmax.xlane.f32.xlu0 %v2683_v21 }
 0x62a   : > { %v2574_v16 = vpop.f32.mrb[8].mxu1 }
 0x62b   : > { %v2679_v8 = vmul.f32 0.35355338, %v2574_v16  ;;  %v7697_v54 = vpop.f32.mrb[9].mxu1 }
 0x62c   : > { %v2577_v18 = vpop.f32.mrb[10].mxu1 }
 0x62d   : > { %v7698_v58 = vpop.f32.mrb[11].mxu1  ;;  %v2686_v63 = vsel %vm2682_vm10, %v2679_v8, -inf }
 0x62e   : > { %2687 = vmax.xlane.f32.xlu1 %v2686_v63  ;;  %v2672_v48 = vpop.f32.mrb[0].mxu0 }
 0x62f   : > { %v7709_v49 = vpop.f32.mrb[1].mxu0  ;;  %v2681_v33 = vmul.f32 0.35355338, %v2672_v48 }
 0x630   : > { %v2675_v32 = vpop.f32.mrb[2].mxu0 }
 0x631   : > { %v7710_v20 = vpop.f32.mrb[3].mxu0  ;;  %v2692_v38 = vsel %vm2682_vm10, %v2681_v33, -inf }
 0x632   : > { %v2623_v15 = vpop.f32.mrb[12].mxu1 }
 0x633   : > { %v2680_v19 = vmul.f32 0.35355338, %v2623_v15  ;;  %v7703_v23 = vpop.f32.mrb[13].mxu1 }
 0x634   : > { %v2626_v10 = vpop.f32.mrb[14].mxu1 }
 0x635   : > { %v7704_v34 = vpop.f32.mrb[15].mxu1  ;;  %v2689_v51 = vsel %vm2682_vm10, %v2680_v19, -inf }
 0x636   : > { %2690 = vmax.xlane.f32.xlu0 %v2689_v51 }
 0x63a   : > { %2693 = vmax.xlane.f32.xlu0 %v2692_v38 }
 0x63f   : > { %2784 = vrot.lane.b32.xlu1 %v8910_v35, %s8117_s10 }
 0x643   : > { %2832 = vrot.lane.b32.xlu1 %v8913_v52, %s8117_s10 }
 0x6b3   : > { %v2685_v3 = vpop.xlane.xlu0 %2684 }
 0x6b4   : > { %v2695_v42 = vsub.f32 %v2678_v43, %v2685_v3 }
 0x6b6   : > { %v2699_v37 = vmul.f32 1.442695, %v2695_v42 }
 0x6b8   : > { %8022 = vpow2.f32 %v2699_v37 }
 0x6bb   : > { %v2688_v28 = vpop.xlane.xlu1 %2687 }
 0x6bc   : > { %v2696_v41 = vsub.f32 %v2679_v8, %v2688_v28 }
 0x6be   : > { %v2701_v13 = vmul.f32 1.442695, %v2696_v41 }
 0x6bf   : > { %v2785_v29 = vpop.permute.xlu1 %2784 }
 0x6c0   : > { %v2790_v46 = vand.u32 %v2785_v29, %v8951_v45 }
 0x6c2   : > { %v8023_v47 = vpop.eup %8022  ;;  %7718 = vmatpush3.bf16.msra.mxu0 %v2790_v46 }
 0x6c3   : > { %v2691_v39 = vpop.xlane.xlu0 %2690  ;;  %v2707_v40 = vsel %vm2682_vm10, %v8023_v47, 0.0  ;;  %7729 = vmatprep.subr.bf16.mxu0 %v8114_v53  ;;  %v2833_v17 = vpop.permute.xlu1 %2832 }
 0x6c4   : > { %2708 = vadd.xlane.f32.xlu0 %v2707_v40  ;;  %v2697_v4 = vsub.f32 %v2680_v19, %v2691_v39  ;;  %v2838_v8 = vand.u32 %v2833_v17, %v8951_v45 }
 0x6c6   : > { %v2703_v22 = vmul.f32 1.442695, %v2697_v4 }
 0x6c7   : > { %v2694_v9 = vpop.xlane.xlu0 %2693 }
 0x6c8   : > { %v2698_v12 = vsub.f32 %v2681_v33, %v2694_v9 }
 0x6ca   : > { %v2705_v14 = vmul.f32 1.442695, %v2698_v12 }
 0x6cc   : > { %8024 = vpow2.f32 %v2705_v14 }
 0x6cd   : > { %8026 = vpow2.f32 %v2701_v13 }
 0x6ce   : > { %8028 = vpow2.f32 %v2703_v22 }
 0x6d6   : > { %v8025_v11 = vpop.eup %8024 }
 0x6d7   : > { %v2716_v6 = vsel %vm2682_vm10, %v8025_v11, 0.0  ;;  %v8027_v55 = vpop.eup %8026 }
 0x6d8   : > { %2717 = vadd.xlane.f32.xlu1 %v2716_v6  ;;  %v2710_v56 = vsel %vm2682_vm10, %v8027_v55, 0.0  ;;  %v8029_v24 = vpop.eup %8028 }
 0x6d9   : > { %v2713_v50 = vsel %vm2682_vm10, %v8029_v24, 0.0 }
 0x6da   : > { %2731 = vrot.lane.b32.xlu0 %v8901_v44, %s8117_s10 }
 0x6dc   : > { %2711 = vadd.xlane.f32.xlu1 %v2710_v56 }
 0x6ed   : > { %2880 = vrot.lane.b32.xlu1 %v8916_v31, %s8117_s10 }
 0x6f1   : > { %3267 = vrot.lane.b32.xlu1 %v8910_v35, %s8119_s23 }
 0x6f5   : > { %3317 = vrot.lane.b32.xlu1 %v8913_v52, %s8119_s23 }
 0x6f9   : > { %2714 = vadd.xlane.f32.xlu0 %v2713_v50  ;;  %3367 = vrot.lane.b32.xlu1 %v8916_v31, %s8119_s23 }
 0x6fd   : > { %3365 = vrot.lane.b32.xlu1 %v8916_v31, %s8120_s26 }
 0x70f   : > { %3217 = vrot.lane.b32.xlu0 %v8901_v44, %s8119_s23  ;;  %s10034_s23 = scalar_lea.vmem %s9938_s11, %s8231_s29 }
 0x713   : > { %3215 = vrot.lane.b32.xlu0 %v8901_v44, %s8120_s26 }
 0x717   : > { %3265 = vrot.lane.b32.xlu0 %v8910_v35, %s8120_s26 }
 0x71b   : > { %3315 = vrot.lane.b32.xlu0 %v8913_v52, %s8120_s26 }
 0x751   : > { %v2709_v25 = vpop.xlane.xlu0 %2708 }
 0x752   : > { %8030 = vrcp.f32 %v2709_v25 }
 0x755   : > { %v2732_v43 = vpop.permute.xlu0 %2731 }
 0x756   : > { %v2742_v30 = vand.u32 %v8951_v45, %v2732_v43 }
 0x758   : > { %7712 = vmatpush3.bf16.msra.mxu1 %v2742_v30 }
 0x759   : > { %7723 = vmatprep.subr.bf16.mxu1 %v8114_v53 }
 0x75c   : > { %v8031_v7 = vpop.eup %8030 }
 0x75d   : > { %v2723_v21 = vmul.f32 %v8031_v7, %v8023_v47 }
 0x75f   : > { %v2727_v16 = vpack.c.bf16 %v2723_v21, %v2723_v21 }
 0x761   : > { %7714 = vmatmul.mubr.msk.bf16.vlgmr.msra.gmra.mrb[16].mxu1 %vm2733_vm13, %v2727_v16 }
 0x762   : > { %7724 = vmatpush3.bf16.msra.mxu1 %v2838_v8  ;;  %7725 = vmatprep.mubr.msk.bf16.mxu1 %vm8115_vm8, %v8114_v53 }
 0x763   : > { %7735 = vmatprep.subr.bf16.mxu1 %v8114_v53 }
 0x765   : > { %v2718_v54 = vpop.xlane.xlu1 %2717 }
 0x769   : > { %v2712_v18 = vpop.xlane.xlu1 %2711 }
 0x76a   : > { %8032 = vrcp.f32 %v2712_v18 }
 0x76b   : > { %8034 = vrcp.f32 %v2718_v54 }
 0x76d   : > { %v2881_v48 = vpop.permute.xlu1 %2880 }
 0x76e   : > { %v2886_v20 = vand.u32 %v2881_v48, %v8951_v45 }
 0x771   : > { %v3268_v19 = vpop.permute.xlu1 %3267 }
 0x772   : > { %v3273_v10 = vsel %vm2484_vm9, %v3268_v19, 0 }
 0x774   : > { %v8033_v58 = vpop.eup %8032 }
 0x775   : > { %v2724_v63 = vmul.f32 %v8033_v58, %v8027_v55  ;;  %v8035_v32 = vpop.eup %8034  ;;  %v3318_v34 = vpop.permute.xlu1 %3317 }
 0x776   : > { %v2726_v15 = vmul.f32 %v8035_v32, %v8025_v11  ;;  %v3323_v47 = vsel %vm2484_vm9, %v3318_v34, 0 }
 0x777   : > { %v2728_v49 = vpack.c.bf16 %v2724_v63, %v2724_v63 }
 0x778   : > { %v2730_v23 = vpack.c.bf16 %v2726_v15, %v2726_v15 }
 0x779   : > { %7720 = vmatmul.mubr.msk.bf16.vlgmr.msra.gmra.mrb[4].mxu0 %vm2733_vm13, %v2728_v49  ;;  %v3368_v3 = vpop.permute.xlu1 %3367 }
 0x77a   : > { %7730 = vmatpush3.bf16.msra.mxu0 %v2886_v20  ;;  %7731 = vmatprep.mubr.msk.bf16.mxu0 %vm8115_vm8, %v8114_v53  ;;  %v3373_v27 = vsel %vm2484_vm9, %v3368_v3, 0 }
 0x77b   : > { %7741 = vmatprep.subr.bf16.mxu0 %v8114_v53 }
 0x77d   : > { %v3366_v46 = vpop.permute.xlu1 %3365 }
 0x781   : > { %7732 = vmatmul.mubr.msk.bf16.vlgmr.msra.gmra.mrb[8].mxu0 %vm2733_vm13, %v2730_v23 }
 0x782   : > { %7743 = vmatprep.mubr.msk.bf16.mxu0 %vm8115_vm8, %v8114_v53 }
 0x783   : > { %7742 = vmatpush3.bf16.xpose.msra.mxu0 %v3273_v10 }
 0x784   : > { %7753 = vmatprep.subr.bf16.mxu0 %v8114_v53 }
 0x786   : > { %v2715_v33 = vpop.xlane.xlu0 %2714 }
 0x787   : > { %8036 = vrcp.f32 %v2715_v33 }
 0x78a   : > { %v3218_v51 = vpop.permute.xlu0 %3217 }
 0x78b   : > { %v3223_v29 = vsel %vm2484_vm9, %v3218_v51, 0 }
 0x78e   : > { %v3216_v38 = vpop.permute.xlu0 %3215 }
 0x791   : > { %v8037_v42 = vpop.eup %8036 }
 0x792   : > { %v2725_v37 = vmul.f32 %v8037_v42, %v8029_v24  ;;  %v3266_v26 = vpop.permute.xlu0 %3265 }
 0x793   : > { %7744 = vmatmul.mubr.msk.bf16.vlgmr.msra.gmra.mrb[12].mxu0 %vm2484_vm9, %v3266_v26 }
 0x794   : > { %7754 = vmatpush3.bf16.xpose.msra.mxu0 %v3373_v27  ;;  %v2729_v28 = vpack.c.bf16 %v2725_v37, %v2725_v37  ;;  %7755 = vmatprep.mubr.msk.bf16.mxu0 %vm8115_vm8, %v8114_v53 }
 0x795   : > { %7765 = vmatprep.subr.bf16.mxu0 %v8114_v53 }
 0x796   : > { %7726 = vmatmul.mubr.msk.bf16.vlgmr.msra.gmra.mrb[20].mxu1 %vm2733_vm13, %v2729_v28  ;;  %v3316_v39 = vpop.permute.xlu0 %3315 }
 0x797   : > { %7736 = vmatpush3.bf16.xpose.msra.mxu1 %v3223_v29  ;;  %7737 = vmatprep.mubr.msk.bf16.mxu1 %vm8115_vm8, %v8114_v53 }
 0x798   : > { %7747 = vmatprep.subr.bf16.mxu1 %v8114_v53 }
 0x79b   : > { %7756 = vmatmul.mubr.msk.bf16.vlgmr.msra.gmra.mrb[16].mxu0 %vm2484_vm9, %v3366_v46 }
 0x79c   : > { %7767 = vmatprep.mubr.msk.bf16.mxu0 %vm8115_vm8, %v8114_v53 }
 0x79e   : > { %7738 = vmatmul.mubr.msk.bf16.vlgmr.msra.gmra.mrb[24].mxu1 %vm2484_vm9, %v3216_v38 }
 0x79f   : > { %7748 = vmatpush3.bf16.xpose.msra.mxu1 %v3323_v47  ;;  %7749 = vmatprep.mubr.msk.bf16.mxu1 %vm8115_vm8, %v8114_v53 }
 0x7a0   : > { %7759 = vmatprep.subr.bf16.mxu1 %v8114_v53 }
 0x7a6   : > { %7750 = vmatmul.mubr.msk.bf16.vlgmr.msra.gmra.mrb[28].mxu1 %vm2484_vm9, %v3316_v39 }
 0x7a7   : > { %7761 = vmatprep.mubr.msk.bf16.mxu1 %vm8115_vm8, %v8114_v53 }
 0x834   : > { %v2778_v40 = vpop.f32.mrb[16].mxu1 }
 0x835   : > { %v7715_v41 = vpop.f32.mrb[17].mxu1  ;;  %v2939_v13 = vrot.slane %v2778_v40, %v8404_v57  ;;  %v2932_v11 = vcombine.high %v2778_v40, %v2778_v40 }
 0x836   : > { %v2781_v9 = vpop.f32.mrb[18].mxu1 }
 0x837   : > { %v7716_v12 = vpop.f32.mrb[19].mxu1  ;;  %v2947_v14 = vcombine.high %v2939_v13, %v2939_v13  ;;  %v2954_v55 = vrot.slane %v2939_v13, %v8404_v57  ;;  %v2946_v56 = vrot.slane %v2932_v11, %v8404_v57 }
 0x839   : > { %v2968_v6 = vrot.slane %v2947_v14, %v8404_v57  ;;  %v2961_v30 = vrot.slane %v2946_v56, %v8404_v57 }
 0x83b   : > { %v3088_v4 = vcombine.low %v2954_v55, %v2968_v6  ;;  %v7519_v24 = vcombine.high %v2954_v55, %v2968_v6 }
 0x83d   : > { %v3098_v16 = vrot.slane %v3088_v4, %v8404_v57  ;;  %v3105_v8 = vrot.slane %v7519_v24, %v8404_v57 }
 0x83f   : > { %v3120_v49 = vcombine.low %v3098_v16, %v3105_v8 }
 0x841   : > { %v3128_v33 = vrot.slane %v3120_v49, %v8404_v57 }
 0x84c   : > { %v2826_v22 = vpop.f32.mrb[4].mxu0 }
 0x84d   : > { %v2978_v50 = vrot.slane %v2826_v22, %v8404_v57  ;;  %v7721_v25 = vpop.f32.mrb[5].mxu0  ;;  %v2971_v38 = vcombine.high %v2826_v22, %v2826_v22 }
 0x84e   : > { %v2829_v43 = vpop.f32.mrb[6].mxu0 }
 0x84f   : > { %v2986_v7 = vcombine.high %v2978_v50, %v2978_v50  ;;  %v2993_v17 = vrot.slane %v2978_v50, %v8404_v57  ;;  %v7722_v21 = vpop.f32.mrb[7].mxu0  ;;  %v2985_v42 = vrot.slane %v2971_v38, %v8404_v57 }
 0x851   : > { %v3007_v54 = vrot.slane %v2986_v7, %v8404_v57  ;;  %v3008_v18 = vcombine.high %v2993_v17, %v2993_v17  ;;  %v3090_v58 = vcombine.low %v2961_v30, %v2993_v17  ;;  %v3000_v12 = vrot.slane %v2985_v42, %v8404_v57 }
 0x853   : > { %v3091_v63 = vcombine.low %v3007_v54, %v3008_v18  ;;  %v3112_v32 = vrot.slane %v3090_v58, %v8404_v57  ;;  %v3009_v28 = vcombine.high %v3007_v54, %v3007_v54 }
 0x854   : > { %v9019_v48 = vpop.f32.mrb[8].mxu0 }
 0x855   : > { %v3119_v20 = vrot.slane %v3091_v63, %v8404_v57  ;;  %v7733_v15 = vpop.f32.mrb[9].mxu0  ;;  %v9031_v39 = vrot.slane %v9019_v48, %v8404_v57  ;;  %v3137_v55 = vcombine.low %v3009_v28, %v3000_v12 }
 0x856   : > { %v2925_v19 = vpop.f32.mrb[10].mxu0 }
 0x857   : > { %v3121_v23 = vcombine.low %v3112_v32, %v3119_v20  ;;  %v7734_v10 = vpop.f32.mrb[11].mxu0  ;;  %v9038_v56 = vrot.slane %v9031_v39, %v8404_v57  ;;  %v3147_v21 = vrot.slane %v3137_v55, %v8404_v57 }
 0x859   : > { %v3135_v34 = vrot.slane %v3121_v23, %v8404_v57 }
 0x85b   : > { %v9025_v51 = vcombine.low %v3128_v33, %v3135_v34 }
 0x866   : > { %v3309_v3 = vpop.f32.mrb[12].mxu0 }
 0x867   : > { %v3416_v37 = vmul.f32 0.35355338, %v3309_v3  ;;  %v7745_v26 = vpop.f32.mrb[13].mxu0 }
 0x868   : > { %v3312_v27 = vpop.f32.mrb[14].mxu0 }
 0x869   : > { %v2874_v29 = vpop.f32.mrb[20].mxu1  ;;  %v7746_v46 = vpop.f32.mrb[15].mxu0  ;;  %v3422_v47 = vsel %vm2682_vm10, %v3416_v37, -inf }
 0x86a   : > { %v3010_v40 = vcombine.high %v2874_v29, %v2874_v29  ;;  %v3017_v41 = vrot.slane %v2874_v29, %v8404_v57  ;;  %v7727_v9 = vpop.f32.mrb[21].mxu1  ;;  %3423 = vmax.xlane.f32.xlu1 %v3422_v47 }
 0x86b   : > { %v2877_v13 = vpop.f32.mrb[22].mxu1 }
 0x86c   : > { %v3024_v14 = vrot.slane %v3010_v40, %v8404_v57  ;;  %v3025_v11 = vcombine.high %v3017_v41, %v3017_v41  ;;  %v7728_v6 = vpop.f32.mrb[23].mxu1  ;;  %v3032_v4 = vrot.slane %v3017_v41, %v8404_v57 }
 0x86e   : > { %v3039_v22 = vrot.slane %v3024_v14, %v8404_v57  ;;  %v3046_v24 = vrot.slane %v3025_v11, %v8404_v57  ;;  %v3409_v50 = vpop.f32.mrb[16].mxu0 }
 0x86f   : > { %v7757_v25 = vpop.f32.mrb[17].mxu0  ;;  %v3418_v28 = vmul.f32 0.35355338, %v3409_v50 }
 0x870   : > { %v3138_v43 = vcombine.low %v3032_v4, %v3046_v24  ;;  %v7520_v30 = vcombine.high %v3032_v4, %v3046_v24  ;;  %v3140_v7 = vcombine.low %v3039_v22, %v9038_v56  ;;  %v3412_v17 = vpop.f32.mrb[18].mxu0 }
 0x871   : > { %v3259_v16 = vpop.f32.mrb[24].mxu1  ;;  %v7758_v8 = vpop.f32.mrb[19].mxu0  ;;  %v3428_v47 = vsel %vm2682_vm10, %v3418_v28, -inf }
 0x872   : > { %v3154_v54 = vrot.slane %v3138_v43, %v8404_v57  ;;  %v3161_v18 = vrot.slane %v7520_v30, %v8404_v57  ;;  %v3168_v58 = vrot.slane %v3140_v7, %v8404_v57  ;;  %v3415_v63 = vmul.f32 0.35355338, %v3259_v16  ;;  %v7739_v49 = vpop.f32.mrb[25].mxu1 }
 0x873   : > { %v3262_v32 = vpop.f32.mrb[26].mxu1 }
 0x874   : > { %v3169_v20 = vcombine.low %v3147_v21, %v3154_v54  ;;  %v3170_v15 = vcombine.low %v3161_v18, %v3168_v58  ;;  %v7740_v19 = vpop.f32.mrb[27].mxu1  ;;  %v3419_v23 = vsel %vm2682_vm10, %v3415_v63, -inf }
 0x875   : > { %3420 = vmax.xlane.f32.xlu0 %v3419_v23 }
 0x876   : > { %v3177_v10 = vrot.slane %v3169_v20, %v8404_v57  ;;  %v3184_v33 = vrot.slane %v3170_v15, %v8404_v57 }
 0x878   : > { %v9051_v34 = vcombine.low %v3177_v10, %v3184_v33 }
 0x879   : > { %v3359_v38 = vpop.f32.mrb[28].mxu1 }
 0x87a   : > { %v3417_v3 = vmul.f32 0.35355338, %v3359_v38  ;;  %v7751_v42 = vpop.f32.mrb[29].mxu1  ;;  %v3213_v26 = vpack.c.bf16 %v9051_v34, %v9025_v51 }
 0x87b   : > { %v3362_v27 = vpop.f32.mrb[30].mxu1 }
 0x87c   : > { %v7752_v29 = vpop.f32.mrb[31].mxu1  ;;  %v3425_v46 = vsel %vm2682_vm10, %v3417_v3, -inf }
 0x87d   : > { %3426 = vmax.xlane.f32.xlu0 %v3425_v46 }
 0x881   : > { %3429 = vmax.xlane.f32.xlu0 %v3428_v47 }
 0x8f7   : > { %v3424_v40 = vpop.xlane.xlu1 %3423 }
 0x8f8   : > { %v3432_v41 = vsub.f32 %v3416_v37, %v3424_v40 }
 0x8fa   : > { %v3437_v9 = vmul.f32 1.442695, %v3432_v41 }
 0x8fc   : > { %8038 = vpow2.f32 %v3437_v9 }
 0x902   : > { %v3421_v12 = vpop.xlane.xlu0 %3420 }
 0x903   : > { %v3431_v13 = vsub.f32 %v3415_v63, %v3421_v12 }
 0x905   : > { %v3435_v14 = vmul.f32 1.442695, %v3431_v13 }
 0x906   : > { %v8039_v11 = vpop.eup %8038 }
 0x907   : > { %8040 = vpow2.f32 %v3435_v14  ;;  %v3446_v6 = vsel %vm2682_vm10, %v8039_v11, 0.0 }
 0x908   : > { %3447 = vadd.xlane.f32.xlu1 %v3446_v6 }
 0x90a   : > { %v3427_v55 = vpop.xlane.xlu0 %3426 }
 0x90b   : > { %v3433_v4 = vsub.f32 %v3417_v3, %v3427_v55 }
 0x90d   : > { %v3439_v22 = vmul.f32 1.442695, %v3433_v4 }
 0x90e   : > { %v3430_v43 = vpop.xlane.xlu0 %3429 }
 0x90f   : > { %8042 = vpow2.f32 %v3439_v22  ;;  %v3434_v30 = vsub.f32 %v3418_v28, %v3430_v43 }
 0x911   : > { %v8041_v24 = vpop.eup %8040  ;;  %v3441_v7 = vmul.f32 1.442695, %v3434_v30 }
 0x912   : > { %v3443_v50 = vsel %vm2682_vm10, %v8041_v24, 0.0 }
 0x913   : > { %3444 = vadd.xlane.f32.xlu0 %v3443_v50  ;;  %8044 = vpow2.f32 %v3441_v7  ;;  %v1212_v50 = vld [vmem:[%s10033_s6 + $0x4] sm:$0xf] }
 0x919   : > { %v8043_v25 = vpop.eup %8042  ;;  %3515 = vrot.lane.b32.xlu1 %v8910_v35, %s8121_s27 }
 0x91a   : > { %v3449_v37 = vsel %vm2682_vm10, %v8043_v25, 0.0 }
 0x91b   : > { %3450 = vadd.xlane.f32.xlu0 %v3449_v37  ;;  %v9111_v37 = vld [vmem:[%s10033_s6] sm:$0xf] }
 0x91d   : > { %3563 = vrot.lane.b32.xlu1 %v8913_v52, %s8121_s27  ;;  %v8045_v17 = vpop.eup %8044 }
 0x91e   : > { %v3452_v21 = vsel %vm2682_vm10, %v8045_v17, 0.0 }
 0x931   : > { %3467 = vrot.lane.b32.xlu0 %v8901_v44, %s8121_s27 }
 0x935   : > { %4063 = vrot.lane.b32.xlu0 %v8901_v44, %s8122_s18 }
 0x939   : > { %4113 = vrot.lane.b32.xlu0 %v8910_v35, %s8122_s18 }
 0x93d   : > { %4111 = vrot.lane.b32.xlu0 %v8910_v35, %s8123_s0 }
 0x941   : > { %4161 = vrot.lane.b32.xlu0 %v8913_v52, %s8123_s0  ;;  %3453 = vadd.xlane.f32.xlu1 %v3452_v21 }
 0x952   : > { %3611 = vrot.lane.b32.xlu1 %v8916_v31, %s8121_s27 }
 0x956   : > { %4061 = vrot.lane.b32.xlu1 %v8901_v44, %s8123_s0 }
 0x95a   : > { %4163 = vrot.lane.b32.xlu1 %v8913_v52, %s8122_s18 }
 0x95e   : > { %4213 = vrot.lane.b32.xlu1 %v8916_v31, %s8122_s18 }
 0x962   : > { %4211 = vrot.lane.b32.xlu1 %v8916_v31, %s8123_s0 }
 0x995   : > { %v3448_v16 = vpop.xlane.xlu1 %3447 }
 0x996   : > { %8046 = vrcp.f32 %v3448_v16 }
 0x999   : > { %v3516_v8 = vpop.permute.xlu1 %3515 }
 0x99a   : > { %v3521_v54 = vand.u32 %v3516_v8, %v8951_v45 }
 0x99c   : > { %7766 = vmatpush3.bf16.msra.mxu0 %v3521_v54 }
 0x99d   : > { %7777 = vmatprep.subr.bf16.mxu0 %v8114_v53  ;;  %v3564_v10 = vpop.permute.xlu1 %3563 }
 0x99e   : > { %v3569_v38 = vand.u32 %v3564_v10, %v8951_v45 }
 0x9a0   : > { %v8047_v18 = vpop.eup %8046  ;;  %v3445_v58 = vpop.xlane.xlu0 %3444 }
 0x9a1   : > { %v3460_v63 = vmul.f32 %v8047_v18, %v8039_v11  ;;  %8048 = vrcp.f32 %v3445_v58 }
 0x9a3   : > { %v3464_v49 = vpack.c.bf16 %v3460_v63, %v3460_v63 }
 0x9a5   : > { %7768 = vmatmul.mubr.msk.bf16.vlgmr.msra.gmra.mrb[20].mxu0 %vm2733_vm13, %v3464_v49 }
 0x9a6   : > { %7779 = vmatprep.mubr.msk.bf16.mxu0 %vm8115_vm8, %v8114_v53 }
 0x9a8   : > { %v3451_v32 = vpop.xlane.xlu0 %3450 }
 0x9a9   : > { %8050 = vrcp.f32 %v3451_v32 }
 0x9ab   : > { %v8049_v20 = vpop.eup %8048 }
 0x9ac   : > { %v3459_v15 = vmul.f32 %v8049_v20, %v8041_v24  ;;  %v3468_v19 = vpop.permute.xlu0 %3467 }
 0x9ad   : > { %v3473_v23 = vand.u32 %v3468_v19, %v8951_v45 }
 0x9ae   : > { %v3463_v33 = vpack.c.bf16 %v3459_v15, %v3459_v15 }
 0x9af   : > { %7760 = vmatpush3.bf16.msra.mxu1 %v3473_v23 }
 0x9b0   : > { %7771 = vmatprep.subr.bf16.mxu1 %v8114_v53  ;;  %v4064_v41 = vpop.permute.xlu0 %4063 }
 0x9b1   : > { %v4069_v12 = vsel %vm2484_vm9, %v4064_v41, 0 }
 0x9b2   : > { %7762 = vmatmul.mubr.msk.bf16.vlgmr.msra.gmra.mrb[32].mxu1 %vm2733_vm13, %v3463_v33 }
 0x9b3   : > { %v8051_v3 = vpop.eup %8050  ;;  %7772 = vmatpush3.bf16.msra.mxu1 %v3569_v38  ;;  %7773 = vmatprep.mubr.msk.bf16.mxu1 %vm8115_vm8, %v8114_v53 }
 0x9b4   : > { %v3461_v42 = vmul.f32 %v8051_v3, %v8043_v25  ;;  %v4114_v14 = vpop.permute.xlu0 %4113  ;;  %7943 = vmatprep.subr.msk.bf16.mxu1 %vm3952_vm14, %v1212_v50  ;;  %v3954_v25 = vsel %vm3952_vm14, %v1212_v50, 0 }
 0x9b5   : > { %v4119_v6 = vsel %vm2484_vm9, %v4114_v14, 0 }
 0x9b6   : > { %v3465_v27 = vpack.c.bf16 %v3461_v42, %v3461_v42 }
 0x9b8   : > { %v4112_v4 = vpop.permute.xlu0 %4111 }
 0x9ba   : > { %7774 = vmatmul.mubr.msk.bf16.vlgmr.msra.gmra.mrb[36].mxu1 %vm2733_vm13, %v3465_v27 }
 0x9bb   : > { %7784 = vmatpush3.bf16.msra.mxu1 %v3954_v25 }
 0x9bc   : > { %7944 = vmatprep.subr.msk.bf16.mxu1 %vm3952_vm14, %v9111_v37  ;;  %v4162_v51 = vpop.permute.xlu0 %4161 }
 0x9ce   : > { %v3454_v28 = vpop.xlane.xlu1 %3453 }
 0x9cf   : > { %8052 = vrcp.f32 %v3454_v28 }
 0x9d2   : > { %v3612_v29 = vpop.permute.xlu1 %3611 }
 0x9d3   : > { %v3617_v46 = vand.u32 %v3612_v29, %v8951_v45 }
 0x9d5   : > { %7778 = vmatpush3.bf16.msra.mxu0 %v3617_v46 }
 0x9d6   : > { %7795 = vmatprep.subr.bf16.mxu0 %v8114_v53  ;;  %v4062_v13 = vpop.permute.xlu1 %4061 }
 0x9d9   : > { %v8053_v47 = vpop.eup %8052 }
 0x9da   : > { %v3462_v40 = vmul.f32 %v8053_v47, %v8045_v17  ;;  %v9092_v11 = vpop.permute.xlu1 %4163 }
 0x9dc   : > { %v3466_v9 = vpack.c.bf16 %v3462_v40, %v3462_v40 }
 0x9de   : > { %7780 = vmatmul.mubr.msk.bf16.vlgmr.msra.gmra.mrb[24].mxu0 %vm2733_vm13, %v3466_v9  ;;  %v4214_v55 = vpop.permute.xlu1 %4213 }
 0x9df   : > { %7796 = vmatpush3.bf16.xpose.msra.mxu0 %v4069_v12  ;;  %7797 = vmatprep.mubr.msk.bf16.mxu0 %vm8115_vm8, %v8114_v53  ;;  %v4219_v22 = vsel %vm2484_vm9, %v4214_v55, 0 }
 0x9e0   : > { %7801 = vmatprep.subr.bf16.mxu0 %v8114_v53 }
 0x9e2   : > { %v4212_v24 = vpop.permute.xlu1 %4211 }
 0x9e6   : > { %7798 = vmatmul.mubr.msk.bf16.vlgmr.msra.gmra.mrb[28].mxu0 %vm2484_vm9, %v4062_v13 }
 0x9e7   : > { %7802 = vmatpush3.bf16.xpose.msra.mxu0 %v4119_v6  ;;  %7803 = vmatprep.mubr.msk.bf16.mxu0 %vm8115_vm8, %v8114_v53 }
 0x9e8   : > { %7813 = vmatprep.subr.bf16.mxu0 %v8114_v53 }
 0x9ee   : > { %7804 = vmatmul.mubr.msk.bf16.vlgmr.msra.gmra.mrb[32].mxu0 %vm2484_vm9, %v4112_v4 }
 0x9ef   : > { %7814 = vmatpush3.bf16.xpose.msra.mxu0 %v4219_v22  ;;  %7815 = vmatprep.mubr.msk.bf16.mxu0 %vm8115_vm8, %v8114_v53 }
 0x9f0   : > { %7825 = vmatprep.subr.bf16.mxu0 %v8114_v53 }
 0x9f6   : > { %7816 = vmatmul.mubr.msk.bf16.vlgmr.msra.gmra.mrb[36].mxu0 %vm2484_vm9, %v4212_v24 }
 0x9f7   : > { %7827 = vmatprep.mubr.msk.bf16.mxu0 %vm8115_vm8, %v8114_v53 }
 0xa78   : > { %v3557_v43 = vpop.f32.mrb[20].mxu0 }
 0xa79   : > { %v7769_v30 = vpop.f32.mrb[21].mxu0  ;;  %v3709_v21 = vrot.slane %v3557_v43, %v8404_v57  ;;  %v3702_v10 = vcombine.high %v3557_v43, %v3557_v43 }
 0xa7a   : > { %v3560_v7 = vpop.f32.mrb[22].mxu0 }
 0xa7b   : > { %v7770_v17 = vpop.f32.mrb[23].mxu0  ;;  %v3717_v16 = vcombine.high %v3709_v21, %v3709_v21  ;;  %v3724_v8 = vrot.slane %v3709_v21, %v8404_v57  ;;  %v3716_v46 = vrot.slane %v3702_v10, %v8404_v57  ;;  %v3049_v10 = vcombine.high %v9019_v48, %v9019_v48 }
 0xa7d   : > { %v3738_v18 = vrot.slane %v3717_v16, %v8404_v57  ;;  %v3739_v58 = vcombine.high %v3724_v8, %v3724_v8  ;;  %v3731_v50 = vrot.slane %v3716_v46, %v8404_v57 }
 0xa7f   : > { %v3822_v33 = vcombine.low %v3738_v18, %v3739_v58  ;;  %v3740_v14 = vcombine.high %v3738_v18, %v3738_v18 }
 0xa81   : > { %v3850_v40 = vrot.slane %v3822_v33, %v8404_v57  ;;  %v3868_v7 = vcombine.low %v3740_v14, %v3731_v50 }
 0xa85   : > { %v3509_v54 = vpop.f32.mrb[32].mxu1 }
 0xa86   : > { %v3663_v63 = vcombine.high %v3509_v54, %v3509_v54  ;;  %v3670_v49 = vrot.slane %v3509_v54, %v8404_v57  ;;  %v7763_v32 = vpop.f32.mrb[33].mxu1  ;;  %v3878_v54 = vrot.slane %v3868_v7, %v8404_v57 }
 0xa87   : > { %v3512_v20 = vpop.f32.mrb[34].mxu1 }
 0xa88   : > { %v3677_v15 = vrot.slane %v3663_v63, %v8404_v57  ;;  %v3678_v19 = vcombine.high %v3670_v49, %v3670_v49  ;;  %v7764_v23 = vpop.f32.mrb[35].mxu1  ;;  %v3685_v38 = vrot.slane %v3670_v49, %v8404_v57  ;;  %v3064_v20 = vcombine.high %v9031_v39, %v9031_v39 }
 0xa8a   : > { %v3692_v3 = vrot.slane %v3677_v15, %v8404_v57  ;;  %v3699_v42 = vrot.slane %v3678_v19, %v8404_v57  ;;  %v3085_v46 = vrot.slane %v3064_v20, %v8404_v57 }
 0xa8c   : > { %v3819_v27 = vcombine.low %v3685_v38, %v3699_v42  ;;  %v7529_v28 = vcombine.high %v3685_v38, %v3699_v42  ;;  %v3821_v29 = vcombine.low %v3692_v3, %v3724_v8 }
 0xa8d   : > { %v3605_v47 = vpop.f32.mrb[36].mxu1 }
 0xa8e   : > { %v3829_v41 = vrot.slane %v3819_v27, %v8404_v57  ;;  %v3836_v9 = vrot.slane %v7529_v28, %v8404_v57  ;;  %v3843_v12 = vrot.slane %v3821_v29, %v8404_v57  ;;  %v7775_v13 = vpop.f32.mrb[37].mxu1  ;;  %v3748_v6 = vrot.slane %v3605_v47, %v8404_v57 }
 0xa8f   : > { %v3608_v55 = vpop.f32.mrb[38].mxu1  ;;  %v3741_v63 = vcombine.high %v3605_v47, %v3605_v47 }
 0xa90   : > { %v3851_v4 = vcombine.low %v3829_v41, %v3836_v9  ;;  %v3852_v22 = vcombine.low %v3843_v12, %v3850_v40  ;;  %v7776_v24 = vpop.f32.mrb[39].mxu1  ;;  %v3756_v25 = vcombine.high %v3748_v6, %v3748_v6  ;;  %v3763_v17 = vrot.slane %v3748_v6, %v8404_v57 }
 0xa91   : > { %v3755_v49 = vrot.slane %v3741_v63, %v8404_v57  ;;  %v3063_v41 = vrot.slane %v3049_v10, %v8404_v57  ;;  %v3087_v55 = vcombine.high %v3085_v46, %v3085_v46 }
 0xa92   : > { %v3859_v43 = vrot.slane %v3851_v4, %v8404_v57  ;;  %v3866_v30 = vrot.slane %v3852_v22, %v8404_v57  ;;  %v3777_v21 = vrot.slane %v3756_v25, %v8404_v57 }
 0xa93   : > { %v3770_v3 = vrot.slane %v3755_v49, %v8404_v57  ;;  %v3078_v25 = vrot.slane %v3063_v41, %v8404_v57  ;;  %v4169_v41 = vsel %vm2484_vm9, %v9092_v11, 0 }
 0xa94   : > { %v3867_v16 = vcombine.low %v3859_v43, %v3866_v30  ;;  %v3869_v8 = vcombine.low %v3763_v17, %v3777_v21  ;;  %v7530_v33 = vcombine.high %v3763_v17, %v3777_v21  ;;  %v3086_v43 = vcombine.high %v9038_v56, %v9038_v56 }
 0xa95   : > { %v3187_v63 = vcombine.low %v3087_v55, %v3078_v25 }
 0xa96   : > { %v3885_v18 = vrot.slane %v3869_v8, %v8404_v57  ;;  %v3892_v48 = vrot.slane %v7530_v33, %v8404_v57  ;;  %v3186_v20 = vcombine.low %v3085_v46, %v3086_v43 }
 0xa98   : > { %v3900_v58 = vcombine.low %v3878_v54, %v3885_v18 }
 0xa9a   : > { %v3908_v7 = vrot.slane %v3900_v58, %v8404_v57  ;;  %v3201_v58 = vrot.slane %v3187_v63, %v8404_v57 }
 0xab1   : > { %v3653_v32 = vpop.f32.mrb[24].mxu0 }
 0xab2   : > { %v3780_v15 = vcombine.high %v3653_v32, %v3653_v32  ;;  %v3787_v19 = vrot.slane %v3653_v32, %v8404_v57  ;;  %v7781_v23 = vpop.f32.mrb[25].mxu0 }
 0xab3   : > { %v3656_v38 = vpop.f32.mrb[26].mxu0 }
 0xab4   : > { %v3794_v42 = vrot.slane %v3780_v15, %v8404_v57  ;;  %v3795_v27 = vcombine.high %v3787_v19, %v3787_v19  ;;  %v3802_v28 = vrot.slane %v3787_v19, %v8404_v57  ;;  %v7782_v29 = vpop.f32.mrb[27].mxu0 }
 0xab6   : > { %v3816_v39 = vrot.slane %v3795_v27, %v8404_v57  ;;  %v3817_v47 = vcombine.high %v3802_v28, %v3802_v28  ;;  %v3871_v40 = vcombine.low %v3770_v3, %v3802_v28  ;;  %v3809_v9 = vrot.slane %v3794_v42, %v8404_v57 }
 0xab7   : > { %v4011_v3 = vsel %vm3952_vm14, %v9111_v37, 0  ;;  %v3194_v42 = vrot.slane %v3186_v20, %v8404_v57 }
 0xab8   : > { %v3818_v12 = vcombine.high %v3816_v39, %v3816_v39  ;;  %v3899_v13 = vrot.slane %v3871_v40, %v8404_v57  ;;  %v3917_v14 = vcombine.low %v3816_v39, %v3817_v47 }
 0xab9   : > { %v4105_v6 = vpop.f32.mrb[28].mxu0  ;;  %v3202_v28 = vcombine.low %v3194_v42, %v3201_v58 }
 0xaba   : > { %v3901_v4 = vcombine.low %v3892_v48, %v3899_v13  ;;  %v3918_v22 = vcombine.low %v3818_v12, %v3809_v9  ;;  %v4261_v24 = vmul.f32 0.35355338, %v4105_v6  ;;  %v7799_v50 = vpop.f32.mrb[29].mxu0  ;;  %v3925_v17 = vrot.slane %v3917_v14, %v8404_v57 }
 0xabb   : > { %v4108_v30 = vpop.f32.mrb[30].mxu0  ;;  %v3209_v37 = vrot.slane %v3202_v28, %v8404_v57 }
 0xabc   : > { %v3932_v21 = vrot.slane %v3918_v22, %v8404_v57  ;;  %v7800_v8 = vpop.f32.mrb[31].mxu0  ;;  %v4265_v54 = vsel %vm2682_vm10, %v4261_v24, -inf  ;;  %v3915_v18 = vrot.slane %v3901_v4, %v8404_v57 }
 0xabd   : > { %4266 = vmax.xlane.f32.xlu0 %v4265_v54  ;;  %v3214_v40 = vpack.c.bf16 %v3209_v37, %v3209_v37 }
 0xabe   : > { %v3933_v49 = vcombine.low %v3925_v17, %v3932_v21  ;;  %v3916_v32 = vcombine.low %v3908_v7, %v3915_v18 }
 0xac0   : > { %v3944_v15 = vpack.c.bf16 %v3916_v32, %v3867_v16  ;;  %v3940_v56 = vrot.slane %v3933_v49, %v8404_v57 }
 0xac1   : > { %v4155_v19 = vpop.f32.mrb[32].mxu0 }
 0xac2   : > { %v4262_v23 = vmul.f32 0.35355338, %v4155_v19  ;;  %7785 = vmatprep.mubr.msk.bf16.mxu1 %vm2484_vm9, %v3944_v15  ;;  %v7805_v10 = vpop.f32.mrb[33].mxu0  ;;  %v3945_v33 = vpack.c.bf16 %v3940_v56, %v3940_v56 }
 0xac3   : > { %v4158_v38 = vpop.f32.mrb[34].mxu0 }
 0xac4   : > { %7786 = vmatmul.mubr.msk.bf16.vlgmr.msra.gmra.mrb[40].mxu1 %vm2484_vm9, %v3945_v33  ;;  %v7806_v27 = vpop.f32.mrb[35].mxu0  ;;  %v4268_v16 = vsel %vm2682_vm10, %v4262_v23, -inf }
 0xac5   : > { %7791 = vmatprep.mubr.msk.bf16.mxu1 %vm2484_vm9, %v3213_v26  ;;  %4269 = vmax.xlane.f32.xlu1 %v4268_v16 }
 0xac6   : > { %7790 = vmatpush3.bf16.msra.mxu1 %v4011_v3 }
 0xac7   : > { %7807 = vmatprep.subr.bf16.mxu1 %v8114_v53 }
 0xac9   : > { %v4255_v29 = vpop.f32.mrb[36].mxu0 }
 0xaca   : > { %v7817_v46 = vpop.f32.mrb[37].mxu0  ;;  %v4264_v50 = vmul.f32 0.35355338, %v4255_v29 }
 0xacb   : > { %v4258_v39 = vpop.f32.mrb[38].mxu0 }
 0xacc   : > { %v7818_v47 = vpop.f32.mrb[39].mxu0  ;;  %v4274_v30 = vsel %vm2682_vm10, %v4264_v50, -inf }
 0xad0   : > { %7792 = vmatmul.mubr.msk.bf16.vlgmr.msra.gmra.mrb[40].mxu1 %vm2484_vm9, %v3214_v40 }
 0xad1   : > { %7808 = vmatpush3.bf16.xpose.msra.mxu1 %v4169_v41  ;;  %7809 = vmatprep.mubr.msk.bf16.mxu1 %vm8115_vm8, %v8114_v53 }
 0xad2   : > { %7819 = vmatprep.subr.bf16.mxu1 %v8114_v53 }
 0xad8   : > { %7810 = vmatmul.mubr.msk.bf16.vlgmr.msra.gmra.mrb[44].mxu1 %vm2484_vm9, %v4162_v51 }
 0xad9   : > { %7821 = vmatprep.mubr.msk.bf16.mxu1 %vm8115_vm8, %v8114_v53 }
 0xb4a   : > { %v4267_v12 = vpop.xlane.xlu0 %4266 }
 0xb4b   : > { %v4277_v13 = vsub.f32 %v4261_v24, %v4267_v12 }
 0xb4d   : > { %v4281_v14 = vmul.f32 1.442695, %v4277_v13 }
 0xb52   : > { %v4270_v34 = vpop.xlane.xlu1 %4269 }
 0xb53   : > { %v4278_v26 = vsub.f32 %v4262_v23, %v4270_v34 }
 0xb55   : > { %v4283_v48 = vmul.f32 1.442695, %v4278_v26 }
 0xb57   : > { %8054 = vpow2.f32 %v4283_v48 }
 0xb58   : > { %8056 = vpow2.f32 %v4281_v14 }
 0xb61   : > { %v9182_v9 = vpop.eup %8054 }
 0xb62   : > { %v4292_v11 = vsel %vm2682_vm10, %v9182_v9, 0.0  ;;  %v8057_v7 = vpop.eup %8056 }
 0xb63   : > { %4293 = vadd.xlane.f32.xlu1 %v4292_v11  ;;  %v4289_v17 = vsel %vm2682_vm10, %v8057_v7, 0.0 }
 0xbab   : > { %v4205_v6 = vpop.f32.mrb[44].mxu1 }
 0xbac   : > { %v4263_v55 = vmul.f32 0.35355338, %v4205_v6  ;;  %v7811_v4 = vpop.f32.mrb[45].mxu1 }
 0xbad   : > { %v4208_v22 = vpop.f32.mrb[46].mxu1 }
 0xbae   : > { %v7812_v25 = vpop.f32.mrb[47].mxu1  ;;  %v4271_v43 = vsel %vm2682_vm10, %v4263_v55, -inf }
 0xbaf   : > { %4272 = vmax.xlane.f32.xlu0 %v4271_v43 }
 0xbb3   : > { %4275 = vmax.xlane.f32.xlu0 %v4274_v30 }
 0xbb7   : > { %4290 = vadd.xlane.f32.xlu0 %v4289_v17 }
 0xbf0   : > { %v4294_v19 = vpop.xlane.xlu1 %4293 }
 0xc3c   : > { %v4273_v21 = vpop.xlane.xlu0 %4272 }
 0xc3d   : > { %v4279_v24 = vsub.f32 %v4263_v55, %v4273_v21 }
 0xc3f   : > { %v4285_v8 = vmul.f32 1.442695, %v4279_v24 }
 0xc40   : > { %v4276_v54 = vpop.xlane.xlu0 %4275 }
 0xc41   : > { %8058 = vpow2.f32 %v4285_v8  ;;  %v4280_v18 = vsub.f32 %v4264_v50, %v4276_v54  ;;  %v1213_v50 = vld [vmem:[%s10033_s6 + $0x8] sm:$0xf] }
 0xc42   : > { %v4799_v25 = vsel %vm3952_vm14, %v1213_v50, 0 }
 0xc43   : > { %v4287_v63 = vmul.f32 1.442695, %v4280_v18 }
 0xc44   : > { %v4291_v56 = vpop.xlane.xlu0 %4290 }
 0xc45   : > { %8060 = vpow2.f32 %v4287_v63 }
 0xc46   : > { %8062 = vrcp.f32 %v4291_v56 }
 0xc47   : > { %8064 = vrcp.f32 %v4294_v19 }
 0xc4b   : > { %v8059_v49 = vpop.eup %8058 }
 0xc4c   : > { %v4295_v32 = vsel %vm2682_vm10, %v8059_v49, 0.0 }
 0xc4d   : > { %4296 = vadd.xlane.f32.xlu0 %v4295_v32 }
 0xc4f   : > { %v8061_v20 = vpop.eup %8060 }
 0xc50   : > { %v4298_v15 = vsel %vm2682_vm10, %v8061_v20, 0.0  ;;  %v8063_v23 = vpop.eup %8062 }
 0xc51   : > { %4299 = vadd.xlane.f32.xlu1 %v4298_v15  ;;  %v4305_v10 = vmul.f32 %v8063_v23, %v8057_v7  ;;  %v8065_v3 = vpop.eup %8064 }
 0xc52   : > { %v4306_v27 = vmul.f32 %v8065_v3, %v9182_v9 }
 0xc53   : > { %v4309_v28 = vpack.c.bf16 %v4305_v10, %v4305_v10 }
 0xc54   : > { %v4310_v47 = vpack.c.bf16 %v4306_v27, %v4306_v27 }
 0xc62   : > { %4361 = vrot.lane.b32.xlu1 %v8910_v35, %s8124_s19 }
 0xc63   : > { %4313 = vrot.lane.b32.xlu0 %v8901_v44, %s8124_s19 }
 0xc66   : > { %4409 = vrot.lane.b32.xlu1 %v8913_v52, %s8124_s19 }
 0xc67   : > { %4854 = vrot.lane.b32.xlu0 %v8901_v44, %s8125_s30 }
 0xc6a   : > { %4457 = vrot.lane.b32.xlu1 %v8916_v31, %s8124_s19  ;;  %s10074_s19 = scalar_lea.vmem %s9944_s17, %s8231_s29 }
 0xc6b   : > { %4852 = vrot.lane.b32.xlu0 %v8901_v44, %s8126_s21 }
 0xc6e   : > { %4904 = vrot.lane.b32.xlu1 %v8910_v35, %s8125_s30 }
 0xc6f   : > { %4902 = vrot.lane.b32.xlu0 %v8910_v35, %s8126_s21 }
 0xc72   : > { %4954 = vrot.lane.b32.xlu1 %v8913_v52, %s8125_s30 }
 0xc73   : > { %4952 = vrot.lane.b32.xlu0 %v8913_v52, %s8126_s21 }
 0xc76   : > { %5004 = vrot.lane.b32.xlu1 %v8916_v31, %s8125_s30 }
 0xc7a   : > { %5002 = vrot.lane.b32.xlu1 %v8916_v31, %s8126_s21 }
 0xcda   : > { %v4297_v58 = vpop.xlane.xlu0 %4296 }
 0xcdb   : > { %8066 = vrcp.f32 %v4297_v58 }
 0xcde   : > { %v4314_v33 = vpop.permute.xlu0 %4313  ;;  %v4300_v38 = vpop.xlane.xlu1 %4299 }
 0xcdf   : > { %v4319_v42 = vand.u32 %v4314_v33, %v8951_v45  ;;  %8068 = vrcp.f32 %v4300_v38 }
 0xce1   : > { %7820 = vmatpush3.bf16.msra.mxu1 %v4319_v42 }
 0xce2   : > { %v4362_v16 = vpop.permute.xlu1 %4361  ;;  %7831 = vmatprep.subr.bf16.mxu1 %v8114_v53  ;;  %v4855_v11 = vpop.permute.xlu0 %4854 }
 0xce3   : > { %v4367_v29 = vand.u32 %v4362_v16, %v8951_v45  ;;  %v4860_v13 = vsel %vm2484_vm9, %v4855_v11, 0 }
 0xce4   : > { %7822 = vmatmul.mubr.msk.bf16.vlgmr.msra.gmra.mrb[48].mxu1 %vm2733_vm13, %v4309_v28 }
 0xce5   : > { %v8067_v46 = vpop.eup %8066  ;;  %7826 = vmatpush3.bf16.msra.mxu0 %v4367_v29  ;;  %7833 = vmatprep.mubr.msk.bf16.mxu1 %vm8115_vm8, %v8114_v53 }
 0xce6   : > { %v4307_v37 = vmul.f32 %v8067_v46, %v8059_v49  ;;  %v4410_v39 = vpop.permute.xlu1 %4409  ;;  %7837 = vmatprep.subr.bf16.mxu0 %v8114_v53  ;;  %v4853_v14 = vpop.permute.xlu0 %4852 }
 0xce7   : > { %v4415_v40 = vand.u32 %v4410_v39, %v8951_v45 }
 0xce8   : > { %7828 = vmatmul.mubr.msk.bf16.vlgmr.msra.gmra.mrb[40].mxu0 %vm2733_vm13, %v4310_v47  ;;  %v4311_v26 = vpack.c.bf16 %v4307_v37, %v4307_v37 }
 0xce9   : > { %v8069_v41 = vpop.eup %8068  ;;  %7832 = vmatpush3.bf16.msra.mxu1 %v4415_v40  ;;  %7839 = vmatprep.mubr.msk.bf16.mxu0 %vm8115_vm8, %v8114_v53 }
 0xcea   : > { %v4308_v51 = vmul.f32 %v8069_v41, %v8061_v20  ;;  %v4458_v34 = vpop.permute.xlu1 %4457  ;;  %v9227_v4 = vpop.permute.xlu0 %4902  ;;  %7945 = vmatprep.subr.msk.bf16.mxu1 %vm3952_vm14, %v1213_v50 }
 0xceb   : > { %v4463_v48 = vand.u32 %v4458_v34, %v8951_v45 }
 0xcec   : > { %7834 = vmatmul.mubr.msk.bf16.vlgmr.msra.gmra.mrb[52].mxu1 %vm2733_vm13, %v4311_v26  ;;  %v4312_v9 = vpack.c.bf16 %v4308_v51, %v4308_v51 }
 0xced   : > { %7838 = vmatpush3.bf16.msra.mxu0 %v4463_v48  ;;  %7844 = vmatpush3.bf16.msra.mxu1 %v4799_v25 }
 0xcee   : > { %7849 = vmatprep.subr.bf16.mxu0 %v8114_v53  ;;  %v9221_v12 = vpop.permute.xlu1 %4904  ;;  %v4953_v22 = vpop.permute.xlu0 %4952  ;;  %7855 = vmatprep.subr.bf16.mxu1 %v8114_v53 }
 0xcf0   : > { %7840 = vmatmul.mubr.msk.bf16.vlgmr.msra.gmra.mrb[44].mxu0 %vm2733_vm13, %v4312_v9 }
 0xcf1   : > { %7851 = vmatprep.mubr.msk.bf16.mxu0 %vm8115_vm8, %v8114_v53 }
 0xcf2   : > { %v4955_v6 = vpop.permute.xlu1 %4954 }
 0xcf3   : > { %v4960_v55 = vsel %vm2484_vm9, %v4955_v6, 0 }
 0xcf6   : > { %7850 = vmatpush3.bf16.xpose.msra.mxu0 %v4860_v13 }
 0xcf7   : > { %7861 = vmatprep.subr.bf16.mxu0 %v8114_v53 }
 0xcfd   : > { %7852 = vmatmul.mubr.msk.bf16.vlgmr.msra.gmra.mrb[48].mxu0 %vm2484_vm9, %v4853_v14 }
 0xcfe   : > { %7862 = vmatpush3.bf16.xpose.msra.mxu0 %v4960_v55  ;;  %7863 = vmatprep.mubr.msk.bf16.mxu0 %vm8115_vm8, %v8114_v53 }
 0xcff   : > { %7873 = vmatprep.subr.bf16.mxu0 %v8114_v53 }
 0xd05   : > { %7864 = vmatmul.mubr.msk.bf16.vlgmr.msra.gmra.mrb[52].mxu0 %vm2484_vm9, %v4953_v22 }
 0xd06   : > { %7875 = vmatprep.mubr.msk.bf16.mxu0 %vm8115_vm8, %v8114_v53 }
 0xdb7   : > { %v4355_v43 = vpop.f32.mrb[48].mxu1 }
 0xdb8   : > { %v4509_v30 = vcombine.high %v4355_v43, %v4355_v43  ;;  %v4516_v7 = vrot.slane %v4355_v43, %v8404_v57  ;;  %v7823_v17 = vpop.f32.mrb[49].mxu1 }
 0xdb9   : > { %v4358_v21 = vpop.f32.mrb[50].mxu1 }
 0xdba   : > { %v4524_v24 = vcombine.high %v4516_v7, %v4516_v7  ;;  %v7824_v8 = vpop.f32.mrb[51].mxu1  ;;  %v4523_v54 = vrot.slane %v4509_v30, %v8404_v57  ;;  %v4531_v63 = vrot.slane %v4516_v7, %v8404_v57 }
 0xdbb   : > { %v4403_v18 = vpop.f32.mrb[40].mxu0 }
 0xdbc   : > { %v4545_v49 = vrot.slane %v4524_v24, %v8404_v57  ;;  %v4548_v32 = vcombine.high %v4403_v18, %v4403_v18  ;;  %v4555_v20 = vrot.slane %v4403_v18, %v8404_v57  ;;  %v7829_v15 = vpop.f32.mrb[41].mxu0  ;;  %v4538_v33 = vrot.slane %v4523_v54, %v8404_v57 }
 0xdbd   : > { %v4406_v56 = vpop.f32.mrb[42].mxu0 }
 0xdbe   : > { %v4665_v19 = vcombine.low %v4531_v63, %v4545_v49  ;;  %v7543_v58 = vcombine.high %v4531_v63, %v4545_v49  ;;  %v4563_v23 = vcombine.high %v4555_v20, %v4555_v20  ;;  %v7830_v10 = vpop.f32.mrb[43].mxu0  ;;  %v4562_v38 = vrot.slane %v4548_v32, %v8404_v57 }
 0xdbf   : > { %v4570_v3 = vrot.slane %v4555_v20, %v8404_v57  ;;  %v4451_v42 = vpop.f32.mrb[52].mxu1 }
 0xdc0   : > { %v4675_v27 = vrot.slane %v4665_v19, %v8404_v57  ;;  %v4682_v16 = vrot.slane %v7543_v58, %v8404_v57  ;;  %v4584_v28 = vrot.slane %v4563_v23, %v8404_v57  ;;  %v7835_v29 = vpop.f32.mrb[53].mxu1  ;;  %v4587_v39 = vcombine.high %v4451_v42, %v4451_v42 }
 0xdc1   : > { %v4585_v46 = vcombine.high %v4570_v3, %v4570_v3  ;;  %v4667_v37 = vcombine.low %v4538_v33, %v4570_v3  ;;  %v4594_v47 = vrot.slane %v4451_v42, %v8404_v57  ;;  %v4454_v40 = vpop.f32.mrb[54].mxu1  ;;  %v4577_v34 = vrot.slane %v4562_v38, %v8404_v57 }
 0xdc2   : > { %v4586_v41 = vcombine.high %v4584_v28, %v4584_v28  ;;  %v7836_v51 = vpop.f32.mrb[55].mxu1  ;;  %v4601_v48 = vrot.slane %v4587_v39, %v8404_v57  ;;  %v4697_v13 = vcombine.low %v4675_v27, %v4682_v16 }
 0xdc3   : > { %v4668_v26 = vcombine.low %v4584_v28, %v4585_v46  ;;  %v4602_v9 = vcombine.high %v4594_v47, %v4594_v47  ;;  %v4499_v11 = vpop.f32.mrb[44].mxu0  ;;  %v4689_v14 = vrot.slane %v4667_v37, %v8404_v57  ;;  %v4609_v43 = vrot.slane %v4594_v47, %v8404_v57 }
 0xdc4   : > { %v4626_v6 = vcombine.high %v4499_v11, %v4499_v11  ;;  %v4633_v55 = vrot.slane %v4499_v11, %v8404_v57  ;;  %v7841_v22 = vpop.f32.mrb[45].mxu0  ;;  %v4714_v25 = vcombine.low %v4586_v41, %v4577_v34  ;;  %v4616_v17 = vrot.slane %v4601_v48, %v8404_v57 }
 0xdc5   : > { %v4696_v50 = vrot.slane %v4668_v26, %v8404_v57  ;;  %v4623_v30 = vrot.slane %v4602_v9, %v8404_v57  ;;  %v4502_v7 = vpop.f32.mrb[46].mxu0  ;;  %v4705_v56 = vrot.slane %v4697_v13, %v8404_v57 }
 0xdc6   : > { %v4640_v21 = vrot.slane %v4626_v6, %v8404_v57  ;;  %v4641_v24 = vcombine.high %v4633_v55, %v4633_v55  ;;  %v4648_v8 = vrot.slane %v4633_v55, %v8404_v57  ;;  %v7842_v54 = vpop.f32.mrb[47].mxu0  ;;  %v4724_v19 = vrot.slane %v4714_v25, %v8404_v57 }
 0xdc7   : > { %v4698_v18 = vcombine.low %v4689_v14, %v4696_v50  ;;  %v4715_v63 = vcombine.low %v4609_v43, %v4623_v30  ;;  %v7544_v49 = vcombine.high %v4609_v43, %v4623_v30  ;;  %v4910_v55 = vsel %vm2484_vm9, %v9221_v12, 0  ;;  %v5005_v30 = vpop.permute.xlu1 %5004 }
 0xdc8   : > { %v4662_v32 = vrot.slane %v4641_v24, %v8404_v57  ;;  %v4663_v20 = vcombine.high %v4648_v8, %v4648_v8  ;;  %v4717_v15 = vcombine.low %v4616_v17, %v4648_v8  ;;  %v4655_v23 = vrot.slane %v4640_v21, %v8404_v57 }
 0xdc9   : > { %v4731_v58 = vrot.slane %v4715_v63, %v8404_v57  ;;  %v4712_v10 = vrot.slane %v4698_v18, %v8404_v57  ;;  %v4738_v33 = vrot.slane %v7544_v49, %v8404_v57  ;;  %v5010_v21 = vsel %vm2484_vm9, %v5005_v30, 0 }
 0xdca   : > { %v4664_v38 = vcombine.high %v4662_v32, %v4662_v32  ;;  %v4745_v3 = vrot.slane %v4717_v15, %v8404_v57  ;;  %v4763_v42 = vcombine.low %v4662_v32, %v4663_v20 }
 0xdcb   : > { %v4746_v27 = vcombine.low %v4724_v19, %v4731_v58  ;;  %v4713_v16 = vcombine.low %v4705_v56, %v4712_v10  ;;  %v5003_v12 = vpop.permute.xlu1 %5002 }
 0xdcc   : > { %v4747_v28 = vcombine.low %v4738_v33, %v4745_v3  ;;  %v4764_v29 = vcombine.low %v4664_v38, %v4655_v23  ;;  %v4771_v46 = vrot.slane %v4763_v42, %v8404_v57 }
 0xdcd   : > { %v4754_v39 = vrot.slane %v4746_v27, %v8404_v57 }
 0xdce   : > { %v4778_v37 = vrot.slane %v4764_v29, %v8404_v57  ;;  %v4761_v47 = vrot.slane %v4747_v28, %v8404_v57 }
 0xdd0   : > { %v4779_v40 = vcombine.low %v4771_v46, %v4778_v37  ;;  %v4896_v41 = vpop.f32.mrb[48].mxu0  ;;  %v4762_v51 = vcombine.low %v4754_v39, %v4761_v47 }
 0xdd1   : > { %v5052_v34 = vmul.f32 0.35355338, %v4896_v41  ;;  %v7853_v26 = vpop.f32.mrb[49].mxu0 }
 0xdd2   : > { %v4899_v48 = vpop.f32.mrb[50].mxu0  ;;  %v4790_v9 = vpack.c.bf16 %v4762_v51, %v4713_v16  ;;  %v4786_v11 = vrot.slane %v4779_v40, %v8404_v57 }
 0xdd3   : > { %v7854_v13 = vpop.f32.mrb[51].mxu0  ;;  %v5056_v14 = vsel %vm2682_vm10, %v5052_v34, -inf }
 0xdd4   : > { %7845 = vmatprep.mubr.msk.bf16.mxu1 %vm2484_vm9, %v4790_v9  ;;  %5057 = vmax.xlane.f32.xlu0 %v5056_v14  ;;  %v4791_v6 = vpack.c.bf16 %v4786_v11, %v4786_v11 }
 0xdd6   : > { %7846 = vmatmul.mubr.msk.bf16.vlgmr.msra.gmra.mrb[40].mxu1 %vm2484_vm9, %v4791_v6 }
 0xdd7   : > { %7856 = vmatpush3.bf16.xpose.msra.mxu1 %v4910_v55  ;;  %7857 = vmatprep.mubr.msk.bf16.mxu1 %vm8115_vm8, %v8114_v53 }
 0xdd8   : > { %v4996_v22 = vpop.f32.mrb[52].mxu0  ;;  %7867 = vmatprep.subr.bf16.mxu1 %v8114_v53 }
 0xdd9   : > { %v5054_v50 = vmul.f32 0.35355338, %v4996_v22  ;;  %v7865_v25 = vpop.f32.mrb[53].mxu0 }
 0xdda   : > { %v4999_v43 = vpop.f32.mrb[54].mxu0 }
 0xddb   : > { %v7866_v7 = vpop.f32.mrb[55].mxu0  ;;  %v5062_v17 = vsel %vm2682_vm10, %v5054_v50, -inf }
 0xddc   : > { %5063 = vmax.xlane.f32.xlu0 %v5062_v17 }
 0xdde   : > { %7858 = vmatmul.mubr.msk.bf16.vlgmr.msra.gmra.mrb[56].mxu1 %vm2484_vm9, %v9227_v4 }
 0xddf   : > { %7868 = vmatpush3.bf16.xpose.msra.mxu1 %v5010_v21  ;;  %7869 = vmatprep.mubr.msk.bf16.mxu1 %vm8115_vm8, %v8114_v53 }
 0xde0   : > { %7879 = vmatprep.subr.bf16.mxu1 %v8114_v53 }
 0xde6   : > { %7870 = vmatmul.mubr.msk.bf16.vlgmr.msra.gmra.mrb[60].mxu1 %vm2484_vm9, %v5003_v12 }
 0xde7   : > { %7881 = vmatprep.mubr.msk.bf16.mxu1 %vm8115_vm8, %v8114_v53 }
 0xe61   : > { %v5058_v24 = vpop.xlane.xlu0 %5057 }
 0xe62   : > { %v5068_v8 = vsub.f32 %v5052_v34, %v5058_v24 }
 0xe64   : > { %v5072_v18 = vmul.f32 1.442695, %v5068_v8 }
 0xe66   : > { %8070 = vpow2.f32 %v5072_v18 }
 0xe69   : > { %v5064_v54 = vpop.xlane.xlu0 %5063 }
 0xe6a   : > { %v5070_v63 = vsub.f32 %v5054_v50, %v5064_v54 }
 0xe6c   : > { %v5076_v20 = vmul.f32 1.442695, %v5070_v63 }
 0xe6e   : > { %8072 = vpow2.f32 %v5076_v20 }
 0xe70   : > { %v8071_v42 = vpop.eup %8070 }
 0xe71   : > { %v5080_v27 = vsel %vm2682_vm10, %v8071_v42, 0.0 }
 0xe78   : > { %v8073_v16 = vpop.eup %8072 }
 0xe79   : > { %v5086_v28 = vsel %vm2682_vm10, %v8073_v16, 0.0 }
 0xeb1   : > { %v4946_v49 = vpop.f32.mrb[56].mxu1 }
 0xeb2   : > { %v5053_v32 = vmul.f32 0.35355338, %v4946_v49  ;;  %v7859_v4 = vpop.f32.mrb[57].mxu1 }
 0xeb3   : > { %v4949_v15 = vpop.f32.mrb[58].mxu1 }
 0xeb4   : > { %v7860_v56 = vpop.f32.mrb[59].mxu1  ;;  %v5059_v19 = vsel %vm2682_vm10, %v5053_v32, -inf }
 0xeb5   : > { %5060 = vmax.xlane.f32.xlu1 %v5059_v19  ;;  %v1214_v19 = vld [vmem:[%s10033_s6 + $0xc] sm:$0xf] }
 0xeb9   : > { %v5046_v58 = vpop.f32.mrb[60].mxu1 }
 0xeba   : > { %v5055_v23 = vmul.f32 0.35355338, %v5046_v58  ;;  %v7871_v10 = vpop.f32.mrb[61].mxu1  ;;  %v5590_v58 = vsel %vm3952_vm14, %v1214_v19, 0 }
 0xebb   : > { %v5049_v33 = vpop.f32.mrb[62].mxu1 }
 0xebc   : > { %v7872_v38 = vpop.f32.mrb[63].mxu1  ;;  %v5065_v3 = vsel %vm2682_vm10, %v5055_v23, -inf }
 0xebd   : > { %5066 = vmax.xlane.f32.xlu0 %v5065_v3 }
 0xec1   : > { %5081 = vadd.xlane.f32.xlu0 %v5080_v27 }
 0xec5   : > { %5087 = vadd.xlane.f32.xlu0 %v5086_v28 }
 0xec6   : > { %5152 = vrot.lane.b32.xlu1 %v8910_v35, %s8127_s25 }
 0xeca   : > { %5200 = vrot.lane.b32.xlu1 %v8913_v52, %s8127_s25 }
 0xedb   : > { %5104 = vrot.lane.b32.xlu0 %v8901_v44, %s8127_s25 }
 0xf42   : > { %v5061_v29 = vpop.xlane.xlu1 %5060 }
 0xf43   : > { %v5069_v46 = vsub.f32 %v5053_v32, %v5061_v29 }
 0xf45   : > { %v5074_v37 = vmul.f32 1.442695, %v5069_v46 }
 0xf46   : > { %v5153_v39 = vpop.permute.xlu1 %5152 }
 0xf47   : > { %8074 = vpow2.f32 %v5074_v37  ;;  %v5158_v47 = vand.u32 %v5153_v39, %v8951_v45 }
 0xf49   : > { %7880 = vmatpush3.bf16.msra.mxu1 %v5158_v47 }
 0xf4a   : > { %v5067_v40 = vpop.xlane.xlu0 %5066  ;;  %7891 = vmatprep.subr.bf16.mxu1 %v8114_v53  ;;  %v5201_v14 = vpop.permute.xlu1 %5200 }
 0xf4b   : > { %v5071_v41 = vsub.f32 %v5055_v23, %v5067_v40  ;;  %v5206_v50 = vand.u32 %v5201_v14, %v8951_v45 }
 0xf4d   : > { %v5078_v51 = vmul.f32 1.442695, %v5071_v41 }
 0xf4e   : > { %v5082_v35 = vpop.xlane.xlu0 %5081 }
 0xf4f   : > { %8076 = vpow2.f32 %v5078_v51 }
 0xf50   : > { %8078 = vrcp.f32 %v5082_v35 }
 0xf51   : > { %v8075_v52 = vpop.eup %8074 }
 0xf52   : > { %v5088_v34 = vpop.xlane.xlu0 %5087  ;;  %v5083_v44 = vsel %vm2682_vm10, %v8075_v52, 0.0 }
 0xf53   : > { %5084 = vadd.xlane.f32.xlu1 %v5083_v44  ;;  %8080 = vrcp.f32 %v5088_v34 }
 0xf56   : > { %v5105_v26 = vpop.permute.xlu0 %5104 }
 0xf57   : > { %v5110_v48 = vand.u32 %v5105_v26, %v8951_v45 }
 0xf59   : > { %v8077_v9 = vpop.eup %8076  ;;  %7874 = vmatpush3.bf16.msra.mxu0 %v5110_v48 }
 0xf5a   : > { %v8079_v11 = vpop.eup %8078  ;;  %v5089_v13 = vsel %vm2682_vm10, %v8077_v9, 0.0  ;;  %7885 = vmatprep.subr.bf16.mxu0 %v8114_v53 }
 0xf5b   : > { %v5096_v6 = vmul.f32 %v8079_v11, %v8071_v42  ;;  %5090 = vadd.xlane.f32.xlu1 %v5089_v13 }
 0xf5d   : > { %v5100_v55 = vpack.c.bf16 %v5096_v6, %v5096_v6  ;;  %v8081_v22 = vpop.eup %8080 }
 0xf5e   : > { %v5098_v25 = vmul.f32 %v8081_v22, %v8073_v16 }
 0xf5f   : > { %7876 = vmatmul.mubr.msk.bf16.vlgmr.msra.gmra.mrb[56].mxu0 %vm2733_vm13, %v5100_v55 }
 0xf60   : > { %7886 = vmatpush3.bf16.msra.mxu0 %v5206_v50  ;;  %7887 = vmatprep.mubr.msk.bf16.mxu0 %vm8115_vm8, %v8114_v53  ;;  %v5102_v43 = vpack.c.bf16 %v5098_v25, %v5098_v25 }
 0xf67   : > { %7888 = vmatmul.mubr.msk.bf16.vlgmr.msra.gmra.mrb[60].mxu0 %vm2733_vm13, %v5102_v43 }
 0xf6c   : > { %5248 = vrot.lane.b32.xlu1 %v8916_v31, %s8127_s25 }
 0xfe0   : > { %v5085_v30 = vpop.xlane.xlu1 %5084 }
 0xfe1   : > { %8082 = vrcp.f32 %v5085_v30 }
 0xfe8   : > { %v5091_v7 = vpop.xlane.xlu1 %5090 }
 0xfe9   : > { %8084 = vrcp.f32 %v5091_v7 }
 0xfeb   : > { %v8083_v17 = vpop.eup %8082 }
 0xfec   : > { %v5097_v21 = vmul.f32 %v8083_v17, %v8075_v52  ;;  %v5249_v12 = vpop.permute.xlu1 %5248 }
 0xfed   : > { %v5254_v24 = vand.u32 %v5249_v12, %v8951_v45 }
 0xfee   : > { %v5101_v8 = vpack.c.bf16 %v5097_v21, %v5097_v21 }
 0xff0   : > { %7882 = vmatmul.mubr.msk.bf16.vlgmr.msra.gmra.mrb[64].mxu1 %vm2733_vm13, %v5101_v8 }
 0xff1   : > { %7892 = vmatpush3.bf16.msra.mxu1 %v5254_v24  ;;  %7893 = vmatprep.mubr.msk.bf16.mxu1 %vm8115_vm8, %v8114_v53 }
 0xff2   : > { %7946 = vmatprep.subr.msk.bf16.mxu1 %vm3952_vm14, %v1214_v19 }
 0xff3   : > { %v8085_v54 = vpop.eup %8084 }
 0xff4   : > { %v5099_v18 = vmul.f32 %v8085_v54, %v8077_v9 }
 0xff6   : > { %v5103_v31 = vpack.c.bf16 %v5099_v18, %v5099_v18 }
 0xff8   : > { %7894 = vmatmul.mubr.msk.bf16.vlgmr.msra.gmra.mrb[68].mxu1 %vm2733_vm13, %v5103_v31 }
 0xff9   : > { %7898 = vmatpush3.bf16.msra.mxu1 %v5590_v58 }
0x1032   : > { %v5146_v63 = vpop.f32.mrb[56].mxu0 }
0x1033   : > { %v7877_v49 = vpop.f32.mrb[57].mxu0  ;;  %v5307_v53 = vrot.slane %v5146_v63, %v8404_v57  ;;  %v5300_v33 = vcombine.high %v5146_v63, %v5146_v63 }
0x1034   : > { %v5149_v32 = vpop.f32.mrb[58].mxu0 }
0x1035   : > { %v7878_v4 = vpop.f32.mrb[59].mxu0  ;;  %v5315_v23 = vcombine.high %v5307_v53, %v5307_v53  ;;  %v5322_v3 = vrot.slane %v5307_v53, %v8404_v57  ;;  %v5314_v27 = vrot.slane %v5300_v33, %v8404_v57 }
0x1037   : > { %v5336_v38 = vrot.slane %v5315_v23, %v8404_v57  ;;  %v5329_v41 = vrot.slane %v5314_v27, %v8404_v57 }
0x1039   : > { %v5456_v16 = vcombine.low %v5322_v3, %v5336_v38  ;;  %v7555_v28 = vcombine.high %v5322_v3, %v5336_v38 }
0x103a   : > { %v5242_v20 = vpop.f32.mrb[60].mxu0 }
0x103b   : > { %v7889_v15 = vpop.f32.mrb[61].mxu0  ;;  %v5385_v10 = vrot.slane %v5242_v20, %v8404_v57  ;;  %v5466_v44 = vrot.slane %v5456_v16, %v8404_v57  ;;  %v5473_v26 = vrot.slane %v7555_v28, %v8404_v57  ;;  %v5378_v48 = vcombine.high %v5242_v20, %v5242_v20 }
0x103c   : > { %v5245_v45 = vpop.f32.mrb[62].mxu0 }
0x103d   : > { %v7890_v56 = vpop.f32.mrb[63].mxu0  ;;  %v5393_v42 = vcombine.high %v5385_v10, %v5385_v10  ;;  %v5400_v9 = vrot.slane %v5385_v10, %v8404_v57  ;;  %v5488_v25 = vcombine.low %v5466_v44, %v5473_v26  ;;  %v5392_v43 = vrot.slane %v5378_v48, %v8404_v57 }
0x103f   : > { %v5414_v47 = vrot.slane %v5393_v42, %v8404_v57  ;;  %v5407_v20 = vrot.slane %v5392_v43, %v8404_v57  ;;  %v5496_v58 = vrot.slane %v5488_v25, %v8404_v57 }
0x1041   : > { %v5506_v6 = vcombine.low %v5400_v9, %v5414_v47  ;;  %v7556_v15 = vcombine.high %v5400_v9, %v5414_v47 }
0x1043   : > { %v5522_v54 = vrot.slane %v5506_v6, %v8404_v57  ;;  %v5529_v42 = vrot.slane %v7556_v15, %v8404_v57 }
0x10c3   : > { %v5194_v29 = vpop.f32.mrb[64].mxu1 }
0x10c4   : > { %v5339_v46 = vcombine.high %v5194_v29, %v5194_v29  ;;  %v5346_v37 = vrot.slane %v5194_v29, %v8404_v57  ;;  %v7883_v39 = vpop.f32.mrb[65].mxu1 }
0x10c5   : > { %v5197_v40 = vpop.f32.mrb[66].mxu1 }
0x10c6   : > { %v5353_v51 = vrot.slane %v5339_v46, %v8404_v57  ;;  %v5354_v35 = vcombine.high %v5346_v37, %v5346_v37  ;;  %v5361_v52 = vrot.slane %v5346_v37, %v8404_v57  ;;  %v7884_v34 = vpop.f32.mrb[67].mxu1 }
0x10c7   : > { %v7559_v34 = vld [vmem:[%s10034_s23] ss:$0 sm:$0xff] }
0x10c8   : > { %v5375_v11 = vrot.slane %v5354_v35, %v8404_v57  ;;  %v5376_v13 = vcombine.high %v5361_v52, %v5361_v52  ;;  %v5458_v14 = vcombine.low %v5329_v41, %v5361_v52  ;;  %v5368_v55 = vrot.slane %v5353_v51, %v8404_v57 }
0x10c9   : > { %v5813_v44 = vcombine.high %v7559_v34, %v7559_v34  ;;  %v5820_v26 = vrot.slane %v7559_v34, %v8404_v57  ;;  %v10044_v34 = vld [vmem:[#allocation20_spill] sm:$0xff] }
0x10ca   : > { %v5377_v22 = vcombine.high %v5375_v11, %v5375_v11  ;;  %v5459_v50 = vcombine.low %v5375_v11, %v5376_v13  ;;  %v5480_v30 = vrot.slane %v5458_v14, %v8404_v57 }
0x10cb   : > { %v5290_v7 = vpop.f32.mrb[68].mxu1  ;;  %v5827_v48 = vrot.slane %v5813_v44, %v8404_v57  ;;  %v5828_v9 = vcombine.high %v5820_v26, %v5820_v26  ;;  %v9368_v13 = vrot.slane %v5820_v26, %v8404_v57  ;;  %v10045_v26 = vld [vmem:[#allocation5_spill] sm:$0xff] }
0x10cc   : > { %v5487_v17 = vrot.slane %v5459_v50, %v8404_v57  ;;  %v5505_v21 = vcombine.low %v5377_v22, %v5368_v55  ;;  %v5417_v12 = vcombine.high %v5290_v7, %v5290_v7  ;;  %v5424_v24 = vrot.slane %v5290_v7, %v8404_v57  ;;  %v7895_v8 = vpop.f32.mrb[69].mxu1 }
0x10cd   : > { %v5293_v18 = vpop.f32.mrb[70].mxu1  ;;  %v5829_v11 = vcombine.high %v5827_v48, %v5827_v48  ;;  %v9371_v14 = vrot.slane %v5828_v9, %v8404_v57  ;;  %v9374_v6 = vrot.slane %v5827_v48, %v8404_v57  ;;  %v9382_v43 = vcombine.high %v9368_v13, %v9368_v13 }
0x10ce   : > { %v5489_v31 = vcombine.low %v5480_v30, %v5487_v17  ;;  %v5515_v63 = vrot.slane %v5505_v21, %v8404_v57  ;;  %v5431_v49 = vrot.slane %v5417_v12, %v8404_v57  ;;  %v5432_v32 = vcombine.high %v5424_v24, %v5424_v24  ;;  %v7896_v4 = vpop.f32.mrb[71].mxu1 }
0x10cf   : > { %v5439_v45 = vrot.slane %v5424_v24, %v8404_v57  ;;  %v9377_v55 = vrot.slane %v5829_v11, %v8404_v57  ;;  %v9386_v30 = vcombine.high %v9371_v14, %v9371_v14  ;;  %v9392_v8 = vcombine.high %v9374_v6, %v9374_v6  ;;  %v10047_v11 = vld [vmem:[#allocation6_spill] sm:$0xff] }
0x10d0   : > { %v5537_v56 = vcombine.low %v5515_v63, %v5522_v54  ;;  %v5453_v19 = vrot.slane %v5432_v32, %v8404_v57  ;;  %v5503_v53 = vrot.slane %v5489_v31, %v8404_v57  ;;  %v5446_v33 = vrot.slane %v5431_v49, %v8404_v57 }
0x10d1   : > { %v5454_v23 = vcombine.high %v5439_v45, %v5439_v45  ;;  %v5508_v10 = vcombine.low %v5407_v20, %v5439_v45  ;;  %v9396_v54 = vcombine.high %v9377_v55, %v9377_v55 }
0x10d2   : > { %v5455_v38 = vcombine.high %v5453_v19, %v5453_v19  ;;  %v5504_v3 = vcombine.low %v5496_v58, %v5503_v53  ;;  %v5545_v39 = vrot.slane %v5537_v56, %v8404_v57 }
0x10d3   : > { %v5536_v27 = vrot.slane %v5508_v10, %v8404_v57  ;;  %v5554_v16 = vcombine.low %v5453_v19, %v5454_v23  ;;  %v10035_v10 = vld [vmem:[#allocation17_spill] sm:$0xff] }
0x10d4   : > { %v5555_v28 = vcombine.low %v5455_v38, %v5446_v33  ;;  %v10036_v38 = vld [vmem:[#allocation18_spill] sm:$0xff] }
0x10d5   : > { %v5538_v29 = vcombine.low %v5529_v42, %v5536_v27  ;;  %v5562_v46 = vrot.slane %v5554_v16, %v8404_v57 }
0x10d6   : > { %v5569_v37 = vrot.slane %v5555_v28, %v8404_v57  ;;  %v10038_v28 = vld [vmem:[#allocation4_spill] sm:$0xff] }
0x10d7   : > { %v5552_v47 = vrot.slane %v5538_v29, %v8404_v57 }
0x10d8   : > { %v5570_v40 = vcombine.low %v5562_v46, %v5569_v37  ;;  %v10039_v46 = vld [vmem:[#allocation16_spill] sm:$0xff] }
0x10d9   : > { %v5553_v41 = vcombine.low %v5545_v39, %v5552_v47 }
0x10da   : > { %v5577_v51 = vrot.slane %v5570_v40, %v8404_v57  ;;  %v10042_v40 = vld [vmem:[#allocation9_spill] sm:$0xff] }
0x10db   : > { %v5581_v35 = vpack.c.bf16 %v5553_v41, %v5504_v3 }
0x10dc   : > { %v5582_v52 = vpack.c.bf16 %v5577_v51, %v5577_v51 }
0x10dd   : > { %7899 = vmatprep.mubr.msk.bf16.mxu1 %vm2484_vm9, %v5581_v35  ;;  %v10043_v35 = vld [vmem:[#allocation19_spill] sm:$0xff] }
0x10de   : > { %7900 = vmatmul.mubr.msk.bf16.vlgmr.msra.gmra.mrb[40].mxu1 %vm2484_vm9, %v5582_v52 }
0x11b1   : > { %v7901_v22 = vpop.f32.mrb[40].mxu1 }
0x11b2   : > { %v5750_v50 = vrot.slane %v7901_v22, %v8404_v57  ;;  %v5626_v25 = vpop.f32.mrb[41].mxu1 }
0x11b3   : > { %v5646_v7 = vcombine.high %v5626_v25, %v5626_v25  ;;  %v5653_v17 = vrot.slane %v5626_v25, %v8404_v57  ;;  %v7902_v21 = vpop.f32.mrb[42].mxu1 }
0x11b4   : > { %v5751_v12 = vcombine.high %v5750_v50, %v5750_v50  ;;  %v5758_v24 = vrot.slane %v5750_v50, %v8404_v57  ;;  %v5629_v18 = vpop.f32.mrb[43].mxu1  ;;  %v10048_v50 = vld [vmem:[#allocation10_spill] sm:$0xff] }
0x11b5   : > { %v5660_v31 = vrot.slane %v5646_v7, %v8404_v57  ;;  %v5661_v63 = vcombine.high %v5653_v17, %v5653_v17  ;;  %v5669_v49 = vrot.slane %v5653_v17, %v8404_v57  ;;  %v5695_v32 = vcombine.high %v5629_v18, %v5629_v18  ;;  %v10050_v17 = vld [vmem:[#allocation13_spill] sm:$0xff] }
0x11b6   : > { %v5765_v4 = vrot.slane %v5751_v12, %v8404_v57  ;;  %v5766_v20 = vcombine.high %v5758_v24, %v5758_v24  ;;  %v5804_v15 = vadd.f32 %v5758_v24, %v8480_v36  ;;  %v5702_v45 = vrot.slane %v5629_v18, %v8404_v57 }
0x11b7   : > { %v5662_v56 = vcombine.high %v5660_v31, %v5660_v31  ;;  %v5676_v19 = vrot.slane %v5660_v31, %v8404_v57  ;;  %v5683_v58 = vrot.slane %v5661_v63, %v8404_v57  ;;  %v5691_v53 = vcombine.high %v5669_v49, %v5669_v49 }
0x11b8   : > { %v5767_v23 = vcombine.high %v5765_v4, %v5765_v4  ;;  %v5805_v33 = vadd.f32 %v5765_v4, %v10035_v10  ;;  %v5806_v3 = vadd.f32 %v5766_v20, %v10036_v38  ;;  %v9408_v42 = vadd.f32 %v9368_v13, %v5804_v15  ;;  %v10057_v38 = vld [vmem:[#allocation15_spill] sm:$0xff] }
0x11b9   : > { %v5690_v27 = vrot.slane %v5662_v56, %v8404_v57  ;;  %v5692_v16 = vcombine.high %v5676_v19, %v5676_v19  ;;  %v5693_v36 = vcombine.high %v5683_v58, %v5683_v58  ;;  %v5788_v29 = vadd.f32 %v5669_v49, %v10038_v28 }
0x11ba   : > { %10037 = vst [vmem:[#allocation17_spill] sm:$0xff] %v9408_v42  ;;  %v5807_v37 = vadd.f32 %v5767_v23, %v10039_v46  ;;  %v9414_v39 = vadd.f32 %v9371_v14, %v5805_v33  ;;  %v9417_v47 = vadd.f32 %v9382_v43, %v5806_v3  ;;  %v5789_v41 = vadd.f32 %v5683_v58, %v10042_v40 }
0x11bb   : > { %v5694_v51 = vcombine.high %v5690_v27, %v5690_v27  ;;  %v5790_v52 = vadd.f32 %v5691_v53, %v10043_v35  ;;  %v5791_v44 = vadd.f32 %v5693_v36, %v10044_v34  ;;  %v5792_v48 = vadd.f32 %v5676_v19, %v10045_v26  ;;  %v10058_v36 = vld [vmem:[#allocation21_spill] sm:$0xff]  ;;  %v10062_v34 = vld [vmem:[#allocation22_spill] sm:$0xff]  ;;  %v10063_v26 = vld [vmem:[#allocation11_spill] sm:$0xff] }
0x11bc   : > { %10040 = vst [vmem:[#allocation18_spill] sm:$0xff] %v9414_v39  ;;  %10041 = vst [vmem:[#allocation4_spill] sm:$0xff] %v9417_v47  ;;  %v9424_v9 = vadd.f32 %v9386_v30, %v5807_v37  ;;  %v5793_v22 = vadd.f32 %v5690_v27, %v10047_v11  ;;  %v5794_v25 = vadd.f32 %v5692_v16, %v10048_v50  ;;  %v10059_v37 = vld [vmem:[#allocation7_spill] sm:$0xff] }
0x11bd   : > { %v9429_v7 = vadd.f32 %v9368_v13, %v5788_v29  ;;  %v5795_v21 = vadd.f32 %v5694_v51, %v10050_v17  ;;  %v9433_v12 = vadd.f32 %v9371_v14, %v5789_v41  ;;  %v9436_v24 = vadd.f32 %v9382_v43, %v5790_v52  ;;  %v10060_v41 = vld [vmem:[#allocation8_spill] sm:$0xff] }
0x11be   : > { %10046 = vst [vmem:[#allocation16_spill] sm:$0xff] %v9424_v9  ;;  %v9439_v18 = vadd.f32 %v9386_v30, %v5791_v44  ;;  %v9442_v31 = vadd.f32 %v9374_v6, %v5792_v48  ;;  %v9445_v63 = vadd.f32 %v9377_v55, %v5793_v22  ;;  %v9448_v49 = vadd.f32 %v9392_v8, %v5794_v25  ;;  %v10065_v22 = vld [vmem:[#allocation14_spill] sm:$0xff] }
0x11bf   : > { %10049 = vst [vmem:[#allocation9_spill] sm:$0xff] %v9429_v7  ;;  %10051 = vst [vmem:[#allocation19_spill] sm:$0xff] %v9436_v24  ;;  %v5709_v4 = vrot.slane %v5695_v32, %v8404_v57  ;;  %v9452_v20 = vadd.f32 %v9396_v54, %v5795_v21  ;;  %v5710_v15 = vcombine.high %v5702_v45, %v5702_v45 }
0x11c0   : > { %10052 = vst [vmem:[#allocation20_spill] sm:$0xff] %v9439_v18  ;;  %10053 = vst [vmem:[#allocation5_spill] sm:$0xff] %v9442_v31  ;;  %v5718_v56 = vrot.slane %v5702_v45, %v8404_v57  ;;  %v5910_v19 = vcombine.low %v9429_v7, %v9433_v12  ;;  %v5911_v23 = vcombine.low %v9436_v24, %v9439_v18 }
0x11c1   : > { %10054 = vst [vmem:[#allocation6_spill] sm:$0xff] %v9445_v63  ;;  %10055 = vst [vmem:[#allocation10_spill] sm:$0xff] %v9448_v49  ;;  %v5711_v58 = vcombine.high %v5709_v4, %v5709_v4  ;;  %v5725_v53 = vrot.slane %v5709_v4, %v8404_v57  ;;  %v5912_v10 = vcombine.low %v9442_v31, %v9445_v63 }
0x11c2   : > { %10056 = vst [vmem:[#allocation13_spill] sm:$0xff] %v9452_v20  ;;  %v5732_v32 = vrot.slane %v5710_v15, %v8404_v57  ;;  %v5740_v33 = vcombine.high %v5718_v56, %v5718_v56  ;;  %v5796_v3 = vadd.f32 %v5718_v56, %v10057_v38  ;;  %v5913_v45 = vcombine.low %v9448_v49, %v9452_v20 }
0x11c3   : > { %v5739_v27 = vrot.slane %v5711_v58, %v8404_v57  ;;  %v5741_v16 = vcombine.high %v5725_v53, %v5725_v53  ;;  %v5800_v28 = vadd.f32 %v5725_v53, %v10058_v36  ;;  %v5920_v29 = vrot.slane %v5910_v19, %v8404_v57 }
0x11c4   : > { %v5742_v46 = vcombine.high %v5732_v32, %v5732_v32  ;;  %v5797_v40 = vadd.f32 %v5732_v32, %v10059_v37  ;;  %v5798_v51 = vadd.f32 %v5740_v33, %v10060_v41  ;;  %v9472_v35 = vadd.f32 %v9368_v13, %v5796_v3  ;;  %v10068_v13 = vld [vmem:[#allocation12_spill] sm:$0xff] }
0x11c5   : > { %v5743_v52 = vcombine.high %v5739_v27, %v5739_v27  ;;  %v5801_v44 = vadd.f32 %v5739_v27, %v10062_v34  ;;  %v5802_v48 = vadd.f32 %v5741_v16, %v10063_v26  ;;  %v9477_v11 = vadd.f32 %v9374_v6, %v5800_v28 }
0x11c6   : > { %10061 = vst [vmem:[#allocation15_spill] sm:$0xff] %v9472_v35  ;;  %v5799_v50 = vadd.f32 %v5742_v46, %v10065_v22  ;;  %v9481_v25 = vadd.f32 %v9371_v14, %v5797_v40  ;;  %v9484_v17 = vadd.f32 %v9382_v43, %v5798_v51  ;;  %v5927_v21 = vrot.slane %v5911_v23, %v8404_v57 }
0x11c7   : > { %10064 = vst [vmem:[#allocation21_spill] sm:$0xff] %v9477_v11  ;;  %v5803_v4 = vadd.f32 %v5743_v52, %v10068_v13  ;;  %v9489_v15 = vadd.f32 %v9377_v55, %v5801_v44  ;;  %v9492_v56 = vadd.f32 %v9392_v8, %v5802_v48  ;;  %v5934_v6 = vrot.slane %v5912_v10, %v8404_v57 }
0x11c8   : > { %10066 = vst [vmem:[#allocation7_spill] sm:$0xff] %v9481_v25  ;;  %10067 = vst [vmem:[#allocation8_spill] sm:$0xff] %v9484_v17  ;;  %v9496_v19 = vadd.f32 %v9386_v30, %v5799_v50  ;;  %v5941_v14 = vrot.slane %v5913_v45, %v8404_v57  ;;  %v5942_v58 = vcombine.low %v5920_v29, %v5927_v21 }
0x11c9   : > { %10069 = vst [vmem:[#allocation22_spill] sm:$0xff] %v9489_v15  ;;  %10070 = vst [vmem:[#allocation11_spill] sm:$0xff] %v9492_v56  ;;  %v5959_v43 = vcombine.low %v9472_v35, %v9481_v25  ;;  %v9502_v53 = vadd.f32 %v9396_v54, %v5803_v4  ;;  %v5961_v55 = vcombine.low %v9477_v11, %v9489_v15 }
0x11ca   : > { %10071 = vst [vmem:[#allocation14_spill] sm:$0xff] %v9496_v19  ;;  %v6008_v8 = vcombine.low %v9408_v42, %v9414_v39  ;;  %v6009_v23 = vcombine.low %v9417_v47, %v9424_v9  ;;  %v5943_v30 = vcombine.low %v5934_v6, %v5941_v14  ;;  %v5960_v10 = vcombine.low %v9484_v17, %v9496_v19 }
0x11cb   : > { %10072 = vst [vmem:[#allocation12_spill] sm:$0xff] %v9502_v53  ;;  %v5962_v32 = vcombine.low %v9492_v56, %v9502_v53  ;;  %v5950_v38 = vrot.slane %v5942_v58, %v8404_v57  ;;  %v5969_v45 = vrot.slane %v5959_v43, %v8404_v57  ;;  %v5983_v16 = vrot.slane %v5961_v55, %v8404_v57 }
0x11cc   : > { %v6016_v33 = vrot.slane %v6008_v8, %v8404_v57  ;;  %v6023_v54 = vrot.slane %v6009_v23, %v8404_v57  ;;  %v5957_v3 = vrot.slane %v5943_v30, %v8404_v57  ;;  %v5976_v27 = vrot.slane %v5960_v10, %v8404_v57 }
0x11cd   : > { %v5990_v36 = vrot.slane %v5962_v32, %v8404_v57 }
0x11ce   : > { %v6024_v28 = vcombine.low %v6016_v33, %v6023_v54  ;;  %v5958_v29 = vcombine.low %v5950_v38, %v5957_v3  ;;  %v5991_v46 = vcombine.low %v5969_v45, %v5976_v27 }
0x11cf   : > { %v5992_v37 = vcombine.low %v5983_v16, %v5990_v36 }
0x11d0   : > { %v6035_v40 = vsel %vm1365_vm6, %v5958_v29, 0.0  ;;  %v6031_v41 = vrot.slane %v6024_v28, %v8404_v57  ;;  %v5999_v51 = vrot.slane %v5991_v46, %v8404_v57 }
0x11d1   : > { %6036 = vadd.xlane.f32.xlu0 %v6035_v40  ;;  %v6006_v52 = vrot.slane %v5992_v37, %v8404_v57 }
0x11d2   : > { %v6041_v44 = vsel %vm1372_vm7, %v6031_v41, 0.0 }
0x11d3   : > { %v6007_v34 = vcombine.low %v5999_v51, %v6006_v52 }
0x11d5   : > { %v6038_v26 = vsel %vm1365_vm6, %v6007_v34, 0.0  ;;  %6042 = vadd.xlane.f32.xlu0 %v6041_v44 }
0x11d6   : > { %6039 = vadd.xlane.f32.xlu1 %v6038_v26 }
0x125e   : > { %v6037_v48 = vpop.xlane.xlu0 %6036 }
0x125f   : > { %v6044_v22 = vmul.f32 0.03125, %v6037_v48 }
0x1261   : > { %v6053_v50 = vrot.slane %v6044_v22, %v8505_v59  ;;  %v6057_v21 = vrot.slane %v6044_v22, %v8508_v60  ;;  %v6061_v13 = vrot.slane %v6044_v22, %v8511_v61  ;;  %v6065_v4 = vrot.slane %v6044_v22, %v8514_v62 }
0x1262   : > { %v6043_v6 = vpop.xlane.xlu0 %6042  ;;  %v6069_v14 = vrot.slane %v6044_v22, %v8517_v0  ;;  %v6073_v58 = vrot.slane %v6044_v22, %v8520_v1  ;;  %v6077_v43 = vrot.slane %v6044_v22, %v8523_v2  ;;  %v6081_v55 = vrot.slane %v6044_v22, %v8526_v5 }
0x1263   : > { %v6040_v8 = vpop.xlane.xlu1 %6039  ;;  %v6046_v23 = vmul.f32 0.03125, %v6043_v6  ;;  %v9537_v30 = vsub.f32 %v9429_v7, %v6053_v50  ;;  %v9540_v10 = vsub.f32 %v9433_v12, %v6057_v21  ;;  %v9543_v32 = vsub.f32 %v9436_v24, %v6061_v13 }
0x1264   : > { %v6045_v33 = vmul.f32 0.03125, %v6040_v8  ;;  %v9546_v54 = vsub.f32 %v9439_v18, %v6065_v4  ;;  %v9549_v38 = vsub.f32 %v9442_v31, %v6069_v14  ;;  %v9552_v3 = vsub.f32 %v9445_v63, %v6073_v58 }
0x1265   : > { %v6117_v45 = vrot.slane %v6046_v23, %v8505_v59  ;;  %v6121_v27 = vrot.slane %v6046_v23, %v8508_v60  ;;  %v6125_v16 = vrot.slane %v6046_v23, %v8511_v61  ;;  %v6129_v36 = vrot.slane %v6046_v23, %v8514_v62 }
0x1266   : > { %v9559_v28 = vsub.f32 %v9448_v49, %v6077_v43  ;;  %v9562_v29 = vsub.f32 %v9452_v20, %v6081_v55  ;;  %v6170_v46 = vmul.f32 %v9537_v30, %v9537_v30  ;;  %v6171_v37 = vmul.f32 %v9540_v10, %v9540_v10 }
0x1267   : > { %v9569_v40 = vsub.f32 %v9408_v42, %v6117_v45  ;;  %v9572_v41 = vsub.f32 %v9414_v39, %v6121_v27  ;;  %v9575_v51 = vsub.f32 %v9417_v47, %v6125_v16  ;;  %v9578_v52 = vsub.f32 %v9424_v9, %v6129_v36 }
0x1268   : > { %v6172_v34 = vmul.f32 %v9543_v32, %v9543_v32  ;;  %v6173_v44 = vmul.f32 %v9546_v54, %v9546_v54  ;;  %v6174_v26 = vmul.f32 %v9549_v38, %v9549_v38  ;;  %v6175_v48 = vmul.f32 %v9552_v3, %v9552_v3 }
0x1269   : > { %v6176_v22 = vmul.f32 %v9559_v28, %v9559_v28  ;;  %v6177_v50 = vmul.f32 %v9562_v29, %v9562_v29  ;;  %v6210_v21 = vcombine.low %v6170_v46, %v6171_v37  ;;  %v6186_v13 = vmul.f32 %v9569_v40, %v9569_v40 }
0x126a   : > { %v6211_v4 = vcombine.low %v6172_v34, %v6173_v44  ;;  %v6212_v6 = vcombine.low %v6174_v26, %v6175_v48  ;;  %v6187_v14 = vmul.f32 %v9572_v41, %v9572_v41  ;;  %v6188_v58 = vmul.f32 %v9575_v51, %v9575_v51 }
0x126b   : > { %v6213_v43 = vcombine.low %v6176_v22, %v6177_v50  ;;  %v6220_v55 = vrot.slane %v6210_v21, %v8404_v57  ;;  %v6189_v8 = vmul.f32 %v9578_v52, %v9578_v52  ;;  %v6085_v23 = vrot.slane %v6045_v33, %v8505_v59 }
0x126c   : > { %v6227_v45 = vrot.slane %v6211_v4, %v8404_v57  ;;  %v6234_v27 = vrot.slane %v6212_v6, %v8404_v57  ;;  %v6308_v16 = vcombine.low %v6186_v13, %v6187_v14  ;;  %v6089_v36 = vrot.slane %v6045_v33, %v8508_v60 }
0x126d   : > { %v6241_v46 = vrot.slane %v6213_v43, %v8404_v57  ;;  %v6309_v37 = vcombine.low %v6188_v58, %v6189_v8  ;;  %v6093_v34 = vrot.slane %v6045_v33, %v8511_v61  ;;  %v6097_v44 = vrot.slane %v6045_v33, %v8514_v62 }
0x126e   : > { %v6242_v26 = vcombine.low %v6220_v55, %v6227_v45  ;;  %v6316_v48 = vrot.slane %v6308_v16, %v8404_v57  ;;  %v6101_v22 = vrot.slane %v6045_v33, %v8517_v0  ;;  %v6105_v50 = vrot.slane %v6045_v33, %v8520_v1 }
0x126f   : > { %v6243_v21 = vcombine.low %v6234_v27, %v6241_v46  ;;  %v6323_v4 = vrot.slane %v6309_v37, %v8404_v57  ;;  %v6109_v13 = vrot.slane %v6045_v33, %v8523_v2  ;;  %v6113_v6 = vrot.slane %v6045_v33, %v8526_v5 }
0x1270   : > { %v6250_v14 = vrot.slane %v6242_v26, %v8404_v57  ;;  %v9616_v58 = vsub.f32 %v9472_v35, %v6085_v23  ;;  %v9619_v43 = vsub.f32 %v9481_v25, %v6089_v36  ;;  %v9622_v55 = vsub.f32 %v9484_v17, %v6093_v34 }
0x1271   : > { %v6257_v8 = vrot.slane %v6243_v21, %v8404_v57  ;;  %v6324_v45 = vcombine.low %v6316_v48, %v6323_v4  ;;  %v9626_v27 = vsub.f32 %v9496_v19, %v6097_v44  ;;  %v9629_v16 = vsub.f32 %v9477_v11, %v6101_v22 }
0x1272   : > { %v9632_v33 = vsub.f32 %v9489_v15, %v6105_v50  ;;  %v9635_v23 = vsub.f32 %v9492_v56, %v6109_v13  ;;  %v9638_v36 = vsub.f32 %v9502_v53, %v6113_v6  ;;  %v6178_v46 = vmul.f32 %v9616_v58, %v9616_v58 }
0x1273   : > { %v6258_v37 = vcombine.low %v6250_v14, %v6257_v8  ;;  %v6331_v34 = vrot.slane %v6324_v45, %v8404_v57  ;;  %v6179_v44 = vmul.f32 %v9619_v43, %v9619_v43  ;;  %v6180_v26 = vmul.f32 %v9622_v55, %v9622_v55 }
0x1274   : > { %v6181_v48 = vmul.f32 %v9626_v27, %v9626_v27  ;;  %v6182_v22 = vmul.f32 %v9629_v16, %v9629_v16  ;;  %v6183_v50 = vmul.f32 %v9632_v33, %v9632_v33  ;;  %v6184_v21 = vmul.f32 %v9635_v23, %v9635_v23 }
0x1275   : > { %v6335_v4 = vsel %vm1365_vm6, %v6258_v37, 0.0  ;;  %v6341_v13 = vsel %vm1372_vm7, %v6331_v34, 0.0  ;;  %v6185_v6 = vmul.f32 %v9638_v36, %v9638_v36  ;;  %v6259_v14 = vcombine.low %v6178_v46, %v6179_v44 }
0x1276   : > { %6336 = vadd.xlane.f32.xlu0 %v6335_v4  ;;  %6342 = vadd.xlane.f32.xlu1 %v6341_v13  ;;  %v6260_v8 = vcombine.low %v6180_v26, %v6181_v48  ;;  %v6261_v45 = vcombine.low %v6182_v22, %v6183_v50  ;;  %v8006_v48 = vld [vmem:[%s8271_s8] sm:$0xff]   ;;  %v8007_v22 = vld [vmem:[%s8271_s8 + $0x8] sm:$0xff]  }
0x1277   : > { %v6262_v53 = vcombine.low %v6184_v21, %v6185_v6  ;;  %v6269_v56 = vrot.slane %v6259_v14, %v8404_v57  ;;  %7903 = vmatprep.subr.bf16.mxu0 %v8006_v48 }
0x1278   : > { %v6276_v15 = vrot.slane %v6260_v8, %v8404_v57  ;;  %v6283_v37 = vrot.slane %v6261_v45, %v8404_v57  ;;  %7904 = vmatpush3.bf16.msra.mxu0 %v8006_v48 }
0x1279   : > { %v6290_v34 = vrot.slane %v6262_v53, %v8404_v57  ;;  %7905 = vmatprep.subr.bf16.mxu0 %v8007_v22 }
0x127a   : > { %v6291_v19 = vcombine.low %v6269_v56, %v6276_v15  ;;  %v7560_v15 = vld [vmem:[%s713_s7] ss:$0 sm:$0xff] }
0x127b   : > { %v6292_v11 = vcombine.low %v6283_v37, %v6290_v34  ;;  %v6481_v56 = vcombine.high %v7560_v15, %v7560_v15  ;;  %v6488_v13 = vrot.slane %v7560_v15, %v8404_v57 }
0x127c   : > { %v6299_v46 = vrot.slane %v6291_v19, %v8404_v57  ;;  %7906 = vmatpush3.bf16.msra.mxu0 %v8007_v22 }
0x127d   : > { %v6306_v44 = vrot.slane %v6292_v11, %v8404_v57  ;;  %v7561_v11 = vld [vmem:[%s716_s24] ss:$0 sm:$0xff]  ;;  %v6495_v6 = vrot.slane %v6481_v56, %v8404_v57  ;;  %v6496_v34 = vcombine.high %v6488_v13, %v6488_v13  ;;  %v9683_v48 = vrot.slane %v6488_v13, %v8404_v57  ;;  %s10073_s24 = scalar_lea.vmem %s9942_s15, %s8231_s29 }
0x127e   : > { %v6563_v19 = vcombine.high %v7561_v11, %v7561_v11  ;;  %v6570_v45 = vrot.slane %v7561_v11, %v8404_v57 }
0x127f   : > { %v6307_v4 = vcombine.low %v6299_v46, %v6306_v44  ;;  %v6497_v46 = vcombine.high %v6495_v6, %v6495_v6  ;;  %v9686_v22 = vrot.slane %v6495_v6, %v8404_v57  ;;  %v9689_v15 = vrot.slane %v6496_v34, %v8404_v57 }
0x1280   : > { %v6577_v37 = vrot.slane %v6563_v19, %v8404_v57  ;;  %v9695_v11 = vrot.slane %v6570_v45, %v8404_v57  ;;  %v9708_v6 = vcombine.high %v9683_v48, %v9683_v48 }
0x1281   : > { %v6338_v26 = vsel %vm1365_vm6, %v6307_v4, 0.0  ;;  %v6578_v4 = vcombine.high %v6570_v45, %v6570_v45  ;;  %v9692_v56 = vrot.slane %v6497_v46, %v8404_v57 }
0x1282   : > { %6339 = vadd.xlane.f32.xlu0 %v6338_v26  ;;  %v6579_v26 = vcombine.high %v6577_v37, %v6577_v37  ;;  %v9698_v19 = vrot.slane %v6577_v37, %v8404_v57  ;;  %v9724_v37 = vcombine.high %v9695_v11, %v9695_v11 }
0x1283   : > { %v9720_v45 = vcombine.high %v9692_v56, %v9692_v56 }
0x1303   : > { %v6337_v53 = vpop.xlane.xlu0 %6336  ;;  %v6343_v50 = vpop.xlane.xlu1 %6342 }
0x1304   : > { %v6344_v21 = vmul.f32 0.03125, %v6337_v53  ;;  %v6346_v8 = vmul.f32 0.03125, %v6343_v50  ;;  %v9701_v53 = vrot.slane %v6578_v4, %v8404_v57  ;;  %v9704_v50 = vrot.slane %v6579_v26, %v8404_v57 }
0x1306   : > { %v6347_v14 = vadd.f32 1e-05, %v6344_v21  ;;  %v6349_v44 = vadd.f32 1e-05, %v6346_v8  ;;  %v9716_v8 = vcombine.high %v9689_v15, %v9689_v15  ;;  %v9732_v4 = vcombine.high %v9701_v53, %v9701_v53 }
0x1307   : > { %v9736_v26 = vcombine.high %v9704_v50, %v9704_v50 }
0x1308   : > { %8086 = vrsqrt.f32 %v6347_v14  ;;  %v9712_v14 = vcombine.high %v9686_v22, %v9686_v22 }
0x1309   : > { %8088 = vrsqrt.f32 %v6349_v44  ;;  %v9728_v44 = vcombine.high %v9698_v19, %v9698_v19 }
0x130f   : > { %v6340_v21 = vpop.xlane.xlu0 %6339 }
0x1310   : > { %v6345_v13 = vmul.f32 0.03125, %v6340_v21 }
0x1312   : > { %v8087_v34 = vpop.eup %8086  ;;  %v6348_v46 = vadd.f32 1e-05, %v6345_v13 }
0x1313   : > { %v6359_v21 = vrot.slane %v8087_v34, %v8505_v59  ;;  %v6363_v17 = vrot.slane %v8087_v34, %v8508_v60  ;;  %v6367_v25 = vrot.slane %v8087_v34, %v8511_v61  ;;  %v6371_v13 = vrot.slane %v8087_v34, %v8514_v62 }
0x1314   : > { %8090 = vrsqrt.f32 %v6348_v46  ;;  %v6375_v35 = vrot.slane %v8087_v34, %v8517_v0  ;;  %v6379_v20 = vrot.slane %v8087_v34, %v8520_v1  ;;  %v6383_v9 = vrot.slane %v8087_v34, %v8523_v2 }
0x1315   : > { %v6387_v42 = vrot.slane %v8087_v34, %v8526_v5  ;;  %v6456_v49 = vmul.f32 %v6359_v21, %v9537_v30  ;;  %v6457_v63 = vmul.f32 %v6363_v17, %v9540_v10  ;;  %v6458_v18 = vmul.f32 %v6367_v25, %v9543_v32  ;;  %v8089_v21 = vpop.eup %8088 }
0x1316   : > { %v6459_v24 = vmul.f32 %v6371_v13, %v9546_v54  ;;  %v6460_v31 = vmul.f32 %v6375_v35, %v9549_v38  ;;  %v6461_v46 = vmul.f32 %v6379_v20, %v9552_v3  ;;  %v6462_v7 = vmul.f32 %v6383_v9, %v9559_v28 }
0x1317   : > { %v6463_v47 = vmul.f32 %v6387_v42, %v9562_v29  ;;  %v6538_v39 = vmul.f32 %v9683_v48, %v6456_v49  ;;  %v6539_v34 = vmul.f32 %v9689_v15, %v6457_v63  ;;  %v6540_v30 = vmul.f32 %v9708_v6, %v6458_v18 }
0x1318   : > { %v6541_v17 = vmul.f32 %v9716_v8, %v6459_v24  ;;  %v6542_v25 = vmul.f32 %v9686_v22, %v6460_v31  ;;  %v6543_v10 = vmul.f32 %v9692_v56, %v6461_v46  ;;  %v6544_v35 = vmul.f32 %v9712_v14, %v6462_v7 }
0x1319   : > { %v6545_v20 = vmul.f32 %v9720_v45, %v6463_v47  ;;  %v6620_v9 = vadd.f32 %v9695_v11, %v6538_v39  ;;  %v6621_v42 = vadd.f32 %v9701_v53, %v6539_v34  ;;  %v6622_v49 = vadd.f32 %v9724_v37, %v6540_v30 }
0x131a   : > { %v6623_v63 = vadd.f32 %v9732_v4, %v6541_v17  ;;  %v6624_v18 = vadd.f32 %v9698_v19, %v6542_v25  ;;  %v6625_v24 = vadd.f32 %v9704_v50, %v6543_v10  ;;  %v6626_v31 = vadd.f32 %v9728_v44, %v6544_v35 }
0x131b   : > { %v6627_v32 = vadd.f32 %v9736_v26, %v6545_v20  ;;  %v6660_v54 = vcombine.low %v6620_v9, %v6621_v42  ;;  %v6423_v7 = vrot.slane %v8089_v21, %v8505_v59  ;;  %v6427_v47 = vrot.slane %v8089_v21, %v8508_v60 }
0x131c   : > { %v6661_v39 = vcombine.low %v6622_v49, %v6623_v63  ;;  %v6662_v38 = vcombine.low %v6624_v18, %v6625_v24  ;;  %v6431_v3 = vrot.slane %v8089_v21, %v8511_v61  ;;  %v6435_v28 = vrot.slane %v8089_v21, %v8514_v62 }
0x131d   : > { %v6663_v29 = vcombine.low %v6626_v31, %v6627_v32  ;;  %v6670_v13 = vrot.slane %v6660_v54, %v8404_v57  ;;  %v6472_v46 = vmul.f32 %v6423_v7, %v9569_v40  ;;  %v6473_v34 = vmul.f32 %v6427_v47, %v9572_v41 }
0x131e   : > { %v8091_v30 = vpop.eup %8090  ;;  %v6677_v17 = vrot.slane %v6661_v39, %v8404_v57  ;;  %v6684_v25 = vrot.slane %v6662_v38, %v8404_v57  ;;  %v6474_v10 = vmul.f32 %v6431_v3, %v9575_v51  ;;  %v6475_v35 = vmul.f32 %v6435_v28, %v9578_v52 }
0x131f   : > { %v6391_v20 = vrot.slane %v8091_v30, %v8505_v59  ;;  %v6395_v21 = vrot.slane %v8091_v30, %v8508_v60  ;;  %v6399_v9 = vrot.slane %v8091_v30, %v8511_v61  ;;  %v6403_v42 = vrot.slane %v8091_v30, %v8514_v62 }
0x1320   : > { %v6407_v40 = vrot.slane %v8091_v30, %v8517_v0  ;;  %v6411_v41 = vrot.slane %v8091_v30, %v8520_v1  ;;  %v6415_v49 = vrot.slane %v8091_v30, %v8523_v2  ;;  %v6419_v63 = vrot.slane %v8091_v30, %v8526_v5 }
0x1321   : > { %v6464_v51 = vmul.f32 %v6391_v20, %v9616_v58  ;;  %v6465_v52 = vmul.f32 %v6395_v21, %v9619_v43  ;;  %v6466_v59 = vmul.f32 %v6399_v9, %v9622_v55  ;;  %v6467_v60 = vmul.f32 %v6403_v42, %v9626_v27 }
0x1322   : > { %v6468_v61 = vmul.f32 %v6407_v40, %v9629_v16  ;;  %v6469_v62 = vmul.f32 %v6411_v41, %v9632_v33  ;;  %v6470_v0 = vmul.f32 %v6415_v49, %v9635_v23  ;;  %v6471_v1 = vmul.f32 %v6419_v63, %v9638_v36  ;;  %v8008_v41 = vld [vmem:[%s8281_s1] sm:$0xff]   ;;  %v8009_v49 = vld [vmem:[%s8281_s1 + $0x8] sm:$0xff]   ;;  %v8010_v63 = vld [vmem:[%s8281_s1 + $0x10] sm:$0xff]  }
0x1323   : > { %v6546_v2 = vmul.f32 %v9683_v48, %v6464_v51  ;;  %v6547_v5 = vmul.f32 %v9689_v15, %v6465_v52  ;;  %v6548_v58 = vmul.f32 %v9708_v6, %v6466_v59  ;;  %v6549_v43 = vmul.f32 %v9716_v8, %v6467_v60  ;;  %7911 = vmatprep.subr.bf16.mxu0 %v8008_v41  ;;  %v8011_v51 = vld [vmem:[%s8281_s1 + $0x18] sm:$0xff]   ;;  %v8012_v52 = vld [vmem:[%s8281_s1 + $0x20] sm:$0xff]   ;;  %v8013_v59 = vld [vmem:[%s8281_s1 + $0x28] sm:$0xff]  }
0x1324   : > { %v6550_v55 = vmul.f32 %v9686_v22, %v6468_v61  ;;  %v6551_v27 = vmul.f32 %v9692_v56, %v6469_v62  ;;  %v6552_v16 = vmul.f32 %v9712_v14, %v6470_v0  ;;  %v6553_v33 = vmul.f32 %v9720_v45, %v6471_v1  ;;  %v8014_v60 = vld [vmem:[%s8281_s1 + $0x30] sm:$0xff]   ;;  %v8015_v61 = vld [vmem:[%s8281_s1 + $0x38] sm:$0xff]   ;;  %v7562_v62 = vld [vmem:[%s10073_s24] ss:$0 sm:$0xff] }
0x1325   : > { %v6628_v23 = vadd.f32 %v9695_v11, %v6546_v2  ;;  %v6629_v36 = vadd.f32 %v9701_v53, %v6547_v5  ;;  %v6630_v18 = vadd.f32 %v9724_v37, %v6548_v58  ;;  %v6631_v24 = vadd.f32 %v9732_v4, %v6549_v43 }
0x1326   : > { %v6632_v31 = vadd.f32 %v9698_v19, %v6550_v55  ;;  %v6633_v32 = vadd.f32 %v9704_v50, %v6551_v27  ;;  %v6634_v22 = vadd.f32 %v9728_v44, %v6552_v16  ;;  %v6635_v56 = vadd.f32 %v9736_v26, %v6553_v33 }
0x1327   : > { %v6691_v14 = vrot.slane %v6663_v29, %v8404_v57  ;;  %v6692_v54 = vcombine.low %v6670_v13, %v6677_v17  ;;  %v6709_v45 = vcombine.low %v6628_v23, %v6629_v36  ;;  %v6710_v7 = vcombine.low %v6630_v18, %v6631_v24 }
0x1328   : > { %v6711_v47 = vcombine.low %v6632_v31, %v6633_v32  ;;  %v6712_v39 = vcombine.low %v6634_v22, %v6635_v56  ;;  %v6554_v38 = vmul.f32 %v9683_v48, %v6472_v46  ;;  %v6555_v3 = vmul.f32 %v9689_v15, %v6473_v34 }
0x1329   : > { %v6693_v28 = vcombine.low %v6684_v25, %v6691_v14  ;;  %v6719_v19 = vrot.slane %v6709_v45, %v8404_v57  ;;  %v6726_v50 = vrot.slane %v6710_v7, %v8404_v57  ;;  %v6556_v29 = vmul.f32 %v9708_v6, %v6474_v10 }
0x132a   : > { %v6733_v44 = vrot.slane %v6711_v47, %v8404_v57  ;;  %v6740_v26 = vrot.slane %v6712_v39, %v8404_v57  ;;  %v6557_v13 = vmul.f32 %v9716_v8, %v6475_v35  ;;  %v6700_v30 = vrot.slane %v6692_v54, %v8404_v57 }
0x132b   : > { %v6741_v17 = vcombine.low %v6719_v19, %v6726_v50  ;;  %v6636_v48 = vadd.f32 %v9695_v11, %v6554_v38  ;;  %v6637_v15 = vadd.f32 %v9701_v53, %v6555_v3  ;;  %v6707_v46 = vrot.slane %v6693_v28, %v8404_v57  ;;  %v7570_v19 = vld [vmem:[%s10074_s19] ss:$0 sm:$0xff] }
0x132c   : > { %v6742_v34 = vcombine.low %v6733_v44, %v6740_v26  ;;  %v6638_v25 = vadd.f32 %v9724_v37, %v6556_v29  ;;  %v6639_v20 = vadd.f32 %v9732_v4, %v6557_v13 }
0x132d   : > { %v6749_v21 = vrot.slane %v6741_v17, %v8404_v57  ;;  %v6758_v6 = vcombine.low %v6636_v48, %v6637_v15  ;;  %v6708_v11 = vcombine.low %v6700_v30, %v6707_v46 }
0x132e   : > { %v6756_v8 = vrot.slane %v6742_v34, %v8404_v57  ;;  %v6759_v10 = vcombine.low %v6638_v25, %v6639_v20 }
0x132f   : > { %v6766_v35 = vrot.slane %v6758_v6, %v8404_v57 }
0x1330   : > { %v6757_v53 = vcombine.low %v6749_v21, %v6756_v8  ;;  %v6773_v9 = vrot.slane %v6759_v10, %v8404_v57 }
0x1332   : > { %v6785_v42 = vpack.c.bf16 %v6757_v53, %v6708_v11  ;;  %v6774_v37 = vcombine.low %v6766_v35, %v6773_v9 }
0x1334   : > { %7907 = vmatprep.mubr.msk.bf16.mxu0 %vm1365_vm6, %v6785_v42  ;;  %v6781_v4 = vrot.slane %v6774_v37, %v8404_v57 }
0x1336   : > { %v6786_v40 = vpack.c.bf16 %v6781_v4, %v6781_v4 }
0x1338   : > { %7908 = vmatmul.mubr.msk.bf16.vlgmr.msra.gmra.mrb[64].mxu0 %vm1365_vm6, %v6786_v40 }
0x1339   : > { %7912 = vmatpush3.bf16.msra.mxu0 %v8008_v41 }
0x133a   : > { %7913 = vmatprep.subr.bf16.mxu0 %v8009_v49 }
0x133d   : > { %7914 = vmatpush3.bf16.msra.mxu0 %v8009_v49 }
0x133e   : > { %7915 = vmatprep.subr.bf16.mxu0 %v8010_v63 }
0x1341   : > { %7916 = vmatpush3.bf16.msra.mxu0 %v8010_v63 }
0x1342   : > { %7917 = vmatprep.subr.bf16.mxu0 %v8011_v51 }
0x1345   : > { %7918 = vmatpush3.bf16.msra.mxu0 %v8011_v51  ;;  %v10075_v51 = vld [vmem:[#allocation18_spill] sm:$0xff] }
0x1346   : > { %7919 = vmatprep.subr.bf16.mxu0 %v8012_v52 }
0x1349   : > { %7920 = vmatpush3.bf16.msra.mxu0 %v8012_v52 }
0x134a   : > { %7921 = vmatprep.subr.bf16.mxu0 %v8013_v59 }
0x134d   : > { %7922 = vmatpush3.bf16.msra.mxu0 %v8013_v59  ;;  %v10076_v59 = vld [vmem:[#allocation4_spill] sm:$0xff] }
0x134e   : > { %7923 = vmatprep.subr.bf16.mxu0 %v8014_v60 }
0x1351   : > { %7924 = vmatpush3.bf16.msra.mxu0 %v8014_v60 }
0x1352   : > { %7925 = vmatprep.subr.bf16.mxu0 %v8015_v61 }
0x1355   : > { %7926 = vmatpush3.bf16.msra.mxu0 %v8015_v61  ;;  %v10077_v61 = vld [vmem:[#allocation9_spill] sm:$0xff] }
0x140b   : > { %v7909_v0 = vpop.f32.mrb[64].mxu0 }
0x140c   : > { %v6854_v1 = vadd.f32 %v7909_v0, %v7562_v62  ;;  %v6845_v2 = vpop.f32.mrb[65].mxu0  ;;  %v10078_v0 = vld [vmem:[#allocation5_spill] sm:$0xff] }
0x140d   : > { %v6846_v5 = vadd.f32 %v7562_v62, %v6845_v2  ;;  %v7910_v58 = vpop.f32.mrb[66].mxu0  ;;  %v10079_v2 = vld [vmem:[#allocation19_spill] sm:$0xff] }
0x140e   : > { %v7569_v43 = vmul.f32 -1.702, %v6854_v1  ;;  %v6848_v55 = vpop.f32.mrb[67].mxu0  ;;  %v10080_v58 = vld [vmem:[#allocation20_spill] sm:$0xff] }
0x140f   : > { %v7567_v27 = vmul.f32 -1.702, %v6846_v5  ;;  %v6849_v16 = vadd.f32 %v7562_v62, %v6848_v55  ;;  %v10081_v55 = vld [vmem:[#allocation6_spill] sm:$0xff] }
0x1410   : > { %v6869_v33 = vmul.f32 1.442695, %v7569_v43 }
0x1411   : > { %v6865_v23 = vmul.f32 1.442695, %v7567_v27  ;;  %v7568_v36 = vmul.f32 -1.702, %v6849_v16 }
0x1412   : > { %8092 = vpow2.f32 %v6869_v33 }
0x1413   : > { %8094 = vpow2.f32 %v6865_v23  ;;  %v6867_v18 = vmul.f32 1.442695, %v7568_v36  ;;  %v10083_v23 = vld [vmem:[#allocation17_spill] sm:$0xff] }
0x1415   : > { %8096 = vpow2.f32 %v6867_v18 }
0x141c   : > { %v8093_v24 = vpop.eup %8092 }
0x141d   : > { %v8095_v31 = vpop.eup %8094  ;;  %v6873_v32 = vadd.f32 1.0, %v8093_v24 }
0x141e   : > { %v6871_v22 = vadd.f32 1.0, %v8095_v31  ;;  %v10084_v31 = vld [vmem:[#allocation16_spill] sm:$0xff] }
0x141f   : > { %v8097_v56 = vpop.eup %8096  ;;  %8098 = vrcp.f32 %v6873_v32 }
0x1420   : > { %8100 = vrcp.f32 %v6871_v22  ;;  %v6872_v14 = vadd.f32 1.0, %v8097_v56 }
0x1422   : > { %8102 = vrcp.f32 %v6872_v14 }
0x1429   : > { %v8099_v54 = vpop.eup %8098 }
0x142a   : > { %v8101_v45 = vpop.eup %8100  ;;  %v6882_v47 = vmul.f32 %v8099_v54, %v6854_v1 }
0x142b   : > { %v6880_v39 = vmul.f32 %v8101_v45, %v6846_v5 }
0x142c   : > { %v8103_v7 = vpop.eup %8102  ;;  %v6884_v28 = vpack.c.bf16 %v6882_v47, %v6882_v47 }
0x142d   : > { %v6881_v38 = vmul.f32 %v8103_v7, %v6849_v16  ;;  %v10082_v16 = vld [vmem:[#allocation10_spill] sm:$0xff] }
0x142f   : > { %v6883_v3 = vpack.c.bf16 %v6881_v38, %v6880_v39 }
0x1431   : > { %7927 = vmatprep.mubr.bf16.mxu0 %v6883_v3 }
0x1432   : > { %7928 = vmatmul.mubr.bf16.vlgmr.msra.gmra.mrb[68].mxu0 %v6884_v28 }
0x1505   : > { %v7929_v50 = vpop.f32.mrb[68].mxu0 }
0x1506   : > { %v6982_v44 = vadd.f32 %v7929_v50, %v7570_v19  ;;  %v6973_v26 = vpop.f32.mrb[69].mxu0 }
0x1507   : > { %v6974_v29 = vadd.f32 %v7570_v19, %v6973_v26  ;;  %v7930_v13 = vpop.f32.mrb[70].mxu0 }
0x1508   : > { %v7094_v30 = vrot.slane %v6982_v44, %v8404_v57  ;;  %v6976_v17 = vpop.f32.mrb[71].mxu0  ;;  %v10085_v44 = vld [vmem:[#allocation13_spill] sm:$0xff] }
0x1509   : > { %v6990_v48 = vcombine.high %v6974_v29, %v6974_v29  ;;  %v6997_v15 = vrot.slane %v6974_v29, %v8404_v57  ;;  %v6977_v25 = vadd.f32 %v7570_v19, %v6976_v17  ;;  %v10086_v29 = vld [vmem:[#allocation15_spill] sm:$0xff] }
0x150a   : > { %v7095_v46 = vcombine.high %v7094_v30, %v7094_v30  ;;  %v7102_v34 = vrot.slane %v7094_v30, %v8404_v57 }
0x150b   : > { %v7004_v20 = vrot.slane %v6990_v48, %v8404_v57  ;;  %v7005_v21 = vcombine.high %v6997_v15, %v6997_v15  ;;  %v7013_v6 = vrot.slane %v6997_v15, %v8404_v57  ;;  %v7039_v37 = vcombine.high %v6977_v25, %v6977_v25 }
0x150c   : > { %v7109_v8 = vrot.slane %v7095_v46, %v8404_v57  ;;  %v7110_v10 = vcombine.high %v7102_v34, %v7102_v34  ;;  %v7046_v4 = vrot.slane %v6977_v25, %v8404_v57  ;;  %v7148_v36 = vadd.f32 %v7102_v34, %v10083_v23  ;;  %v10087_v46 = vld [vmem:[#allocation7_spill] sm:$0xff]  ;;  %v10088_v25 = vld [vmem:[#allocation8_spill] sm:$0xff] }
0x150d   : > { %v7006_v35 = vcombine.high %v7004_v20, %v7004_v20  ;;  %v7020_v11 = vrot.slane %v7004_v20, %v8404_v57  ;;  %v7027_v53 = vrot.slane %v7005_v21, %v8404_v57  ;;  %v7035_v9 = vcombine.high %v7013_v6, %v7013_v6  ;;  %v10089_v21 = vld [vmem:[#allocation21_spill] sm:$0xff] }
0x150e   : > { %v7111_v42 = vcombine.high %v7109_v8, %v7109_v8  ;;  %v7149_v52 = vadd.f32 %v7109_v8, %v10075_v51  ;;  %v7150_v60 = vadd.f32 %v7110_v10, %v10076_v59  ;;  %v7132_v62 = vadd.f32 %v7013_v6, %v10077_v61  ;;  %v10093_v51 = vld [vmem:[#allocation12_spill] sm:$0xff] }
0x150f   : > { %v7034_v40 = vrot.slane %v7006_v35, %v8404_v57  ;;  %v7036_v41 = vcombine.high %v7020_v11, %v7020_v11  ;;  %v7037_v49 = vcombine.high %v7027_v53, %v7027_v53  ;;  %v7133_v63 = vadd.f32 %v7027_v53, %v9433_v12 }
0x1510   : > { %v7136_v1 = vadd.f32 %v7020_v11, %v10078_v0  ;;  %v7134_v5 = vadd.f32 %v7035_v9, %v10079_v2  ;;  %v7151_v32 = vadd.f32 %v7111_v42, %v10084_v31  ;;  %v7053_v56 = vrot.slane %v7039_v37, %v8404_v57  ;;  %v10090_v11 = vld [vmem:[#allocation14_spill] sm:$0xff]  ;;  %v10092_v37 = vld [vmem:[#allocation11_spill] sm:$0xff] }
0x1511   : > { %v7135_v43 = vadd.f32 %v7037_v49, %v10080_v58  ;;  %v7137_v27 = vadd.f32 %v7034_v40, %v10081_v55  ;;  %v7138_v33 = vadd.f32 %v7036_v41, %v10082_v16  ;;  %v7038_v18 = vcombine.high %v7034_v40, %v7034_v40  ;;  %v10091_v9 = vld [vmem:[#allocation22_spill] sm:$0xff] }
0x1512   : > { %v7172_v12 = vcombine.low %v7132_v62, %v7133_v63  ;;  %v7194_v24 = vrot.slane %v7136_v1, %v8404_v57  ;;  %v7054_v14 = vcombine.high %v7046_v4, %v7046_v4  ;;  %v7290_v54 = vcombine.low %v7149_v52, %v7150_v60 }
0x1513   : > { %v7173_v22 = vcombine.low %v7134_v5, %v7135_v43  ;;  %v7211_v7 = vcombine.low %v7137_v27, %v7138_v33  ;;  %v7062_v47 = vrot.slane %v7046_v4, %v8404_v57  ;;  %v7055_v38 = vcombine.high %v7053_v56, %v7053_v56 }
0x1514   : > { %v7180_v45 = vrot.slane %v7172_v12, %v8404_v57  ;;  %v7069_v3 = vrot.slane %v7053_v56, %v8404_v57  ;;  %v7076_v28 = vrot.slane %v7054_v14, %v8404_v57  ;;  %v7209_v19 = vrot.slane %v7194_v24, %v8404_v57 }
0x1515   : > { %v7187_v39 = vrot.slane %v7173_v22, %v8404_v57  ;;  %v7084_v50 = vcombine.high %v7062_v47, %v7062_v47  ;;  %v7139_v26 = vadd.f32 %v7038_v18, %v10085_v44  ;;  %v7140_v13 = vadd.f32 %v7062_v47, %v10086_v29 }
0x1516   : > { %v7083_v17 = vrot.slane %v7055_v38, %v8404_v57  ;;  %v7085_v48 = vcombine.high %v7069_v3, %v7069_v3  ;;  %v7086_v15 = vcombine.high %v7076_v28, %v7076_v28  ;;  %v7141_v34 = vadd.f32 %v7076_v28, %v10087_v46 }
0x1517   : > { %v7195_v30 = vcombine.low %v7180_v45, %v7187_v39  ;;  %v7142_v20 = vadd.f32 %v7084_v50, %v10088_v25  ;;  %v7144_v6 = vadd.f32 %v7069_v3, %v10089_v21  ;;  %v7212_v8 = vcombine.low %v7139_v26, %v7140_v13 }
0x1518   : > { %v7087_v35 = vcombine.high %v7083_v17, %v7083_v17  ;;  %v7143_v53 = vadd.f32 %v7086_v15, %v10090_v11  ;;  %v7145_v42 = vadd.f32 %v7083_v17, %v10091_v9  ;;  %v7146_v4 = vadd.f32 %v7085_v48, %v10092_v37 }
0x1519   : > { %v7202_v10 = vrot.slane %v7195_v30, %v8404_v57  ;;  %v7219_v40 = vrot.slane %v7211_v7, %v8404_v57  ;;  %v7226_v41 = vrot.slane %v7212_v8, %v8404_v57  ;;  %v7233_v49 = vrot.slane %v7141_v34, %v8404_v57 }
0x151a   : > { %v7147_v52 = vadd.f32 %v7087_v35, %v10093_v51  ;;  %v7250_v59 = vcombine.low %v7142_v20, %v7143_v53  ;;  %v7251_v60 = vcombine.low %v7144_v6, %v7145_v42  ;;  %v7272_v1 = vrot.slane %v7146_v4, %v8404_v57 }
0x151b   : > { %v7210_v63 = vcombine.low %v7202_v10, %v7209_v19  ;;  %v7234_v61 = vcombine.low %v7219_v40, %v7226_v41  ;;  %v7248_v58 = vrot.slane %v7233_v49, %v8404_v57  ;;  %v7304_v43 = vrot.slane %v7290_v54, %v8404_v57 }
0x151c   : > { %v7258_v62 = vrot.slane %v7250_v59, %v8404_v57  ;;  %v7265_v0 = vrot.slane %v7251_v60, %v8404_v57  ;;  %v7289_v2 = vcombine.low %v7147_v52, %v7148_v36  ;;  %v7311_v55 = vrot.slane %v7151_v32, %v8404_v57 }
0x151d   : > { %7333 = vst.msk [vmem:[%s10008_s28] sm:$0x1f] %vm7332_vm15, %v7210_v63  ;;  %v7241_v5 = vrot.slane %v7234_v61, %v8404_v57  ;;  %v7287_v18 = vrot.slane %v7272_v1, %v8404_v57 }
0x151e   : > { %v7273_v27 = vcombine.low %v7258_v62, %v7265_v0  ;;  %v7297_v16 = vrot.slane %v7289_v2, %v8404_v57  ;;  %v7326_v36 = vrot.slane %v7311_v55, %v8404_v57 }
0x151f   : > { %v7249_v33 = vcombine.low %v7241_v5, %v7248_v58 }
0x1520   : > { %v7280_v23 = vrot.slane %v7273_v27, %v8404_v57  ;;  %v7312_v12 = vcombine.low %v7297_v16, %v7304_v43 }
0x1521   : > { %7334 = vst.msk [vmem:[%s10008_s28 + $0x8] sm:$0x1f] %vm7332_vm15, %v7249_v33 }
0x1522   : > { %v7288_v24 = vcombine.low %v7280_v23, %v7287_v18  ;;  %v7319_v31 = vrot.slane %v7312_v12, %v8404_v57 }
0x1524   : > { %v7327_v32 = vcombine.low %v7319_v31, %v7326_v36  ;;  %7335 = vst.msk [vmem:[%s10008_s28 + $0x10] sm:$0x1f] %vm7332_vm15, %v7288_v24 }
0x1526   : > { %7336 = vst.msk [vmem:[%s10008_s28 + $0x18] sm:$0x1f] %vm7332_vm15, %v7327_v32 }
0x1527 PF: > { %s10094_s27 = sld [smem:[#allocation2_spill]] }
0x152d   : > { %s28_s27 = sadd.s32 1, %s10094_s27  }
0x152e   : > { %p25_p5 = scmp.ge.s32.totalorder %s28_s27, 4  }
0x1530   :  { %27 = sbr.rel (!%p25_p5) target bundleno = 9 (0x9), region = 155 }

</bundles_post_ra>
